<compile_context>
chip_gen: v5e
topology: v5e:2x2
jax: 0.10.0
libtpu: 0.0.40
codegen_flags: <defaults>
</compile_context>

<pallas_src>
import math

import jax
import jax.numpy as jnp
from jax import lax
from jax.experimental import pallas as pl
from jax.experimental.pallas import tpu as pltpu


def _round_up(x, m):
    return (x + m - 1) // m * m


def _nbytes(shape, dtype):
    return math.prod(shape) * jnp.dtype(dtype).itemsize


def _pick_vmem_limit(required_bytes):
    """vmem_limit_bytes derived from actual buffer sizes, capped per-chip."""
    cap = 128 * 1024 * 1024
    try:
        cap = int(pltpu.get_tpu_info().vmem_capacity_bytes)
    except Exception:
        pass
    ceiling = (cap * 3) // 4                 # headroom below physical VMEM
    want = required_bytes * 2 + (4 << 20)    # double-buffering + slack
    return int(max(min(want, ceiling), 32 * 1024 * 1024))


def _make_lstm_kernel(num_layers, T, Tc, n_chunks, Bp, Ip, Hp, unroll):
    """Fused multi-layer LSTM + FC kernel (time-chunked grid, layer-inner)."""
    four_h = 4 * Hp
    need_mask = (n_chunks * Tc) != T

    def _gate_update(gates, c):
        # gate layout (host-permuted): [i, f, o, g]
        sig = jax.nn.sigmoid(gates[:, :3 * Hp])   # one contiguous sigmoid
        i_g = sig[:, :Hp]
        f_g = sig[:, Hp:2 * Hp]
        o_g = sig[:, 2 * Hp:3 * Hp]
        g_g = jnp.tanh(gates[:, 3 * Hp:])
        c_new = f_g * c + i_g * g_g
        h_new = o_g * jnp.tanh(c_new)
        return h_new, c_new

    def kernel(*refs):
        x_ref = refs[0]                                   # (Tc, Bp, Ip) bf16
        w0_ref, whh0_ref, b0_ref = refs[1], refs[2], refs[3]
        n_mid = 3 * (num_layers - 1)
        mid = refs[4:4 + n_mid]                           # (wih_l, whh_l, b_l)*
        wfc_ref = refs[4 + n_mid]                         # (Hp, Cp) bf16
        bfc_ref = refs[5 + n_mid]                         # (1, Cp)  f32
        out_ref = refs[6 + n_mid]                         # (Bp, Cp) f32
        xproj_sc, h_sc, c_sc = refs[7 + n_mid:]           # scratch

        chunk = pl.program_id(0)

        @pl.when(chunk == 0)
        def _():
            h_sc[...] = jnp.zeros_like(h_sc)              # torch.zeros h0/c0
            c_sc[...] = jnp.zeros_like(c_sc)

        # Layer-0 input projection for this time-chunk: one MXU matmul.
        # Stored bf16: halves the dominant VMEM resident + per-step vld bytes.
        x_flat = x_ref[...].reshape(Tc * Bp, Ip)
        proj = (jnp.dot(x_flat, w0_ref[...], preferred_element_type=jnp.float32)
                + b0_ref[...])
        xproj_sc[...] = proj.reshape(Tc, Bp, four_h).astype(xproj_sc.dtype)

        # Load carried state into vregs once per chunk; recurrence keeps h/c
        # in registers (f32) — no per-step VMEM round-trips.
        hs0 = tuple(h_sc[l] for l in range(num_layers))
        cs0 = tuple(c_sc[l] for l in range(num_layers))

        def step(t, carry):
            hs, cs = carry
            # Layer 0: only the recurrent dot is on the critical path.
            gates = xproj_sc[t] + jnp.dot(
                hs[0].astype(jnp.bfloat16), whh0_ref[...],
                preferred_element_type=jnp.float32)
            h_new, c_new = _gate_update(gates, cs[0])
            new_hs, new_cs = [h_new], [c_new]
            prev_h = h_new

            # Layers > 0: two bf16 dots (no lane concat on the critical path).
            for l in range(1, num_layers):
                wih_ref = mid[3 * (l - 1)]
                whh_ref = mid[3 * (l - 1) + 1]
                b_ref = mid[3 * (l - 1) + 2]
                gates = (jnp.dot(prev_h.astype(jnp.bfloat16), wih_ref[...],
                                 preferred_element_type=jnp.float32)
                         + jnp.dot(hs[l].astype(jnp.bfloat16), whh_ref[...],
                                   preferred_element_type=jnp.float32)
                         + b_ref[...])
                h_new, c_new = _gate_update(gates, cs[l])
                new_hs.append(h_new)
                new_cs.append(c_new)
                prev_h = h_new

            if need_mask:   # only emitted if T is not a multiple of Tc
                valid = (chunk * Tc + t) < T
                new_hs = [jnp.where(valid, hn, ho) for hn, ho in zip(new_hs, hs)]
                new_cs = [jnp.where(valid, cn, co) for cn, co in zip(new_cs, cs)]
            return tuple(new_hs), tuple(new_cs)

        hs, cs = lax.fori_loop(0, Tc, step, (hs0, cs0), unroll=unroll)

        # Persist state for the next time-chunk (once per chunk, not per step).
        for l in range(num_layers):
            h_sc[l] = hs[l]
            c_sc[l] = cs[l]

        # out[:, -1, :] == final hidden of last layer; Dropout(0.5) is identity
        # in eval mode.
        @pl.when(chunk == n_chunks - 1)
        def _():
            out_ref[...] = (
                jnp.dot(hs[num_layers - 1].astype(jnp.bfloat16), wfc_ref[...],
                        preferred_element_type=jnp.float32)
                + bfc_ref[...])

    return kernel


def init_params(key, input_size, hidden_size, num_layers, num_classes):
    """Deterministic init mimicking PyTorch's U(-1/sqrt(H), 1/sqrt(H))."""
    H = hidden_size
    bound = 1.0 / float(H) ** 0.5
    params = {}
    for l in range(num_layers):
        in_sz = input_size if l == 0 else H
        key, k1, k2, k3, k4 = jax.random.split(key, 5)
        params[f"layer{l}"] = (
            jax.random.uniform(k1, (4 * H, in_sz), jnp.float32, -bound, bound),  # w_ih
            jax.random.uniform(k2, (4 * H, H), jnp.float32, -bound, bound),      # w_hh
            jax.random.uniform(k3, (4 * H,), jnp.float32, -bound, bound),        # b_ih
            jax.random.uniform(k4, (4 * H,), jnp.float32, -bound, bound),        # b_hh
        )
    key, k1, k2 = jax.random.split(key, 3)
    params["fc"] = (
        jax.random.uniform(k1, (num_classes, H), jnp.float32, -bound, bound),    # (C, H)
        jax.random.uniform(k2, (num_classes,), jnp.float32, -bound, bound),      # (C,)
    )
    return params


def lstm_model_forward(x, params, *, hidden_size, num_layers, num_classes):
    """x: (B, T, input_size) float32, batch_first (PyTorch convention)."""
    B, T, I = x.shape
    H = hidden_size
    C = num_classes

    # Pad batch to a bf16-friendly sublane multiple (16) and feature dims to
    # lane multiples (128). Zero-padding is numerically inert for this
    # recurrence (padded hidden columns stay exactly 0).
    Bp = _round_up(B, 16)
    Ip = _round_up(I, 128)
    Hp = _round_up(H, 128)
    Cp = _round_up(C, 128)
    four_hp = 4 * Hp

    # Time-chunking: stream x / the layer-0 projection over the grid.
    Tc = min(T, 32)
    n_chunks = -(-T // Tc)
    Tp = n_chunks * Tc

    def reorder_ifog(w):
        # PyTorch gate order along the leading 4H axis is [i, f, g, o];
        # permute once to [i, f, o, g].
        return jnp.concatenate([w[:2 * H], w[3 * H:4 * H], w[2 * H:3 * H]], axis=0)

    def pad_gate_weight(w_t, in_p):
        # w_t: (in_real, 4H) in [i,f,o,g] order -> (in_p, 4Hp) bf16, each gate
        # block zero-padded independently so block k lives at [k*Hp, k*Hp+H).
        in_real = w_t.shape[0]
        blocks = []
        for k in range(4):
            blk = w_t[:, k * H:(k + 1) * H]
            blocks.append(jnp.pad(blk, ((0, in_p - in_real), (0, Hp - H))))
        return jnp.concatenate(blocks, axis=1).astype(jnp.bfloat16)

    def pad_gate_bias(b4h):
        blocks = [jnp.pad(b4h[k * H:(k + 1) * H], (0, Hp - H)) for k in range(4)]
        return jnp.concatenate(blocks, axis=0).reshape(1, four_hp).astype(jnp.float32)

    # x -> time-major, bf16, padded: (Tp, Bp, Ip)
    x_tm = jnp.transpose(x, (1, 0, 2)).astype(jnp.bfloat16)
    x_tm = jnp.pad(x_tm, ((0, Tp - T), (0, Bp - B), (0, Ip - I)))

    inputs = [x_tm]

    # Layer 0: separate input / recurrent weights (input part hoisted per chunk).
    w_ih0, w_hh0, b_ih0, b_hh0 = params["layer0"]
    w0 = pad_gate_weight(reorder_ifog(w_ih0).T.astype(jnp.float32), Ip)    # (Ip, 4Hp)
    whh0 = pad_gate_weight(reorder_ifog(w_hh0).T.astype(jnp.float32), Hp)  # (Hp, 4Hp)
    b0 = pad_gate_bias(reorder_ifog((b_ih0 + b_hh0).astype(jnp.float32)))  # (1, 4Hp)
    inputs += [w0, whh0, b0]

    # Layers > 0: separate input/recurrent weights -> two dots per step (no concat).
    for l in range(1, num_layers):
        w_ih, w_hh, b_ih, b_hh = params[f"layer{l}"]
        wih_p = pad_gate_weight(reorder_ifog(w_ih).T.astype(jnp.float32), Hp)  # (Hp, 4Hp)
        whh_p = pad_gate_weight(reorder_ifog(w_hh).T.astype(jnp.float32), Hp)  # (Hp, 4Hp)
        b = pad_gate_bias(reorder_ifog((b_ih + b_hh).astype(jnp.float32)))     # (1, 4Hp)
        inputs += [wih_p, whh_p, b]

    w_fc, b_fc = params["fc"]
    wfc = jnp.pad(jnp.asarray(w_fc.T, jnp.float32),
                  ((0, Hp - H), (0, Cp - C))).astype(jnp.bfloat16)               # (Hp, Cp)
    bfc = jnp.pad(jnp.asarray(b_fc, jnp.float32), (0, Cp - C)).reshape(1, Cp)    # (1, Cp)
    inputs += [wfc, bfc]

    unroll = max(1, min(8, Tc))
    kernel = _make_lstm_kernel(num_layers, T, Tc, n_chunks, Bp, Ip, Hp, unroll)

    # in_specs: x streamed per chunk; weights resident (constant block index).
    in_specs = [pl.BlockSpec((Tc, Bp, Ip), lambda i: (i, 0, 0))]
    for a in inputs[1:]:
        shp = a.shape
        in_specs.append(pl.BlockSpec(shp, lambda i, _s=shp: (0,) * len(_s)))

    scratch_shapes = [
        pltpu.VMEM((Tc, Bp, four_hp), jnp.bfloat16),       # per-chunk layer-0 proj
        pltpu.VMEM((num_layers, Bp, Hp), jnp.float32),     # h carry (per layer)
        pltpu.VMEM((num_layers, Bp, Hp), jnp.float32),     # c carry (per layer)
    ]

    # vmem_limit derived from actual resident bytes.
    required = (
        sum(_nbytes(a.shape, a.dtype) for a in inputs[1:])     # weights / biases
        + _nbytes((Tc, Bp, Ip), jnp.bfloat16)                  # x block
        + _nbytes((Bp, Cp), jnp.float32)                       # output block
        + _nbytes((Tc, Bp, four_hp), jnp.bfloat16)             # xproj scratch
        + 2 * _nbytes((num_layers, Bp, Hp), jnp.float32)       # h/c scratch
    )
    vmem_limit = _pick_vmem_limit(required)

    out_p = pl.pallas_call(
        kernel,
        out_shape=jax.ShapeDtypeStruct((Bp, Cp), jnp.float32),
        grid_spec=pltpu.PrefetchScalarGridSpec(
            num_scalar_prefetch=0,
            grid=(n_chunks,),
            in_specs=in_specs,
            out_specs=pl.BlockSpec((Bp, Cp), lambda i: (0, 0)),
            scratch_shapes=scratch_shapes),
        compiler_params=pltpu.CompilerParams(
            dimension_semantics=("arbitrary",),
            vmem_limit_bytes=vmem_limit),
    )(*inputs)

    return out_p[:B, :C]


def lstm_model_reference(x, params, *, hidden_size, num_layers, num_classes):
    """Pure-JAX f32 reference mirroring torch.nn.LSTM + Linear (eval mode)."""
    B, T, _ = x.shape
    H = hidden_size
    seq = x
    for l in range(num_layers):
        w_ih, w_hh, b_ih, b_hh = params[f"layer{l}"]
        h = jnp.zeros((B, H), jnp.float32)
        c = jnp.zeros((B, H), jnp.float32)
        outs = []
        for t in range(T):
            gates = seq[:, t, :] @ w_ih.T + h @ w_hh.T + b_ih + b_hh
            i = jax.nn.sigmoid(gates[:, :H])
            f = jax.nn.sigmoid(gates[:, H:2 * H])
            g = jnp.tanh(gates[:, 2 * H:3 * H])
            o = jax.nn.sigmoid(gates[:, 3 * H:])
            c = f * c + i * g
            h = o * jnp.tanh(c)
            outs.append(h)
        seq = jnp.stack(outs, axis=1)
    w_fc, b_fc = params["fc"]
    return seq[:, -1, :] @ w_fc.T + b_fc


if __name__ == "__main__":
    # Small shapes consistent with the module's forward: x (batch, seq_len, input)
    B, T = 2, 8
    INPUT_SIZE, HIDDEN_SIZE, NUM_LAYERS, NUM_CLASSES = 16, 32, 2, 4

    key = jax.random.PRNGKey(0)
    key, pkey, xkey = jax.random.split(key, 3)
    params = init_params(pkey, INPUT_SIZE, HIDDEN_SIZE, NUM_LAYERS, NUM_CLASSES)
    x = jax.random.normal(xkey, (B, T, INPUT_SIZE), jnp.float32)

    out = lstm_model_forward(x, params, hidden_size=HIDDEN_SIZE,
                             num_layers=NUM_LAYERS, num_classes=NUM_CLASSES)
    out = jax.block_until_ready(out)

    ref = lstm_model_reference(x, params, hidden_size=HIDDEN_SIZE,
                               num_layers=NUM_LAYERS, num_classes=NUM_CLASSES)
    assert out.shape == (B, NUM_CLASSES), out.shape
    # bf16 MXU operands (f32 accumulation / f32 cell state) -> loosened tolerance
    # vs. the f32 reference.
    max_diff = float(jnp.max(jnp.abs(out - ref)))
    assert jnp.allclose(out, ref, atol=5e-2, rtol=5e-2), (out, ref, max_diff)

    print("KERNEL_OK")
</pallas_src>

<mosaic_0001>
module attributes {stable_mosaic.version = 11 : i64} {
  func.func @kernel(%arg0: i32, %arg1: memref<8x16x128xbf16, #tpu.memory_space<vmem>>, %arg2: memref<128x512xbf16, #tpu.memory_space<vmem>>, %arg3: memref<128x512xbf16, #tpu.memory_space<vmem>>, %arg4: memref<1x512xf32, #tpu.memory_space<vmem>>, %arg5: memref<128x512xbf16, #tpu.memory_space<vmem>>, %arg6: memref<128x512xbf16, #tpu.memory_space<vmem>>, %arg7: memref<1x512xf32, #tpu.memory_space<vmem>>, %arg8: memref<128x128xbf16, #tpu.memory_space<vmem>>, %arg9: memref<1x128xf32, #tpu.memory_space<vmem>>, %arg10: memref<16x128xf32, #tpu.memory_space<vmem>>, %arg11: memref<8x16x512xbf16, #tpu.memory_space<vmem>>, %arg12: memref<2x16x128xf32, #tpu.memory_space<vmem>>, %arg13: memref<2x16x128xf32, #tpu.memory_space<vmem>>) attributes {dimension_semantics = [#tpu.dimension_semantics<arbitrary>], iteration_bounds = array<i64: 1>, scalar_prefetch = 0 : i64, scratch_operands = 3 : i64, tpu.core_type = #tpu.core_type<tc>, window_params = [{transform_indices = @transform_0, window_bounds = array<i64: 8, 16, 128>}, {pipeline_mode = #tpu.pipeline_mode<synchronous>, transform_indices = @transform_1, window_bounds = array<i64: 128, 512>}, {pipeline_mode = #tpu.pipeline_mode<synchronous>, transform_indices = @transform_2, window_bounds = array<i64: 128, 512>}, {pipeline_mode = #tpu.pipeline_mode<synchronous>, transform_indices = @transform_3, window_bounds = array<i64: 1, 512>}, {pipeline_mode = #tpu.pipeline_mode<synchronous>, transform_indices = @transform_4, window_bounds = array<i64: 128, 512>}, {pipeline_mode = #tpu.pipeline_mode<synchronous>, transform_indices = @transform_5, window_bounds = array<i64: 128, 512>}, {pipeline_mode = #tpu.pipeline_mode<synchronous>, transform_indices = @transform_6, window_bounds = array<i64: 1, 512>}, {pipeline_mode = #tpu.pipeline_mode<synchronous>, transform_indices = @transform_7, window_bounds = array<i64: 128, 128>}, {pipeline_mode = #tpu.pipeline_mode<synchronous>, transform_indices = @transform_8, window_bounds = array<i64: 1, 128>}, {pipeline_mode = #tpu.pipeline_mode<synchronous>, transform_indices = @transform_9, window_bounds = array<i64: 16, 128>}]} {
    %c0_i32 = arith.constant 0 : i32
    %0 = arith.cmpi eq, %arg0, %c0_i32 : i32
    %1 = arith.extui %0 : i1 to i32
    %c0_i32_0 = arith.constant 0 : i32
    %2 = arith.cmpi ne, %1, %c0_i32_0 : i32
    scf.if %2 {
      %cst_156 = arith.constant 0.000000e+00 : f32
      %436 = vector.broadcast %cst_156 : f32 to vector<2x16x128xf32>
      %c0_157 = arith.constant 0 : index
      %c0_158 = arith.constant 0 : index
      %c0_159 = arith.constant 0 : index
      %437 = vector.load %arg12[%c0_157, %c0_158, %c0_159] : memref<2x16x128xf32, #tpu.memory_space<vmem>>, vector<2x16x128xf32>
      tpu.vector_store %arg12[%c0_157, %c0_158, %c0_159], %436 {strides = array<i32>} : memref<2x16x128xf32, #tpu.memory_space<vmem>>, vector<2x16x128xf32>,
      %cst_160 = arith.constant 0.000000e+00 : f32
      %438 = vector.broadcast %cst_160 : f32 to vector<2x16x128xf32>
      %c0_161 = arith.constant 0 : index
      %c0_162 = arith.constant 0 : index
      %c0_163 = arith.constant 0 : index
      %439 = vector.load %arg13[%c0_161, %c0_162, %c0_163] : memref<2x16x128xf32, #tpu.memory_space<vmem>>, vector<2x16x128xf32>
      tpu.vector_store %arg13[%c0_161, %c0_162, %c0_163], %438 {strides = array<i32>} : memref<2x16x128xf32, #tpu.memory_space<vmem>>, vector<2x16x128xf32>,
    } else {
    }
    %c0 = arith.constant 0 : index
    %c0_1 = arith.constant 0 : index
    %c0_2 = arith.constant 0 : index
    %3 = vector.load %arg1[%c0, %c0_1, %c0_2] : memref<8x16x128xbf16, #tpu.memory_space<vmem>>, vector<8x16x128xbf16>
    %4 = vector.shape_cast %3 : vector<8x16x128xbf16> to vector<128x128xbf16>
    %c0_3 = arith.constant 0 : index
    %c0_4 = arith.constant 0 : index
    %5 = vector.load %arg2[%c0_3, %c0_4] : memref<128x512xbf16, #tpu.memory_space<vmem>>, vector<128x512xbf16>
    %cst = arith.constant dense<0.000000e+00> : vector<128x512xf32>
    %6 = tpu.matmul %4, %5, %cst {dimension_numbers = #tpu.dot_dimension_numbers<[1], [0], [0], [1], [0, 0, 1, 1], [], []>} : vector<128x128xbf16>, vector<128x512xbf16>, vector<128x512xf32> -> vector<128x512xf32>
    %c0_5 = arith.constant 0 : index
    %c0_6 = arith.constant 0 : index
    %7 = vector.load %arg4[%c0_5, %c0_6] : memref<1x512xf32, #tpu.memory_space<vmem>>, vector<1x512xf32>
    %8 = vector.broadcast %7 : vector<1x512xf32> to vector<128x512xf32>
    %9 = arith.addf %6, %8 : vector<128x512xf32>
    %10 = vector.shape_cast %9 : vector<128x512xf32> to vector<8x16x512xf32>
    %11 = arith.truncf %10 : vector<8x16x512xf32> to vector<8x16x512xbf16>
    %c0_7 = arith.constant 0 : index
    %c0_8 = arith.constant 0 : index
    %c0_9 = arith.constant 0 : index
    %12 = vector.load %arg11[%c0_7, %c0_8, %c0_9] : memref<8x16x512xbf16, #tpu.memory_space<vmem>>, vector<8x16x512xbf16>
    tpu.vector_store %arg11[%c0_7, %c0_8, %c0_9], %11 {strides = array<i32>} : memref<8x16x512xbf16, #tpu.memory_space<vmem>>, vector<8x16x512xbf16>,
    %c0_10 = arith.constant 0 : index
    %c0_11 = arith.constant 0 : index
    %c0_12 = arith.constant 0 : index
    %13 = vector.load %arg12[%c0_10, %c0_11, %c0_12] : memref<2x16x128xf32, #tpu.memory_space<vmem>>, vector<1x16x128xf32>
    %14 = vector.shape_cast %13 : vector<1x16x128xf32> to vector<16x128xf32>
    %c1 = arith.constant 1 : index
    %c0_13 = arith.constant 0 : index
    %c0_14 = arith.constant 0 : index
    %15 = vector.load %arg12[%c1, %c0_13, %c0_14] : memref<2x16x128xf32, #tpu.memory_space<vmem>>, vector<1x16x128xf32>
    %16 = vector.shape_cast %15 : vector<1x16x128xf32> to vector<16x128xf32>
    %c0_15 = arith.constant 0 : index
    %c0_16 = arith.constant 0 : index
    %c0_17 = arith.constant 0 : index
    %17 = vector.load %arg13[%c0_15, %c0_16, %c0_17] : memref<2x16x128xf32, #tpu.memory_space<vmem>>, vector<1x16x128xf32>
    %18 = vector.shape_cast %17 : vector<1x16x128xf32> to vector<16x128xf32>
    %c1_18 = arith.constant 1 : index
    %c0_19 = arith.constant 0 : index
    %c0_20 = arith.constant 0 : index
    %19 = vector.load %arg13[%c1_18, %c0_19, %c0_20] : memref<2x16x128xf32, #tpu.memory_space<vmem>>, vector<1x16x128xf32>
    %20 = vector.shape_cast %19 : vector<1x16x128xf32> to vector<16x128xf32>
    %c0_i32_21 = arith.constant 0 : i32
    %21 = arith.index_cast %c0_i32_21 : i32 to index
    %c0_22 = arith.constant 0 : index
    %c0_23 = arith.constant 0 : index
    %22 = vector.load %arg11[%21, %c0_22, %c0_23] : memref<8x16x512xbf16, #tpu.memory_space<vmem>>, vector<1x16x512xbf16>
    %23 = vector.shape_cast %22 : vector<1x16x512xbf16> to vector<16x512xbf16>
    %24 = arith.truncf %14 : vector<16x128xf32> to vector<16x128xbf16>
    %c0_24 = arith.constant 0 : index
    %c0_25 = arith.constant 0 : index
    %25 = vector.load %arg3[%c0_24, %c0_25] : memref<128x512xbf16, #tpu.memory_space<vmem>>, vector<128x512xbf16>
    %cst_26 = arith.constant dense<0.000000e+00> : vector<16x512xf32>
    %26 = tpu.matmul %24, %25, %cst_26 {dimension_numbers = #tpu.dot_dimension_numbers<[1], [0], [0], [1], [0, 0, 1, 1], [], []>} : vector<16x128xbf16>, vector<128x512xbf16>, vector<16x512xf32> -> vector<16x512xf32>
    %27 = arith.extf %23 : vector<16x512xbf16> to vector<16x512xf32>
    %28 = arith.addf %27, %26 : vector<16x512xf32>
    %29 = vector.extract_strided_slice %28 {offsets = [0, 0], sizes = [16, 384], strides = [1, 1]} : vector<16x512xf32> to vector<16x384xf32>
    %30 = arith.negf %29 : vector<16x384xf32>
    %31 = math.exp %30 : vector<16x384xf32>
    %cst_27 = arith.constant 1.000000e+00 : f32
    %32 = vector.broadcast %cst_27 : f32 to vector<16x384xf32>
    %33 = arith.addf %32, %31 : vector<16x384xf32>
    %34 = arith.divf %32, %33 : vector<16x384xf32>
    %35 = vector.extract_strided_slice %34 {offsets = [0, 0], sizes = [16, 128], strides = [1, 1]} : vector<16x384xf32> to vector<16x128xf32>
    %36 = vector.extract_strided_slice %34 {offsets = [0, 128], sizes = [16, 128], strides = [1, 1]} : vector<16x384xf32> to vector<16x128xf32>
    %37 = vector.extract_strided_slice %34 {offsets = [0, 256], sizes = [16, 128], strides = [1, 1]} : vector<16x384xf32> to vector<16x128xf32>
    %38 = vector.extract_strided_slice %28 {offsets = [0, 384], sizes = [16, 128], strides = [1, 1]} : vector<16x512xf32> to vector<16x128xf32>
    %39 = math.tanh %38 : vector<16x128xf32>
    %40 = arith.mulf %36, %18 : vector<16x128xf32>
    %41 = arith.mulf %35, %39 : vector<16x128xf32>
    %42 = arith.addf %40, %41 : vector<16x128xf32>
    %43 = math.tanh %42 : vector<16x128xf32>
    %44 = arith.mulf %37, %43 : vector<16x128xf32>
    %45 = arith.truncf %44 : vector<16x128xf32> to vector<16x128xbf16>
    %c0_28 = arith.constant 0 : index
    %c0_29 = arith.constant 0 : index
    %46 = vector.load %arg5[%c0_28, %c0_29] : memref<128x512xbf16, #tpu.memory_space<vmem>>, vector<128x512xbf16>
    %cst_30 = arith.constant dense<0.000000e+00> : vector<16x512xf32>
    %47 = tpu.matmul %45, %46, %cst_30 {dimension_numbers = #tpu.dot_dimension_numbers<[1], [0], [0], [1], [0, 0, 1, 1], [], []>} : vector<16x128xbf16>, vector<128x512xbf16>, vector<16x512xf32> -> vector<16x512xf32>
    %48 = arith.truncf %16 : vector<16x128xf32> to vector<16x128xbf16>
    %c0_31 = arith.constant 0 : index
    %c0_32 = arith.constant 0 : index
    %49 = vector.load %arg6[%c0_31, %c0_32] : memref<128x512xbf16, #tpu.memory_space<vmem>>, vector<128x512xbf16>
    %cst_33 = arith.constant dense<0.000000e+00> : vector<16x512xf32>
    %50 = tpu.matmul %48, %49, %cst_33 {dimension_numbers = #tpu.dot_dimension_numbers<[1], [0], [0], [1], [0, 0, 1, 1], [], []>} : vector<16x128xbf16>, vector<128x512xbf16>, vector<16x512xf32> -> vector<16x512xf32>
    %51 = arith.addf %47, %50 : vector<16x512xf32>
    %c0_34 = arith.constant 0 : index
    %c0_35 = arith.constant 0 : index
    %52 = vector.load %arg7[%c0_34, %c0_35] : memref<1x512xf32, #tpu.memory_space<vmem>>, vector<1x512xf32>
    %53 = vector.broadcast %52 : vector<1x512xf32> to vector<16x512xf32>
    %54 = arith.addf %51, %53 : vector<16x512xf32>
    %55 = vector.extract_strided_slice %54 {offsets = [0, 0], sizes = [16, 384], strides = [1, 1]} : vector<16x512xf32> to vector<16x384xf32>
    %56 = arith.negf %55 : vector<16x384xf32>
    %57 = math.exp %56 : vector<16x384xf32>
    %cst_36 = arith.constant 1.000000e+00 : f32
    %58 = vector.broadcast %cst_36 : f32 to vector<16x384xf32>
    %59 = arith.addf %58, %57 : vector<16x384xf32>
    %60 = arith.divf %58, %59 : vector<16x384xf32>
    %61 = vector.extract_strided_slice %60 {offsets = [0, 0], sizes = [16, 128], strides = [1, 1]} : vector<16x384xf32> to vector<16x128xf32>
    %62 = vector.extract_strided_slice %60 {offsets = [0, 128], sizes = [16, 128], strides = [1, 1]} : vector<16x384xf32> to vector<16x128xf32>
    %63 = vector.extract_strided_slice %60 {offsets = [0, 256], sizes = [16, 128], strides = [1, 1]} : vector<16x384xf32> to vector<16x128xf32>
    %64 = vector.extract_strided_slice %54 {offsets = [0, 384], sizes = [16, 128], strides = [1, 1]} : vector<16x512xf32> to vector<16x128xf32>
    %65 = math.tanh %64 : vector<16x128xf32>
    %66 = arith.mulf %62, %20 : vector<16x128xf32>
    %67 = arith.mulf %61, %65 : vector<16x128xf32>
    %68 = arith.addf %66, %67 : vector<16x128xf32>
    %69 = math.tanh %68 : vector<16x128xf32>
    %70 = arith.mulf %63, %69 : vector<16x128xf32>
    %c1_i32 = arith.constant 1 : i32
    %71 = arith.index_cast %c1_i32 : i32 to index
    %c0_37 = arith.constant 0 : index
    %c0_38 = arith.constant 0 : index
    %72 = vector.load %arg11[%71, %c0_37, %c0_38] : memref<8x16x512xbf16, #tpu.memory_space<vmem>>, vector<1x16x512xbf16>
    %73 = vector.shape_cast %72 : vector<1x16x512xbf16> to vector<16x512xbf16>
    %74 = arith.truncf %44 : vector<16x128xf32> to vector<16x128xbf16>
    %c0_39 = arith.constant 0 : index
    %c0_40 = arith.constant 0 : index
    %75 = vector.load %arg3[%c0_39, %c0_40] : memref<128x512xbf16, #tpu.memory_space<vmem>>, vector<128x512xbf16>
    %cst_41 = arith.constant dense<0.000000e+00> : vector<16x512xf32>
    %76 = tpu.matmul %74, %75, %cst_41 {dimension_numbers = #tpu.dot_dimension_numbers<[1], [0], [0], [1], [0, 0, 1, 1], [], []>} : vector<16x128xbf16>, vector<128x512xbf16>, vector<16x512xf32> -> vector<16x512xf32>
    %77 = arith.extf %73 : vector<16x512xbf16> to vector<16x512xf32>
    %78 = arith.addf %77, %76 : vector<16x512xf32>
    %79 = vector.extract_strided_slice %78 {offsets = [0, 0], sizes = [16, 384], strides = [1, 1]} : vector<16x512xf32> to vector<16x384xf32>
    %80 = arith.negf %79 : vector<16x384xf32>
    %81 = math.exp %80 : vector<16x384xf32>
    %cst_42 = arith.constant 1.000000e+00 : f32
    %82 = vector.broadcast %cst_42 : f32 to vector<16x384xf32>
    %83 = arith.addf %82, %81 : vector<16x384xf32>
    %84 = arith.divf %82, %83 : vector<16x384xf32>
    %85 = vector.extract_strided_slice %84 {offsets = [0, 0], sizes = [16, 128], strides = [1, 1]} : vector<16x384xf32> to vector<16x128xf32>
    %86 = vector.extract_strided_slice %84 {offsets = [0, 128], sizes = [16, 128], strides = [1, 1]} : vector<16x384xf32> to vector<16x128xf32>
    %87 = vector.extract_strided_slice %84 {offsets = [0, 256], sizes = [16, 128], strides = [1, 1]} : vector<16x384xf32> to vector<16x128xf32>
    %88 = vector.extract_strided_slice %78 {offsets = [0, 384], sizes = [16, 128], strides = [1, 1]} : vector<16x512xf32> to vector<16x128xf32>
    %89 = math.tanh %88 : vector<16x128xf32>
    %90 = arith.mulf %86, %42 : vector<16x128xf32>
    %91 = arith.mulf %85, %89 : vector<16x128xf32>
    %92 = arith.addf %90, %91 : vector<16x128xf32>
    %93 = math.tanh %92 : vector<16x128xf32>
    %94 = arith.mulf %87, %93 : vector<16x128xf32>
    %95 = arith.truncf %94 : vector<16x128xf32> to vector<16x128xbf16>
    %c0_43 = arith.constant 0 : index
    %c0_44 = arith.constant 0 : index
    %96 = vector.load %arg5[%c0_43, %c0_44] : memref<128x512xbf16, #tpu.memory_space<vmem>>, vector<128x512xbf16>
    %cst_45 = arith.constant dense<0.000000e+00> : vector<16x512xf32>
    %97 = tpu.matmul %95, %96, %cst_45 {dimension_numbers = #tpu.dot_dimension_numbers<[1], [0], [0], [1], [0, 0, 1, 1], [], []>} : vector<16x128xbf16>, vector<128x512xbf16>, vector<16x512xf32> -> vector<16x512xf32>
    %98 = arith.truncf %70 : vector<16x128xf32> to vector<16x128xbf16>
    %c0_46 = arith.constant 0 : index
    %c0_47 = arith.constant 0 : index
    %99 = vector.load %arg6[%c0_46, %c0_47] : memref<128x512xbf16, #tpu.memory_space<vmem>>, vector<128x512xbf16>
    %cst_48 = arith.constant dense<0.000000e+00> : vector<16x512xf32>
    %100 = tpu.matmul %98, %99, %cst_48 {dimension_numbers = #tpu.dot_dimension_numbers<[1], [0], [0], [1], [0, 0, 1, 1], [], []>} : vector<16x128xbf16>, vector<128x512xbf16>, vector<16x512xf32> -> vector<16x512xf32>
    %101 = arith.addf %97, %100 : vector<16x512xf32>
    %c0_49 = arith.constant 0 : index
    %c0_50 = arith.constant 0 : index
    %102 = vector.load %arg7[%c0_49, %c0_50] : memref<1x512xf32, #tpu.memory_space<vmem>>, vector<1x512xf32>
    %103 = vector.broadcast %102 : vector<1x512xf32> to vector<16x512xf32>
    %104 = arith.addf %101, %103 : vector<16x512xf32>
    %105 = vector.extract_strided_slice %104 {offsets = [0, 0], sizes = [16, 384], strides = [1, 1]} : vector<16x512xf32> to vector<16x384xf32>
    %106 = arith.negf %105 : vector<16x384xf32>
    %107 = math.exp %106 : vector<16x384xf32>
    %cst_51 = arith.constant 1.000000e+00 : f32
    %108 = vector.broadcast %cst_51 : f32 to vector<16x384xf32>
    %109 = arith.addf %108, %107 : vector<16x384xf32>
    %110 = arith.divf %108, %109 : vector<16x384xf32>
    %111 = vector.extract_strided_slice %110 {offsets = [0, 0], sizes = [16, 128], strides = [1, 1]} : vector<16x384xf32> to vector<16x128xf32>
    %112 = vector.extract_strided_slice %110 {offsets = [0, 128], sizes = [16, 128], strides = [1, 1]} : vector<16x384xf32> to vector<16x128xf32>
    %113 = vector.extract_strided_slice %110 {offsets = [0, 256], sizes = [16, 128], strides = [1, 1]} : vector<16x384xf32> to vector<16x128xf32>
    %114 = vector.extract_strided_slice %104 {offsets = [0, 384], sizes = [16, 128], strides = [1, 1]} : vector<16x512xf32> to vector<16x128xf32>
    %115 = math.tanh %114 : vector<16x128xf32>
    %116 = arith.mulf %112, %68 : vector<16x128xf32>
    %117 = arith.mulf %111, %115 : vector<16x128xf32>
    %118 = arith.addf %116, %117 : vector<16x128xf32>
    %119 = math.tanh %118 : vector<16x128xf32>
    %120 = arith.mulf %113, %119 : vector<16x128xf32>
    %c2_i32 = arith.constant 2 : i32
    %121 = arith.index_cast %c2_i32 : i32 to index
    %c0_52 = arith.constant 0 : index
    %c0_53 = arith.constant 0 : index
    %122 = vector.load %arg11[%121, %c0_52, %c0_53] : memref<8x16x512xbf16, #tpu.memory_space<vmem>>, vector<1x16x512xbf16>
    %123 = vector.shape_cast %122 : vector<1x16x512xbf16> to vector<16x512xbf16>
    %124 = arith.truncf %94 : vector<16x128xf32> to vector<16x128xbf16>
    %c0_54 = arith.constant 0 : index
    %c0_55 = arith.constant 0 : index
    %125 = vector.load %arg3[%c0_54, %c0_55] : memref<128x512xbf16, #tpu.memory_space<vmem>>, vector<128x512xbf16>
    %cst_56 = arith.constant dense<0.000000e+00> : vector<16x512xf32>
    %126 = tpu.matmul %124, %125, %cst_56 {dimension_numbers = #tpu.dot_dimension_numbers<[1], [0], [0], [1], [0, 0, 1, 1], [], []>} : vector<16x128xbf16>, vector<128x512xbf16>, vector<16x512xf32> -> vector<16x512xf32>
    %127 = arith.extf %123 : vector<16x512xbf16> to vector<16x512xf32>
    %128 = arith.addf %127, %126 : vector<16x512xf32>
    %129 = vector.extract_strided_slice %128 {offsets = [0, 0], sizes = [16, 384], strides = [1, 1]} : vector<16x512xf32> to vector<16x384xf32>
    %130 = arith.negf %129 : vector<16x384xf32>
    %131 = math.exp %130 : vector<16x384xf32>
    %cst_57 = arith.constant 1.000000e+00 : f32
    %132 = vector.broadcast %cst_57 : f32 to vector<16x384xf32>
    %133 = arith.addf %132, %131 : vector<16x384xf32>
    %134 = arith.divf %132, %133 : vector<16x384xf32>
    %135 = vector.extract_strided_slice %134 {offsets = [0, 0], sizes = [16, 128], strides = [1, 1]} : vector<16x384xf32> to vector<16x128xf32>
    %136 = vector.extract_strided_slice %134 {offsets = [0, 128], sizes = [16, 128], strides = [1, 1]} : vector<16x384xf32> to vector<16x128xf32>
    %137 = vector.extract_strided_slice %134 {offsets = [0, 256], sizes = [16, 128], strides = [1, 1]} : vector<16x384xf32> to vector<16x128xf32>
    %138 = vector.extract_strided_slice %128 {offsets = [0, 384], sizes = [16, 128], strides = [1, 1]} : vector<16x512xf32> to vector<16x128xf32>
    %139 = math.tanh %138 : vector<16x128xf32>
    %140 = arith.mulf %136, %92 : vector<16x128xf32>
    %141 = arith.mulf %135, %139 : vector<16x128xf32>
    %142 = arith.addf %140, %141 : vector<16x128xf32>
    %143 = math.tanh %142 : vector<16x128xf32>
    %144 = arith.mulf %137, %143 : vector<16x128xf32>
    %145 = arith.truncf %144 : vector<16x128xf32> to vector<16x128xbf16>
    %c0_58 = arith.constant 0 : index
    %c0_59 = arith.constant 0 : index
    %146 = vector.load %arg5[%c0_58, %c0_59] : memref<128x512xbf16, #tpu.memory_space<vmem>>, vector<128x512xbf16>
    %cst_60 = arith.constant dense<0.000000e+00> : vector<16x512xf32>
    %147 = tpu.matmul %145, %146, %cst_60 {dimension_numbers = #tpu.dot_dimension_numbers<[1], [0], [0], [1], [0, 0, 1, 1], [], []>} : vector<16x128xbf16>, vector<128x512xbf16>, vector<16x512xf32> -> vector<16x512xf32>
    %148 = arith.truncf %120 : vector<16x128xf32> to vector<16x128xbf16>
    %c0_61 = arith.constant 0 : index
    %c0_62 = arith.constant 0 : index
    %149 = vector.load %arg6[%c0_61, %c0_62] : memref<128x512xbf16, #tpu.memory_space<vmem>>, vector<128x512xbf16>
    %cst_63 = arith.constant dense<0.000000e+00> : vector<16x512xf32>
    %150 = tpu.matmul %148, %149, %cst_63 {dimension_numbers = #tpu.dot_dimension_numbers<[1], [0], [0], [1], [0, 0, 1, 1], [], []>} : vector<16x128xbf16>, vector<128x512xbf16>, vector<16x512xf32> -> vector<16x512xf32>
    %151 = arith.addf %147, %150 : vector<16x512xf32>
    %c0_64 = arith.constant 0 : index
    %c0_65 = arith.constant 0 : index
    %152 = vector.load %arg7[%c0_64, %c0_65] : memref<1x512xf32, #tpu.memory_space<vmem>>, vector<1x512xf32>
    %153 = vector.broadcast %152 : vector<1x512xf32> to vector<16x512xf32>
    %154 = arith.addf %151, %153 : vector<16x512xf32>
    %155 = vector.extract_strided_slice %154 {offsets = [0, 0], sizes = [16, 384], strides = [1, 1]} : vector<16x512xf32> to vector<16x384xf32>
    %156 = arith.negf %155 : vector<16x384xf32>
    %157 = math.exp %156 : vector<16x384xf32>
    %cst_66 = arith.constant 1.000000e+00 : f32
    %158 = vector.broadcast %cst_66 : f32 to vector<16x384xf32>
    %159 = arith.addf %158, %157 : vector<16x384xf32>
    %160 = arith.divf %158, %159 : vector<16x384xf32>
    %161 = vector.extract_strided_slice %160 {offsets = [0, 0], sizes = [16, 128], strides = [1, 1]} : vector<16x384xf32> to vector<16x128xf32>
    %162 = vector.extract_strided_slice %160 {offsets = [0, 128], sizes = [16, 128], strides = [1, 1]} : vector<16x384xf32> to vector<16x128xf32>
    %163 = vector.extract_strided_slice %160 {offsets = [0, 256], sizes = [16, 128], strides = [1, 1]} : vector<16x384xf32> to vector<16x128xf32>
    %164 = vector.extract_strided_slice %154 {offsets = [0, 384], sizes = [16, 128], strides = [1, 1]} : vector<16x512xf32> to vector<16x128xf32>
    %165 = math.tanh %164 : vector<16x128xf32>
    %166 = arith.mulf %162, %118 : vector<16x128xf32>
    %167 = arith.mulf %161, %165 : vector<16x128xf32>
    %168 = arith.addf %166, %167 : vector<16x128xf32>
    %169 = math.tanh %168 : vector<16x128xf32>
    %170 = arith.mulf %163, %169 : vector<16x128xf32>
    %c3_i32 = arith.constant 3 : i32
    %171 = arith.index_cast %c3_i32 : i32 to index
    %c0_67 = arith.constant 0 : index
    %c0_68 = arith.constant 0 : index
    %172 = vector.load %arg11[%171, %c0_67, %c0_68] : memref<8x16x512xbf16, #tpu.memory_space<vmem>>, vector<1x16x512xbf16>
    %173 = vector.shape_cast %172 : vector<1x16x512xbf16> to vector<16x512xbf16>
    %174 = arith.truncf %144 : vector<16x128xf32> to vector<16x128xbf16>
    %c0_69 = arith.constant 0 : index
    %c0_70 = arith.constant 0 : index
    %175 = vector.load %arg3[%c0_69, %c0_70] : memref<128x512xbf16, #tpu.memory_space<vmem>>, vector<128x512xbf16>
    %cst_71 = arith.constant dense<0.000000e+00> : vector<16x512xf32>
    %176 = tpu.matmul %174, %175, %cst_71 {dimension_numbers = #tpu.dot_dimension_numbers<[1], [0], [0], [1], [0, 0, 1, 1], [], []>} : vector<16x128xbf16>, vector<128x512xbf16>, vector<16x512xf32> -> vector<16x512xf32>
    %177 = arith.extf %173 : vector<16x512xbf16> to vector<16x512xf32>
    %178 = arith.addf %177, %176 : vector<16x512xf32>
    %179 = vector.extract_strided_slice %178 {offsets = [0, 0], sizes = [16, 384], strides = [1, 1]} : vector<16x512xf32> to vector<16x384xf32>
    %180 = arith.negf %179 : vector<16x384xf32>
    %181 = math.exp %180 : vector<16x384xf32>
    %cst_72 = arith.constant 1.000000e+00 : f32
    %182 = vector.broadcast %cst_72 : f32 to vector<16x384xf32>
    %183 = arith.addf %182, %181 : vector<16x384xf32>
    %184 = arith.divf %182, %183 : vector<16x384xf32>
    %185 = vector.extract_strided_slice %184 {offsets = [0, 0], sizes = [16, 128], strides = [1, 1]} : vector<16x384xf32> to vector<16x128xf32>
    %186 = vector.extract_strided_slice %184 {offsets = [0, 128], sizes = [16, 128], strides = [1, 1]} : vector<16x384xf32> to vector<16x128xf32>
    %187 = vector.extract_strided_slice %184 {offsets = [0, 256], sizes = [16, 128], strides = [1, 1]} : vector<16x384xf32> to vector<16x128xf32>
    %188 = vector.extract_strided_slice %178 {offsets = [0, 384], sizes = [16, 128], strides = [1, 1]} : vector<16x512xf32> to vector<16x128xf32>
    %189 = math.tanh %188 : vector<16x128xf32>
    %190 = arith.mulf %186, %142 : vector<16x128xf32>
    %191 = arith.mulf %185, %189 : vector<16x128xf32>
    %192 = arith.addf %190, %191 : vector<16x128xf32>
    %193 = math.tanh %192 : vector<16x128xf32>
    %194 = arith.mulf %187, %193 : vector<16x128xf32>
    %195 = arith.truncf %194 : vector<16x128xf32> to vector<16x128xbf16>
    %c0_73 = arith.constant 0 : index
    %c0_74 = arith.constant 0 : index
    %196 = vector.load %arg5[%c0_73, %c0_74] : memref<128x512xbf16, #tpu.memory_space<vmem>>, vector<128x512xbf16>
    %cst_75 = arith.constant dense<0.000000e+00> : vector<16x512xf32>
    %197 = tpu.matmul %195, %196, %cst_75 {dimension_numbers = #tpu.dot_dimension_numbers<[1], [0], [0], [1], [0, 0, 1, 1], [], []>} : vector<16x128xbf16>, vector<128x512xbf16>, vector<16x512xf32> -> vector<16x512xf32>
    %198 = arith.truncf %170 : vector<16x128xf32> to vector<16x128xbf16>
    %c0_76 = arith.constant 0 : index
    %c0_77 = arith.constant 0 : index
    %199 = vector.load %arg6[%c0_76, %c0_77] : memref<128x512xbf16, #tpu.memory_space<vmem>>, vector<128x512xbf16>
    %cst_78 = arith.constant dense<0.000000e+00> : vector<16x512xf32>
    %200 = tpu.matmul %198, %199, %cst_78 {dimension_numbers = #tpu.dot_dimension_numbers<[1], [0], [0], [1], [0, 0, 1, 1], [], []>} : vector<16x128xbf16>, vector<128x512xbf16>, vector<16x512xf32> -> vector<16x512xf32>
    %201 = arith.addf %197, %200 : vector<16x512xf32>
    %c0_79 = arith.constant 0 : index
    %c0_80 = arith.constant 0 : index
    %202 = vector.load %arg7[%c0_79, %c0_80] : memref<1x512xf32, #tpu.memory_space<vmem>>, vector<1x512xf32>
    %203 = vector.broadcast %202 : vector<1x512xf32> to vector<16x512xf32>
    %204 = arith.addf %201, %203 : vector<16x512xf32>
    %205 = vector.extract_strided_slice %204 {offsets = [0, 0], sizes = [16, 384], strides = [1, 1]} : vector<16x512xf32> to vector<16x384xf32>
    %206 = arith.negf %205 : vector<16x384xf32>
    %207 = math.exp %206 : vector<16x384xf32>
    %cst_81 = arith.constant 1.000000e+00 : f32
    %208 = vector.broadcast %cst_81 : f32 to vector<16x384xf32>
    %209 = arith.addf %208, %207 : vector<16x384xf32>
    %210 = arith.divf %208, %209 : vector<16x384xf32>
    %211 = vector.extract_strided_slice %210 {offsets = [0, 0], sizes = [16, 128], strides = [1, 1]} : vector<16x384xf32> to vector<16x128xf32>
    %212 = vector.extract_strided_slice %210 {offsets = [0, 128], sizes = [16, 128], strides = [1, 1]} : vector<16x384xf32> to vector<16x128xf32>
    %213 = vector.extract_strided_slice %210 {offsets = [0, 256], sizes = [16, 128], strides = [1, 1]} : vector<16x384xf32> to vector<16x128xf32>
    %214 = vector.extract_strided_slice %204 {offsets = [0, 384], sizes = [16, 128], strides = [1, 1]} : vector<16x512xf32> to vector<16x128xf32>
    %215 = math.tanh %214 : vector<16x128xf32>
    %216 = arith.mulf %212, %168 : vector<16x128xf32>
    %217 = arith.mulf %211, %215 : vector<16x128xf32>
    %218 = arith.addf %216, %217 : vector<16x128xf32>
    %219 = math.tanh %218 : vector<16x128xf32>
    %220 = arith.mulf %213, %219 : vector<16x128xf32>
    %c4_i32 = arith.constant 4 : i32
    %221 = arith.index_cast %c4_i32 : i32 to index
    %c0_82 = arith.constant 0 : index
    %c0_83 = arith.constant 0 : index
    %222 = vector.load %arg11[%221, %c0_82, %c0_83] : memref<8x16x512xbf16, #tpu.memory_space<vmem>>, vector<1x16x512xbf16>
    %223 = vector.shape_cast %222 : vector<1x16x512xbf16> to vector<16x512xbf16>
    %224 = arith.truncf %194 : vector<16x128xf32> to vector<16x128xbf16>
    %c0_84 = arith.constant 0 : index
    %c0_85 = arith.constant 0 : index
    %225 = vector.load %arg3[%c0_84, %c0_85] : memref<128x512xbf16, #tpu.memory_space<vmem>>, vector<128x512xbf16>
    %cst_86 = arith.constant dense<0.000000e+00> : vector<16x512xf32>
    %226 = tpu.matmul %224, %225, %cst_86 {dimension_numbers = #tpu.dot_dimension_numbers<[1], [0], [0], [1], [0, 0, 1, 1], [], []>} : vector<16x128xbf16>, vector<128x512xbf16>, vector<16x512xf32> -> vector<16x512xf32>
    %227 = arith.extf %223 : vector<16x512xbf16> to vector<16x512xf32>
    %228 = arith.addf %227, %226 : vector<16x512xf32>
    %229 = vector.extract_strided_slice %228 {offsets = [0, 0], sizes = [16, 384], strides = [1, 1]} : vector<16x512xf32> to vector<16x384xf32>
    %230 = arith.negf %229 : vector<16x384xf32>
    %231 = math.exp %230 : vector<16x384xf32>
    %cst_87 = arith.constant 1.000000e+00 : f32
    %232 = vector.broadcast %cst_87 : f32 to vector<16x384xf32>
    %233 = arith.addf %232, %231 : vector<16x384xf32>
    %234 = arith.divf %232, %233 : vector<16x384xf32>
    %235 = vector.extract_strided_slice %234 {offsets = [0, 0], sizes = [16, 128], strides = [1, 1]} : vector<16x384xf32> to vector<16x128xf32>
    %236 = vector.extract_strided_slice %234 {offsets = [0, 128], sizes = [16, 128], strides = [1, 1]} : vector<16x384xf32> to vector<16x128xf32>
    %237 = vector.extract_strided_slice %234 {offsets = [0, 256], sizes = [16, 128], strides = [1, 1]} : vector<16x384xf32> to vector<16x128xf32>
    %238 = vector.extract_strided_slice %228 {offsets = [0, 384], sizes = [16, 128], strides = [1, 1]} : vector<16x512xf32> to vector<16x128xf32>
    %239 = math.tanh %238 : vector<16x128xf32>
    %240 = arith.mulf %236, %192 : vector<16x128xf32>
    %241 = arith.mulf %235, %239 : vector<16x128xf32>
    %242 = arith.addf %240, %241 : vector<16x128xf32>
    %243 = math.tanh %242 : vector<16x128xf32>
    %244 = arith.mulf %237, %243 : vector<16x128xf32>
    %245 = arith.truncf %244 : vector<16x128xf32> to vector<16x128xbf16>
    %c0_88 = arith.constant 0 : index
    %c0_89 = arith.constant 0 : index
    %246 = vector.load %arg5[%c0_88, %c0_89] : memref<128x512xbf16, #tpu.memory_space<vmem>>, vector<128x512xbf16>
    %cst_90 = arith.constant dense<0.000000e+00> : vector<16x512xf32>
    %247 = tpu.matmul %245, %246, %cst_90 {dimension_numbers = #tpu.dot_dimension_numbers<[1], [0], [0], [1], [0, 0, 1, 1], [], []>} : vector<16x128xbf16>, vector<128x512xbf16>, vector<16x512xf32> -> vector<16x512xf32>
    %248 = arith.truncf %220 : vector<16x128xf32> to vector<16x128xbf16>
    %c0_91 = arith.constant 0 : index
    %c0_92 = arith.constant 0 : index
    %249 = vector.load %arg6[%c0_91, %c0_92] : memref<128x512xbf16, #tpu.memory_space<vmem>>, vector<128x512xbf16>
    %cst_93 = arith.constant dense<0.000000e+00> : vector<16x512xf32>
    %250 = tpu.matmul %248, %249, %cst_93 {dimension_numbers = #tpu.dot_dimension_numbers<[1], [0], [0], [1], [0, 0, 1, 1], [], []>} : vector<16x128xbf16>, vector<128x512xbf16>, vector<16x512xf32> -> vector<16x512xf32>
    %251 = arith.addf %247, %250 : vector<16x512xf32>
    %c0_94 = arith.constant 0 : index
    %c0_95 = arith.constant 0 : index
    %252 = vector.load %arg7[%c0_94, %c0_95] : memref<1x512xf32, #tpu.memory_space<vmem>>, vector<1x512xf32>
    %253 = vector.broadcast %252 : vector<1x512xf32> to vector<16x512xf32>
    %254 = arith.addf %251, %253 : vector<16x512xf32>
    %255 = vector.extract_strided_slice %254 {offsets = [0, 0], sizes = [16, 384], strides = [1, 1]} : vector<16x512xf32> to vector<16x384xf32>
    %256 = arith.negf %255 : vector<16x384xf32>
    %257 = math.exp %256 : vector<16x384xf32>
    %cst_96 = arith.constant 1.000000e+00 : f32
    %258 = vector.broadcast %cst_96 : f32 to vector<16x384xf32>
    %259 = arith.addf %258, %257 : vector<16x384xf32>
    %260 = arith.divf %258, %259 : vector<16x384xf32>
    %261 = vector.extract_strided_slice %260 {offsets = [0, 0], sizes = [16, 128], strides = [1, 1]} : vector<16x384xf32> to vector<16x128xf32>
    %262 = vector.extract_strided_slice %260 {offsets = [0, 128], sizes = [16, 128], strides = [1, 1]} : vector<16x384xf32> to vector<16x128xf32>
    %263 = vector.extract_strided_slice %260 {offsets = [0, 256], sizes = [16, 128], strides = [1, 1]} : vector<16x384xf32> to vector<16x128xf32>
    %264 = vector.extract_strided_slice %254 {offsets = [0, 384], sizes = [16, 128], strides = [1, 1]} : vector<16x512xf32> to vector<16x128xf32>
    %265 = math.tanh %264 : vector<16x128xf32>
    %266 = arith.mulf %262, %218 : vector<16x128xf32>
    %267 = arith.mulf %261, %265 : vector<16x128xf32>
    %268 = arith.addf %266, %267 : vector<16x128xf32>
    %269 = math.tanh %268 : vector<16x128xf32>
    %270 = arith.mulf %263, %269 : vector<16x128xf32>
    %c5_i32 = arith.constant 5 : i32
    %271 = arith.index_cast %c5_i32 : i32 to index
    %c0_97 = arith.constant 0 : index
    %c0_98 = arith.constant 0 : index
    %272 = vector.load %arg11[%271, %c0_97, %c0_98] : memref<8x16x512xbf16, #tpu.memory_space<vmem>>, vector<1x16x512xbf16>
    %273 = vector.shape_cast %272 : vector<1x16x512xbf16> to vector<16x512xbf16>
    %274 = arith.truncf %244 : vector<16x128xf32> to vector<16x128xbf16>
    %c0_99 = arith.constant 0 : index
    %c0_100 = arith.constant 0 : index
    %275 = vector.load %arg3[%c0_99, %c0_100] : memref<128x512xbf16, #tpu.memory_space<vmem>>, vector<128x512xbf16>
    %cst_101 = arith.constant dense<0.000000e+00> : vector<16x512xf32>
    %276 = tpu.matmul %274, %275, %cst_101 {dimension_numbers = #tpu.dot_dimension_numbers<[1], [0], [0], [1], [0, 0, 1, 1], [], []>} : vector<16x128xbf16>, vector<128x512xbf16>, vector<16x512xf32> -> vector<16x512xf32>
    %277 = arith.extf %273 : vector<16x512xbf16> to vector<16x512xf32>
    %278 = arith.addf %277, %276 : vector<16x512xf32>
    %279 = vector.extract_strided_slice %278 {offsets = [0, 0], sizes = [16, 384], strides = [1, 1]} : vector<16x512xf32> to vector<16x384xf32>
    %280 = arith.negf %279 : vector<16x384xf32>
    %281 = math.exp %280 : vector<16x384xf32>
    %cst_102 = arith.constant 1.000000e+00 : f32
    %282 = vector.broadcast %cst_102 : f32 to vector<16x384xf32>
    %283 = arith.addf %282, %281 : vector<16x384xf32>
    %284 = arith.divf %282, %283 : vector<16x384xf32>
    %285 = vector.extract_strided_slice %284 {offsets = [0, 0], sizes = [16, 128], strides = [1, 1]} : vector<16x384xf32> to vector<16x128xf32>
    %286 = vector.extract_strided_slice %284 {offsets = [0, 128], sizes = [16, 128], strides = [1, 1]} : vector<16x384xf32> to vector<16x128xf32>
    %287 = vector.extract_strided_slice %284 {offsets = [0, 256], sizes = [16, 128], strides = [1, 1]} : vector<16x384xf32> to vector<16x128xf32>
    %288 = vector.extract_strided_slice %278 {offsets = [0, 384], sizes = [16, 128], strides = [1, 1]} : vector<16x512xf32> to vector<16x128xf32>
    %289 = math.tanh %288 : vector<16x128xf32>
    %290 = arith.mulf %286, %242 : vector<16x128xf32>
    %291 = arith.mulf %285, %289 : vector<16x128xf32>
    %292 = arith.addf %290, %291 : vector<16x128xf32>
    %293 = math.tanh %292 : vector<16x128xf32>
    %294 = arith.mulf %287, %293 : vector<16x128xf32>
    %295 = arith.truncf %294 : vector<16x128xf32> to vector<16x128xbf16>
    %c0_103 = arith.constant 0 : index
    %c0_104 = arith.constant 0 : index
    %296 = vector.load %arg5[%c0_103, %c0_104] : memref<128x512xbf16, #tpu.memory_space<vmem>>, vector<128x512xbf16>
    %cst_105 = arith.constant dense<0.000000e+00> : vector<16x512xf32>
    %297 = tpu.matmul %295, %296, %cst_105 {dimension_numbers = #tpu.dot_dimension_numbers<[1], [0], [0], [1], [0, 0, 1, 1], [], []>} : vector<16x128xbf16>, vector<128x512xbf16>, vector<16x512xf32> -> vector<16x512xf32>
    %298 = arith.truncf %270 : vector<16x128xf32> to vector<16x128xbf16>
    %c0_106 = arith.constant 0 : index
    %c0_107 = arith.constant 0 : index
    %299 = vector.load %arg6[%c0_106, %c0_107] : memref<128x512xbf16, #tpu.memory_space<vmem>>, vector<128x512xbf16>
    %cst_108 = arith.constant dense<0.000000e+00> : vector<16x512xf32>
    %300 = tpu.matmul %298, %299, %cst_108 {dimension_numbers = #tpu.dot_dimension_numbers<[1], [0], [0], [1], [0, 0, 1, 1], [], []>} : vector<16x128xbf16>, vector<128x512xbf16>, vector<16x512xf32> -> vector<16x512xf32>
    %301 = arith.addf %297, %300 : vector<16x512xf32>
    %c0_109 = arith.constant 0 : index
    %c0_110 = arith.constant 0 : index
    %302 = vector.load %arg7[%c0_109, %c0_110] : memref<1x512xf32, #tpu.memory_space<vmem>>, vector<1x512xf32>
    %303 = vector.broadcast %302 : vector<1x512xf32> to vector<16x512xf32>
    %304 = arith.addf %301, %303 : vector<16x512xf32>
    %305 = vector.extract_strided_slice %304 {offsets = [0, 0], sizes = [16, 384], strides = [1, 1]} : vector<16x512xf32> to vector<16x384xf32>
    %306 = arith.negf %305 : vector<16x384xf32>
    %307 = math.exp %306 : vector<16x384xf32>
    %cst_111 = arith.constant 1.000000e+00 : f32
    %308 = vector.broadcast %cst_111 : f32 to vector<16x384xf32>
    %309 = arith.addf %308, %307 : vector<16x384xf32>
    %310 = arith.divf %308, %309 : vector<16x384xf32>
    %311 = vector.extract_strided_slice %310 {offsets = [0, 0], sizes = [16, 128], strides = [1, 1]} : vector<16x384xf32> to vector<16x128xf32>
    %312 = vector.extract_strided_slice %310 {offsets = [0, 128], sizes = [16, 128], strides = [1, 1]} : vector<16x384xf32> to vector<16x128xf32>
    %313 = vector.extract_strided_slice %310 {offsets = [0, 256], sizes = [16, 128], strides = [1, 1]} : vector<16x384xf32> to vector<16x128xf32>
    %314 = vector.extract_strided_slice %304 {offsets = [0, 384], sizes = [16, 128], strides = [1, 1]} : vector<16x512xf32> to vector<16x128xf32>
    %315 = math.tanh %314 : vector<16x128xf32>
    %316 = arith.mulf %312, %268 : vector<16x128xf32>
    %317 = arith.mulf %311, %315 : vector<16x128xf32>
    %318 = arith.addf %316, %317 : vector<16x128xf32>
    %319 = math.tanh %318 : vector<16x128xf32>
    %320 = arith.mulf %313, %319 : vector<16x128xf32>
    %c6_i32 = arith.constant 6 : i32
    %321 = arith.index_cast %c6_i32 : i32 to index
    %c0_112 = arith.constant 0 : index
    %c0_113 = arith.constant 0 : index
    %322 = vector.load %arg11[%321, %c0_112, %c0_113] : memref<8x16x512xbf16, #tpu.memory_space<vmem>>, vector<1x16x512xbf16>
    %323 = vector.shape_cast %322 : vector<1x16x512xbf16> to vector<16x512xbf16>
    %324 = arith.truncf %294 : vector<16x128xf32> to vector<16x128xbf16>
    %c0_114 = arith.constant 0 : index
    %c0_115 = arith.constant 0 : index
    %325 = vector.load %arg3[%c0_114, %c0_115] : memref<128x512xbf16, #tpu.memory_space<vmem>>, vector<128x512xbf16>
    %cst_116 = arith.constant dense<0.000000e+00> : vector<16x512xf32>
    %326 = tpu.matmul %324, %325, %cst_116 {dimension_numbers = #tpu.dot_dimension_numbers<[1], [0], [0], [1], [0, 0, 1, 1], [], []>} : vector<16x128xbf16>, vector<128x512xbf16>, vector<16x512xf32> -> vector<16x512xf32>
    %327 = arith.extf %323 : vector<16x512xbf16> to vector<16x512xf32>
    %328 = arith.addf %327, %326 : vector<16x512xf32>
    %329 = vector.extract_strided_slice %328 {offsets = [0, 0], sizes = [16, 384], strides = [1, 1]} : vector<16x512xf32> to vector<16x384xf32>
    %330 = arith.negf %329 : vector<16x384xf32>
    %331 = math.exp %330 : vector<16x384xf32>
    %cst_117 = arith.constant 1.000000e+00 : f32
    %332 = vector.broadcast %cst_117 : f32 to vector<16x384xf32>
    %333 = arith.addf %332, %331 : vector<16x384xf32>
    %334 = arith.divf %332, %333 : vector<16x384xf32>
    %335 = vector.extract_strided_slice %334 {offsets = [0, 0], sizes = [16, 128], strides = [1, 1]} : vector<16x384xf32> to vector<16x128xf32>
    %336 = vector.extract_strided_slice %334 {offsets = [0, 128], sizes = [16, 128], strides = [1, 1]} : vector<16x384xf32> to vector<16x128xf32>
    %337 = vector.extract_strided_slice %334 {offsets = [0, 256], sizes = [16, 128], strides = [1, 1]} : vector<16x384xf32> to vector<16x128xf32>
    %338 = vector.extract_strided_slice %328 {offsets = [0, 384], sizes = [16, 128], strides = [1, 1]} : vector<16x512xf32> to vector<16x128xf32>
    %339 = math.tanh %338 : vector<16x128xf32>
    %340 = arith.mulf %336, %292 : vector<16x128xf32>
    %341 = arith.mulf %335, %339 : vector<16x128xf32>
    %342 = arith.addf %340, %341 : vector<16x128xf32>
    %343 = math.tanh %342 : vector<16x128xf32>
    %344 = arith.mulf %337, %343 : vector<16x128xf32>
    %345 = arith.truncf %344 : vector<16x128xf32> to vector<16x128xbf16>
    %c0_118 = arith.constant 0 : index
    %c0_119 = arith.constant 0 : index
    %346 = vector.load %arg5[%c0_118, %c0_119] : memref<128x512xbf16, #tpu.memory_space<vmem>>, vector<128x512xbf16>
    %cst_120 = arith.constant dense<0.000000e+00> : vector<16x512xf32>
    %347 = tpu.matmul %345, %346, %cst_120 {dimension_numbers = #tpu.dot_dimension_numbers<[1], [0], [0], [1], [0, 0, 1, 1], [], []>} : vector<16x128xbf16>, vector<128x512xbf16>, vector<16x512xf32> -> vector<16x512xf32>
    %348 = arith.truncf %320 : vector<16x128xf32> to vector<16x128xbf16>
    %c0_121 = arith.constant 0 : index
    %c0_122 = arith.constant 0 : index
    %349 = vector.load %arg6[%c0_121, %c0_122] : memref<128x512xbf16, #tpu.memory_space<vmem>>, vector<128x512xbf16>
    %cst_123 = arith.constant dense<0.000000e+00> : vector<16x512xf32>
    %350 = tpu.matmul %348, %349, %cst_123 {dimension_numbers = #tpu.dot_dimension_numbers<[1], [0], [0], [1], [0, 0, 1, 1], [], []>} : vector<16x128xbf16>, vector<128x512xbf16>, vector<16x512xf32> -> vector<16x512xf32>
    %351 = arith.addf %347, %350 : vector<16x512xf32>
    %c0_124 = arith.constant 0 : index
    %c0_125 = arith.constant 0 : index
    %352 = vector.load %arg7[%c0_124, %c0_125] : memref<1x512xf32, #tpu.memory_space<vmem>>, vector<1x512xf32>
    %353 = vector.broadcast %352 : vector<1x512xf32> to vector<16x512xf32>
    %354 = arith.addf %351, %353 : vector<16x512xf32>
    %355 = vector.extract_strided_slice %354 {offsets = [0, 0], sizes = [16, 384], strides = [1, 1]} : vector<16x512xf32> to vector<16x384xf32>
    %356 = arith.negf %355 : vector<16x384xf32>
    %357 = math.exp %356 : vector<16x384xf32>
    %cst_126 = arith.constant 1.000000e+00 : f32
    %358 = vector.broadcast %cst_126 : f32 to vector<16x384xf32>
    %359 = arith.addf %358, %357 : vector<16x384xf32>
    %360 = arith.divf %358, %359 : vector<16x384xf32>
    %361 = vector.extract_strided_slice %360 {offsets = [0, 0], sizes = [16, 128], strides = [1, 1]} : vector<16x384xf32> to vector<16x128xf32>
    %362 = vector.extract_strided_slice %360 {offsets = [0, 128], sizes = [16, 128], strides = [1, 1]} : vector<16x384xf32> to vector<16x128xf32>
    %363 = vector.extract_strided_slice %360 {offsets = [0, 256], sizes = [16, 128], strides = [1, 1]} : vector<16x384xf32> to vector<16x128xf32>
    %364 = vector.extract_strided_slice %354 {offsets = [0, 384], sizes = [16, 128], strides = [1, 1]} : vector<16x512xf32> to vector<16x128xf32>
    %365 = math.tanh %364 : vector<16x128xf32>
    %366 = arith.mulf %362, %318 : vector<16x128xf32>
    %367 = arith.mulf %361, %365 : vector<16x128xf32>
    %368 = arith.addf %366, %367 : vector<16x128xf32>
    %369 = math.tanh %368 : vector<16x128xf32>
    %370 = arith.mulf %363, %369 : vector<16x128xf32>
    %c7_i32 = arith.constant 7 : i32
    %371 = arith.index_cast %c7_i32 : i32 to index
    %c0_127 = arith.constant 0 : index
    %c0_128 = arith.constant 0 : index
    %372 = vector.load %arg11[%371, %c0_127, %c0_128] : memref<8x16x512xbf16, #tpu.memory_space<vmem>>, vector<1x16x512xbf16>
    %373 = vector.shape_cast %372 : vector<1x16x512xbf16> to vector<16x512xbf16>
    %374 = arith.truncf %344 : vector<16x128xf32> to vector<16x128xbf16>
    %c0_129 = arith.constant 0 : index
    %c0_130 = arith.constant 0 : index
    %375 = vector.load %arg3[%c0_129, %c0_130] : memref<128x512xbf16, #tpu.memory_space<vmem>>, vector<128x512xbf16>
    %cst_131 = arith.constant dense<0.000000e+00> : vector<16x512xf32>
    %376 = tpu.matmul %374, %375, %cst_131 {dimension_numbers = #tpu.dot_dimension_numbers<[1], [0], [0], [1], [0, 0, 1, 1], [], []>} : vector<16x128xbf16>, vector<128x512xbf16>, vector<16x512xf32> -> vector<16x512xf32>
    %377 = arith.extf %373 : vector<16x512xbf16> to vector<16x512xf32>
    %378 = arith.addf %377, %376 : vector<16x512xf32>
    %379 = vector.extract_strided_slice %378 {offsets = [0, 0], sizes = [16, 384], strides = [1, 1]} : vector<16x512xf32> to vector<16x384xf32>
    %380 = arith.negf %379 : vector<16x384xf32>
    %381 = math.exp %380 : vector<16x384xf32>
    %cst_132 = arith.constant 1.000000e+00 : f32
    %382 = vector.broadcast %cst_132 : f32 to vector<16x384xf32>
    %383 = arith.addf %382, %381 : vector<16x384xf32>
    %384 = arith.divf %382, %383 : vector<16x384xf32>
    %385 = vector.extract_strided_slice %384 {offsets = [0, 0], sizes = [16, 128], strides = [1, 1]} : vector<16x384xf32> to vector<16x128xf32>
    %386 = vector.extract_strided_slice %384 {offsets = [0, 128], sizes = [16, 128], strides = [1, 1]} : vector<16x384xf32> to vector<16x128xf32>
    %387 = vector.extract_strided_slice %384 {offsets = [0, 256], sizes = [16, 128], strides = [1, 1]} : vector<16x384xf32> to vector<16x128xf32>
    %388 = vector.extract_strided_slice %378 {offsets = [0, 384], sizes = [16, 128], strides = [1, 1]} : vector<16x512xf32> to vector<16x128xf32>
    %389 = math.tanh %388 : vector<16x128xf32>
    %390 = arith.mulf %386, %342 : vector<16x128xf32>
    %391 = arith.mulf %385, %389 : vector<16x128xf32>
    %392 = arith.addf %390, %391 : vector<16x128xf32>
    %393 = math.tanh %392 : vector<16x128xf32>
    %394 = arith.mulf %387, %393 : vector<16x128xf32>
    %395 = arith.truncf %394 : vector<16x128xf32> to vector<16x128xbf16>
    %c0_133 = arith.constant 0 : index
    %c0_134 = arith.constant 0 : index
    %396 = vector.load %arg5[%c0_133, %c0_134] : memref<128x512xbf16, #tpu.memory_space<vmem>>, vector<128x512xbf16>
    %cst_135 = arith.constant dense<0.000000e+00> : vector<16x512xf32>
    %397 = tpu.matmul %395, %396, %cst_135 {dimension_numbers = #tpu.dot_dimension_numbers<[1], [0], [0], [1], [0, 0, 1, 1], [], []>} : vector<16x128xbf16>, vector<128x512xbf16>, vector<16x512xf32> -> vector<16x512xf32>
    %398 = arith.truncf %370 : vector<16x128xf32> to vector<16x128xbf16>
    %c0_136 = arith.constant 0 : index
    %c0_137 = arith.constant 0 : index
    %399 = vector.load %arg6[%c0_136, %c0_137] : memref<128x512xbf16, #tpu.memory_space<vmem>>, vector<128x512xbf16>
    %cst_138 = arith.constant dense<0.000000e+00> : vector<16x512xf32>
    %400 = tpu.matmul %398, %399, %cst_138 {dimension_numbers = #tpu.dot_dimension_numbers<[1], [0], [0], [1], [0, 0, 1, 1], [], []>} : vector<16x128xbf16>, vector<128x512xbf16>, vector<16x512xf32> -> vector<16x512xf32>
    %401 = arith.addf %397, %400 : vector<16x512xf32>
    %c0_139 = arith.constant 0 : index
    %c0_140 = arith.constant 0 : index
    %402 = vector.load %arg7[%c0_139, %c0_140] : memref<1x512xf32, #tpu.memory_space<vmem>>, vector<1x512xf32>
    %403 = vector.broadcast %402 : vector<1x512xf32> to vector<16x512xf32>
    %404 = arith.addf %401, %403 : vector<16x512xf32>
    %405 = vector.extract_strided_slice %404 {offsets = [0, 0], sizes = [16, 384], strides = [1, 1]} : vector<16x512xf32> to vector<16x384xf32>
    %406 = arith.negf %405 : vector<16x384xf32>
    %407 = math.exp %406 : vector<16x384xf32>
    %cst_141 = arith.constant 1.000000e+00 : f32
    %408 = vector.broadcast %cst_141 : f32 to vector<16x384xf32>
    %409 = arith.addf %408, %407 : vector<16x384xf32>
    %410 = arith.divf %408, %409 : vector<16x384xf32>
    %411 = vector.extract_strided_slice %410 {offsets = [0, 0], sizes = [16, 128], strides = [1, 1]} : vector<16x384xf32> to vector<16x128xf32>
    %412 = vector.extract_strided_slice %410 {offsets = [0, 128], sizes = [16, 128], strides = [1, 1]} : vector<16x384xf32> to vector<16x128xf32>
    %413 = vector.extract_strided_slice %410 {offsets = [0, 256], sizes = [16, 128], strides = [1, 1]} : vector<16x384xf32> to vector<16x128xf32>
    %414 = vector.extract_strided_slice %404 {offsets = [0, 384], sizes = [16, 128], strides = [1, 1]} : vector<16x512xf32> to vector<16x128xf32>
    %415 = math.tanh %414 : vector<16x128xf32>
    %416 = arith.mulf %412, %368 : vector<16x128xf32>
    %417 = arith.mulf %411, %415 : vector<16x128xf32>
    %418 = arith.addf %416, %417 : vector<16x128xf32>
    %419 = math.tanh %418 : vector<16x128xf32>
    %420 = arith.mulf %413, %419 : vector<16x128xf32>
    %c8_i32 = arith.constant 8 : i32
    %c0_142 = arith.constant 0 : index
    %c0_143 = arith.constant 0 : index
    %c0_144 = arith.constant 0 : index
    %421 = vector.load %arg12[%c0_142, %c0_143, %c0_144] : memref<2x16x128xf32, #tpu.memory_space<vmem>>, vector<1x16x128xf32>
    %422 = vector.shape_cast %421 : vector<1x16x128xf32> to vector<16x128xf32>
    %423 = vector.shape_cast %394 : vector<16x128xf32> to vector<1x16x128xf32>
    tpu.vector_store %arg12[%c0_142, %c0_143, %c0_144], %423 {strides = array<i32>} : memref<2x16x128xf32, #tpu.memory_space<vmem>>, vector<1x16x128xf32>,
    %c0_145 = arith.constant 0 : index
    %c0_146 = arith.constant 0 : index
    %c0_147 = arith.constant 0 : index
    %424 = vector.load %arg13[%c0_145, %c0_146, %c0_147] : memref<2x16x128xf32, #tpu.memory_space<vmem>>, vector<1x16x128xf32>
    %425 = vector.shape_cast %424 : vector<1x16x128xf32> to vector<16x128xf32>
    %426 = vector.shape_cast %392 : vector<16x128xf32> to vector<1x16x128xf32>
    tpu.vector_store %arg13[%c0_145, %c0_146, %c0_147], %426 {strides = array<i32>} : memref<2x16x128xf32, #tpu.memory_space<vmem>>, vector<1x16x128xf32>,
    %c1_148 = arith.constant 1 : index
    %c0_149 = arith.constant 0 : index
    %c0_150 = arith.constant 0 : index
    %427 = vector.load %arg12[%c1_148, %c0_149, %c0_150] : memref<2x16x128xf32, #tpu.memory_space<vmem>>, vector<1x16x128xf32>
    %428 = vector.shape_cast %427 : vector<1x16x128xf32> to vector<16x128xf32>
    %429 = vector.shape_cast %420 : vector<16x128xf32> to vector<1x16x128xf32>
    tpu.vector_store %arg12[%c1_148, %c0_149, %c0_150], %429 {strides = array<i32>} : memref<2x16x128xf32, #tpu.memory_space<vmem>>, vector<1x16x128xf32>,
    %c1_151 = arith.constant 1 : index
    %c0_152 = arith.constant 0 : index
    %c0_153 = arith.constant 0 : index
    %430 = vector.load %arg13[%c1_151, %c0_152, %c0_153] : memref<2x16x128xf32, #tpu.memory_space<vmem>>, vector<1x16x128xf32>
    %431 = vector.shape_cast %430 : vector<1x16x128xf32> to vector<16x128xf32>
    %432 = vector.shape_cast %418 : vector<16x128xf32> to vector<1x16x128xf32>
    tpu.vector_store %arg13[%c1_151, %c0_152, %c0_153], %432 {strides = array<i32>} : memref<2x16x128xf32, #tpu.memory_space<vmem>>, vector<1x16x128xf32>,
    %c0_i32_154 = arith.constant 0 : i32
    %433 = arith.cmpi eq, %arg0, %c0_i32_154 : i32
    %434 = arith.extui %433 : i1 to i32
    %c0_i32_155 = arith.constant 0 : i32
    %435 = arith.cmpi ne, %434, %c0_i32_155 : i32
    scf.if %435 {
      %436 = arith.truncf %420 : vector<16x128xf32> to vector<16x128xbf16>
      %c0_156 = arith.constant 0 : index
      %c0_157 = arith.constant 0 : index
      %437 = vector.load %arg8[%c0_156, %c0_157] : memref<128x128xbf16, #tpu.memory_space<vmem>>, vector<128x128xbf16>
      %cst_158 = arith.constant dense<0.000000e+00> : vector<16x128xf32>
      %438 = tpu.matmul %436, %437, %cst_158 {dimension_numbers = #tpu.dot_dimension_numbers<[1], [0], [0], [1], [0, 0, 1, 1], [], []>} : vector<16x128xbf16>, vector<128x128xbf16>, vector<16x128xf32> -> vector<16x128xf32>
      %c0_159 = arith.constant 0 : index
      %c0_160 = arith.constant 0 : index
      %439 = vector.load %arg9[%c0_159, %c0_160] : memref<1x128xf32, #tpu.memory_space<vmem>>, vector<1x128xf32>
      %440 = vector.broadcast %439 : vector<1x128xf32> to vector<16x128xf32>
      %441 = arith.addf %438, %440 : vector<16x128xf32>
      %c0_161 = arith.constant 0 : index
      %c0_162 = arith.constant 0 : index
      %442 = vector.load %arg10[%c0_161, %c0_162] : memref<16x128xf32, #tpu.memory_space<vmem>>, vector<16x128xf32>
      tpu.vector_store %arg10[%c0_161, %c0_162], %441 {strides = array<i32>} : memref<16x128xf32, #tpu.memory_space<vmem>>, vector<16x128xf32>,
    } else {
    }
    return
  }
  func.func @transform_0(%arg0: i32) -> (i32, i32, i32) {
    %c0_i32 = arith.constant 0 : i32
    %c0_i32_0 = arith.constant 0 : i32
    %c0_i32_1 = arith.constant 0 : i32
    return %arg0, %c0_i32, %c0_i32_0 : i32, i32, i32
  }
  func.func @transform_1(%arg0: i32) -> (i32, i32) {
    %c0_i32 = arith.constant 0 : i32
    %c0_i32_0 = arith.constant 0 : i32
    %c0_i32_1 = arith.constant 0 : i32
    return %c0_i32, %c0_i32_0 : i32, i32
  }
  func.func @transform_2(%arg0: i32) -> (i32, i32) {
    %c0_i32 = arith.constant 0 : i32
    %c0_i32_0 = arith.constant 0 : i32
    %c0_i32_1 = arith.constant 0 : i32
    return %c0_i32, %c0_i32_0 : i32, i32
  }
  func.func @transform_3(%arg0: i32) -> (i32, i32) {
    %c0_i32 = arith.constant 0 : i32
    %c0_i32_0 = arith.constant 0 : i32
    %c0_i32_1 = arith.constant 0 : i32
    return %c0_i32, %c0_i32_0 : i32, i32
  }
  func.func @transform_4(%arg0: i32) -> (i32, i32) {
    %c0_i32 = arith.constant 0 : i32
    %c0_i32_0 = arith.constant 0 : i32
    %c0_i32_1 = arith.constant 0 : i32
    return %c0_i32, %c0_i32_0 : i32, i32
  }
  func.func @transform_5(%arg0: i32) -> (i32, i32) {
    %c0_i32 = arith.constant 0 : i32
    %c0_i32_0 = arith.constant 0 : i32
    %c0_i32_1 = arith.constant 0 : i32
    return %c0_i32, %c0_i32_0 : i32, i32
  }
  func.func @transform_6(%arg0: i32) -> (i32, i32) {
    %c0_i32 = arith.constant 0 : i32
    %c0_i32_0 = arith.constant 0 : i32
    %c0_i32_1 = arith.constant 0 : i32
    return %c0_i32, %c0_i32_0 : i32, i32
  }
  func.func @transform_7(%arg0: i32) -> (i32, i32) {
    %c0_i32 = arith.constant 0 : i32
    %c0_i32_0 = arith.constant 0 : i32
    %c0_i32_1 = arith.constant 0 : i32
    return %c0_i32, %c0_i32_0 : i32, i32
  }
  func.func @transform_8(%arg0: i32) -> (i32, i32) {
    %c0_i32 = arith.constant 0 : i32
    %c0_i32_0 = arith.constant 0 : i32
    %c0_i32_1 = arith.constant 0 : i32
    return %c0_i32, %c0_i32_0 : i32, i32
  }
  func.func @transform_9(%arg0: i32) -> (i32, i32) {
    %c0_i32 = arith.constant 0 : i32
    %c0_i32_0 = arith.constant 0 : i32
    %c0_i32_1 = arith.constant 0 : i32
    return %c0_i32, %c0_i32_0 : i32, i32
  }
}

</mosaic_0001>

<bundles_post_ra>
// kernel: tpu_custom_call.1
= control target key start
LH: loop header
LB: loop body
LE: loop exit
PB: predicated region body
PF: predicated region fallthrough
CT: control target
= control target key end

     0   :  { %14 = vsyncpa [#allocation6], 0  ;;  %s9764_s0 = inlined_call_operand.hbm [shape: bf16[8,16,128], index: 0, kind: input, shape index: {}]   ;;  %s9765_s1 = inlined_call_operand.hbm [shape: bf16[128,512], index: 1, kind: input, shape index: {}]   ;;  %s9766_s2 = inlined_call_operand.hbm [shape: bf16[128,512], index: 2, kind: input, shape index: {}]   ;;  %s9767_s3 = inlined_call_operand.hbm [shape: f32[1,512], index: 3, kind: input, shape index: {}]   ;;  %s9768_s4 = inlined_call_operand.hbm [shape: bf16[128,512], index: 4, kind: input, shape index: {}]   ;;  %s9769_s5 = inlined_call_operand.hbm [shape: bf16[128,512], index: 5, kind: input, shape index: {}]   ;;  %s9770_s6 = inlined_call_operand.vmem [shape: f32[1,512], index: 6, kind: input, shape index: {}]   ;;  %s9771_s7 = inlined_call_operand.hbm [shape: bf16[128,128], index: 7, kind: input, shape index: {}]   ;;  %s9772_s8 = inlined_call_operand.vmem [shape: f32[1,128], index: 8, kind: input, shape index: {}]   ;;  %s9773_s9 = inlined_call_operand.hbm [shape: f32[16,128], index: 9, kind: output, shape index: {}]  }
   0x1   :  { %15 = vsyncpa [#allocation9], 0 }
   0x2   :  { %16 = vsyncpa [#allocation12], 0 }
   0x3   :  { %17 = vsyncpa [#allocation15], 0  ;;  %s36_s11 = sshll.u32 %s9765_s1, 4  ;;  %s37_s11 = int_to_ptr.hbm [resolvable:$true] %s36_s11 }
   0x4   :  { %18 = vsyncpa [#allocation7], 0  ;;  %s6546_s12 = smov [#allocation8]   ;;  %s63_s16 = sshll.u32 %s9767_s3, 4  ;;  %s64_s16 = int_to_ptr.hbm [resolvable:$true] %s63_s16 }
   0x5   :  { %s38_s13 = sshll.u32 %s6546_s12, 4  ;;  %s6547_s17 = smov 256   ;;  %s39_s13 = int_to_ptr.vmem [resolvable:$true] %s38_s13 }
   0x6   :  { %s6548_s18 = smov 16   ;;  %s6549_s19 = smov [#allocation11]  }
   0x7   :  { %44 = dma.hbm_to_vmem [thread:$0]  %s37_s11, 4096, %s39_s13, [#allocation9], %s6547_s17, %s6547_s17, %s6548_s18  }
   0x8   :  { %s65_s20 = sshll.u32 %s6549_s19, 4  ;;  %s86_s22 = sshll.u32 %s9769_s5, 4  ;;  %s66_s20 = int_to_ptr.vmem [resolvable:$true] %s65_s20  ;;  %s87_s22 = int_to_ptr.hbm [resolvable:$true] %s86_s22 }
   0x9   :  { %68 = dma.hbm_to_vmem [thread:$0]  %s64_s16, 64, %s66_s20, [#allocation12]  }
   0xa   :  { %s23_s3 = sshll.u32 %s9764_s0, 4  ;;  %s6550_s25 = smov [#allocation14]   ;;  %s24_s3 = int_to_ptr.hbm [resolvable:$true] %s23_s3 }
   0xb   :  { %s88_s26 = sshll.u32 %s6550_s25, 4  ;;  %s6551_s27 = smov [#allocation5]   ;;  %s89_s26 = int_to_ptr.vmem [resolvable:$true] %s88_s26 }
   0xc   :  { %94 = dma.hbm_to_vmem [thread:$0]  %s87_s22, 4096, %s89_s26, [#allocation15], %s6547_s17, %s6547_s17, %s6548_s18  }
   0xd   :  { %s25_s28 = sshll.u32 %s6551_s27, 4  ;;  %s6552_s29 = smov 64   ;;  %s26_s28 = int_to_ptr.vmem [resolvable:$true] %s25_s28 }
   0xe   :  { %s6553_s5 = smov 4   ;;  %s49_s11 = sshll.u32 %s9766_s2, 4  ;;  %s50_s11 = int_to_ptr.hbm [resolvable:$true] %s49_s11 }
   0xf   :  { %31 = dma.hbm_to_vmem [thread:$0]  %s24_s3, 1024, %s26_s28, [#allocation6], %s6552_s29, %s6552_s29, %s6553_s5  }
  0x10   :  { %s6554_s0 = smov [#allocation10]   ;;  %s73_s15 = sshll.u32 %s9768_s4, 4  ;;  %s74_s15 = int_to_ptr.hbm [resolvable:$true] %s73_s15 }
  0x11   :  { %s51_s12 = sshll.u32 %s6554_s0, 4  ;;  %s6555_s16 = smov [#allocation13]   ;;  %s52_s12 = int_to_ptr.vmem [resolvable:$true] %s51_s12 }
  0x12   :  { %57 = dma.hbm_to_vmem [thread:$0]  %s50_s11, 4096, %s52_s12, [#allocation9], %s6547_s17, %s6547_s17, %s6548_s18  }
  0x13   :  { %s75_s19 = sshll.u32 %s6555_s16, 4  ;;  %s101_s1 = sshll.u32 %s9771_s7, 4  ;;  %s76_s19 = int_to_ptr.vmem [resolvable:$true] %s75_s19  ;;  %s102_s1 = int_to_ptr.hbm [resolvable:$true] %s101_s1 }
  0x14   :  { %81 = dma.hbm_to_vmem [thread:$0]  %s74_s15, 4096, %s76_s19, [#allocation12], %s6547_s17, %s6547_s17, %s6548_s18  }
  0x15   :  { %s6556_s2 = smov [#allocation16]  }
  0x16   :  { %s103_s22 = sshll.u32 %s6556_s2, 4  ;;  %s104_s22 = int_to_ptr.vmem [resolvable:$true] %s103_s22 }
  0x17   :  { %109 = dma.hbm_to_vmem [thread:$0]  %s102_s1, 1024, %s104_s22, [#allocation15], %s6552_s29, %s6552_s29, %s6553_s5  }
  0x18   :  { %6536 = dma.done.wait [#allocation6], 1024  }
  0x19   :  { %6537 = vsyncadd [#allocation6], 4294966272 }
  0x1a   :  { %6538 = dma.done.wait [#allocation9], 8192  }
  0x1b   :  { %6539 = vsyncadd [#allocation9], 4294959104 }
  0x1c   :  { %6540 = dma.done.wait [#allocation12], 4160  }
  0x1d   :  { %6541 = vsyncadd [#allocation12], 4294963136 }
  0x1e   :  { %6542 = dma.done.wait [#allocation15], 5120  }
  0x1f   :  { %6543 = vsyncadd [#allocation15], 4294962176  ;;  %v5146_v0 = vld [vmem:[#allocation8 + $0xe0] sm:$0xf]  ;;  %v5710_v1 = vld [vmem:[#allocation8 + $0xec] sm:$0xf0] }
  0x20   :  { %v5708_v2 = vld [vmem:[#allocation8 + $0xe4] sm:$0xf]  ;;  %v5147_v3 = vor.u32 %v5710_v1, %v5146_v0  ;;  %v5148_v4 = vld [vmem:[#allocation8 + $0xf0] sm:$0xf0]  ;;  %v5154_v5 = vld [vmem:[#allocation8 + $0xe8] sm:$0xf] }
  0x21   :  { %v5711_v6 = vld [vmem:[#allocation8 + $0xf4] sm:$0xf0]  ;;  %v5151_v7 = vor.u32 %v5708_v2, %v5148_v4  ;;  %v5709_v9 = vld [vmem:[#allocation8 + $0xec] sm:$0xf]  ;;  %v5156_v10 = vld [vmem:[#allocation8 + $0xf8] sm:$0xf0] }
  0x22   :  { %v5155_v8 = vor.u32 %v5711_v6, %v5154_v5  ;;  %v5130_v11 = vld [vmem:[#allocation8 + $0xc0] sm:$0xf]  ;;  %418 = vmatpush.bf16.msra.mxu0 %v5147_v3  ;;  %v5159_v12 = vor.u32 %v5709_v9, %v5156_v10  ;;  %v5706_v13 = vld [vmem:[#allocation8 + $0xcc] sm:$0xf0]  ;;  %v5704_v14 = vld [vmem:[#allocation8 + $0xc4] sm:$0xf] }
  0x23   :  { %v5132_v15 = vld [vmem:[#allocation8 + $0xd0] sm:$0xf0]  ;;  %467 = vmatpush.bf16.msra.mxu1 %v5151_v7  ;;  %v5131_v16 = vor.u32 %v5706_v13, %v5130_v11  ;;  %v5138_v18 = vld [vmem:[#allocation8 + $0xc8] sm:$0xf]  ;;  %v5707_v19 = vld [vmem:[#allocation8 + $0xd4] sm:$0xf0] }
  0x24   :  { %516 = vmatpush.bf16.msra.mxu2 %v5155_v8  ;;  %v5135_v17 = vor.u32 %v5704_v14, %v5132_v15  ;;  %v5705_v20 = vld [vmem:[#allocation8 + $0xcc] sm:$0xf]  ;;  %565 = vmatpush.bf16.msra.mxu3 %v5159_v12  ;;  %v5139_v21 = vor.u32 %v5707_v19, %v5138_v18  ;;  %v5140_v22 = vld [vmem:[#allocation8 + $0xd8] sm:$0xf0]  ;;  %v5114_v23 = vld [vmem:[#allocation8 + $0xa0] sm:$0xf] }
  0x25   :  { %v5702_v24 = vld [vmem:[#allocation8 + $0xac] sm:$0xf0]  ;;  %v5143_v25 = vor.u32 %v5705_v20, %v5140_v22  ;;  %v5700_v26 = vld [vmem:[#allocation8 + $0xa4] sm:$0xf]  ;;  %v5116_v27 = vld [vmem:[#allocation8 + $0xb0] sm:$0xf0] }
  0x26   :  { %v5122_v28 = vld [vmem:[#allocation8 + $0xa8] sm:$0xf]  ;;  %419 = vmatpush.bf16.msra.mxu0 %v5131_v16  ;;  %v5115_v29 = vor.u32 %v5702_v24, %v5114_v23  ;;  %v5703_v30 = vld [vmem:[#allocation8 + $0xb4] sm:$0xf0]  ;;  %v5701_v31 = vld [vmem:[#allocation8 + $0xac] sm:$0xf]  ;;  %v5119_v33 = vor.u32 %v5700_v26, %v5116_v27 }
  0x27   :  { %v5124_v32 = vld [vmem:[#allocation8 + $0xb8] sm:$0xf0]  ;;  %468 = vmatpush.bf16.msra.mxu1 %v5135_v17  ;;  %v5123_v34 = vor.u32 %v5703_v30, %v5122_v28  ;;  %v5098_v35 = vld [vmem:[#allocation8 + $0x80] sm:$0xf]  ;;  %v5698_v36 = vld [vmem:[#allocation8 + $0x8c] sm:$0xf0] }
  0x28   :  { %517 = vmatpush.bf16.msra.mxu2 %v5139_v21  ;;  %v5696_v37 = vld [vmem:[#allocation8 + $0x84] sm:$0xf]  ;;  %566 = vmatpush.bf16.msra.mxu3 %v5143_v25  ;;  %v5127_v38 = vor.u32 %v5701_v31, %v5124_v32  ;;  %v5100_v39 = vld [vmem:[#allocation8 + $0x90] sm:$0xf0]  ;;  %v5106_v40 = vld [vmem:[#allocation8 + $0x88] sm:$0xf]  ;;  %v5099_v44 = vor.u32 %v5698_v36, %v5098_v35 }
  0x29   :  { %v5699_v41 = vld [vmem:[#allocation8 + $0x94] sm:$0xf0]  ;;  %v5697_v42 = vld [vmem:[#allocation8 + $0x8c] sm:$0xf]  ;;  %v5108_v43 = vld [vmem:[#allocation8 + $0x98] sm:$0xf0]  ;;  %v5103_v45 = vor.u32 %v5696_v37, %v5100_v39 }
  0x2a   :  { %420 = vmatpush.bf16.msra.mxu0 %v5115_v29  ;;  %v5107_v46 = vor.u32 %v5699_v41, %v5106_v40  ;;  %v5082_v47 = vld [vmem:[#allocation8 + $0x60] sm:$0xf]  ;;  %v5694_v48 = vld [vmem:[#allocation8 + $0x6c] sm:$0xf0]  ;;  %v5692_v49 = vld [vmem:[#allocation8 + $0x64] sm:$0xf]  ;;  %v5111_v50 = vor.u32 %v5697_v42, %v5108_v43 }
  0x2b   :  { %469 = vmatpush.bf16.msra.mxu1 %v5119_v33  ;;  %v5084_v51 = vld [vmem:[#allocation8 + $0x70] sm:$0xf0]  ;;  %v5090_v52 = vld [vmem:[#allocation8 + $0x68] sm:$0xf]  ;;  %v5695_v53 = vld [vmem:[#allocation8 + $0x74] sm:$0xf0]  ;;  %v5083_v56 = vor.u32 %v5694_v48, %v5082_v47 }
  0x2c   :  { %518 = vmatpush.bf16.msra.mxu2 %v5123_v34  ;;  %567 = vmatpush.bf16.msra.mxu3 %v5127_v38  ;;  %v5693_v54 = vld [vmem:[#allocation8 + $0x6c] sm:$0xf]  ;;  %v5092_v55 = vld [vmem:[#allocation8 + $0x78] sm:$0xf0]  ;;  %v5087_v57 = vor.u32 %v5692_v49, %v5084_v51  ;;  %v5091_v58 = vor.u32 %v5695_v53, %v5090_v52  ;;  %v5066_v59 = vld [vmem:[#allocation8 + $0x40] sm:$0xf] }
  0x2d   :  { %v5690_v60 = vld [vmem:[#allocation8 + $0x4c] sm:$0xf0]  ;;  %v5688_v61 = vld [vmem:[#allocation8 + $0x44] sm:$0xf]  ;;  %v5095_v62 = vor.u32 %v5693_v54, %v5092_v55  ;;  %v5068_v63 = vld [vmem:[#allocation8 + $0x50] sm:$0xf0] }
  0x2e   :  { %421 = vmatpush.bf16.msra.mxu0 %v5099_v44  ;;  %v5074_v0 = vld [vmem:[#allocation8 + $0x48] sm:$0xf]  ;;  %v5691_v1 = vld [vmem:[#allocation8 + $0x54] sm:$0xf0]  ;;  %v5689_v2 = vld [vmem:[#allocation8 + $0x4c] sm:$0xf]  ;;  %v5067_v4 = vor.u32 %v5690_v60, %v5066_v59  ;;  %v5071_v5 = vor.u32 %v5688_v61, %v5068_v63 }
  0x2f   :  { %470 = vmatpush.bf16.msra.mxu1 %v5103_v45  ;;  %v5076_v3 = vld [vmem:[#allocation8 + $0x58] sm:$0xf0]  ;;  %v5075_v6 = vor.u32 %v5691_v1, %v5074_v0  ;;  %v5050_v7 = vld [vmem:[#allocation8 + $0x20] sm:$0xf]  ;;  %v5686_v8 = vld [vmem:[#allocation8 + $0x2c] sm:$0xf0] }
  0x30   :  { %519 = vmatpush.bf16.msra.mxu2 %v5107_v46  ;;  %568 = vmatpush.bf16.msra.mxu3 %v5111_v50  ;;  %v5684_v9 = vld [vmem:[#allocation8 + $0x24] sm:$0xf]  ;;  %v5079_v10 = vor.u32 %v5689_v2, %v5076_v3  ;;  %v5052_v11 = vld [vmem:[#allocation8 + $0x30] sm:$0xf0]  ;;  %v5058_v12 = vld [vmem:[#allocation8 + $0x28] sm:$0xf]  ;;  %v5051_v16 = vor.u32 %v5686_v8, %v5050_v7 }
  0x31   :  { %v5687_v13 = vld [vmem:[#allocation8 + $0x34] sm:$0xf0]  ;;  %v5685_v14 = vld [vmem:[#allocation8 + $0x2c] sm:$0xf]  ;;  %v5060_v15 = vld [vmem:[#allocation8 + $0x38] sm:$0xf0]  ;;  %v5055_v18 = vor.u32 %v5684_v9, %v5052_v11 }
  0x32   :  { %422 = vmatpush.bf16.msra.mxu0 %v5083_v56  ;;  %v5034_v17 = vld [vmem:[#allocation8] sm:$0xf]  ;;  %v5059_v19 = vor.u32 %v5687_v13, %v5058_v12  ;;  %v5682_v20 = vld [vmem:[#allocation8 + $0xc] sm:$0xf0]  ;;  %v5680_v21 = vld [vmem:[#allocation8 + $0x4] sm:$0xf]  ;;  %v5063_v23 = vor.u32 %v5685_v14, %v5060_v15 }
  0x33   :  { %471 = vmatpush.bf16.msra.mxu1 %v5087_v57  ;;  %v5036_v22 = vld [vmem:[#allocation8 + $0x10] sm:$0xf0]  ;;  %v5042_v24 = vld [vmem:[#allocation8 + $0x8] sm:$0xf]  ;;  %v5683_v25 = vld [vmem:[#allocation8 + $0x14] sm:$0xf0]  ;;  %v5035_v30 = vor.u32 %v5682_v20, %v5034_v17 }
  0x34   :  { %520 = vmatpush.bf16.msra.mxu2 %v5091_v58  ;;  %569 = vmatpush.bf16.msra.mxu3 %v5095_v62  ;;  %v5681_v26 = vld [vmem:[#allocation8 + $0xc] sm:$0xf]  ;;  %v5044_v27 = vld [vmem:[#allocation8 + $0x18] sm:$0xf0]  ;;  %v5274_v28 = vld [vmem:[#allocation10 + $0xe0] sm:$0xf]  ;;  %v5039_v33 = vor.u32 %v5680_v21, %v5036_v22  ;;  %v5043_v34 = vor.u32 %v5683_v25, %v5042_v24 }
  0x35   :  { %v5742_v29 = vld [vmem:[#allocation10 + $0xec] sm:$0xf0]  ;;  %v5740_v31 = vld [vmem:[#allocation10 + $0xe4] sm:$0xf]  ;;  %v5276_v32 = vld [vmem:[#allocation10 + $0xf0] sm:$0xf0]  ;;  %v5047_v36 = vor.u32 %v5681_v26, %v5044_v27 }
  0x36   :  { %423 = vmatpush.bf16.msra.mxu0 %v5067_v4  ;;  %v5672_v35 = vld [vmem:[#allocation5] sm:$0xff]  ;;  %v6644_v37 = vor.u32 %v5742_v29, %v5274_v28  ;;  %v5282_v38 = vld [vmem:[#allocation10 + $0xe8] sm:$0xf]  ;;  %v5743_v39 = vld [vmem:[#allocation10 + $0xf4] sm:$0xf0]  ;;  %v6646_v41 = vor.u32 %v5740_v31, %v5276_v32  ;;  %s6558_s18 = smov [#allocation17]  }
  0x37   :  { %472 = vmatpush.bf16.msra.mxu1 %v5071_v5  ;;  %v5741_v40 = vld [vmem:[#allocation10 + $0xec] sm:$0xf]  ;;  %v5284_v42 = vld [vmem:[#allocation10 + $0xf8] sm:$0xf0]  ;;  %v5258_v43 = vld [vmem:[#allocation10 + $0xc0] sm:$0xf]  ;;  %v6648_v47 = vor.u32 %v5743_v39, %v5282_v38 }
  0x38   :  { %521 = vmatpush.bf16.msra.mxu2 %v5075_v6  ;;  %570 = vmatpush.bf16.msra.mxu3 %v5079_v10  ;;  %v5738_v44 = vld [vmem:[#allocation10 + $0xcc] sm:$0xf0]  ;;  %v5736_v45 = vld [vmem:[#allocation10 + $0xc4] sm:$0xf]  ;;  %v5260_v46 = vld [vmem:[#allocation10 + $0xd0] sm:$0xf0]  ;;  %v6651_v48 = vor.u32 %v5741_v40, %v5284_v42 }
  0x39   :  { %v6653_v49 = vor.u32 %v5738_v44, %v5258_v43  ;;  %v5266_v50 = vld [vmem:[#allocation10 + $0xc8] sm:$0xf]  ;;  %v5739_v51 = vld [vmem:[#allocation10 + $0xd4] sm:$0xf0]  ;;  %v6656_v52 = vor.u32 %v5736_v45, %v5260_v46  ;;  %v5737_v53 = vld [vmem:[#allocation10 + $0xcc] sm:$0xf] }
  0x3a   :  { %424 = vmatpush.bf16.msra.mxu0 %v5051_v16  ;;  %v5268_v54 = vld [vmem:[#allocation10 + $0xd8] sm:$0xf0]  ;;  %v6659_v55 = vor.u32 %v5739_v51, %v5266_v50  ;;  %v5242_v56 = vld [vmem:[#allocation10 + $0xa0] sm:$0xf]  ;;  %v5734_v57 = vld [vmem:[#allocation10 + $0xac] sm:$0xf0] }
  0x3b   :  { %473 = vmatpush.bf16.msra.mxu1 %v5055_v18  ;;  %9979 = vst [vmem:[#allocation23_spill] sm:$0xff] %v6653_v49  ;;  %v5732_v58 = vld [vmem:[#allocation10 + $0xa4] sm:$0xf]  ;;  %v6663_v59 = vor.u32 %v5737_v53, %v5268_v54  ;;  %v6665_v60 = vor.u32 %v5734_v57, %v5242_v56  ;;  %v5244_v61 = vld [vmem:[#allocation10 + $0xb0] sm:$0xf0]  ;;  %v5673_v5 = vld [vmem:[#allocation5 + $0x8] sm:$0xff] }
  0x3c   :  { %522 = vmatpush.bf16.msra.mxu2 %v5059_v19  ;;  %571 = vmatpush.bf16.msra.mxu3 %v5063_v23  ;;  %9980 = vst [vmem:[#allocation24_spill] sm:$0xff] %v6656_v52  ;;  %v5250_v62 = vld [vmem:[#allocation10 + $0xa8] sm:$0xf]  ;;  %v5735_v63 = vld [vmem:[#allocation10 + $0xb4] sm:$0xf0]  ;;  %v6668_v0 = vor.u32 %v5732_v58, %v5244_v61  ;;  %v5674_v18 = vld [vmem:[#allocation5 + $0x10] sm:$0xff] }
  0x3d   :  { %9981 = vst [vmem:[#allocation25_spill] sm:$0xff] %v6659_v55  ;;  %v5733_v1 = vld [vmem:[#allocation10 + $0xac] sm:$0xf]  ;;  %v5252_v2 = vld [vmem:[#allocation10 + $0xb8] sm:$0xf0]  ;;  %v6671_v3 = vor.u32 %v5735_v63, %v5250_v62  ;;  %v5676_v46 = vld [vmem:[#allocation5 + $0x20] sm:$0xff] }
  0x3e   :  { %425 = vmatpush.bf16.msra.mxu0 %v5035_v30  ;;  %v6675_v4 = vor.u32 %v5733_v1, %v5252_v2  ;;  %v5226_v6 = vld [vmem:[#allocation10 + $0x80] sm:$0xf]  ;;  %v5730_v7 = vld [vmem:[#allocation10 + $0x8c] sm:$0xf0]  ;;  %v5728_v8 = vld [vmem:[#allocation10 + $0x84] sm:$0xf] }
  0x3f   :  { %474 = vmatpush.bf16.msra.mxu1 %v5039_v33  ;;  %v6680_v9 = vor.u32 %v5730_v7, %v5226_v6  ;;  %v5228_v10 = vld [vmem:[#allocation10 + $0x90] sm:$0xf0]  ;;  %v5234_v11 = vld [vmem:[#allocation10 + $0x88] sm:$0xf]  ;;  %v5731_v12 = vld [vmem:[#allocation10 + $0x94] sm:$0xf0] }
  0x40   :  { %523 = vmatpush.bf16.msra.mxu2 %v5043_v34  ;;  %572 = vmatpush.bf16.msra.mxu3 %v5047_v36  ;;  %v6682_v13 = vor.u32 %v5728_v8, %v5228_v10  ;;  %v6684_v14 = vor.u32 %v5731_v12, %v5234_v11  ;;  %v5729_v15 = vld [vmem:[#allocation10 + $0x8c] sm:$0xf]  ;;  %v5236_v16 = vld [vmem:[#allocation10 + $0x98] sm:$0xf0]  ;;  %v5210_v19 = vld [vmem:[#allocation10 + $0x60] sm:$0xf] }
  0x41   :  { %426 = vmatmul.bf16.vlgmr.msra.gmra.mxu0 %v5672_v35  ;;  %v6687_v17 = vor.u32 %v5729_v15, %v5236_v16  ;;  %v5726_v20 = vld [vmem:[#allocation10 + $0x6c] sm:$0xf0]  ;;  %v5724_v21 = vld [vmem:[#allocation10 + $0x64] sm:$0xf]  ;;  %v5212_v23 = vld [vmem:[#allocation10 + $0x70] sm:$0xf0] }
  0x42   :  { %885 = vmatpush.bf16.msrb.mxu0 %v6644_v37  ;;  %475 = vmatmul.bf16.vlgmr.msra.gmra.mxu1 %v5672_v35  ;;  %v6692_v22 = vor.u32 %v5726_v20, %v5210_v19  ;;  %v5218_v24 = vld [vmem:[#allocation10 + $0x68] sm:$0xf]  ;;  %v5727_v25 = vld [vmem:[#allocation10 + $0x74] sm:$0xf0]  ;;  %v6694_v26 = vor.u32 %v5724_v21, %v5212_v23  ;;  %v5725_v28 = vld [vmem:[#allocation10 + $0x6c] sm:$0xf] }
  0x43   :  { %899 = vmatpush.bf16.msrb.mxu1 %v6646_v41  ;;  %524 = vmatmul.bf16.vlgmr.msra.gmra.mxu2 %v5672_v35  ;;  %v6696_v27 = vor.u32 %v5727_v25, %v5218_v24  ;;  %v5220_v29 = vld [vmem:[#allocation10 + $0x78] sm:$0xf0]  ;;  %v5194_v32 = vld [vmem:[#allocation10 + $0x40] sm:$0xf]  ;;  %v5722_v33 = vld [vmem:[#allocation10 + $0x4c] sm:$0xf0] }
  0x44   :  { %573 = vmatmul.bf16.vlgmr.msra.gmra.mxu3 %v5672_v35  ;;  %913 = vmatpush.bf16.msrb.mxu2 %v6648_v47  ;;  %v6699_v30 = vor.u32 %v5725_v28, %v5220_v29  ;;  %v5675_v31 = vld [vmem:[#allocation5 + $0x18] sm:$0xff]  ;;  %v5720_v34 = vld [vmem:[#allocation10 + $0x44] sm:$0xf]  ;;  %v6704_v35 = vor.u32 %v5722_v33, %v5194_v32  ;;  %v5196_v36 = vld [vmem:[#allocation10 + $0x50] sm:$0xf0]  ;;  %s4982_s23 = sshll.u32 %s6558_s18, 4  ;;  %s4983_s23 = int_to_ptr.vmem [resolvable:$true] %s4982_s23 }
  0x45   :  { %927 = vmatpush.bf16.msrb.mxu3 %v6651_v48  ;;  %v5202_v38 = vld [vmem:[#allocation10 + $0x48] sm:$0xf]  ;;  %v5723_v39 = vld [vmem:[#allocation10 + $0x54] sm:$0xf0]  ;;  %v6706_v40 = vor.u32 %v5720_v34, %v5196_v36  ;;  %v5721_v43 = vld [vmem:[#allocation10 + $0x4c] sm:$0xf] }
  0x46   :  { %886 = vmatpush.bf16.msrb.mxu0 %v6653_v49  ;;  %v6708_v42 = vor.u32 %v5723_v39, %v5202_v38  ;;  %v5204_v44 = vld [vmem:[#allocation10 + $0x58] sm:$0xf0]  ;;  %v5178_v50 = vld [vmem:[#allocation10 + $0x20] sm:$0xf]  ;;  %v5718_v51 = vld [vmem:[#allocation10 + $0x2c] sm:$0xf0] }
  0x47   :  { %900 = vmatpush.bf16.msrb.mxu1 %v6656_v52  ;;  %v6711_v45 = vor.u32 %v5721_v43, %v5204_v44  ;;  %v5716_v53 = vld [vmem:[#allocation10 + $0x24] sm:$0xf]  ;;  %v6716_v54 = vor.u32 %v5718_v51, %v5178_v50  ;;  %v5180_v56 = vld [vmem:[#allocation10 + $0x30] sm:$0xf0]  ;;  %v5186_v57 = vld [vmem:[#allocation10 + $0x28] sm:$0xf] }
  0x48   :  { %914 = vmatpush.bf16.msrb.mxu2 %v6659_v55  ;;  %v5719_v58 = vld [vmem:[#allocation10 + $0x34] sm:$0xf0]  ;;  %v6718_v61 = vor.u32 %v5716_v53, %v5180_v56  ;;  %v5717_v63 = vld [vmem:[#allocation10 + $0x2c] sm:$0xf]  ;;  %v5188_v1 = vld [vmem:[#allocation10 + $0x38] sm:$0xf0] }
  0x49   :  { %928 = vmatpush.bf16.msrb.mxu3 %v6663_v59  ;;  %9982 = vst [vmem:[#allocation26_spill] sm:$0xff] %v6711_v45  ;;  %v6720_v62 = vor.u32 %v5719_v58, %v5186_v57  ;;  %v6723_v2 = vor.u32 %v5717_v63, %v5188_v1  ;;  %v5162_v6 = vld [vmem:[#allocation10] sm:$0xf]  ;;  %v5714_v7 = vld [vmem:[#allocation10 + $0xc] sm:$0xf0]  ;;  %v5679_v24 = vld [vmem:[#allocation5 + $0x38] sm:$0xff] }
  0x4a   :  { %887 = vmatpush.bf16.msrb.mxu0 %v6665_v60  ;;  %9983 = vst [vmem:[#allocation27_spill] sm:$0xff] %v6716_v54  ;;  %v5712_v8 = vld [vmem:[#allocation10 + $0x4] sm:$0xf]  ;;  %v6728_v10 = vor.u32 %v5714_v7, %v5162_v6  ;;  %v5164_v11 = vld [vmem:[#allocation10 + $0x10] sm:$0xf0]  ;;  %v9774_v36 = vmov 0.0|0.0  }
  0x4b   :  { %901 = vmatpush.bf16.msrb.mxu1 %v6668_v0  ;;  %9984 = vst [vmem:[#allocation28_spill] sm:$0xff] %v6718_v61  ;;  %v5170_v12 = vld [vmem:[#allocation10 + $0x8] sm:$0xf]  ;;  %v5715_v15 = vld [vmem:[#allocation10 + $0x14] sm:$0xf0]  ;;  %v6730_v16 = vor.u32 %v5712_v8, %v5164_v11  ;;  %v5678_v19 = vld [vmem:[#allocation5 + $0x30] sm:$0xff] }
  0x4c   :  { %915 = vmatpush.bf16.msrb.mxu2 %v6671_v3  ;;  %9985 = vst [vmem:[#allocation29_spill] sm:$0xff] %v6720_v62  ;;  %v5713_v20 = vld [vmem:[#allocation10 + $0xc] sm:$0xf]  ;;  %v5172_v21 = vld [vmem:[#allocation10 + $0x18] sm:$0xf0]  ;;  %s4984_s25 = sshll.u32 %s9773_s9, 4  ;;  %s4985_s25 = int_to_ptr.hbm [resolvable:$true] %s4984_s25 }
  0x4d   :  { %929 = vmatpush.bf16.msrb.mxu3 %v6675_v4  ;;  %9986 = vst [vmem:[#allocation30_spill] sm:$0xff] %v6723_v2  ;;  %v6737_v23 = vor.u32 %v5713_v20, %v5172_v21  ;;  %v200_v25 = vld [vmem:[#allocation11] sm:$0xf]  ;;  %s6559_s26 = smov 128   ;;  %s6560_s27 = smov 8  }
  0x4e   :  { %888 = vmatpush.bf16.msrb.mxu0 %v6680_v9  ;;  %9987 = vst [vmem:[#allocation31_spill] sm:$0xff] %v6728_v10  ;;  %v6740_v28 = vperm.slane %v200_v25, 0  ;;  %v6742_v29 = vperm.slane %v200_v25, 1  ;;  %v6751_v39 = vperm.slane %v200_v25, 2  ;;  %v6754_v43 = vperm.slane %v200_v25, 3 }
  0x4f   :  { %902 = vmatpush.bf16.msrb.mxu1 %v6682_v13  ;;  %9988 = vst [vmem:[#allocation32_spill] sm:$0xff] %v6730_v16 }
  0x50   :  { %916 = vmatpush.bf16.msrb.mxu2 %v6684_v14  ;;  %9990 = vst [vmem:[#allocation34_spill] sm:$0xff] %v6737_v23 }
  0x51   :  { %431 = vmatmul.bf16.gmra.mxu0 %v5673_v5  ;;  %930 = vmatpush.bf16.msrb.mxu3 %v6687_v17  ;;  %9991 = vst [vmem:[#allocation35_spill] sm:$0xff] %v6740_v28 }
  0x52   :  { %480 = vmatmul.bf16.gmra.mxu1 %v5673_v5  ;;  %889 = vmatpush.bf16.msrb.mxu0 %v6692_v22  ;;  %9992 = vst [vmem:[#allocation36_spill] sm:$0xff] %v6742_v29 }
  0x53   :  { %529 = vmatmul.bf16.gmra.mxu2 %v5673_v5  ;;  %903 = vmatpush.bf16.msrb.mxu1 %v6694_v26  ;;  %9993 = vst [vmem:[#allocation37_spill] sm:$0xff] %v6751_v39 }
  0x54   :  { %578 = vmatmul.bf16.gmra.mxu3 %v5673_v5  ;;  %917 = vmatpush.bf16.msrb.mxu2 %v6696_v27  ;;  %v5677_v5 = vld [vmem:[#allocation5 + $0x28] sm:$0xff]  ;;  %9994 = vst [vmem:[#allocation38_spill] sm:$0xff] %v6754_v43 }
  0x55   :  { %931 = vmatpush.bf16.msrb.mxu3 %v6699_v30 }
  0x56   :  { %890 = vmatpush.bf16.msrb.mxu0 %v6704_v35 }
  0x57   :  { %904 = vmatpush.bf16.msrb.mxu1 %v6706_v40 }
  0x58   :  { %918 = vmatpush.bf16.msrb.mxu2 %v6708_v42 }
  0x59   :  { %932 = vmatpush.bf16.msrb.mxu3 %v6711_v45 }
  0x5a   :  { %891 = vmatpush.bf16.msrb.mxu0 %v6716_v54 }
  0x5b   :  { %905 = vmatpush.bf16.msrb.mxu1 %v6718_v61 }
  0x5c   :  { %919 = vmatpush.bf16.msrb.mxu2 %v6720_v62 }
  0x5d   :  { %933 = vmatpush.bf16.msrb.mxu3 %v6723_v2 }
  0x5e   :  { %892 = vmatpush.bf16.msrb.mxu0 %v6728_v10 }
  0x5f   :  { %906 = vmatpush.bf16.msrb.mxu1 %v6730_v16 }
  0x61   :  { %436 = vmatmul.bf16.gmra.mxu0 %v5674_v18  ;;  %934 = vmatpush.bf16.msrb.mxu3 %v6737_v23 }
  0x62   :  { %485 = vmatmul.bf16.gmra.mxu1 %v5674_v18 }
  0x63   :  { %534 = vmatmul.bf16.gmra.mxu2 %v5674_v18 }
  0x64   :  { %583 = vmatmul.bf16.gmra.mxu3 %v5674_v18  ;;  %v6732_v18 = vor.u32 %v5715_v15, %v5170_v12 }
  0x66   :  { %9989 = vst [vmem:[#allocation33_spill] sm:$0xff] %v6732_v18  ;;  %920 = vmatpush.bf16.msrb.mxu2 %v6732_v18 }
  0x71   :  { %441 = vmatmul.bf16.gmra.mxu0 %v5675_v31 }
  0x72   :  { %490 = vmatmul.bf16.gmra.mxu1 %v5675_v31 }
  0x73   :  { %539 = vmatmul.bf16.gmra.mxu2 %v5675_v31 }
  0x74   :  { %588 = vmatmul.bf16.gmra.mxu3 %v5675_v31 }
  0x81   :  { %446 = vmatmul.bf16.gmra.mxu0 %v5676_v46 }
  0x82   :  { %495 = vmatmul.bf16.gmra.mxu1 %v5676_v46 }
  0x83   :  { %544 = vmatmul.bf16.gmra.mxu2 %v5676_v46 }
  0x84   :  { %593 = vmatmul.bf16.gmra.mxu3 %v5676_v46 }
  0x91   :  { %451 = vmatmul.bf16.gmra.mxu0 %v5677_v5 }
  0x92   :  { %500 = vmatmul.bf16.gmra.mxu1 %v5677_v5 }
  0x93   :  { %549 = vmatmul.bf16.gmra.mxu2 %v5677_v5 }
  0x94   :  { %598 = vmatmul.bf16.gmra.mxu3 %v5677_v5 }
  0xa1   :  { %456 = vmatmul.bf16.gmra.mxu0 %v5678_v19 }
  0xa2   :  { %505 = vmatmul.bf16.gmra.mxu1 %v5678_v19 }
  0xa3   :  { %554 = vmatmul.bf16.gmra.mxu2 %v5678_v19 }
  0xa4   :  { %603 = vmatmul.bf16.gmra.mxu3 %v5678_v19 }
  0xb1   :  { %461 = vmatmul.bf16.gmra.mxu0 %v5679_v24 }
  0xb2   :  { %510 = vmatmul.bf16.gmra.mxu1 %v5679_v24 }
  0xb3   :  { %559 = vmatmul.bf16.gmra.mxu2 %v5679_v24 }
  0xb4   :  { %608 = vmatmul.bf16.gmra.mxu3 %v5679_v24 }
  0xbe   :  { %v427_v31 = vpop.f32.mrf.mxu0 }
  0xbf   :  { %v428_v32 = vadd.f32 %v427_v31, %v6740_v28  ;;  %v476_v33 = vpop.f32.mrf.mxu1 }
  0xc0   :  { %v477_v34 = vadd.f32 %v476_v33, %v6742_v29 }
  0xc1   :  { %893 = vmatmul.bf16.vlgmr.msrb.gmra.mxu0 %v9774_v36 }
  0xc2   :  { %v6747_v38 = vpack.c.bf16 %v477_v34, %v428_v32  ;;  %907 = vmatmul.bf16.vlgmr.msrb.gmra.mxu1 %v9774_v36 }
  0xc3   :  { %921 = vmatmul.bf16.vlgmr.msrb.gmra.mxu2 %v9774_v36 }
  0xc4   :  { %935 = vmatmul.bf16.vlgmr.msrb.gmra.mxu3 %v9774_v36 }
  0xc6   :  { %v525_v44 = vpop.f32.mrf.mxu2  ;;  %v6757_v51 = vpop.f32.mrf.mxu0 }
  0xc7   :  { %v526_v46 = vadd.f32 %v525_v44, %v6751_v39  ;;  %v574_v50 = vpop.f32.mrf.mxu3  ;;  %v6760_v56 = vpop.f32.mrf.mxu1 }
  0xc8   :  { %v575_v53 = vadd.f32 %v574_v50, %v6754_v43 }
  0xca   :  { %v6762_v57 = vpack.c.bf16 %v575_v53, %v526_v46 }
  0xce   :  { %v6764_v58 = vpop.f32.mrf.mxu2  ;;  %v432_v1 = vpop.f32.mrf.mxu0 }
  0xcf   :  { %v6766_v63 = vpop.f32.mrf.mxu3  ;;  %v433_v5 = vadd.f32 %v432_v1, %v6740_v28  ;;  %v481_v6 = vpop.f32.mrf.mxu1 }
  0xd0   :  { %v482_v7 = vadd.f32 %v481_v6, %v6742_v29 }
  0xd2   :  { %v6770_v8 = vpack.c.bf16 %v482_v7, %v433_v5 }
  0xd4   :  { %9995 = vst [vmem:[#allocation39_spill] sm:$0xff] %v6770_v8  ;;  %v5402_v8 = vld [vmem:[#allocation14 + $0xd8] sm:$0xf0] }
  0xd6   :  { %v530_v11 = vpop.f32.mrf.mxu2  ;;  %v6773_v19 = vpop.f32.mrf.mxu0 }
  0xd7   :  { %v531_v12 = vadd.f32 %v530_v11, %v6751_v39  ;;  %v579_v15 = vpop.f32.mrf.mxu3  ;;  %9996 = vst [vmem:[#allocation40_spill] sm:$0xff] %v6773_v19  ;;  %v6776_v21 = vpop.f32.mrf.mxu1 }
  0xd8   :  { %v580_v20 = vadd.f32 %v579_v15, %v6754_v43  ;;  %9997 = vst [vmem:[#allocation41_spill] sm:$0xff] %v6776_v21  ;;  %v5796_v21 = vld [vmem:[#allocation14 + $0xa4] sm:$0xf] }
  0xda   :  { %v6778_v24 = vpack.c.bf16 %v580_v20, %v531_v12 }
  0xdc   :  { %9998 = vst [vmem:[#allocation42_spill] sm:$0xff] %v6778_v24 }
  0xde   :  { %v6780_v25 = vpop.f32.mrf.mxu2  ;;  %v437_v32 = vpop.f32.mrf.mxu0 }
  0xdf   :  { %9999 = vst [vmem:[#allocation43_spill] sm:$0xff] %v6780_v25  ;;  %v6782_v31 = vpop.f32.mrf.mxu3  ;;  %v438_v33 = vadd.f32 %v437_v32, %v6740_v28  ;;  %v486_v34 = vpop.f32.mrf.mxu1 }
  0xe0   :  { %10000 = vst [vmem:[#allocation44_spill] sm:$0xff] %v6782_v31  ;;  %v487_v44 = vadd.f32 %v486_v34, %v6742_v29  ;;  %v5801_v31 = vld [vmem:[#allocation14 + $0xcc] sm:$0xf] }
  0xe1   :  { %v6853_v25 = vor.u32 %v5801_v31, %v5402_v8  ;;  %v5797_v31 = vld [vmem:[#allocation14 + $0xac] sm:$0xf] }
  0xe2   :  { %v6786_v46 = vpack.c.bf16 %v487_v44, %v438_v33 }
  0xe3   :  { %10026 = vst [vmem:[#allocation70_spill] sm:$0xff] %v6853_v25 }
  0xe4   :  { %10001 = vst [vmem:[#allocation45_spill] sm:$0xff] %v6786_v46 }
  0xe6   :  { %v535_v50 = vpop.f32.mrf.mxu2  ;;  %v6789_v5 = vpop.f32.mrf.mxu0 }
  0xe7   :  { %v536_v53 = vadd.f32 %v535_v50, %v6751_v39  ;;  %v584_v1 = vpop.f32.mrf.mxu3  ;;  %10002 = vst [vmem:[#allocation46_spill] sm:$0xff] %v6789_v5  ;;  %v6792_v7 = vpop.f32.mrf.mxu1  ;;  %v5805_v5 = vld [vmem:[#allocation14 + $0xec] sm:$0xf] }
  0xe8   :  { %v585_v6 = vadd.f32 %v584_v1, %v6754_v43  ;;  %10003 = vst [vmem:[#allocation47_spill] sm:$0xff] %v6792_v7 }
  0xea   :  { %v6794_v11 = vpack.c.bf16 %v585_v6, %v536_v53 }
  0xec   :  { %10004 = vst [vmem:[#allocation48_spill] sm:$0xff] %v6794_v11 }
  0xee   :  { %v6796_v12 = vpop.f32.mrf.mxu2  ;;  %v442_v20 = vpop.f32.mrf.mxu0 }
  0xef   :  { %10005 = vst [vmem:[#allocation49_spill] sm:$0xff] %v6796_v12  ;;  %v6798_v15 = vpop.f32.mrf.mxu3  ;;  %v443_v32 = vadd.f32 %v442_v20, %v6740_v28  ;;  %v491_v33 = vpop.f32.mrf.mxu1 }
  0xf0   :  { %10006 = vst [vmem:[#allocation50_spill] sm:$0xff] %v6798_v15  ;;  %v492_v34 = vadd.f32 %v491_v33, %v6742_v29 }
  0xf2   :  { %v6802_v44 = vpack.c.bf16 %v492_v34, %v443_v32 }
  0xf4   :  { %10007 = vst [vmem:[#allocation51_spill] sm:$0xff] %v6802_v44 }
  0xf6   :  { %v540_v50 = vpop.f32.mrf.mxu2  ;;  %v6805_v46 = vpop.f32.mrf.mxu0 }
  0xf7   :  { %v541_v36 = vadd.f32 %v540_v50, %v6751_v39  ;;  %v589_v1 = vpop.f32.mrf.mxu3  ;;  %10008 = vst [vmem:[#allocation52_spill] sm:$0xff] %v6805_v46  ;;  %v6808_v6 = vpop.f32.mrf.mxu1 }
  0xf8   :  { %v590_v53 = vadd.f32 %v589_v1, %v6754_v43  ;;  %10009 = vst [vmem:[#allocation53_spill] sm:$0xff] %v6808_v6 }
  0xfa   :  { %v6810_v11 = vpack.c.bf16 %v590_v53, %v541_v36 }
  0xfc   :  { %10010 = vst [vmem:[#allocation54_spill] sm:$0xff] %v6810_v11 }
  0xfe   :  { %v6812_v15 = vpop.f32.mrf.mxu2  ;;  %v447_v12 = vpop.f32.mrf.mxu0 }
  0xff   :  { %10011 = vst [vmem:[#allocation55_spill] sm:$0xff] %v6812_v15  ;;  %v6814_v20 = vpop.f32.mrf.mxu3  ;;  %v448_v32 = vadd.f32 %v447_v12, %v6740_v28  ;;  %v496_v33 = vpop.f32.mrf.mxu1  ;;  %v5806_v15 = vld [vmem:[#allocation14 + $0xec] sm:$0xf0]  ;;  %v5804_v12 = vld [vmem:[#allocation14 + $0xe4] sm:$0xf] }
 0x100   :  { %10012 = vst [vmem:[#allocation56_spill] sm:$0xff] %v6814_v20  ;;  %v497_v34 = vadd.f32 %v496_v33, %v6742_v29  ;;  %v5408_v20 = vld [vmem:[#allocation14 + $0xe0] sm:$0xf]  ;;  %v5410_v33 = vld [vmem:[#allocation14 + $0xf0] sm:$0xf0] }
 0x101   :  { %v6828_v6 = vor.u32 %v5806_v15, %v5408_v20  ;;  %v5392_v15 = vld [vmem:[#allocation14 + $0xc0] sm:$0xf]  ;;  %v5802_v20 = vld [vmem:[#allocation14 + $0xcc] sm:$0xf0] }
 0x102   :  { %v6818_v50 = vpack.c.bf16 %v497_v34, %v448_v32  ;;  %v5416_v32 = vld [vmem:[#allocation14 + $0xe8] sm:$0xf]  ;;  %v5807_v34 = vld [vmem:[#allocation14 + $0xf4] sm:$0xf0] }
 0x103   :  { %10017 = vst [vmem:[#allocation61_spill] sm:$0xff] %v6828_v6  ;;  %1309 = vmatpush.bf16.msra.mxu0 %v6828_v6 }
 0x104   :  { %10013 = vst [vmem:[#allocation57_spill] sm:$0xff] %v6818_v50  ;;  %v6830_v50 = vor.u32 %v5804_v12, %v5410_v33  ;;  %v5800_v12 = vld [vmem:[#allocation14 + $0xc4] sm:$0xf] }
 0x106   :  { %v545_v44 = vpop.f32.mrf.mxu2  ;;  %v6821_v7 = vpop.f32.mrf.mxu0  ;;  %10018 = vst [vmem:[#allocation62_spill] sm:$0xff] %v6830_v50  ;;  %1323 = vmatpush.bf16.msra.mxu1 %v6830_v50 }
 0x107   :  { %v546_v46 = vadd.f32 %v545_v44, %v6751_v39  ;;  %v594_v1 = vpop.f32.mrf.mxu3  ;;  %10014 = vst [vmem:[#allocation58_spill] sm:$0xff] %v6821_v7  ;;  %v6824_v53 = vpop.f32.mrf.mxu1  ;;  %v6832_v44 = vor.u32 %v5807_v34, %v5416_v32  ;;  %v5418_v7 = vld [vmem:[#allocation14 + $0xf8] sm:$0xf0]  ;;  %v6845_v34 = vor.u32 %v5802_v20, %v5392_v15  ;;  %v5376_v15 = vld [vmem:[#allocation14 + $0xa0] sm:$0xf] }
 0x108   :  { %v595_v36 = vadd.f32 %v594_v1, %v6754_v43  ;;  %10015 = vst [vmem:[#allocation59_spill] sm:$0xff] %v6824_v53  ;;  %v5798_v20 = vld [vmem:[#allocation14 + $0xac] sm:$0xf0] }
 0x109   :  { %10019 = vst [vmem:[#allocation63_spill] sm:$0xff] %v6832_v44  ;;  %1337 = vmatpush.bf16.msra.mxu2 %v6832_v44  ;;  %1310 = vmatpush.bf16.msra.mxu0 %v6845_v34 }
 0x10a   :  { %v6826_v11 = vpack.c.bf16 %v595_v36, %v546_v46  ;;  %v6837_v46 = vor.u32 %v5805_v5, %v5418_v7  ;;  %10023 = vst [vmem:[#allocation67_spill] sm:$0xff] %v6845_v34  ;;  %v5400_v5 = vld [vmem:[#allocation14 + $0xc8] sm:$0xf]  ;;  %v5803_v7 = vld [vmem:[#allocation14 + $0xd4] sm:$0xf0] }
 0x10b   :  { %v6850_v53 = vor.u32 %v5803_v7, %v5400_v5  ;;  %v5799_v5 = vld [vmem:[#allocation14 + $0xb4] sm:$0xf0]  ;;  %v5772_v34 = vld [vmem:[#allocation13 + $0xe4] sm:$0xf] }
 0x10c   :  { %10016 = vst [vmem:[#allocation60_spill] sm:$0xff] %v6826_v11  ;;  %1351 = vmatpush.bf16.msra.mxu3 %v6837_v46  ;;  %v5394_v11 = vld [vmem:[#allocation14 + $0xd0] sm:$0xf0] }
 0x10d   :  { %10021 = vst [vmem:[#allocation65_spill] sm:$0xff] %v6837_v46  ;;  %1338 = vmatpush.bf16.msra.mxu2 %v6850_v53 }
 0x10e   :  { %v6834_v24 = vpop.f32.mrf.mxu2  ;;  %v452_v36 = vpop.f32.mrf.mxu0  ;;  %10025 = vst [vmem:[#allocation69_spill] sm:$0xff] %v6850_v53 }
 0x10f   :  { %10020 = vst [vmem:[#allocation64_spill] sm:$0xff] %v6834_v24  ;;  %v6839_v1 = vpop.f32.mrf.mxu3  ;;  %v453_v33 = vadd.f32 %v452_v36, %v6740_v28  ;;  %v501_v32 = vpop.f32.mrf.mxu1  ;;  %v6848_v24 = vor.u32 %v5800_v12, %v5394_v11  ;;  %v6860_v11 = vor.u32 %v5798_v20, %v5376_v15  ;;  %v5378_v12 = vld [vmem:[#allocation14 + $0xb0] sm:$0xf0]  ;;  %v5794_v15 = vld [vmem:[#allocation14 + $0x8c] sm:$0xf0] }
 0x110   :  { %10022 = vst [vmem:[#allocation66_spill] sm:$0xff] %v6839_v1  ;;  %v502_v1 = vadd.f32 %v501_v32, %v6742_v29  ;;  %1352 = vmatpush.bf16.msra.mxu3 %v6853_v25  ;;  %v5384_v32 = vld [vmem:[#allocation14 + $0xa8] sm:$0xf]  ;;  %v6862_v7 = vor.u32 %v5796_v21, %v5378_v12  ;;  %v5360_v21 = vld [vmem:[#allocation14 + $0x80] sm:$0xf] }
 0x111   :  { %10024 = vst [vmem:[#allocation68_spill] sm:$0xff] %v6848_v24  ;;  %1324 = vmatpush.bf16.msra.mxu1 %v6848_v24  ;;  %v6864_v8 = vor.u32 %v5799_v5, %v5384_v32  ;;  %1311 = vmatpush.bf16.msra.mxu0 %v6860_v11  ;;  %v5792_v20 = vld [vmem:[#allocation14 + $0x84] sm:$0xf]  ;;  %v6878_v5 = vor.u32 %v5794_v15, %v5360_v21  ;;  %v5344_v21 = vld [vmem:[#allocation14 + $0x60] sm:$0xf] }
 0x112   :  { %v6855_v36 = vpack.c.bf16 %v502_v1, %v453_v33  ;;  %10028 = vst [vmem:[#allocation72_spill] sm:$0xff] %v6860_v11  ;;  %v5386_v1 = vld [vmem:[#allocation14 + $0xb8] sm:$0xf0]  ;;  %v5790_v15 = vld [vmem:[#allocation14 + $0x6c] sm:$0xf0] }
 0x113   :  { %10029 = vst [vmem:[#allocation73_spill] sm:$0xff] %v6862_v7  ;;  %1339 = vmatpush.bf16.msra.mxu2 %v6864_v8 }
 0x114   :  { %10027 = vst [vmem:[#allocation71_spill] sm:$0xff] %v6855_v36  ;;  %v6867_v36 = vor.u32 %v5797_v31, %v5386_v1  ;;  %v5362_v31 = vld [vmem:[#allocation14 + $0x90] sm:$0xf0]  ;;  %v5368_v1 = vld [vmem:[#allocation14 + $0x88] sm:$0xf] }
 0x115   :  { %10030 = vst [vmem:[#allocation74_spill] sm:$0xff] %v6864_v8  ;;  %1325 = vmatpush.bf16.msra.mxu1 %v6862_v7  ;;  %v6880_v11 = vor.u32 %v5792_v20, %v5362_v31  ;;  %v5793_v7 = vld [vmem:[#allocation14 + $0x8c] sm:$0xf]  ;;  %v5370_v8 = vld [vmem:[#allocation14 + $0x98] sm:$0xf0]  ;;  %1312 = vmatpush.bf16.msra.mxu0 %v6878_v5  ;;  %v6892_v20 = vor.u32 %v5790_v15, %v5344_v21 }
 0x116   :  { %v550_v33 = vpop.f32.mrf.mxu2  ;;  %10031 = vst [vmem:[#allocation75_spill] sm:$0xff] %v6867_v36  ;;  %v6870_v25 = vpop.f32.mrf.mxu0  ;;  %1353 = vmatpush.bf16.msra.mxu3 %v6867_v36  ;;  %v5346_v31 = vld [vmem:[#allocation14 + $0x70] sm:$0xf0]  ;;  %v5328_v21 = vld [vmem:[#allocation14 + $0x40] sm:$0xf] }
 0x117   :  { %v551_v19 = vadd.f32 %v550_v33, %v6751_v39  ;;  %v599_v53 = vpop.f32.mrf.mxu3  ;;  %10032 = vst [vmem:[#allocation76_spill] sm:$0xff] %v6870_v25  ;;  %v6875_v32 = vpop.f32.mrf.mxu1  ;;  %v5795_v33 = vld [vmem:[#allocation14 + $0x94] sm:$0xf0]  ;;  %v5784_v15 = vld [vmem:[#allocation14 + $0x44] sm:$0xf] }
 0x118   :  { %v600_v12 = vadd.f32 %v599_v53, %v6754_v43  ;;  %10033 = vst [vmem:[#allocation77_spill] sm:$0xff] %v6875_v32  ;;  %v6882_v25 = vor.u32 %v5795_v33, %v5368_v1  ;;  %v6887_v53 = vor.u32 %v5793_v7, %v5370_v8  ;;  %v5788_v32 = vld [vmem:[#allocation14 + $0x64] sm:$0xf]  ;;  %v5352_v1 = vld [vmem:[#allocation14 + $0x68] sm:$0xf] }
 0x119   :  { %10034 = vst [vmem:[#allocation78_spill] sm:$0xff] %v6878_v5  ;;  %1326 = vmatpush.bf16.msra.mxu1 %v6880_v11  ;;  %v5791_v33 = vld [vmem:[#allocation14 + $0x74] sm:$0xf0]  ;;  %v5789_v7 = vld [vmem:[#allocation14 + $0x6c] sm:$0xf]  ;;  %1313 = vmatpush.bf16.msra.mxu0 %v6892_v20 }
 0x11a   :  { %10035 = vst [vmem:[#allocation79_spill] sm:$0xff] %v6880_v11  ;;  %v6884_v24 = vpack.c.bf16 %v600_v12, %v551_v19  ;;  %1340 = vmatpush.bf16.msra.mxu2 %v6882_v25  ;;  %1354 = vmatpush.bf16.msra.mxu3 %v6887_v53  ;;  %v6894_v19 = vor.u32 %v5788_v32, %v5346_v31  ;;  %v5354_v8 = vld [vmem:[#allocation14 + $0x78] sm:$0xf0]  ;;  %v5786_v32 = vld [vmem:[#allocation14 + $0x4c] sm:$0xf0] }
 0x11b   :  { %10036 = vst [vmem:[#allocation80_spill] sm:$0xff] %v6882_v25  ;;  %v6896_v12 = vor.u32 %v5791_v33, %v5352_v1  ;;  %v6901_v25 = vor.u32 %v5789_v7, %v5354_v8  ;;  %v6909_v33 = vor.u32 %v5786_v32, %v5328_v21  ;;  %v5336_v7 = vld [vmem:[#allocation14 + $0x48] sm:$0xf]  ;;  %v5787_v8 = vld [vmem:[#allocation14 + $0x54] sm:$0xf0] }
 0x11c   :  { %10037 = vst [vmem:[#allocation81_spill] sm:$0xff] %v6884_v24  ;;  %v5338_v5 = vld [vmem:[#allocation14 + $0x58] sm:$0xf0]  ;;  %v5312_v21 = vld [vmem:[#allocation14 + $0x20] sm:$0xf] }
 0x11d   :  { %10038 = vst [vmem:[#allocation82_spill] sm:$0xff] %v6887_v53  ;;  %1327 = vmatpush.bf16.msra.mxu1 %v6894_v19  ;;  %1314 = vmatpush.bf16.msra.mxu0 %v6909_v33  ;;  %v5782_v32 = vld [vmem:[#allocation14 + $0x2c] sm:$0xf0] }
 0x11e   :  { %10039 = vst [vmem:[#allocation83_spill] sm:$0xff] %v6892_v20  ;;  %v6898_v24 = vpop.f32.mrf.mxu2  ;;  %v457_v53 = vpop.f32.mrf.mxu0  ;;  %1341 = vmatpush.bf16.msra.mxu2 %v6896_v12  ;;  %1355 = vmatpush.bf16.msra.mxu3 %v6901_v25 }
 0x11f   :  { %10040 = vst [vmem:[#allocation84_spill] sm:$0xff] %v6894_v19  ;;  %v6903_v11 = vpop.f32.mrf.mxu3  ;;  %v458_v31 = vadd.f32 %v457_v53, %v6740_v28  ;;  %v506_v1 = vpop.f32.mrf.mxu1  ;;  %v6914_v19 = vor.u32 %v5787_v8, %v5336_v7  ;;  %v5783_v7 = vld [vmem:[#allocation14 + $0x34] sm:$0xf0] }
 0x120   :  { %10041 = vst [vmem:[#allocation85_spill] sm:$0xff] %v6896_v12  ;;  %v5785_v12 = vld [vmem:[#allocation14 + $0x4c] sm:$0xf] }
 0x121   :  { %10042 = vst [vmem:[#allocation86_spill] sm:$0xff] %v6898_v24  ;;  %v5330_v24 = vld [vmem:[#allocation14 + $0x50] sm:$0xf0]  ;;  %v6917_v36 = vor.u32 %v5785_v12, %v5338_v5  ;;  %v5322_v12 = vld [vmem:[#allocation14 + $0x38] sm:$0xf0] }
 0x122   :  { %10043 = vst [vmem:[#allocation87_spill] sm:$0xff] %v6901_v25  ;;  %v6912_v20 = vor.u32 %v5784_v15, %v5330_v24  ;;  %1342 = vmatpush.bf16.msra.mxu2 %v6914_v19  ;;  %v5780_v25 = vld [vmem:[#allocation14 + $0x24] sm:$0xf]  ;;  %v6924_v24 = vor.u32 %v5782_v32, %v5312_v21  ;;  %v5314_v15 = vld [vmem:[#allocation14 + $0x30] sm:$0xf0] }
 0x123   :  { %10044 = vst [vmem:[#allocation88_spill] sm:$0xff] %v6903_v11  ;;  %v507_v11 = vadd.f32 %v506_v1, %v6742_v29  ;;  %1356 = vmatpush.bf16.msra.mxu3 %v6917_v36  ;;  %v5320_v1 = vld [vmem:[#allocation14 + $0x28] sm:$0xf]  ;;  %v6926_v8 = vor.u32 %v5780_v25, %v5314_v15  ;;  %v5296_v32 = vld [vmem:[#allocation14] sm:$0xf] }
 0x124   :  { %10045 = vst [vmem:[#allocation89_spill] sm:$0xff] %v6909_v33  ;;  %1328 = vmatpush.bf16.msra.mxu1 %v6912_v20  ;;  %v6928_v5 = vor.u32 %v5783_v7, %v5320_v1  ;;  %1315 = vmatpush.bf16.msra.mxu0 %v6924_v24  ;;  %v5778_v15 = vld [vmem:[#allocation14 + $0xc] sm:$0xf0]  ;;  %v5776_v1 = vld [vmem:[#allocation14 + $0x4] sm:$0xf] }
 0x125   :  { %10046 = vst [vmem:[#allocation90_spill] sm:$0xff] %v6912_v20  ;;  %v6919_v53 = vpack.c.bf16 %v507_v11, %v458_v31  ;;  %v5781_v11 = vld [vmem:[#allocation14 + $0x2c] sm:$0xf]  ;;  %v6942_v7 = vor.u32 %v5778_v15, %v5296_v32  ;;  %v5536_v33 = vld [vmem:[#allocation13 + $0xe0] sm:$0xf] }
 0x126   :  { %10047 = vst [vmem:[#allocation91_spill] sm:$0xff] %v6914_v19  ;;  %v555_v31 = vpop.f32.mrf.mxu2  ;;  %1343 = vmatpush.bf16.msra.mxu2 %v6928_v5  ;;  %v5538_v32 = vld [vmem:[#allocation13 + $0xf0] sm:$0xf0]  ;;  %v5544_v15 = vld [vmem:[#allocation13 + $0xe8] sm:$0xf] }
 0x127   :  { %10048 = vst [vmem:[#allocation92_spill] sm:$0xff] %v6917_v36  ;;  %v556_v19 = vadd.f32 %v555_v31, %v6751_v39  ;;  %v604_v20 = vpop.f32.mrf.mxu3  ;;  %v6934_v36 = vpop.f32.mrf.mxu0  ;;  %v5779_v31 = vld [vmem:[#allocation14 + $0x14] sm:$0xf0] }
 0x128   :  { %10049 = vst [vmem:[#allocation93_spill] sm:$0xff] %v6919_v53  ;;  %v6931_v53 = vor.u32 %v5781_v11, %v5322_v12  ;;  %1329 = vmatpush.bf16.msra.mxu1 %v6926_v8  ;;  %v605_v25 = vadd.f32 %v604_v20, %v6754_v43  ;;  %v6939_v21 = vpop.f32.mrf.mxu1  ;;  %v5298_v11 = vld [vmem:[#allocation14 + $0x10] sm:$0xf0]  ;;  %v5304_v12 = vld [vmem:[#allocation14 + $0x8] sm:$0xf]  ;;  %1316 = vmatpush.bf16.msra.mxu0 %v6942_v7 }
 0x129   :  { %10050 = vst [vmem:[#allocation94_spill] sm:$0xff] %v6924_v24  ;;  %v5306_v20 = vld [vmem:[#allocation14 + $0x18] sm:$0xf0] }
 0x12a   :  { %10051 = vst [vmem:[#allocation95_spill] sm:$0xff] %v6926_v8  ;;  %1357 = vmatpush.bf16.msra.mxu3 %v6931_v53  ;;  %v6944_v24 = vpack.c.bf16 %v605_v25, %v556_v19  ;;  %v6948_v8 = vor.u32 %v5779_v31, %v5304_v12  ;;  %v6957_v25 = vor.u32 %v5772_v34, %v5538_v32 }
 0x12b   :  { %10052 = vst [vmem:[#allocation96_spill] sm:$0xff] %v6928_v5  ;;  %v5777_v5 = vld [vmem:[#allocation14 + $0xc] sm:$0xf] }
 0x12c   :  { %10053 = vst [vmem:[#allocation97_spill] sm:$0xff] %v6931_v53  ;;  %v5774_v53 = vld [vmem:[#allocation13 + $0xec] sm:$0xf0]  ;;  %1344 = vmatpush.bf16.msra.mxu2 %v6948_v8 }
 0x12d   :  { %10054 = vst [vmem:[#allocation98_spill] sm:$0xff] %v6934_v36  ;;  %v6946_v36 = vor.u32 %v5776_v1, %v5298_v11  ;;  %v6955_v19 = vor.u32 %v5774_v53, %v5536_v33  ;;  %v5775_v1 = vld [vmem:[#allocation13 + $0xf4] sm:$0xf0]  ;;  %v5773_v11 = vld [vmem:[#allocation13 + $0xec] sm:$0xf]  ;;  %v10067_v53 = vmov 0.0|0.0  }
 0x12e   :  { %10055 = vst [vmem:[#allocation99_spill] sm:$0xff] %v6939_v21  ;;  %v6951_v21 = vor.u32 %v5777_v5, %v5306_v20  ;;  %v6960_v12 = vor.u32 %v5775_v1, %v5544_v15  ;;  %v5546_v5 = vld [vmem:[#allocation13 + $0xf8] sm:$0xf0]  ;;  %v6962_v31 = vpop.f32.mrf.mxu2  ;;  %1317 = vmatmul.bf16.vlgmr.msra.gmra.mxu0 %v10067_v53 }
 0x12f   :  { %10056 = vst [vmem:[#allocation100_spill] sm:$0xff] %v6942_v7  ;;  %1330 = vmatpush.bf16.msra.mxu1 %v6946_v36  ;;  %1525 = vmatpush.bf16.msrb.mxu0 %v6955_v19  ;;  %v6966_v20 = vor.u32 %v5773_v11, %v5546_v5  ;;  %v6968_v33 = vpop.f32.mrf.mxu3  ;;  %v462_v34 = vpop.f32.mrf.mxu0  ;;  %v5520_v5 = vld [vmem:[#allocation13 + $0xc0] sm:$0xf] }
 0x130   :  { %10057 = vst [vmem:[#allocation101_spill] sm:$0xff] %v6944_v24  ;;  %1358 = vmatpush.bf16.msra.mxu3 %v6951_v21  ;;  %1553 = vmatpush.bf16.msrb.mxu2 %v6960_v12  ;;  %v463_v32 = vadd.f32 %v462_v34, %v6740_v28  ;;  %v511_v15 = vpop.f32.mrf.mxu1  ;;  %v5770_v24 = vld [vmem:[#allocation13 + $0xcc] sm:$0xf0]  ;;  %v5528_v34 = vld [vmem:[#allocation13 + $0xc8] sm:$0xf] }
 0x131   :  { %10058 = vst [vmem:[#allocation102_spill] sm:$0xff] %v6946_v36  ;;  %v512_v1 = vadd.f32 %v511_v15, %v6742_v29  ;;  %1345 = vmatmul.bf16.vlgmr.msra.gmra.mxu2 %v10067_v53  ;;  %v5530_v15 = vld [vmem:[#allocation13 + $0xd8] sm:$0xf0] }
 0x132   :  { %10059 = vst [vmem:[#allocation103_spill] sm:$0xff] %v6948_v8  ;;  %1331 = vmatmul.bf16.vlgmr.msra.gmra.mxu1 %v10067_v53 }
 0x133   :  { %10060 = vst [vmem:[#allocation104_spill] sm:$0xff] %v6951_v21  ;;  %1539 = vmatpush.bf16.msrb.mxu1 %v6957_v25  ;;  %1359 = vmatmul.bf16.vlgmr.msra.gmra.mxu3 %v10067_v53  ;;  %v6978_v11 = vpack.c.bf16 %v512_v1, %v463_v32  ;;  %v5769_v21 = vld [vmem:[#allocation13 + $0xcc] sm:$0xf] }
 0x134   :  { %10061 = vst [vmem:[#allocation105_spill] sm:$0xff] %v6955_v19  ;;  %1567 = vmatpush.bf16.msrb.mxu3 %v6966_v20  ;;  %v6987_v53 = vor.u32 %v5769_v21, %v5530_v15  ;;  %v5767_v15 = vld [vmem:[#allocation13 + $0xb4] sm:$0xf0] }
 0x135   :  { %10062 = vst [vmem:[#allocation106_spill] sm:$0xff] %v6957_v25  ;;  %v5771_v25 = vld [vmem:[#allocation13 + $0xd4] sm:$0xf0] }
 0x136   :  { %10063 = vst [vmem:[#allocation107_spill] sm:$0xff] %v6960_v12  ;;  %v5522_v12 = vld [vmem:[#allocation13 + $0xd0] sm:$0xf0]  ;;  %v560_v8 = vpop.f32.mrf.mxu2 }
 0x137   :  { %10064 = vst [vmem:[#allocation108_spill] sm:$0xff] %v6962_v31  ;;  %v6980_v31 = vor.u32 %v5770_v24, %v5520_v5  ;;  %v561_v32 = vadd.f32 %v560_v8, %v6751_v39  ;;  %v609_v1 = vpop.f32.mrf.mxu3  ;;  %v5504_v24 = vld [vmem:[#allocation13 + $0xa0] sm:$0xf]  ;;  %v5512_v8 = vld [vmem:[#allocation13 + $0xa8] sm:$0xf] }
 0x138   :  { %10065 = vst [vmem:[#allocation109_spill] sm:$0xff] %v6966_v20  ;;  %v6984_v20 = vor.u32 %v5771_v25, %v5528_v34  ;;  %v5764_v25 = vld [vmem:[#allocation13 + $0xa4] sm:$0xf]  ;;  %v6995_v5 = vpop.f32.mrf.mxu1  ;;  %1568 = vmatpush.bf16.msrb.mxu3 %v6987_v53  ;;  %v5506_v34 = vld [vmem:[#allocation13 + $0xb0] sm:$0xf0] }
 0x139   :  { %10066 = vst [vmem:[#allocation110_spill] sm:$0xff] %v6968_v33  ;;  %v5768_v33 = vld [vmem:[#allocation13 + $0xc4] sm:$0xf]  ;;  %1526 = vmatpush.bf16.msrb.mxu0 %v6980_v31 }
 0x13a   :  { %10068 = vst [vmem:[#allocation111_spill] sm:$0xff] %v6978_v11  ;;  %v6982_v19 = vor.u32 %v5768_v33, %v5522_v12  ;;  %v6990_v11 = vpop.f32.mrf.mxu0  ;;  %1554 = vmatpush.bf16.msrb.mxu2 %v6984_v20  ;;  %v5766_v12 = vld [vmem:[#allocation13 + $0xac] sm:$0xf0]  ;;  %v610_v33 = vadd.f32 %v609_v1, %v6754_v43 }
 0x13b   :  { %10069 = vst [vmem:[#allocation112_spill] sm:$0xff] %v6980_v31  ;;  %v6998_v21 = vor.u32 %v5766_v12, %v5504_v24  ;;  %v7000_v31 = vor.u32 %v5764_v25, %v5506_v34  ;;  %v5488_v24 = vld [vmem:[#allocation13 + $0x80] sm:$0xf]  ;;  %v5762_v12 = vld [vmem:[#allocation13 + $0x8c] sm:$0xf0] }
 0x13c   :  { %10070 = vst [vmem:[#allocation113_spill] sm:$0xff] %v6982_v19  ;;  %1540 = vmatpush.bf16.msrb.mxu1 %v6982_v19  ;;  %v5765_v19 = vld [vmem:[#allocation13 + $0xac] sm:$0xf]  ;;  %v7004_v36 = vpack.c.bf16 %v610_v33, %v561_v32  ;;  %v7012_v25 = vor.u32 %v5762_v12, %v5488_v24  ;;  %v5490_v34 = vld [vmem:[#allocation13 + $0x90] sm:$0xf0]  ;;  %v941_v24 = vunpack.c.l.bf16 %v6747_v38 }
 0x13d   :  { %10071 = vst [vmem:[#allocation114_spill] sm:$0xff] %v6984_v20  ;;  %v5514_v20 = vld [vmem:[#allocation13 + $0xb8] sm:$0xf0]  ;;  %1527 = vmatpush.bf16.msrb.mxu0 %v6998_v21 }
 0x13e   :  { %10072 = vst [vmem:[#allocation115_spill] sm:$0xff] %v6987_v53  ;;  %v7007_v1 = vor.u32 %v5765_v19, %v5514_v20  ;;  %v5761_v19 = vld [vmem:[#allocation13 + $0x8c] sm:$0xf]  ;;  %v5498_v20 = vld [vmem:[#allocation13 + $0x98] sm:$0xf0] }
 0x13f   :  { %10073 = vst [vmem:[#allocation116_spill] sm:$0xff] %v6990_v11  ;;  %v7002_v11 = vor.u32 %v5767_v15, %v5512_v8  ;;  %v5496_v8 = vld [vmem:[#allocation13 + $0x88] sm:$0xf]  ;;  %v5763_v15 = vld [vmem:[#allocation13 + $0x94] sm:$0xf0]  ;;  %v7026_v12 = vor.u32 %v5761_v19, %v5498_v20 }
 0x140   :  { %10074 = vst [vmem:[#allocation117_spill] sm:$0xff] %v6995_v5  ;;  %1541 = vmatpush.bf16.msrb.mxu1 %v7000_v31  ;;  %v5760_v5 = vld [vmem:[#allocation13 + $0x84] sm:$0xf]  ;;  %1569 = vmatpush.bf16.msrb.mxu3 %v7007_v1  ;;  %v7016_v33 = vor.u32 %v5763_v15, %v5496_v8  ;;  %v5472_v8 = vld [vmem:[#allocation13 + $0x60] sm:$0xf] }
 0x141   :  { %10075 = vst [vmem:[#allocation118_spill] sm:$0xff] %v6998_v21  ;;  %1555 = vmatpush.bf16.msrb.mxu2 %v7002_v11  ;;  %v7014_v32 = vor.u32 %v5760_v5, %v5490_v34  ;;  %1528 = vmatpush.bf16.msrb.mxu0 %v7012_v25  ;;  %v942_v34 = vunpack.c.h.bf16 %v6747_v38  ;;  %v5756_v15 = vld [vmem:[#allocation13 + $0x64] sm:$0xf]  ;;  %v5759_v19 = vld [vmem:[#allocation13 + $0x74] sm:$0xf0] }
 0x142   :  { %10076 = vst [vmem:[#allocation119_spill] sm:$0xff] %v7000_v31  ;;  %v7022_v31 = vpop.f32.mrf.mxu2  ;;  %v894_v5 = vpop.f32.mrf.mxu0  ;;  %v5482_v21 = vld [vmem:[#allocation13 + $0x78] sm:$0xf0] }
 0x143   :  { %10077 = vst [vmem:[#allocation120_spill] sm:$0xff] %v7002_v11  ;;  %v479_v11 = vadd.f32 %v6760_v56, %v6742_v29  ;;  %v908_v56 = vpop.f32.mrf.mxu1  ;;  %v5474_v29 = vld [vmem:[#allocation13 + $0x70] sm:$0xf0] }
 0x144   :  { %10078 = vst [vmem:[#allocation121_spill] sm:$0xff] %v7004_v36  ;;  %v430_v36 = vadd.f32 %v6757_v51, %v6740_v28  ;;  %1542 = vmatpush.bf16.msrb.mxu1 %v7014_v32  ;;  %v5758_v51 = vld [vmem:[#allocation13 + $0x6c] sm:$0xf0]  ;;  %v949_v28 = vadd.f32 %v941_v24, %v894_v5  ;;  %1570 = vmatpush.bf16.msrb.mxu3 %v7026_v12  ;;  %v7041_v5 = vpop.f32.mrf.mxu3 }
 0x145   :  { %10079 = vst [vmem:[#allocation122_spill] sm:$0xff] %v7007_v1  ;;  %1556 = vmatpush.bf16.msrb.mxu2 %v7016_v33  ;;  %v950_v20 = vadd.f32 %v942_v34, %v908_v56  ;;  %v7034_v1 = vor.u32 %v5756_v15, %v5474_v29  ;;  %v5456_v34 = vld [vmem:[#allocation13 + $0x40] sm:$0xf]  ;;  %v5754_v29 = vld [vmem:[#allocation13 + $0x4c] sm:$0xf0] }
 0x146   :  { %10080 = vst [vmem:[#allocation123_spill] sm:$0xff] %v7012_v25  ;;  %v5480_v25 = vld [vmem:[#allocation13 + $0x68] sm:$0xf]  ;;  %v5288_v53 = vmul.f32 -1.442695, %v949_v28  ;;  %v7050_v28 = vor.u32 %v5754_v29, %v5456_v34 }
 0x147   :  { %10081 = vst [vmem:[#allocation124_spill] sm:$0xff] %v7014_v32  ;;  %v7036_v38 = vor.u32 %v5759_v19, %v5480_v25  ;;  %v5757_v32 = vld [vmem:[#allocation13 + $0x6c] sm:$0xf]  ;;  %v528_v25 = vadd.f32 %v6764_v58, %v6751_v39  ;;  %v5755_v56 = vld [vmem:[#allocation13 + $0x54] sm:$0xf0] }
 0x148   :  { %10082 = vst [vmem:[#allocation125_spill] sm:$0xff] %v7016_v33  ;;  %v616_v33 = vpack.c.bf16 %v479_v11, %v430_v36  ;;  %v7039_v24 = vor.u32 %v5757_v32, %v5482_v21  ;;  %1543 = vmatpush.bf16.msrb.mxu1 %v7034_v1  ;;  %v577_v36 = vadd.f32 %v6766_v63, %v6754_v43  ;;  %5832 = vpow2.f32 %v5288_v53  ;;  %v5752_v11 = vld [vmem:[#allocation13 + $0x44] sm:$0xf]  ;;  %v5458_v21 = vld [vmem:[#allocation13 + $0x50] sm:$0xf0] }
 0x149   :  { %10083 = vst [vmem:[#allocation126_spill] sm:$0xff] %v7022_v31  ;;  %v7032_v31 = vor.u32 %v5758_v51, %v5472_v8  ;;  %v5289_v8 = vmul.f32 -1.442695, %v950_v20  ;;  %1557 = vmatpush.bf16.msrb.mxu2 %v7036_v38  ;;  %v5464_v32 = vld [vmem:[#allocation13 + $0x48] sm:$0xf]  ;;  %v943_v51 = vunpack.c.l.bf16 %v6762_v57  ;;  %v7053_v15 = vor.u32 %v5752_v11, %v5458_v21 }
 0x14a   :  { %10084 = vst [vmem:[#allocation127_spill] sm:$0xff] %v7026_v12  ;;  %1571 = vmatpush.bf16.msrb.mxu3 %v7039_v24  ;;  %v5753_v19 = vld [vmem:[#allocation13 + $0x4c] sm:$0xf]  ;;  %v5466_v20 = vld [vmem:[#allocation13 + $0x58] sm:$0xf0]  ;;  %v922_v58 = vpop.f32.mrf.mxu2  ;;  %v7056_v63 = vor.u32 %v5755_v56, %v5464_v32  ;;  %v896_v29 = vpop.f32.mrf.mxu0  ;;  %v946_v43 = vunpack.c.h.bf16 %v616_v33  ;;  %v7061_v21 = vpack.c.bf16 %v577_v36, %v528_v25 }
 0x14b   :  { %10085 = vst [vmem:[#allocation128_spill] sm:$0xff] %v7032_v31  ;;  %1529 = vmatpush.bf16.msrb.mxu0 %v7032_v31  ;;  %5834 = vpow2.f32 %v5289_v8  ;;  %v7058_v53 = vor.u32 %v5753_v19, %v5466_v20  ;;  %v951_v34 = vadd.f32 %v943_v51, %v922_v58  ;;  %v5440_v8 = vld [vmem:[#allocation13 + $0x20] sm:$0xf]  ;;  %v5750_v39 = vld [vmem:[#allocation13 + $0x2c] sm:$0xf0] }
 0x14c   :  { %10086 = vst [vmem:[#allocation129_spill] sm:$0xff] %v7034_v1  ;;  %1544 = vmatpush.bf16.msrb.mxu1 %v7053_v15  ;;  %v5748_v11 = vld [vmem:[#allocation13 + $0x24] sm:$0xf]  ;;  %v7065_v32 = vor.u32 %v5750_v39, %v5440_v8  ;;  %v5442_v56 = vld [vmem:[#allocation13 + $0x30] sm:$0xf0] }
 0x14d   :  { %10087 = vst [vmem:[#allocation130_spill] sm:$0xff] %v7036_v38  ;;  %v910_v38 = vpop.f32.mrf.mxu1  ;;  %1558 = vmatpush.bf16.msrb.mxu2 %v7056_v63  ;;  %v5448_v19 = vld [vmem:[#allocation13 + $0x28] sm:$0xf]  ;;  %v5751_v51 = vld [vmem:[#allocation13 + $0x34] sm:$0xf0]  ;;  %v7067_v58 = vor.u32 %v5748_v11, %v5442_v56  ;;  %v944_v11 = vunpack.c.h.bf16 %v6762_v57 }
 0x14e   :  { %10088 = vst [vmem:[#allocation131_spill] sm:$0xff] %v7039_v24  ;;  %1572 = vmatpush.bf16.msrb.mxu3 %v7058_v53  ;;  %v5290_v20 = vmul.f32 -1.442695, %v951_v34  ;;  %v5450_v25 = vld [vmem:[#allocation13 + $0x38] sm:$0xf0]  ;;  %v5833_v36 = vpop.eup %5832 }
 0x14f   :  { %10089 = vst [vmem:[#allocation132_spill] sm:$0xff] %v7041_v5  ;;  %v945_v5 = vunpack.c.l.bf16 %v616_v33  ;;  %1530 = vmatpush.bf16.msrb.mxu0 %v7050_v28  ;;  %v954_v33 = vadd.f32 %v946_v43, %v910_v38  ;;  %v7074_v39 = vadd.f32 1.0, %v5833_v36  ;;  %v936_v38 = vpop.f32.mrf.mxu3  ;;  %v5746_v34 = vld [vmem:[#allocation13 + $0xc] sm:$0xf0] }
 0x150   :  { %10090 = vst [vmem:[#allocation133_spill] sm:$0xff] %v7050_v28  ;;  %v5749_v28 = vld [vmem:[#allocation13 + $0x2c] sm:$0xf]  ;;  %5836 = vpow2.f32 %v5290_v20  ;;  %1545 = vmatpush.bf16.msrb.mxu1 %v7067_v58  ;;  %v952_v36 = vadd.f32 %v944_v11, %v936_v38 }
 0x151   :  { %10091 = vst [vmem:[#allocation134_spill] sm:$0xff] %v7053_v15  ;;  %v953_v24 = vadd.f32 %v945_v5, %v896_v29  ;;  %v7069_v15 = vor.u32 %v5751_v51, %v5448_v19  ;;  %v7072_v29 = vor.u32 %v5749_v28, %v5450_v25  ;;  %v5292_v8 = vmul.f32 -1.442695, %v954_v33  ;;  %v5424_v28 = vld [vmem:[#allocation13] sm:$0xf] }
 0x152   :  { %10092 = vst [vmem:[#allocation135_spill] sm:$0xff] %v7056_v63  ;;  %v924_v56 = vpop.f32.mrf.mxu2  ;;  %v5744_v19 = vld [vmem:[#allocation13 + $0x4] sm:$0xf]  ;;  %v5432_v51 = vld [vmem:[#allocation13 + $0x8] sm:$0xf]  ;;  %vm986_vm2 = vweird.f32 %v7074_v39 }
 0x153   :  { %10093 = vst [vmem:[#allocation136_spill] sm:$0xff] %v7058_v53  ;;  %v5291_v5 = vmul.f32 -1.442695, %v953_v24  ;;  %1531 = vmatpush.bf16.msrb.mxu0 %v7065_v32  ;;  %v5835_v53 = vpop.eup %5834  ;;  %1559 = vmatpush.bf16.msrb.mxu2 %v7069_v15  ;;  %v947_v24 = vunpack.c.l.bf16 %v7061_v21  ;;  %v5747_v33 = vld [vmem:[#allocation13 + $0x14] sm:$0xf0] }
 0x154   :  { %10094 = vst [vmem:[#allocation137_spill] sm:$0xff] %v7065_v32  ;;  %v7077_v43 = vadd.f32 1.0, %v5835_v53  ;;  %1573 = vmatpush.bf16.msrb.mxu3 %v7072_v29  ;;  %v5426_v53 = vld [vmem:[#allocation13 + $0x10] sm:$0xf0]  ;;  %v5745_v25 = vld [vmem:[#allocation13 + $0xc] sm:$0xf]  ;;  %v7089_v63 = vor.u32 %v5747_v33, %v5432_v51 }
 0x155   :  { %10095 = vst [vmem:[#allocation138_spill] sm:$0xff] %v7067_v58  ;;  %5838 = vpow2.f32 %v5291_v5  ;;  %v955_v20 = vadd.f32 %v947_v24, %v924_v56  ;;  %v7085_v5 = vor.u32 %v5746_v34, %v5424_v28  ;;  %v7087_v32 = vor.u32 %v5744_v19, %v5426_v53 }
 0x156   :  { %10096 = vst [vmem:[#allocation139_spill] sm:$0xff] %v7069_v15  ;;  %5840 = vrcp.f32 %v7074_v39  ;;  %v5837_v15 = vpop.eup %5836  ;;  %v990_v56 = vand.u32 2147483647, %v7074_v39  ;;  %v992_v19 = vand.u32 2147483648, %v7074_v39  ;;  %v1007_v53 = vand.u32 2147483648, %v7077_v43 }
 0x157   :  { %10097 = vst [vmem:[#allocation140_spill] sm:$0xff] %v7072_v29  ;;  %5842 = vrcp.f32 %v7077_v43  ;;  %v5434_v29 = vld [vmem:[#allocation13 + $0x18] sm:$0xf0]  ;;  %v5293_v58 = vmul.f32 -1.442695, %v955_v20  ;;  %1532 = vmatpush.bf16.msrb.mxu0 %v7085_v5  ;;  %1546 = vmatpush.bf16.msrb.mxu1 %v7087_v32  ;;  %vm1001_vm3 = vweird.f32 %v7077_v43 }
 0x158   :  { %5844 = vpow2.f32 %v5292_v8  ;;  %10098 = vst [vmem:[#allocation141_spill] sm:$0xff] %v7085_v5  ;;  %v7091_v1 = vor.u32 %v5745_v25, %v5434_v29  ;;  %v7094_v8 = vadd.f32 1.0, %v5837_v15  ;;  %1560 = vmatpush.bf16.msrb.mxu2 %v7089_v63  ;;  %v1005_v25 = vand.u32 2147483647, %v7077_v43 }
 0x159   :  { %10099 = vst [vmem:[#allocation142_spill] sm:$0xff] %v7087_v32  ;;  %5846 = vpow2.f32 %v5293_v58  ;;  %vm991_vm5 = vcmp.eq.f32.partialorder %v990_v56, 8.507059e+37 }
 0x15a   :  { %10100 = vst [vmem:[#allocation143_spill] sm:$0xff] %v7089_v63  ;;  %1574 = vmatpush.bf16.msrb.mxu3 %v7091_v1  ;;  %5848 = vtanh.f32 %v952_v36  ;;  %v938_v36 = vpop.f32.mrf.mxu3  ;;  %vm1006_vm7 = vcmp.eq.f32.partialorder %v1005_v25, 8.507059e+37 }
 0x15b   :  { %10101 = vst [vmem:[#allocation144_spill] sm:$0xff] %v7091_v1  ;;  %v5839_v57 = vpop.eup %5838  ;;  %1730 = vmatpush.bf16.msra.mxu0 %v6644_v37  ;;  %1744 = vmatpush.bf16.msra.mxu1 %v6646_v41 }
 0x15c   :  { %v5841_v31 = vpop.eup %5840  ;;  %v7096_v24 = vadd.f32 1.0, %v5839_v57  ;;  %1758 = vmatpush.bf16.msra.mxu2 %v6648_v47 }
 0x15d   :  { %v5843_v38 = vpop.eup %5842  ;;  %v982_v28 = vmul.f32 %v5841_v31, %v7074_v39  ;;  %vm987_vm0 = vweird.f32 %v5841_v31 }
 0x15e   :  { %v5845_v29 = vpop.eup %5844  ;;  %v997_v34 = vmul.f32 %v5843_v38, %v7077_v43  ;;  %5850 = vrcp.f32 %v7096_v24  ;;  %1772 = vmatpush.bf16.msra.mxu3 %v6651_v48  ;;  %vm1002_vm1 = vweird.f32 %v5843_v38  ;;  %vm988_vm4 = vmor %vm986_vm2, %vm987_vm0  ;;  %vm1031_vm10 = vweird.f32 %v7096_v24 }
 0x15f   :  { %v983_v15 = vsub.f32 1.0, %v982_v28  ;;  %v7107_v58 = vadd.f32 1.0, %v5845_v29  ;;  %5852 = vrcp.f32 %v7094_v8  ;;  %1731 = vmatpush.bf16.msra.mxu0 %v6653_v49  ;;  %v5847_v20 = vpop.eup %5846  ;;  %1745 = vmatpush.bf16.msra.mxu1 %v6656_v52  ;;  %v948_v29 = vunpack.c.h.bf16 %v7061_v21  ;;  %vm1003_vm6 = vmor %vm1001_vm3, %vm1002_vm1 }
 0x160   :  { %v998_v11 = vsub.f32 1.0, %v997_v34  ;;  %1759 = vmatpush.bf16.msra.mxu2 %v6659_v55  ;;  %v7120_v28 = vadd.f32 1.0, %v5847_v20  ;;  %v5849_v34 = vpop.eup %5848  ;;  %v1008_v49 = vor.u32 1.1754944e-38, %v1007_v53  ;;  %vm1016_vm2 = vweird.f32 %v7094_v8 }
 0x161   :  { %v984_v51 = vmul.f32 %v5841_v31, %v983_v15  ;;  %5854 = vrcp.f32 %v7107_v58  ;;  %v993_v15 = vor.u32 1.1754944e-38, %v992_v19  ;;  %v956_v39 = vadd.f32 %v948_v29, %v938_v36 }
 0x162   :  { %v999_v33 = vmul.f32 %v5843_v38, %v998_v11  ;;  %1773 = vmatpush.bf16.msra.mxu3 %v6663_v59  ;;  %5856 = vrcp.f32 %v7120_v28  ;;  %v1037_v29 = vand.u32 2147483648, %v7096_v24  ;;  %vm1046_vm11 = vweird.f32 %v7107_v58 }
 0x163   :  { %v985_v57 = vadd.f32 %v5841_v31, %v984_v51  ;;  %1732 = vmatpush.bf16.msra.mxu0 %v6665_v60  ;;  %1746 = vmatpush.bf16.msra.mxu1 %v6668_v0  ;;  %5858 = vtanh.f32 %v956_v39 }
 0x164   :  { %v1000_v11 = vadd.f32 %v5843_v38, %v999_v33  ;;  %v5851_v52 = vpop.eup %5850  ;;  %1760 = vmatpush.bf16.msra.mxu2 %v6671_v3 }
 0x165   :  { %v989_v55 = vsel %vm988_vm4, %v5841_v31, %v985_v57  ;;  %v7129_v21 = vpop.eup %5852  ;;  %v1027_v43 = vmul.f32 %v5851_v52, %v7096_v24  ;;  %vm1032_vm8 = vweird.f32 %v5851_v52  ;;  %vm1061_vm4 = vweird.f32 %v7120_v28 }
 0x166   :  { %v994_v51 = vsel %vm991_vm5, %v993_v15, %v989_v55  ;;  %v1004_v20 = vsel %vm1003_vm6, %v5843_v38, %v1000_v11  ;;  %1774 = vmatpush.bf16.msra.mxu3 %v6675_v4  ;;  %v1012_v55 = vmul.f32 %v7129_v21, %v7094_v8  ;;  %v1035_v15 = vand.u32 2147483647, %v7096_v24  ;;  %vm1033_vm12 = vmor %vm1031_vm10, %vm1032_vm8 }
 0x167   :  { %v5855_v56 = vpop.eup %5854  ;;  %v1009_v31 = vsel %vm1006_vm7, %v1008_v49, %v1004_v20  ;;  %v1075_v19 = vmul.f32 %v5849_v34, %v994_v51  ;;  %v1028_v33 = vsub.f32 1.0, %v1027_v43  ;;  %1733 = vmatpush.bf16.msra.mxu0 %v6680_v9  ;;  %1747 = vmatpush.bf16.msra.mxu1 %v6682_v13  ;;  %v1052_v34 = vand.u32 2147483648, %v7107_v58 }
 0x168   :  { %v1073_v53 = vmul.f32 0.0, %v1009_v31  ;;  %v1042_v36 = vmul.f32 %v5855_v56, %v7107_v58  ;;  %1761 = vmatpush.bf16.msra.mxu2 %v6684_v14  ;;  %v7144_v49 = vpop.eup %5856  ;;  %vm1047_vm9 = vweird.f32 %v5855_v56  ;;  %v1050_v51 = vand.u32 2147483647, %v7107_v58 }
 0x169   :  { %v1029_v57 = vmul.f32 %v5851_v52, %v1028_v33  ;;  %v1057_v39 = vmul.f32 %v7144_v49, %v7120_v28  ;;  %v1013_v20 = vsub.f32 1.0, %v1012_v55  ;;  %v5859_v33 = vpop.eup %5858  ;;  %vm1036_vm13 = vcmp.eq.f32.partialorder %v1035_v15, 8.507059e+37  ;;  %vm1048_vm14 = vmor %vm1046_vm11, %vm1047_vm9 }
 0x16a   :  { %v7139_v38 = vadd.f32 %v1075_v19, %v1073_v53  ;;  %v1043_v25 = vsub.f32 1.0, %v1042_v36  ;;  %1775 = vmatpush.bf16.msra.mxu3 %v6687_v17  ;;  %v1038_v19 = vor.u32 1.1754944e-38, %v1037_v29  ;;  %v1053_v36 = vor.u32 1.1754944e-38, %v1052_v34 }
 0x16b   :  { %v1030_v43 = vadd.f32 %v5851_v52, %v1029_v57  ;;  %1734 = vmatpush.bf16.msra.mxu0 %v6692_v22  ;;  %v1058_v31 = vsub.f32 1.0, %v1057_v39  ;;  %1748 = vmatpush.bf16.msra.mxu1 %v6694_v26  ;;  %vm1051_vm15 = vcmp.eq.f32.partialorder %v1050_v51, 8.507059e+37  ;;  %v1014_v58 = vmul.f32 %v7129_v21, %v1013_v20  ;;  %v10113_v20 = vld [vmem:[#allocation79_spill] sm:$0xff] }
 0x16c   :  { %v1044_v11 = vmul.f32 %v5855_v56, %v1043_v25  ;;  %1762 = vmatpush.bf16.msra.mxu2 %v6696_v27  ;;  %vm1017_vm0 = vweird.f32 %v7129_v21  ;;  %5860 = vtanh.f32 %v7139_v38  ;;  %vm1062_vm1 = vweird.f32 %v7144_v49 }
 0x16d   :  { %v1034_v25 = vsel %vm1033_vm12, %v5851_v52, %v1030_v43  ;;  %v1059_v57 = vmul.f32 %v7144_v49, %v1058_v31  ;;  %v1022_v15 = vand.u32 2147483648, %v7094_v8  ;;  %v1067_v51 = vand.u32 2147483648, %v7120_v28  ;;  %vm7179_vm3 = vmor %vm1016_vm2, %vm1017_vm0 }
 0x16e   :  { %v1045_v53 = vadd.f32 %v5855_v56, %v1044_v11  ;;  %1776 = vmatpush.bf16.msra.mxu3 %v6699_v30  ;;  %v1039_v24 = vsel %vm1036_vm13, %v1038_v19, %v1034_v25  ;;  %v1020_v43 = vand.u32 2147483647, %v7094_v8  ;;  %v1065_v31 = vand.u32 2147483647, %v7120_v28  ;;  %vm1063_vm5 = vmor %vm1061_vm4, %vm1062_vm1 }
 0x16f   :  { %v1076_v11 = vmul.f32 %v5859_v33, %v1039_v24  ;;  %1735 = vmatpush.bf16.msra.mxu0 %v6704_v35  ;;  %1749 = vmatpush.bf16.msra.mxu1 %v6706_v40  ;;  %v1060_v34 = vadd.f32 %v7144_v49, %v1059_v57  ;;  %v1068_v25 = vor.u32 1.1754944e-38, %v1067_v51  ;;  %v10105_v57 = vld [vmem:[#allocation68_spill] sm:$0xff]  ;;  %v10112_v51 = vld [vmem:[#allocation78_spill] sm:$0xff] }
 0x170   :  { %v1049_v55 = vsel %vm1048_vm14, %v5855_v56, %v1045_v53  ;;  %1763 = vmatpush.bf16.msra.mxu2 %v6708_v42  ;;  %v1015_v56 = vadd.f32 %v7129_v21, %v1014_v58  ;;  %vm1021_vm6 = vcmp.eq.f32.partialorder %v1020_v43, 8.507059e+37  ;;  %vm1066_vm7 = vcmp.eq.f32.partialorder %v1065_v31, 8.507059e+37  ;;  %v10114_v43 = vld [vmem:[#allocation80_spill] sm:$0xff]  ;;  %v10115_v31 = vld [vmem:[#allocation82_spill] sm:$0xff] }
 0x171   :  { %v1054_v29 = vsel %vm1051_vm15, %v1053_v36, %v1049_v55  ;;  %v1064_v53 = vsel %vm1063_vm5, %v7144_v49, %v1060_v34  ;;  %v1023_v36 = vor.u32 1.1754944e-38, %v1022_v15  ;;  %v10104_v49 = vld [vmem:[#allocation67_spill] sm:$0xff]  ;;  %v10110_v34 = vld [vmem:[#allocation74_spill] sm:$0xff] }
 0x172   :  { %v1074_v39 = vmul.f32 0.0, %v1054_v29  ;;  %1777 = vmatpush.bf16.msra.mxu3 %v6711_v45  ;;  %v1019_v19 = vsel %vm7179_vm3, %v7129_v21, %v1015_v56  ;;  %v5861_v33 = vpop.eup %5860  ;;  %v1069_v24 = vsel %vm1066_vm7, %v1068_v25, %v1064_v53  ;;  %v10106_v29 = vld [vmem:[#allocation69_spill] sm:$0xff]  ;;  %v10111_v15 = vld [vmem:[#allocation75_spill] sm:$0xff]  ;;  %v10117_v53 = vld [vmem:[#allocation84_spill] sm:$0xff] }
 0x173   :  { %1736 = vmatpush.bf16.msra.mxu0 %v6716_v54  ;;  %1750 = vmatpush.bf16.msra.mxu1 %v6718_v61  ;;  %v1024_v28 = vsel %vm1021_vm6, %v1023_v36, %v1019_v19  ;;  %v10109_v56 = vld [vmem:[#allocation73_spill] sm:$0xff]  ;;  %v10116_v19 = vld [vmem:[#allocation83_spill] sm:$0xff] }
 0x174   :  { %v7167_v52 = vadd.f32 %v1076_v11, %v1074_v39  ;;  %1764 = vmatpush.bf16.msra.mxu2 %v6720_v62  ;;  %v1081_v55 = vmul.f32 %v5861_v33, %v1024_v28  ;;  %v10107_v11 = vld [vmem:[#allocation70_spill] sm:$0xff]  ;;  %v10108_v39 = vld [vmem:[#allocation72_spill] sm:$0xff]  ;;  %v10118_v33 = vld [vmem:[#allocation85_spill] sm:$0xff] }
 0x175   :  { %v10119_v36 = vld [vmem:[#allocation87_spill] sm:$0xff]  ;;  %v10120_v25 = vld [vmem:[#allocation89_spill] sm:$0xff] }
 0x176   :  { %5862 = vtanh.f32 %v7167_v52  ;;  %1778 = vmatpush.bf16.msra.mxu3 %v6723_v2  ;;  %v10122_v28 = vld [vmem:[#allocation91_spill] sm:$0xff] }
 0x177   :  { %1737 = vmatpush.bf16.msra.mxu0 %v6728_v10  ;;  %1751 = vmatpush.bf16.msra.mxu1 %v6730_v16 }
 0x178   :  { %1765 = vmatpush.bf16.msra.mxu2 %v6732_v18 }
 0x17a   :  { %1779 = vmatpush.bf16.msra.mxu3 %v6737_v23 }
 0x17c   :  { %v5863_v8 = vpop.eup %5862 }
 0x17d   :  { %v1082_v21 = vmul.f32 %v5863_v8, %v1069_v24  ;;  %v10121_v8 = vld [vmem:[#allocation90_spill] sm:$0xff]  ;;  %v10123_v24 = vld [vmem:[#allocation92_spill] sm:$0xff] }
 0x17f   :  { %v1083_v58 = vpack.c.bf16 %v1082_v21, %v1081_v55  ;;  %v10124_v55 = vld [vmem:[#allocation94_spill] sm:$0xff]  ;;  %v10125_v21 = vld [vmem:[#allocation95_spill] sm:$0xff] }
 0x181   :  { %1533 = vmatmul.bf16.vlgmr.msrb.gmra.mxu0 %v1083_v58  ;;  %1547 = vmatmul.bf16.vlgmr.msrb.gmra.mxu1 %v1083_v58 }
 0x182   :  { %1561 = vmatmul.bf16.vlgmr.msrb.gmra.mxu2 %v1083_v58  ;;  %1575 = vmatmul.bf16.vlgmr.msrb.gmra.mxu3 %v1083_v58 }
 0x183   :  { %1930 = vmatpush.bf16.msrb.mxu0 %v6828_v6  ;;  %1944 = vmatpush.bf16.msrb.mxu1 %v6830_v50 }
 0x184   :  { %1958 = vmatpush.bf16.msrb.mxu2 %v6832_v44  ;;  %1972 = vmatpush.bf16.msrb.mxu3 %v6837_v46 }
 0x187   :  { %1931 = vmatpush.bf16.msrb.mxu0 %v10104_v49  ;;  %1945 = vmatpush.bf16.msrb.mxu1 %v10105_v57 }
 0x188   :  { %1959 = vmatpush.bf16.msrb.mxu2 %v10106_v29  ;;  %1973 = vmatpush.bf16.msrb.mxu3 %v10107_v11  ;;  %v10169_v29 = vld [vmem:[#allocation38_spill] sm:$0xff] }
 0x18b   :  { %1932 = vmatpush.bf16.msrb.mxu0 %v10108_v39  ;;  %1946 = vmatpush.bf16.msrb.mxu1 %v10109_v56 }
 0x18c   :  { %1960 = vmatpush.bf16.msrb.mxu2 %v10110_v34  ;;  %1974 = vmatpush.bf16.msrb.mxu3 %v10111_v15 }
 0x18f   :  { %1933 = vmatpush.bf16.msrb.mxu0 %v10112_v51  ;;  %1947 = vmatpush.bf16.msrb.mxu1 %v10113_v20 }
 0x190   :  { %1961 = vmatpush.bf16.msrb.mxu2 %v10114_v43  ;;  %1975 = vmatpush.bf16.msrb.mxu3 %v10115_v31 }
 0x191   :  { %1738 = vmatmul.bf16.vlgmr.msra.gmra.mxu0 %v1083_v58  ;;  %1752 = vmatmul.bf16.vlgmr.msra.gmra.mxu1 %v1083_v58 }
 0x192   :  { %1766 = vmatmul.bf16.vlgmr.msra.gmra.mxu2 %v1083_v58  ;;  %1780 = vmatmul.bf16.vlgmr.msra.gmra.mxu3 %v1083_v58  ;;  %v10126_v58 = vld [vmem:[#allocation96_spill] sm:$0xff] }
 0x193   :  { %1934 = vmatpush.bf16.msrb.mxu0 %v10116_v19  ;;  %1948 = vmatpush.bf16.msrb.mxu1 %v10117_v53  ;;  %v10127_v19 = vld [vmem:[#allocation97_spill] sm:$0xff] }
 0x194   :  { %1962 = vmatpush.bf16.msrb.mxu2 %v10118_v33  ;;  %1976 = vmatpush.bf16.msrb.mxu3 %v10119_v36  ;;  %v10128_v33 = vld [vmem:[#allocation102_spill] sm:$0xff]  ;;  %v10129_v36 = vld [vmem:[#allocation103_spill] sm:$0xff] }
 0x197   :  { %1935 = vmatpush.bf16.msrb.mxu0 %v10120_v25  ;;  %1949 = vmatpush.bf16.msrb.mxu1 %v10121_v8  ;;  %v10130_v25 = vld [vmem:[#allocation104_spill] sm:$0xff]  ;;  %v10131_v8 = vld [vmem:[#allocation105_spill] sm:$0xff] }
 0x198   :  { %1963 = vmatpush.bf16.msrb.mxu2 %v10122_v28  ;;  %1977 = vmatpush.bf16.msrb.mxu3 %v10123_v24  ;;  %v10132_v28 = vld [vmem:[#allocation106_spill] sm:$0xff]  ;;  %v10133_v24 = vld [vmem:[#allocation107_spill] sm:$0xff] }
 0x19b   :  { %1936 = vmatpush.bf16.msrb.mxu0 %v10124_v55  ;;  %1950 = vmatpush.bf16.msrb.mxu1 %v10125_v21  ;;  %v10134_v55 = vld [vmem:[#allocation109_spill] sm:$0xff]  ;;  %v10135_v21 = vld [vmem:[#allocation112_spill] sm:$0xff] }
 0x19c   :  { %1964 = vmatpush.bf16.msrb.mxu2 %v10126_v58  ;;  %1978 = vmatpush.bf16.msrb.mxu3 %v10127_v19  ;;  %v10136_v58 = vld [vmem:[#allocation113_spill] sm:$0xff]  ;;  %v10137_v19 = vld [vmem:[#allocation114_spill] sm:$0xff] }
 0x19f   :  { %1937 = vmatpush.bf16.msrb.mxu0 %v6942_v7  ;;  %1951 = vmatpush.bf16.msrb.mxu1 %v10128_v33  ;;  %v10138_v7 = vld [vmem:[#allocation115_spill] sm:$0xff]  ;;  %v10139_v33 = vld [vmem:[#allocation118_spill] sm:$0xff] }
 0x1a0   :  { %1965 = vmatpush.bf16.msrb.mxu2 %v10129_v36  ;;  %1979 = vmatpush.bf16.msrb.mxu3 %v10130_v25  ;;  %v10140_v36 = vld [vmem:[#allocation119_spill] sm:$0xff]  ;;  %v10141_v25 = vld [vmem:[#allocation120_spill] sm:$0xff] }
 0x1a3   :  { %1986 = vmatpush.bf16.msra.mxu0 %v10131_v8  ;;  %2000 = vmatpush.bf16.msra.mxu1 %v10132_v28  ;;  %v10142_v8 = vld [vmem:[#allocation122_spill] sm:$0xff]  ;;  %v10143_v28 = vld [vmem:[#allocation123_spill] sm:$0xff] }
 0x1a4   :  { %2014 = vmatpush.bf16.msra.mxu2 %v10133_v24  ;;  %2028 = vmatpush.bf16.msra.mxu3 %v10134_v55  ;;  %v10144_v24 = vld [vmem:[#allocation124_spill] sm:$0xff]  ;;  %v10145_v55 = vld [vmem:[#allocation125_spill] sm:$0xff] }
 0x1a7   :  { %1987 = vmatpush.bf16.msra.mxu0 %v10135_v21  ;;  %2001 = vmatpush.bf16.msra.mxu1 %v10136_v58  ;;  %v10146_v58 = vld [vmem:[#allocation128_spill] sm:$0xff] }
 0x1a8   :  { %2015 = vmatpush.bf16.msra.mxu2 %v10137_v19  ;;  %2029 = vmatpush.bf16.msra.mxu3 %v10138_v7  ;;  %v10147_v19 = vld [vmem:[#allocation129_spill] sm:$0xff]  ;;  %v10148_v7 = vld [vmem:[#allocation130_spill] sm:$0xff] }
 0x1ab   :  { %1988 = vmatpush.bf16.msra.mxu0 %v10139_v33  ;;  %2002 = vmatpush.bf16.msra.mxu1 %v10140_v36  ;;  %v10149_v33 = vld [vmem:[#allocation131_spill] sm:$0xff]  ;;  %v10150_v36 = vld [vmem:[#allocation133_spill] sm:$0xff] }
 0x1ac   :  { %2016 = vmatpush.bf16.msra.mxu2 %v10141_v25  ;;  %2030 = vmatpush.bf16.msra.mxu3 %v10142_v8  ;;  %v10151_v25 = vld [vmem:[#allocation134_spill] sm:$0xff]  ;;  %v10152_v8 = vld [vmem:[#allocation135_spill] sm:$0xff] }
 0x1af   :  { %1989 = vmatpush.bf16.msra.mxu0 %v10143_v28  ;;  %2003 = vmatpush.bf16.msra.mxu1 %v10144_v24  ;;  %v10153_v28 = vld [vmem:[#allocation136_spill] sm:$0xff]  ;;  %v10154_v24 = vld [vmem:[#allocation137_spill] sm:$0xff] }
 0x1b0   :  { %2017 = vmatpush.bf16.msra.mxu2 %v10145_v55  ;;  %2031 = vmatpush.bf16.msra.mxu3 %v7026_v12  ;;  %v10155_v55 = vld [vmem:[#allocation138_spill] sm:$0xff]  ;;  %v10156_v12 = vld [vmem:[#allocation139_spill] sm:$0xff] }
 0x1b3   :  { %1990 = vmatpush.bf16.msra.mxu0 %v10146_v58  ;;  %2004 = vmatpush.bf16.msra.mxu1 %v10147_v19  ;;  %v10157_v58 = vld [vmem:[#allocation140_spill] sm:$0xff] }
 0x1b4   :  { %2018 = vmatpush.bf16.msra.mxu2 %v10148_v7  ;;  %2032 = vmatpush.bf16.msra.mxu3 %v10149_v33 }
 0x1b7   :  { %1991 = vmatpush.bf16.msra.mxu0 %v10150_v36  ;;  %2005 = vmatpush.bf16.msra.mxu1 %v10151_v25  ;;  %v1318_v25 = vpop.f32.mrf.mxu0  ;;  %v1346_v36 = vpop.f32.mrf.mxu2 }
 0x1b8   :  { %2019 = vmatpush.bf16.msra.mxu2 %v10152_v8  ;;  %2033 = vmatpush.bf16.msra.mxu3 %v10153_v28  ;;  %v1332_v8 = vpop.f32.mrf.mxu1 }
 0x1bb   :  { %1992 = vmatpush.bf16.msra.mxu0 %v10154_v24  ;;  %2006 = vmatpush.bf16.msra.mxu1 %v10155_v55  ;;  %v1360_v24 = vpop.f32.mrf.mxu3 }
 0x1bc   :  { %2020 = vmatpush.bf16.msra.mxu2 %v10156_v12  ;;  %2034 = vmatpush.bf16.msra.mxu3 %v10157_v58  ;;  %v1581_v12 = vld [vmem:[%s9770_s6] sm:$0xf] }
 0x1bd   :  { %v7262_v58 = vperm.slane %v1581_v12, 0  ;;  %v7270_v20 = vperm.slane %v1581_v12, 2 }
 0x1bf   :  { %1993 = vmatpush.bf16.msra.mxu0 %v7085_v5  ;;  %2007 = vmatpush.bf16.msra.mxu1 %v7087_v32  ;;  %v1320_v28 = vpop.f32.mrf.mxu0  ;;  %v1348_v55 = vpop.f32.mrf.mxu2  ;;  %10158 = vst [vmem:[#allocation145_spill] sm:$0xff] %v7262_v58  ;;  %v7264_v5 = vperm.slane %v1581_v12, 1 }
 0x1c0   :  { %2021 = vmatpush.bf16.msra.mxu2 %v7089_v63  ;;  %2035 = vmatpush.bf16.msra.mxu3 %v7091_v1  ;;  %v1334_v33 = vpop.f32.mrf.mxu1  ;;  %10160 = vst [vmem:[#allocation147_spill] sm:$0xff] %v7270_v20 }
 0x1c1   :  { %10159 = vst [vmem:[#allocation146_spill] sm:$0xff] %v7264_v5 }
 0x1c3   :  { %v7268_v53 = vpop.f32.mrf.mxu3 }
 0x1fe   :  { %v1534_v32 = vpop.f32.mrf.mxu0  ;;  %v1548_v7 = vpop.f32.mrf.mxu1 }
 0x1ff   :  { %v1535_v63 = vadd.f32 %v1534_v32, %v1318_v25  ;;  %v1549_v19 = vadd.f32 %v1548_v7, %v1332_v8 }
 0x201   :  { %v1591_v1 = vadd.f32 %v7262_v58, %v1535_v63  ;;  %v1592_v21 = vadd.f32 %v7264_v5, %v1549_v19 }
 0x203   :  { %v5550_v31 = vmul.f32 -1.442695, %v1591_v1  ;;  %v5551_v43 = vmul.f32 -1.442695, %v1592_v21 }
 0x205   :  { %5864 = vpow2.f32 %v5550_v31  ;;  %v1562_v51 = vpop.f32.mrf.mxu2 }
 0x206   :  { %5866 = vpow2.f32 %v5551_v43  ;;  %v1563_v15 = vadd.f32 %v1562_v51, %v1346_v36  ;;  %v1536_v34 = vpop.f32.mrf.mxu0  ;;  %v1550_v56 = vpop.f32.mrf.mxu1  ;;  %v10163_v36 = vld [vmem:[#allocation36_spill] sm:$0xff] }
 0x207   :  { %v1537_v39 = vadd.f32 %v1536_v34, %v1320_v28  ;;  %v1551_v11 = vadd.f32 %v1550_v56, %v1334_v33  ;;  %v1576_v51 = vpop.f32.mrf.mxu3  ;;  %v10161_v56 = vld [vmem:[#allocation35_spill] sm:$0xff]  ;;  %v10162_v33 = vld [vmem:[#allocation40_spill] sm:$0xff] }
 0x208   :  { %v1593_v7 = vadd.f32 %v7270_v20, %v1563_v15  ;;  %v435_v15 = vadd.f32 %v10162_v33, %v10161_v56  ;;  %v10166_v33 = vld [vmem:[#allocation37_spill] sm:$0xff]  ;;  %v10167_v56 = vld [vmem:[#allocation43_spill] sm:$0xff] }
 0x209   :  { %v1595_v63 = vadd.f32 %v7262_v58, %v1537_v39  ;;  %v1596_v32 = vadd.f32 %v7264_v5, %v1551_v11  ;;  %v10164_v39 = vld [vmem:[#allocation41_spill] sm:$0xff]  ;;  %v1577_v11 = vadd.f32 %v1576_v51, %v1360_v24  ;;  %v533_v5 = vadd.f32 %v10167_v56, %v10166_v33  ;;  %v10170_v24 = vld [vmem:[#allocation44_spill] sm:$0xff]  ;;  %v10171_v33 = vld [vmem:[#allocation42_spill] sm:$0xff] }
 0x20a   :  { %v5552_v19 = vmul.f32 -1.442695, %v1593_v7  ;;  %v484_v28 = vadd.f32 %v10164_v39, %v10163_v36  ;;  %v7285_v7 = vperm.slane %v1581_v12, 3  ;;  %v10168_v39 = vld [vmem:[#allocation39_spill] sm:$0xff]  ;;  %v582_v12 = vadd.f32 %v10170_v24, %v10169_v29 }
 0x20b   :  { %v5865_v25 = vpop.eup %5864  ;;  %v5553_v1 = vmul.f32 -1.442695, %v1595_v63  ;;  %v5554_v31 = vmul.f32 -1.442695, %v1596_v32  ;;  %v1786_v36 = vunpack.c.l.bf16 %v10168_v39  ;;  %v1787_v56 = vunpack.c.h.bf16 %v10168_v39 }
 0x20c   :  { %v5867_v8 = vpop.eup %5866  ;;  %v7275_v21 = vadd.f32 1.0, %v5865_v25  ;;  %5868 = vpow2.f32 %v5552_v19  ;;  %10165 = vst [vmem:[#allocation40_spill] sm:$0xff] %v7285_v7  ;;  %v7287_v19 = vpack.c.bf16 %v484_v28, %v435_v15 }
 0x20d   :  { %v7277_v43 = vadd.f32 1.0, %v5867_v8  ;;  %5870 = vpow2.f32 %v5553_v1  ;;  %v1564_v34 = vpop.f32.mrf.mxu2 }
 0x20e   :  { %5872 = vrcp.f32 %v7275_v21  ;;  %v1565_v63 = vadd.f32 %v1564_v34, %v1348_v55  ;;  %v1739_v1 = vpop.f32.mrf.mxu0  ;;  %v1753_v34 = vpop.f32.mrf.mxu1  ;;  %vm1628_vm8 = vweird.f32 %v7275_v21 }
 0x20f   :  { %5874 = vrcp.f32 %v7277_v43  ;;  %v1795_v49 = vadd.f32 %v1787_v56, %v1753_v34  ;;  %v1647_v56 = vand.u32 2147483647, %v7277_v43  ;;  %vm1643_vm11 = vweird.f32 %v7277_v43 }
 0x210   :  { %5876 = vpow2.f32 %v5554_v31  ;;  %v1597_v25 = vadd.f32 %v7270_v20, %v1565_v63  ;;  %v1594_v31 = vadd.f32 %v7285_v7, %v1577_v11  ;;  %v1794_v63 = vadd.f32 %v1786_v36, %v1739_v1  ;;  %v1578_v11 = vpop.f32.mrf.mxu3 }
 0x211   :  { %v1788_v20 = vunpack.c.l.bf16 %v10171_v33  ;;  %v7313_v36 = vpack.c.bf16 %v582_v12, %v533_v5  ;;  %v1634_v5 = vand.u32 2147483648, %v7275_v21  ;;  %vm1648_vm15 = vcmp.eq.f32.partialorder %v1647_v56, 8.507059e+37 }
 0x212   :  { %v5869_v32 = vpop.eup %5868  ;;  %v5555_v51 = vmul.f32 -1.442695, %v1597_v25  ;;  %v5556_v44 = vmul.f32 -1.442695, %v1794_v63 }
 0x213   :  { %v5871_v8 = vpop.eup %5870  ;;  %v7315_v39 = vadd.f32 1.0, %v5869_v32  ;;  %v1649_v32 = vand.u32 2147483648, %v7277_v43 }
 0x214   :  { %v7293_v58 = vpop.eup %5872  ;;  %v7298_v55 = vadd.f32 1.0, %v5871_v8 }
 0x215   :  { %v7300_v15 = vpop.eup %5874  ;;  %v1624_v28 = vmul.f32 %v7293_v58, %v7275_v21  ;;  %vm1629_vm9 = vweird.f32 %v7293_v58  ;;  %v1767_v12 = vpop.f32.mrf.mxu2 }
 0x216   :  { %v5877_v57 = vpop.eup %5876  ;;  %v1639_v24 = vmul.f32 %v7300_v15, %v7277_v43  ;;  %5878 = vrcp.f32 %v7298_v55  ;;  %vm1644_vm10 = vweird.f32 %v7300_v15  ;;  %vm7338_vm12 = vmor %vm1628_vm8, %vm1629_vm9  ;;  %v1796_v25 = vadd.f32 %v1788_v20, %v1767_v12  ;;  %v1741_v6 = vpop.f32.mrf.mxu0 }
 0x217   :  { %v1625_v8 = vsub.f32 1.0, %v1624_v28  ;;  %v7311_v29 = vadd.f32 1.0, %v5877_v57  ;;  %5880 = vpow2.f32 %v5555_v51  ;;  %v1632_v57 = vand.u32 2147483647, %v7275_v21  ;;  %vm7354_vm14 = vmor %vm1643_vm11, %vm1644_vm10 }
 0x218   :  { %v1640_v1 = vsub.f32 1.0, %v1639_v24  ;;  %5882 = vtanh.f32 %v1594_v31  ;;  %v5557_v51 = vmul.f32 -1.442695, %v1795_v49  ;;  %v1579_v24 = vadd.f32 %v1578_v11, %v7268_v53 }
 0x219   :  { %v1626_v46 = vmul.f32 %v7293_v58, %v1625_v8  ;;  %5884 = vrcp.f32 %v7311_v29  ;;  %vm7348_vm13 = vcmp.eq.f32.partialorder %v1632_v57, 8.507059e+37  ;;  %v1635_v21 = vor.u32 1.1754944e-38, %v1634_v5 }
 0x21a   :  { %v1641_v28 = vmul.f32 %v7300_v15, %v1640_v1  ;;  %5886 = vrcp.f32 %v7315_v39  ;;  %v1792_v1 = vunpack.c.l.bf16 %v7313_v36  ;;  %v1650_v57 = vor.u32 1.1754944e-38, %v1649_v32 }
 0x21b   :  { %v1627_v31 = vadd.f32 %v7293_v58, %v1626_v46  ;;  %5888 = vpow2.f32 %v5556_v44  ;;  %vm1673_vm0 = vweird.f32 %v7298_v55  ;;  %v1677_v12 = vand.u32 2147483647, %v7298_v55 }
 0x21c   :  { %v7327_v34 = vpop.eup %5878  ;;  %v1642_v63 = vadd.f32 %v7300_v15, %v1641_v28  ;;  %5890 = vpow2.f32 %v5557_v51  ;;  %vm1688_vm1 = vweird.f32 %v7311_v29 }
 0x21d   :  { %v5881_v8 = vpop.eup %5880  ;;  %v1669_v49 = vmul.f32 %v7327_v34, %v7298_v55  ;;  %v1631_v53 = vsel %vm7338_vm12, %v7293_v58, %v1627_v31  ;;  %v1598_v31 = vadd.f32 %v7285_v7, %v1579_v24  ;;  %vm1674_vm2 = vweird.f32 %v7327_v34 }
 0x21e   :  { %v5883_v28 = vpop.eup %5882  ;;  %v1646_v50 = vsel %vm7354_vm14, %v7300_v15, %v1642_v63  ;;  %v7363_v58 = vadd.f32 1.0, %v5881_v8  ;;  %v1679_v15 = vand.u32 2147483648, %v7298_v55  ;;  %v1755_v63 = vpop.f32.mrf.mxu1  ;;  %v1636_v32 = vsel %vm7348_vm13, %v1635_v21, %v1631_v53  ;;  %vm7399_vm4 = vmor %vm1673_vm0, %vm1674_vm2 }
 0x21f   :  { %v7358_v44 = vpop.eup %5884  ;;  %v1670_v46 = vsub.f32 1.0, %v1669_v49  ;;  %v1651_v51 = vsel %vm1648_vm15, %v1650_v57, %v1646_v50  ;;  %v5558_v49 = vmul.f32 -1.442695, %v1796_v25  ;;  %v10178_v24 = vunpack.c.l.bf16 %v7287_v19  ;;  %v1769_v25 = vpop.f32.mrf.mxu2 }
 0x220   :  { %v1684_v5 = vmul.f32 %v7358_v44, %v7311_v29  ;;  %v7372_v8 = vpop.eup %5886  ;;  %5892 = vrcp.f32 %v7363_v58  ;;  %v10179_v50 = vunpack.c.h.bf16 %v7287_v19  ;;  %v1715_v57 = vmul.f32 0.0, %v1651_v51 }
 0x221   :  { %v1671_v20 = vmul.f32 %v7327_v34, %v1670_v46  ;;  %v5889_v11 = vpop.eup %5888  ;;  %v1798_v46 = vadd.f32 %v10178_v24, %v1741_v6  ;;  %v1654_v21 = vmul.f32 %v7372_v8, %v7315_v39  ;;  %5894 = vpow2.f32 %v5558_v49 }
 0x222   :  { %v1685_v56 = vsub.f32 1.0, %v1684_v5  ;;  %v7383_v18 = vadd.f32 1.0, %v5889_v11  ;;  %v1799_v53 = vadd.f32 %v10179_v50, %v1755_v63  ;;  %v5891_v43 = vpop.eup %5890  ;;  %v1717_v5 = vmul.f32 %v5883_v28, %v1636_v32 }
 0x223   :  { %v1672_v23 = vadd.f32 %v7327_v34, %v1671_v20  ;;  %vm1689_vm3 = vweird.f32 %v7358_v44  ;;  %v7392_v6 = vadd.f32 1.0, %v5891_v43  ;;  %v1694_v20 = vand.u32 2147483648, %v7311_v29 }
 0x224   :  { %v1686_v7 = vmul.f32 %v7358_v44, %v1685_v56  ;;  %5896 = vrcp.f32 %v7383_v18  ;;  %v5559_v28 = vmul.f32 -1.442695, %v1798_v46  ;;  %v1800_v63 = vadd.f32 %v1792_v1, %v1769_v25  ;;  %vm7415_vm5 = vmor %vm1688_vm1, %vm1689_vm3 }
 0x225   :  { %5898 = vtanh.f32 %v1598_v31  ;;  %v1692_v32 = vand.u32 2147483647, %v7311_v29  ;;  %v5560_v51 = vmul.f32 -1.442695, %v1799_v53  ;;  %v1664_v55 = vand.u32 2147483648, %v7315_v39  ;;  %v1781_v31 = vpop.f32.mrf.mxu3 }
 0x226   :  { %v1687_v16 = vadd.f32 %v7358_v44, %v1686_v7  ;;  %v1676_v7 = vsel %vm7399_vm4, %v7327_v34, %v1672_v23  ;;  %5900 = vrcp.f32 %v7392_v6  ;;  %v7408_v56 = vpop.eup %5892  ;;  %v1680_v49 = vor.u32 1.1754944e-38, %v1679_v15 }
 0x227   :  { %v1789_v23 = vunpack.c.h.bf16 %v10171_v33  ;;  %v1793_v34 = vunpack.c.h.bf16 %v7313_v36  ;;  %v1655_v11 = vsub.f32 1.0, %v1654_v21  ;;  %v7421_v24 = vadd.f32 %v1717_v5, %v1715_v57  ;;  %v5895_v46 = vpop.eup %5894 }
 0x228   :  { %vm1678_vm6 = vcmp.eq.f32.partialorder %v1677_v12, 8.507059e+37  ;;  %v1691_v15 = vsel %vm7415_vm5, %v7358_v44, %v1687_v16  ;;  %v1695_v50 = vor.u32 1.1754944e-38, %v1694_v20  ;;  %5902 = vpow2.f32 %v5559_v28 }
 0x229   :  { %v1681_v29 = vsel %vm1678_vm6, %v1680_v49, %v1676_v7  ;;  %v5561_v53 = vmul.f32 -1.442695, %v1800_v63  ;;  %v1699_v43 = vmul.f32 %v7408_v56, %v7363_v58  ;;  %vm1693_vm7 = vcmp.eq.f32.partialorder %v1692_v32, 8.507059e+37 }
 0x22a   :  { %v5897_v25 = vpop.eup %5896  ;;  %v1797_v33 = vadd.f32 %v1789_v23, %v1781_v31  ;;  %5904 = vpow2.f32 %v5560_v51  ;;  %v1696_v57 = vsel %vm1693_vm7, %v1695_v50, %v1691_v15  ;;  %v7429_v5 = vadd.f32 1.0, %v5895_v46 }
 0x22b   :  { %v5899_v21 = vpop.eup %5898  ;;  %v1827_v12 = vmul.f32 %v5897_v25, %v7383_v18  ;;  %5906 = vpow2.f32 %v5561_v53  ;;  %v1656_v44 = vmul.f32 %v7372_v8, %v1655_v11  ;;  %v1835_v19 = vand.u32 2147483647, %v7383_v18 }
 0x22c   :  { %v5901_v16 = vpop.eup %5900  ;;  %5908 = vtanh.f32 %v7421_v24  ;;  %v1718_v20 = vmul.f32 %v5899_v21, %v1681_v29  ;;  %vm1659_vm8 = vweird.f32 %v7372_v8  ;;  %vm1846_vm9 = vweird.f32 %v7392_v6 }
 0x22d   :  { %v1828_v28 = vsub.f32 1.0, %v1827_v12  ;;  %v1842_v63 = vmul.f32 %v5901_v16, %v7392_v6  ;;  %vm1831_vm10 = vweird.f32 %v7383_v18  ;;  %v1700_v7 = vsub.f32 1.0, %v1699_v43  ;;  %v1783_v21 = vpop.f32.mrf.mxu3 }
 0x22e   :  { %v1716_v32 = vmul.f32 0.0, %v1696_v57  ;;  %v1837_v51 = vand.u32 2147483648, %v7383_v18  ;;  %5910 = vtanh.f32 %v1797_v33  ;;  %v5903_v49 = vpop.eup %5902  ;;  %vm1832_vm11 = vweird.f32 %v5897_v25 }
 0x22f   :  { %v1843_v1 = vsub.f32 1.0, %v1842_v63  ;;  %5912 = vrcp.f32 %v7429_v5  ;;  %v1829_v31 = vmul.f32 %v5897_v25, %v1828_v28  ;;  %v1852_v11 = vand.u32 2147483648, %v7392_v6  ;;  %vm1833_vm14 = vmor %vm1831_vm10, %vm1832_vm11 }
 0x230   :  { %v5905_v23 = vpop.eup %5904  ;;  %vm7441_vm12 = vcmp.eq.f32.partialorder %v1835_v19, 8.507059e+37  ;;  %v1850_v46 = vand.u32 2147483647, %v7392_v6  ;;  %v7446_v50 = vadd.f32 1.0, %v5903_v49  ;;  %vm1847_vm13 = vweird.f32 %v5901_v16 }
 0x231   :  { %v5907_v29 = vpop.eup %5906  ;;  %v1844_v53 = vmul.f32 %v5901_v16, %v1843_v1  ;;  %v1830_v43 = vadd.f32 %v5897_v25, %v1829_v31  ;;  %v7448_v33 = vadd.f32 1.0, %v5905_v23  ;;  %v7452_v12 = vadd.f32 %v1718_v20, %v1716_v32  ;;  %vm1848_vm15 = vmor %vm1846_vm9, %vm1847_vm13 }
 0x232   :  { %v7450_v57 = vpop.eup %5908  ;;  %v1838_v19 = vor.u32 1.1754944e-38, %v1837_v51  ;;  %5914 = vrcp.f32 %v7446_v50  ;;  %v7457_v28 = vadd.f32 1.0, %v5907_v29  ;;  %v1701_v63 = vmul.f32 %v7408_v56, %v1700_v7 }
 0x233   :  { %10186 = vst [vmem:[#allocation41_spill] sm:$0xff] %v7452_v12  ;;  %v1834_v49 = vsel %vm1833_vm14, %v5897_v25, %v1830_v43  ;;  %v1845_v1 = vadd.f32 %v5901_v16, %v1844_v53  ;;  %5916 = vrcp.f32 %v7448_v33  ;;  %v1853_v20 = vor.u32 1.1754944e-38, %v1852_v11 }
 0x234   :  { %v5911_v31 = vpop.eup %5910  ;;  %v1839_v18 = vsel %vm7441_vm12, %v1838_v19, %v1834_v49  ;;  %vm1851_vm0 = vcmp.eq.f32.partialorder %v1850_v46, 8.507059e+37  ;;  %v1801_v32 = vadd.f32 %v1793_v34, %v1783_v21  ;;  %5918 = vrcp.f32 %v7457_v28 }
 0x235   :  { %v7468_v51 = vpop.eup %5912  ;;  %v1849_v7 = vsel %vm1848_vm15, %v5901_v16, %v1845_v1  ;;  %v1920_v25 = vmul.f32 %v5911_v31, %v1839_v18  ;;  %v1657_v23 = vadd.f32 %v7372_v8, %v1656_v44  ;;  %v1709_v29 = vand.u32 2147483648, %v7363_v58 }
 0x236   :  { %5920 = vtanh.f32 %v7452_v12  ;;  %v1854_v6 = vsel %vm1851_vm0, %v1853_v20, %v1849_v7  ;;  %v1662_v11 = vand.u32 2147483647, %v7315_v39  ;;  %vm1658_vm1 = vweird.f32 %v7315_v39 }
 0x237   :  { %v1918_v36 = vmul.f32 %v1854_v6, %v7139_v38  ;;  %v1702_v34 = vadd.f32 %v7408_v56, %v1701_v63  ;;  %vm1704_vm2 = vweird.f32 %v7408_v56  ;;  %vm7481_vm3 = vmor %vm1658_vm1, %vm1659_vm8  ;;  %v1665_v15 = vor.u32 1.1754944e-38, %v1664_v55 }
 0x238   :  { %v5915_v16 = vpop.eup %5914  ;;  %vm1703_vm4 = vweird.f32 %v7363_v58  ;;  %v1857_v46 = vmul.f32 %v7468_v51, %v7429_v5  ;;  %5922 = vtanh.f32 %v1801_v32  ;;  %v1661_v21 = vsel %vm7481_vm3, %v7372_v8, %v1657_v23 }
 0x239   :  { %v5917_v38 = vpop.eup %5916  ;;  %v7490_v53 = vadd.f32 %v1920_v25, %v1918_v36  ;;  %v1872_v43 = vmul.f32 %v5915_v16, %v7446_v50  ;;  %v1707_v19 = vand.u32 2147483647, %v7363_v58  ;;  %vm1876_vm5 = vweird.f32 %v7446_v50  ;;  %vm7505_vm7 = vmor %vm1703_vm4, %vm1704_vm2 }
 0x23a   :  { %v1887_v39 = vmul.f32 %v5917_v38, %v7448_v33  ;;  %vm7499_vm6 = vcmp.eq.f32.partialorder %v1662_v11, 8.507059e+37  ;;  %v1710_v49 = vor.u32 1.1754944e-38, %v1709_v29  ;;  %v7509_v1 = vpop.eup %5918  ;;  %v1897_v58 = vand.u32 2147483648, %v7448_v33 }
 0x23b   :  { %v1873_v8 = vsub.f32 1.0, %v1872_v43  ;;  %v1880_v31 = vand.u32 2147483647, %v7446_v50  ;;  %v1706_v20 = vsel %vm7505_vm7, %v7408_v56, %v1702_v34  ;;  %v1858_v32 = vsub.f32 1.0, %v1857_v46 }
 0x23c   :  { %v5921_v18 = vpop.eup %5920  ;;  %v1888_v7 = vsub.f32 1.0, %v1887_v39  ;;  %v1902_v25 = vmul.f32 %v7509_v1, %v7457_v28  ;;  %v1882_v23 = vand.u32 2147483648, %v7446_v50  ;;  %vm1877_vm8 = vweird.f32 %v5915_v16 }
 0x23d   :  { %v1874_v29 = vmul.f32 %v5915_v16, %v1873_v8  ;;  %v1895_v6 = vand.u32 2147483647, %v7448_v33  ;;  %vm1708_vm9 = vcmp.eq.f32.partialorder %v1707_v19, 8.507059e+37  ;;  %vm1892_vm10 = vweird.f32 %v5917_v38  ;;  %vm1878_vm12 = vmor %vm1876_vm5, %vm1877_vm8 }
 0x23e   :  { %v5923_v11 = vpop.eup %5922  ;;  %v1889_v36 = vmul.f32 %v5917_v38, %v1888_v7  ;;  %v1666_v44 = vsel %vm7499_vm6, %v1665_v15, %v1661_v21  ;;  %v1711_v56 = vsel %vm1708_vm9, %v1710_v49, %v1706_v20  ;;  %v1903_v34 = vsub.f32 1.0, %v1902_v25  ;;  %v10196_v25 = vld [vmem:[#allocation24_spill] sm:$0xff] }
 0x23f   :  { %v1875_v46 = vadd.f32 %v5915_v16, %v1874_v29  ;;  %v1723_v43 = vmul.f32 %v7450_v57, %v1666_v44  ;;  %v1724_v39 = vmul.f32 %v5921_v18, %v1711_v56  ;;  %vm1891_vm11 = vweird.f32 %v7448_v33 }
 0x240   :  { %v1883_v63 = vor.u32 1.1754944e-38, %v1882_v23  ;;  %v1890_v8 = vadd.f32 %v5917_v38, %v1889_v36  ;;  %vm1893_vm13 = vmor %vm1891_vm11, %vm1892_vm10  ;;  %v1898_v19 = vor.u32 1.1754944e-38, %v1897_v58  ;;  %vm1881_vm14 = vcmp.eq.f32.partialorder %v1880_v31, 8.507059e+37  ;;  %v10197_v23 = vld [vmem:[#allocation25_spill] sm:$0xff]  ;;  %v10216_v58 = vld [vmem:[#allocation82_spill] sm:$0xff] }
 0x241   :  { %v1879_v7 = vsel %vm1878_vm12, %v5915_v16, %v1875_v46  ;;  %v1929_v12 = vpack.c.bf16 %v1724_v39, %v1723_v43  ;;  %v1859_v15 = vmul.f32 %v7468_v51, %v1858_v32  ;;  %vm1896_vm15 = vcmp.eq.f32.partialorder %v1895_v6, 8.507059e+37  ;;  %v10195_v32 = vld [vmem:[#allocation23_spill] sm:$0xff]  ;;  %v10199_v43 = vld [vmem:[#allocation33_spill] sm:$0xff]  ;;  %v10200_v39 = vld [vmem:[#allocation34_spill] sm:$0xff] }
 0x242   :  { %v1884_v21 = vsel %vm1881_vm14, %v1883_v63, %v1879_v7  ;;  %v1894_v55 = vsel %vm1893_vm13, %v5917_v38, %v1890_v8  ;;  %v1904_v57 = vmul.f32 %v7509_v1, %v1903_v34  ;;  %vm1862_vm0 = vweird.f32 %v7468_v51  ;;  %v10201_v63 = vld [vmem:[#allocation61_spill] sm:$0xff]  ;;  %v10202_v8 = vld [vmem:[#allocation62_spill] sm:$0xff] }
 0x243   :  { %v1899_v49 = vsel %vm1896_vm15, %v1898_v19, %v1894_v55  ;;  %v1921_v20 = vmul.f32 %v5923_v11, %v1884_v21  ;;  %1938 = vmatmul.bf16.vlgmr.msrb.gmra.mxu0 %v1929_v12  ;;  %1952 = vmatmul.bf16.vlgmr.msrb.gmra.mxu1 %v1929_v12  ;;  %5924 = vtanh.f32 %v7490_v53  ;;  %v1860_v16 = vadd.f32 %v7468_v51, %v1859_v15  ;;  %v10203_v19 = vld [vmem:[#allocation63_spill] sm:$0xff]  ;;  %v10204_v7 = vld [vmem:[#allocation65_spill] sm:$0xff]  ;;  %v10206_v21 = vld [vmem:[#allocation68_spill] sm:$0xff] }
 0x244   :  { %v1919_v50 = vmul.f32 %v1899_v49, %v7167_v52  ;;  %1966 = vmatmul.bf16.vlgmr.msrb.gmra.mxu2 %v1929_v12  ;;  %1980 = vmatmul.bf16.vlgmr.msrb.gmra.mxu3 %v1929_v12  ;;  %v1905_v52 = vadd.f32 %v7509_v1, %v1904_v57  ;;  %vm1907_vm1 = vweird.f32 %v7509_v1  ;;  %vm1861_vm2 = vweird.f32 %v7429_v5  ;;  %v10205_v15 = vld [vmem:[#allocation67_spill] sm:$0xff]  ;;  %v10207_v55 = vld [vmem:[#allocation69_spill] sm:$0xff]  ;;  %v10208_v57 = vld [vmem:[#allocation70_spill] sm:$0xff] }
 0x245   :  { %2181 = vmatpush.bf16.msrb.mxu0 %v6644_v37  ;;  %2195 = vmatpush.bf16.msrb.mxu1 %v6646_v41  ;;  %v1867_v12 = vand.u32 2147483648, %v7429_v5  ;;  %v1912_v38 = vand.u32 2147483648, %v7457_v28  ;;  %vm7544_vm3 = vmor %vm1861_vm2, %vm1862_vm0  ;;  %v1865_v31 = vand.u32 2147483647, %v7429_v5  ;;  %vm1906_vm4 = vweird.f32 %v7457_v28  ;;  %v10209_v49 = vld [vmem:[#allocation72_spill] sm:$0xff] }
 0x246   :  { %v7533_v33 = vadd.f32 %v1921_v20, %v1919_v50  ;;  %2209 = vmatpush.bf16.msrb.mxu2 %v6648_v47  ;;  %2223 = vmatpush.bf16.msrb.mxu3 %v6651_v48  ;;  %v1910_v18 = vand.u32 2147483647, %v7457_v28  ;;  %vm1908_vm5 = vmor %vm1906_vm4, %vm1907_vm1  ;;  %v1864_v29 = vsel %vm7544_vm3, %v7468_v51, %v1860_v16  ;;  %v10210_v20 = vld [vmem:[#allocation73_spill] sm:$0xff]  ;;  %v10211_v50 = vld [vmem:[#allocation74_spill] sm:$0xff] }
 0x247   :  { %v1909_v6 = vsel %vm1908_vm5, %v7509_v1, %v1905_v52  ;;  %v1868_v11 = vor.u32 1.1754944e-38, %v1867_v12  ;;  %v1913_v36 = vor.u32 1.1754944e-38, %v1912_v38  ;;  %vm1866_vm6 = vcmp.eq.f32.partialorder %v1865_v31, 8.507059e+37  ;;  %v10198_v1 = vld [vmem:[#allocation32_spill] sm:$0xff]  ;;  %v10212_v16 = vld [vmem:[#allocation75_spill] sm:$0xff]  ;;  %v10213_v52 = vld [vmem:[#allocation78_spill] sm:$0xff] }
 0x248   :  { %5926 = vtanh.f32 %v7533_v33  ;;  %vm1911_vm7 = vcmp.eq.f32.partialorder %v1910_v18, 8.507059e+37  ;;  %v10214_v12 = vld [vmem:[#allocation79_spill] sm:$0xff]  ;;  %v10215_v38 = vld [vmem:[#allocation80_spill] sm:$0xff] }
 0x249   :  { %2182 = vmatpush.bf16.msrb.mxu0 %v10195_v32  ;;  %2196 = vmatpush.bf16.msrb.mxu1 %v10196_v25  ;;  %v5925_v5 = vpop.eup %5924  ;;  %v1869_v44 = vsel %vm1866_vm6, %v1868_v11, %v1864_v29  ;;  %v1914_v56 = vsel %vm1911_vm7, %v1913_v36, %v1909_v6  ;;  %v10217_v31 = vld [vmem:[#allocation83_spill] sm:$0xff]  ;;  %v10218_v18 = vld [vmem:[#allocation84_spill] sm:$0xff]  ;;  %v10219_v29 = vld [vmem:[#allocation85_spill] sm:$0xff] }
 0x24a   :  { %2210 = vmatpush.bf16.msrb.mxu2 %v10197_v23  ;;  %2224 = vmatpush.bf16.msrb.mxu3 %v6663_v59  ;;  %v1926_v34 = vmul.f32 %v5925_v5, %v1869_v44  ;;  %v10220_v6 = vld [vmem:[#allocation87_spill] sm:$0xff]  ;;  %v10221_v5 = vld [vmem:[#allocation89_spill] sm:$0xff]  ;;  %v10222_v11 = vld [vmem:[#allocation90_spill] sm:$0xff] }
 0x24b   :  { %v10223_v36 = vld [vmem:[#allocation91_spill] sm:$0xff]  ;;  %v10225_v44 = vld [vmem:[#allocation94_spill] sm:$0xff] }
 0x24d   :  { %2183 = vmatpush.bf16.msrb.mxu0 %v6665_v60  ;;  %2197 = vmatpush.bf16.msrb.mxu1 %v6668_v0 }
 0x24e   :  { %v5927_v28 = vpop.eup %5926  ;;  %2211 = vmatpush.bf16.msrb.mxu2 %v6671_v3  ;;  %2225 = vmatpush.bf16.msrb.mxu3 %v6675_v4 }
 0x24f   :  { %v1927_v51 = vmul.f32 %v5927_v28, %v1914_v56  ;;  %v10224_v28 = vld [vmem:[#allocation92_spill] sm:$0xff]  ;;  %v10226_v56 = vld [vmem:[#allocation95_spill] sm:$0xff] }
 0x251   :  { %v1928_v46 = vpack.c.bf16 %v1927_v51, %v1926_v34  ;;  %2184 = vmatpush.bf16.msrb.mxu0 %v6680_v9  ;;  %2198 = vmatpush.bf16.msrb.mxu1 %v6682_v13  ;;  %v10227_v34 = vld [vmem:[#allocation96_spill] sm:$0xff]  ;;  %v10228_v51 = vld [vmem:[#allocation97_spill] sm:$0xff] }
 0x252   :  { %2212 = vmatpush.bf16.msrb.mxu2 %v6684_v14  ;;  %2226 = vmatpush.bf16.msrb.mxu3 %v6687_v17 }
 0x253   :  { %1994 = vmatmul.bf16.vlgmr.msra.gmra.mxu0 %v1928_v46  ;;  %2008 = vmatmul.bf16.vlgmr.msra.gmra.mxu1 %v1928_v46 }
 0x254   :  { %2022 = vmatmul.bf16.vlgmr.msra.gmra.mxu2 %v1928_v46  ;;  %2036 = vmatmul.bf16.vlgmr.msra.gmra.mxu3 %v1928_v46 }
 0x255   :  { %2185 = vmatpush.bf16.msrb.mxu0 %v6692_v22  ;;  %2199 = vmatpush.bf16.msrb.mxu1 %v6694_v26 }
 0x256   :  { %2213 = vmatpush.bf16.msrb.mxu2 %v6696_v27  ;;  %2227 = vmatpush.bf16.msrb.mxu3 %v6699_v30 }
 0x259   :  { %2186 = vmatpush.bf16.msrb.mxu0 %v6704_v35  ;;  %2200 = vmatpush.bf16.msrb.mxu1 %v6706_v40 }
 0x25a   :  { %2214 = vmatpush.bf16.msrb.mxu2 %v6708_v42  ;;  %2228 = vmatpush.bf16.msrb.mxu3 %v6711_v45 }
 0x25d   :  { %2187 = vmatpush.bf16.msrb.mxu0 %v6716_v54  ;;  %2201 = vmatpush.bf16.msrb.mxu1 %v6718_v61 }
 0x25e   :  { %2215 = vmatpush.bf16.msrb.mxu2 %v6720_v62  ;;  %2229 = vmatpush.bf16.msrb.mxu3 %v6723_v2 }
 0x261   :  { %2188 = vmatpush.bf16.msrb.mxu0 %v6728_v10  ;;  %2202 = vmatpush.bf16.msrb.mxu1 %v10198_v1 }
 0x262   :  { %2216 = vmatpush.bf16.msrb.mxu2 %v10199_v43  ;;  %2230 = vmatpush.bf16.msrb.mxu3 %v10200_v39 }
 0x264   :  { %2189 = vmatmul.bf16.vlgmr.msrb.gmra.mxu0 %v1928_v46  ;;  %2203 = vmatmul.bf16.vlgmr.msrb.gmra.mxu1 %v1928_v46 }
 0x265   :  { %2381 = vmatpush.bf16.msra.mxu0 %v10201_v63  ;;  %2395 = vmatpush.bf16.msra.mxu1 %v10202_v8  ;;  %v10272_v8 = vld [vmem:[#allocation37_spill] sm:$0xff] }
 0x266   :  { %2217 = vmatmul.bf16.vlgmr.msrb.gmra.mxu2 %v1928_v46  ;;  %2231 = vmatmul.bf16.vlgmr.msrb.gmra.mxu3 %v1928_v46  ;;  %v10229_v46 = vld [vmem:[#allocation100_spill] sm:$0xff] }
 0x267   :  { %2409 = vmatpush.bf16.msra.mxu2 %v10203_v19  ;;  %2423 = vmatpush.bf16.msra.mxu3 %v10204_v7  ;;  %v10271_v19 = vld [vmem:[#allocation47_spill] sm:$0xff] }
 0x269   :  { %2382 = vmatpush.bf16.msra.mxu0 %v10205_v15  ;;  %2396 = vmatpush.bf16.msra.mxu1 %v10206_v21  ;;  %v10267_v15 = vld [vmem:[#allocation147_spill] sm:$0xff] }
 0x26b   :  { %2410 = vmatpush.bf16.msra.mxu2 %v10207_v55  ;;  %2424 = vmatpush.bf16.msra.mxu3 %v10208_v57 }
 0x26d   :  { %2383 = vmatpush.bf16.msra.mxu0 %v10209_v49  ;;  %2397 = vmatpush.bf16.msra.mxu1 %v10210_v20 }
 0x26f   :  { %2411 = vmatpush.bf16.msra.mxu2 %v10211_v50  ;;  %2425 = vmatpush.bf16.msra.mxu3 %v10212_v16 }
 0x271   :  { %2384 = vmatpush.bf16.msra.mxu0 %v10213_v52  ;;  %2398 = vmatpush.bf16.msra.mxu1 %v10214_v12 }
 0x273   :  { %2412 = vmatpush.bf16.msra.mxu2 %v10215_v38  ;;  %2426 = vmatpush.bf16.msra.mxu3 %v10216_v58 }
 0x275   :  { %2385 = vmatpush.bf16.msra.mxu0 %v10217_v31  ;;  %2399 = vmatpush.bf16.msra.mxu1 %v10218_v18 }
 0x277   :  { %2413 = vmatpush.bf16.msra.mxu2 %v10219_v29  ;;  %2427 = vmatpush.bf16.msra.mxu3 %v10220_v6  ;;  %v10230_v29 = vld [vmem:[#allocation102_spill] sm:$0xff]  ;;  %v10231_v6 = vld [vmem:[#allocation105_spill] sm:$0xff] }
 0x279   :  { %2386 = vmatpush.bf16.msra.mxu0 %v10221_v5  ;;  %2400 = vmatpush.bf16.msra.mxu1 %v10222_v11  ;;  %v10232_v5 = vld [vmem:[#allocation106_spill] sm:$0xff]  ;;  %v10233_v11 = vld [vmem:[#allocation103_spill] sm:$0xff] }
 0x27b   :  { %2414 = vmatpush.bf16.msra.mxu2 %v10223_v36  ;;  %2428 = vmatpush.bf16.msra.mxu3 %v10224_v28  ;;  %v10234_v36 = vld [vmem:[#allocation104_spill] sm:$0xff]  ;;  %v10235_v28 = vld [vmem:[#allocation107_spill] sm:$0xff] }
 0x27d   :  { %2387 = vmatpush.bf16.msra.mxu0 %v10225_v44  ;;  %2401 = vmatpush.bf16.msra.mxu1 %v10226_v56  ;;  %v10236_v44 = vld [vmem:[#allocation109_spill] sm:$0xff]  ;;  %v10237_v56 = vld [vmem:[#allocation112_spill] sm:$0xff] }
 0x27f   :  { %2415 = vmatpush.bf16.msra.mxu2 %v10227_v34  ;;  %2429 = vmatpush.bf16.msra.mxu3 %v10228_v51  ;;  %v10238_v34 = vld [vmem:[#allocation113_spill] sm:$0xff]  ;;  %v10239_v51 = vld [vmem:[#allocation114_spill] sm:$0xff] }
 0x281   :  { %2388 = vmatpush.bf16.msra.mxu0 %v10229_v46  ;;  %2402 = vmatpush.bf16.msra.mxu1 %v10230_v29  ;;  %v10240_v46 = vld [vmem:[#allocation115_spill] sm:$0xff]  ;;  %v10241_v29 = vld [vmem:[#allocation118_spill] sm:$0xff] }
 0x283   :  { %2416 = vmatpush.bf16.msra.mxu2 %v10233_v11  ;;  %2430 = vmatpush.bf16.msra.mxu3 %v10234_v36  ;;  %v10244_v11 = vld [vmem:[#allocation122_spill] sm:$0xff]  ;;  %v10245_v36 = vld [vmem:[#allocation123_spill] sm:$0xff] }
 0x285   :  { %2437 = vmatpush.bf16.msrb.mxu0 %v10231_v6  ;;  %2451 = vmatpush.bf16.msrb.mxu1 %v10232_v5  ;;  %v10242_v6 = vld [vmem:[#allocation119_spill] sm:$0xff]  ;;  %v10243_v5 = vld [vmem:[#allocation120_spill] sm:$0xff] }
 0x287   :  { %2465 = vmatpush.bf16.msrb.mxu2 %v10235_v28  ;;  %2479 = vmatpush.bf16.msrb.mxu3 %v10236_v44  ;;  %v10246_v28 = vld [vmem:[#allocation124_spill] sm:$0xff]  ;;  %v10247_v44 = vld [vmem:[#allocation125_spill] sm:$0xff] }
 0x289   :  { %2438 = vmatpush.bf16.msrb.mxu0 %v10237_v56  ;;  %2452 = vmatpush.bf16.msrb.mxu1 %v10238_v34  ;;  %v10248_v56 = vld [vmem:[#allocation127_spill] sm:$0xff]  ;;  %v10249_v34 = vld [vmem:[#allocation128_spill] sm:$0xff] }
 0x28b   :  { %2466 = vmatpush.bf16.msrb.mxu2 %v10239_v51  ;;  %2480 = vmatpush.bf16.msrb.mxu3 %v10240_v46  ;;  %v10250_v51 = vld [vmem:[#allocation129_spill] sm:$0xff]  ;;  %v10251_v46 = vld [vmem:[#allocation130_spill] sm:$0xff] }
 0x28d   :  { %2439 = vmatpush.bf16.msrb.mxu0 %v10241_v29  ;;  %2453 = vmatpush.bf16.msrb.mxu1 %v10242_v6  ;;  %v10252_v29 = vld [vmem:[#allocation131_spill] sm:$0xff]  ;;  %v10253_v6 = vld [vmem:[#allocation133_spill] sm:$0xff] }
 0x28f   :  { %2467 = vmatpush.bf16.msrb.mxu2 %v10243_v5  ;;  %2481 = vmatpush.bf16.msrb.mxu3 %v10244_v11  ;;  %v10254_v5 = vld [vmem:[#allocation134_spill] sm:$0xff]  ;;  %v10255_v11 = vld [vmem:[#allocation135_spill] sm:$0xff] }
 0x291   :  { %2440 = vmatpush.bf16.msrb.mxu0 %v10245_v36  ;;  %2454 = vmatpush.bf16.msrb.mxu1 %v10246_v28  ;;  %v10256_v36 = vld [vmem:[#allocation136_spill] sm:$0xff]  ;;  %v10257_v28 = vld [vmem:[#allocation137_spill] sm:$0xff] }
 0x293   :  { %2468 = vmatpush.bf16.msrb.mxu2 %v10247_v44  ;;  %2482 = vmatpush.bf16.msrb.mxu3 %v10248_v56  ;;  %v10258_v44 = vld [vmem:[#allocation138_spill] sm:$0xff]  ;;  %v10259_v56 = vld [vmem:[#allocation139_spill] sm:$0xff] }
 0x295   :  { %2441 = vmatpush.bf16.msrb.mxu0 %v10249_v34  ;;  %2455 = vmatpush.bf16.msrb.mxu1 %v10250_v51  ;;  %v10260_v34 = vld [vmem:[#allocation140_spill] sm:$0xff]  ;;  %v10261_v51 = vld [vmem:[#allocation141_spill] sm:$0xff] }
 0x297   :  { %2469 = vmatpush.bf16.msrb.mxu2 %v10251_v46  ;;  %2483 = vmatpush.bf16.msrb.mxu3 %v10252_v29  ;;  %v10262_v46 = vld [vmem:[#allocation142_spill] sm:$0xff]  ;;  %v10263_v29 = vld [vmem:[#allocation143_spill] sm:$0xff] }
 0x299   :  { %2442 = vmatpush.bf16.msrb.mxu0 %v10253_v6  ;;  %2456 = vmatpush.bf16.msrb.mxu1 %v10254_v5  ;;  %v10264_v6 = vld [vmem:[#allocation144_spill] sm:$0xff] }
 0x29b   :  { %2470 = vmatpush.bf16.msrb.mxu2 %v10255_v11  ;;  %2484 = vmatpush.bf16.msrb.mxu3 %v10256_v36 }
 0x29d   :  { %2443 = vmatpush.bf16.msrb.mxu0 %v10257_v28  ;;  %2457 = vmatpush.bf16.msrb.mxu1 %v10258_v44 }
 0x29f   :  { %2471 = vmatpush.bf16.msrb.mxu2 %v10259_v56  ;;  %2485 = vmatpush.bf16.msrb.mxu3 %v10260_v34 }
 0x2a1   :  { %2444 = vmatpush.bf16.msrb.mxu0 %v10261_v51  ;;  %2458 = vmatpush.bf16.msrb.mxu1 %v10262_v46  ;;  %v10265_v51 = vld [vmem:[#allocation145_spill] sm:$0xff]  ;;  %v10266_v46 = vld [vmem:[#allocation146_spill] sm:$0xff] }
 0x2a3   :  { %2472 = vmatpush.bf16.msrb.mxu2 %v10263_v29  ;;  %2486 = vmatpush.bf16.msrb.mxu3 %v10264_v6 }
 0x2c0   :  { %v1939_v5 = vpop.f32.mrf.mxu0  ;;  %v1953_v11 = vpop.f32.mrf.mxu1 }
 0x2c7   :  { %v1967_v18 = vpop.f32.mrf.mxu2  ;;  %v1981_v36 = vpop.f32.mrf.mxu3 }
 0x2c8   :  { %v1941_v31 = vpop.f32.mrf.mxu0  ;;  %v1955_v28 = vpop.f32.mrf.mxu1 }
 0x2cf   :  { %v1969_v58 = vpop.f32.mrf.mxu2  ;;  %v7647_v34 = vpop.f32.mrf.mxu3 }
 0x2d0   :  { %v1995_v44 = vpop.f32.mrf.mxu0  ;;  %v2009_v38 = vpop.f32.mrf.mxu1 }
 0x2d1   :  { %v1996_v56 = vadd.f32 %v1995_v44, %v1939_v5  ;;  %v2010_v12 = vadd.f32 %v2009_v38, %v1953_v11 }
 0x2d3   :  { %v2042_v52 = vadd.f32 %v1996_v56, %v10265_v51  ;;  %v2043_v16 = vadd.f32 %v2010_v12, %v10266_v46  ;;  %v10268_v12 = vld [vmem:[#allocation35_spill] sm:$0xff] }
 0x2d5   :  { %v5562_v29 = vmul.f32 -1.442695, %v2042_v52  ;;  %v5563_v50 = vmul.f32 -1.442695, %v2043_v16  ;;  %v10269_v52 = vld [vmem:[#allocation46_spill] sm:$0xff] }
 0x2d6   :  { %v440_v16 = vadd.f32 %v10269_v52, %v10268_v12 }
 0x2d7   :  { %5928 = vpow2.f32 %v5562_v29  ;;  %v2023_v6 = vpop.f32.mrf.mxu2  ;;  %v2037_v44 = vpop.f32.mrf.mxu3  ;;  %v10270_v29 = vld [vmem:[#allocation36_spill] sm:$0xff] }
 0x2d8   :  { %5930 = vpow2.f32 %v5563_v50  ;;  %v2024_v20 = vadd.f32 %v2023_v6, %v1967_v18  ;;  %v1997_v49 = vpop.f32.mrf.mxu0  ;;  %v2011_v57 = vpop.f32.mrf.mxu1  ;;  %v489_v50 = vadd.f32 %v10271_v19, %v10270_v29 }
 0x2d9   :  { %v1998_v55 = vadd.f32 %v1997_v49, %v1941_v31  ;;  %v2012_v21 = vadd.f32 %v2011_v57, %v1955_v28  ;;  %v10273_v49 = vld [vmem:[#allocation49_spill] sm:$0xff] }
 0x2da   :  { %v2044_v7 = vadd.f32 %v2024_v20, %v10267_v15  ;;  %v538_v57 = vadd.f32 %v10273_v49, %v10272_v8  ;;  %v10274_v20 = vld [vmem:[#allocation38_spill] sm:$0xff]  ;;  %v7667_v19 = vpack.c.bf16 %v489_v50, %v440_v16 }
 0x2db   :  { %v2046_v38 = vadd.f32 %v1998_v55, %v10265_v51  ;;  %v2047_v5 = vadd.f32 %v2012_v21, %v10266_v46  ;;  %v10275_v21 = vld [vmem:[#allocation50_spill] sm:$0xff]  ;;  %v2038_v46 = vadd.f32 %v2037_v44, %v1981_v36  ;;  %v10277_v36 = vld [vmem:[#allocation45_spill] sm:$0xff] }
 0x2dc   :  { %v5564_v11 = vmul.f32 -1.442695, %v2044_v7  ;;  %v587_v7 = vadd.f32 %v10275_v21, %v10274_v20  ;;  %v2237_v44 = vunpack.c.l.bf16 %v10277_v36 }
 0x2dd   :  { %v5929_v56 = vpop.eup %5928  ;;  %v5565_v18 = vmul.f32 -1.442695, %v2046_v38  ;;  %v5566_v55 = vmul.f32 -1.442695, %v2047_v5 }
 0x2de   :  { %v5931_v6 = vpop.eup %5930  ;;  %v7660_v31 = vadd.f32 1.0, %v5929_v56  ;;  %5932 = vpow2.f32 %v5564_v11  ;;  %v7670_v56 = vpack.c.bf16 %v587_v7, %v538_v57  ;;  %v10276_v11 = vld [vmem:[#allocation40_spill] sm:$0xff] }
 0x2df   :  { %v7664_v28 = vadd.f32 1.0, %v5931_v6  ;;  %5934 = vpow2.f32 %v5565_v18  ;;  %v2025_v52 = vpop.f32.mrf.mxu2  ;;  %v2045_v5 = vadd.f32 %v2038_v46, %v10276_v11  ;;  %v2238_v18 = vunpack.c.h.bf16 %v10277_v36  ;;  %v2039_v51 = vpop.f32.mrf.mxu3 }
 0x2e0   :  { %5936 = vrcp.f32 %v7660_v31  ;;  %v2026_v38 = vadd.f32 %v2025_v52, %v1969_v58  ;;  %v2085_v12 = vand.u32 2147483648, %v7660_v31  ;;  %vm2079_vm8 = vweird.f32 %v7660_v31 }
 0x2e1   :  { %5938 = vrcp.f32 %v7664_v28  ;;  %v2190_v6 = vpop.f32.mrf.mxu0  ;;  %v2204_v57 = vpop.f32.mrf.mxu1  ;;  %v2098_v39 = vand.u32 2147483647, %v7664_v28  ;;  %vm2094_vm9 = vweird.f32 %v7664_v28 }
 0x2e2   :  { %5940 = vpow2.f32 %v5566_v55  ;;  %v2048_v21 = vadd.f32 %v2026_v38, %v10267_v15  ;;  %v10278_v55 = vld [vmem:[#allocation48_spill] sm:$0xff]  ;;  %v2245_v29 = vadd.f32 %v2237_v44, %v2190_v6  ;;  %v2246_v63 = vadd.f32 %v2238_v18, %v2204_v57 }
 0x2e3   :  { %v2239_v7 = vunpack.c.l.bf16 %v10278_v55  ;;  %5942 = vtanh.f32 %v2045_v5  ;;  %v2100_v6 = vand.u32 2147483648, %v7664_v28  ;;  %vm7716_vm13 = vcmp.eq.f32.partialorder %v2098_v39, 8.507059e+37 }
 0x2e4   :  { %v5933_v49 = vpop.eup %5932  ;;  %v5567_v58 = vmul.f32 -1.442695, %v2048_v21  ;;  %v2083_v21 = vand.u32 2147483647, %v7660_v31  ;;  %v5568_v43 = vmul.f32 -1.442695, %v2245_v29 }
 0x2e5   :  { %v5935_v20 = vpop.eup %5934  ;;  %v7696_v44 = vadd.f32 1.0, %v5933_v49  ;;  %v2040_v49 = vadd.f32 %v2039_v51, %v7647_v34  ;;  %v2101_v29 = vor.u32 1.1754944e-38, %v2100_v6 }
 0x2e6   :  { %v7677_v50 = vpop.eup %5936  ;;  %v7679_v8 = vadd.f32 1.0, %v5935_v20  ;;  %vm7704_vm10 = vcmp.eq.f32.partialorder %v2083_v21, 8.507059e+37 }
 0x2e7   :  { %v7683_v52 = vpop.eup %5938  ;;  %v2075_v38 = vmul.f32 %v7677_v50, %v7660_v31  ;;  %vm2080_vm11 = vweird.f32 %v7677_v50  ;;  %v2049_v6 = vadd.f32 %v2040_v49, %v10276_v11 }
 0x2e8   :  { %v5941_v16 = vpop.eup %5940  ;;  %v2090_v20 = vmul.f32 %v7683_v52, %v7664_v28  ;;  %5944 = vrcp.f32 %v7679_v8  ;;  %vm2095_vm12 = vweird.f32 %v7683_v52  ;;  %vm7725_vm14 = vmor %vm2079_vm8, %vm2080_vm11  ;;  %vm2124_vm15 = vweird.f32 %v7679_v8 }
 0x2e9   :  { %v2076_v46 = vsub.f32 1.0, %v2075_v38  ;;  %v7693_v15 = vadd.f32 1.0, %v5941_v16  ;;  %5946 = vpow2.f32 %v5567_v58  ;;  %v5943_v58 = vpop.eup %5942  ;;  %v5569_v38 = vmul.f32 -1.442695, %v2246_v63  ;;  %vm7738_vm0 = vmor %vm2094_vm9, %vm2095_vm12  ;;  %v2192_v2 = vpop.f32.mrf.mxu0 }
 0x2ea   :  { %v2091_v5 = vsub.f32 1.0, %v2090_v20  ;;  %v2218_v20 = vpop.f32.mrf.mxu2  ;;  %v2128_v63 = vand.u32 2147483647, %v7679_v8  ;;  %v2130_v39 = vand.u32 2147483648, %v7679_v8 }
 0x2eb   :  { %v2077_v36 = vmul.f32 %v7677_v50, %v2076_v46  ;;  %5948 = vrcp.f32 %v7693_v15  ;;  %v2086_v46 = vor.u32 1.1754944e-38, %v2085_v12  ;;  %v2247_v49 = vadd.f32 %v2239_v7, %v2218_v20 }
 0x2ec   :  { %v2092_v16 = vmul.f32 %v7683_v52, %v2091_v5  ;;  %5950 = vrcp.f32 %v7696_v44  ;;  %vm2139_vm1 = vweird.f32 %v7693_v15  ;;  %v2145_v28 = vand.u32 2147483648, %v7693_v15 }
 0x2ed   :  { %v2078_v57 = vadd.f32 %v7677_v50, %v2077_v36  ;;  %5952 = vpow2.f32 %v5568_v43  ;;  %vm7754_vm3 = vcmp.eq.f32.partialorder %v2128_v63, 8.507059e+37  ;;  %v2143_v20 = vand.u32 2147483647, %v7693_v15 }
 0x2ee   :  { %v7711_v1 = vpop.eup %5944  ;;  %v2093_v21 = vadd.f32 %v7683_v52, %v2092_v16  ;;  %5954 = vpow2.f32 %v5569_v38  ;;  %v2131_v38 = vor.u32 1.1754944e-38, %v2130_v39  ;;  %v5570_v63 = vmul.f32 -1.442695, %v2247_v49 }
 0x2ef   :  { %v5947_v5 = vpop.eup %5946  ;;  %v2120_v51 = vmul.f32 %v7711_v1, %v7679_v8  ;;  %v2082_v31 = vsel %vm7725_vm14, %v7677_v50, %v2078_v57  ;;  %vm2125_vm2 = vweird.f32 %v7711_v1  ;;  %vm2144_vm7 = vcmp.eq.f32.partialorder %v2143_v20, 8.507059e+37  ;;  %v10294_v50 = vld [vmem:[#allocation41_spill] sm:$0xff] }
 0x2f0   :  { %v7729_v36 = vadd.f32 1.0, %v5947_v5  ;;  %v2097_v11 = vsel %vm7738_vm0, %v7683_v52, %v2093_v21  ;;  %v2087_v52 = vsel %vm7704_vm10, %v2086_v46, %v2082_v31  ;;  %v2206_v21 = vpop.f32.mrf.mxu1  ;;  %vm7772_vm5 = vmor %vm2124_vm15, %vm2125_vm2  ;;  %vm2109_vm10 = vweird.f32 %v7696_v44 }
 0x2f1   :  { %v5949_v16 = vpop.eup %5948  ;;  %v2121_v5 = vsub.f32 1.0, %v2120_v51  ;;  %v2102_v12 = vsel %vm7716_vm13, %v2101_v29, %v2097_v11  ;;  %v2168_v46 = vmul.f32 %v5943_v58, %v2087_v52  ;;  %v10292_v29 = vunpack.c.h.bf16 %v7667_v19 }
 0x2f2   :  { %v2135_v10 = vmul.f32 %v5949_v16, %v7693_v15  ;;  %5956 = vrcp.f32 %v7729_v36  ;;  %v7758_v7 = vpop.eup %5950  ;;  %vm2140_vm4 = vweird.f32 %v5949_v16  ;;  %v2220_v8 = vpop.f32.mrf.mxu2  ;;  %v2166_v39 = vmul.f32 %v2102_v12, %v7421_v24 }
 0x2f3   :  { %v2122_v62 = vmul.f32 %v7711_v1, %v2121_v5  ;;  %v5953_v51 = vpop.eup %5952  ;;  %v10289_v5 = vunpack.c.l.bf16 %v7667_v19  ;;  %5958 = vtanh.f32 %v2049_v6  ;;  %v2250_v34 = vadd.f32 %v10292_v29, %v2206_v21  ;;  %vm2141_vm6 = vmor %vm2139_vm1, %vm2140_vm4 }
 0x2f4   :  { %v2136_v57 = vsub.f32 1.0, %v2135_v10  ;;  %v7776_v18 = vadd.f32 1.0, %v5953_v51  ;;  %v5955_v11 = vpop.eup %5954  ;;  %v2146_v58 = vor.u32 1.1754944e-38, %v2145_v28  ;;  %v10293_v24 = vunpack.c.l.bf16 %v7670_v56 }
 0x2f5   :  { %v2123_v43 = vadd.f32 %v7711_v1, %v2122_v62  ;;  %v2249_v61 = vadd.f32 %v10289_v5, %v2192_v2  ;;  %v2105_v62 = vmul.f32 %v7758_v7, %v7696_v44  ;;  %v7787_v6 = vadd.f32 1.0, %v5955_v11 }
 0x2f6   :  { %v2137_v54 = vmul.f32 %v5949_v16, %v2136_v57  ;;  %5960 = vrcp.f32 %v7776_v18  ;;  %v2251_v57 = vadd.f32 %v10293_v24, %v2220_v8  ;;  %v2240_v12 = vunpack.c.h.bf16 %v10278_v55 }
 0x2f7   :  { %v2127_v2 = vsel %vm7772_vm5, %v7711_v1, %v2123_v43  ;;  %5962 = vpow2.f32 %v5570_v63  ;;  %v5571_v1 = vmul.f32 -1.442695, %v2249_v61  ;;  %v2106_v21 = vsub.f32 1.0, %v2105_v62 }
 0x2f8   :  { %v2138_v31 = vadd.f32 %v5949_v16, %v2137_v54  ;;  %v7789_v49 = vpop.eup %5956  ;;  %v2132_v19 = vsel %vm7754_vm3, %v2131_v38, %v2127_v2  ;;  %5964 = vrcp.f32 %v7787_v6  ;;  %v2232_v54 = vpop.f32.mrf.mxu3  ;;  %v5572_v15 = vmul.f32 -1.442695, %v2250_v34 }
 0x2f9   :  { %v5959_v43 = vpop.eup %5958  ;;  %v7800_v28 = vadd.f32 %v2168_v46, %v2166_v39  ;;  %v2150_v61 = vmul.f32 %v7789_v49, %v7729_v36  ;;  %v2248_v20 = vadd.f32 %v2240_v12, %v2232_v54  ;;  %5966 = vpow2.f32 %v5571_v1 }
 0x2fa   :  { %v2142_v52 = vsel %vm2141_vm6, %v5949_v16, %v2138_v31  ;;  %v2169_v16 = vmul.f32 %v5959_v43, %v2132_v19  ;;  %v5573_v5 = vmul.f32 -1.442695, %v2251_v57  ;;  %v2244_v10 = vunpack.c.h.bf16 %v7670_v56 }
 0x2fb   :  { %v2147_v51 = vsel %vm2144_vm7, %v2146_v58, %v2142_v52  ;;  %v2107_v62 = vmul.f32 %v7758_v7, %v2106_v21  ;;  %v2115_v55 = vand.u32 2147483648, %v7696_v44  ;;  %5968 = vpow2.f32 %v5572_v15 }
 0x2fc   :  { %v2167_v38 = vmul.f32 %v2147_v51, %v10294_v50  ;;  %v5961_v63 = vpop.eup %5960  ;;  %vm2110_vm8 = vweird.f32 %v7758_v7  ;;  %5970 = vtanh.f32 %v7800_v28  ;;  %v2151_v29 = vsub.f32 1.0, %v2150_v61 }
 0x2fd   :  { %v5963_v11 = vpop.eup %5962  ;;  %v2278_v46 = vmul.f32 %v5961_v63, %v7776_v18  ;;  %v2160_v34 = vand.u32 2147483648, %v7729_v36  ;;  %vm2282_vm9 = vweird.f32 %v7776_v18  ;;  %5972 = vtanh.f32 %v2248_v20  ;;  %vm7848_vm3 = vmor %vm2109_vm10, %vm2110_vm8 }
 0x2fe   :  { %v5965_v2 = vpop.eup %5964  ;;  %v7813_v8 = vadd.f32 %v2169_v16, %v2167_v38  ;;  %v2303_v31 = vand.u32 2147483648, %v7787_v6  ;;  %v2286_v58 = vand.u32 2147483647, %v7776_v18  ;;  %v2288_v1 = vand.u32 2147483648, %v7776_v18 }
 0x2ff   :  { %v2279_v56 = vsub.f32 1.0, %v2278_v46  ;;  %v2293_v39 = vmul.f32 %v5965_v2, %v7787_v6  ;;  %5974 = vpow2.f32 %v5573_v5  ;;  %v5967_v19 = vpop.eup %5966  ;;  %v7820_v54 = vadd.f32 1.0, %v5963_v11 }
 0x300   :  { %vm2283_vm11 = vweird.f32 %v5961_v63  ;;  %v2152_v57 = vmul.f32 %v7789_v49, %v2151_v29  ;;  %vm2297_vm12 = vweird.f32 %v7787_v6  ;;  %v2301_v21 = vand.u32 2147483647, %v7787_v6  ;;  %v2234_v46 = vpop.f32.mrf.mxu3 }
 0x301   :  { %v2294_v52 = vsub.f32 1.0, %v2293_v39  ;;  %v2280_v24 = vmul.f32 %v5961_v63, %v2279_v56  ;;  %v7825_v51 = vadd.f32 1.0, %v5967_v19  ;;  %v5969_v12 = vpop.eup %5968  ;;  %5976 = vtanh.f32 %v7813_v8  ;;  %vm2284_vm14 = vmor %vm2282_vm9, %vm2283_vm11 }
 0x302   :  { %vm2298_vm13 = vweird.f32 %v5965_v2  ;;  %v5971_v61 = vpop.eup %5970  ;;  %vm2287_vm15 = vcmp.eq.f32.partialorder %v2286_v58, 8.507059e+37  ;;  %v2289_v50 = vor.u32 1.1754944e-38, %v2288_v1  ;;  %v7831_v38 = vadd.f32 1.0, %v5969_v12 }
 0x303   :  { %v2295_v15 = vmul.f32 %v5965_v2, %v2294_v52  ;;  %v2281_v43 = vadd.f32 %v5961_v63, %v2280_v24  ;;  %5978 = vrcp.f32 %v7825_v51  ;;  %v5973_v16 = vpop.eup %5972  ;;  %v2304_v20 = vor.u32 1.1754944e-38, %v2303_v31  ;;  %vm2299_vm0 = vmor %vm2297_vm12, %vm2298_vm13 }
 0x304   :  { %5980 = vrcp.f32 %v7820_v54  ;;  %vm2302_vm1 = vcmp.eq.f32.partialorder %v2301_v21, 8.507059e+37  ;;  %v2108_v56 = vadd.f32 %v7758_v7, %v2107_v62  ;;  %v2153_v31 = vadd.f32 %v7789_v49, %v2152_v57 }
 0x305   :  { %v2285_v5 = vsel %vm2284_vm14, %v5961_v63, %v2281_v43  ;;  %v2296_v11 = vadd.f32 %v5965_v2, %v2295_v15  ;;  %v5975_v29 = vpop.eup %5974  ;;  %5982 = vrcp.f32 %v7831_v38  ;;  %vm2155_vm2 = vweird.f32 %v7789_v49 }
 0x306   :  { %v2290_v18 = vsel %vm2287_vm15, %v2289_v50, %v2285_v5  ;;  %v7841_v1 = vadd.f32 1.0, %v5975_v29  ;;  %v2252_v19 = vadd.f32 %v2244_v10, %v2234_v46  ;;  %v2113_v52 = vand.u32 2147483647, %v7696_v44 }
 0x307   :  { %v2300_v39 = vsel %vm2299_vm0, %v5965_v2, %v2296_v11  ;;  %v2371_v58 = vmul.f32 %v5973_v16, %v2290_v18  ;;  %v5977_v6 = vpop.eup %5976  ;;  %vm2154_vm4 = vweird.f32 %v7729_v36  ;;  %v2158_v2 = vand.u32 2147483647, %v7729_v36 }
 0x308   :  { %v2305_v63 = vsel %vm2302_vm1, %v2304_v20, %v2300_v39  ;;  %5984 = vrcp.f32 %v7841_v1  ;;  %v2112_v10 = vsel %vm7848_vm3, %v7758_v7, %v2108_v56  ;;  %vm7859_vm5 = vmor %vm2154_vm4, %vm2155_vm2  ;;  %v2116_v15 = vor.u32 1.1754944e-38, %v2115_v55 }
 0x309   :  { %v2369_v62 = vmul.f32 %v2305_v63, %v7490_v53  ;;  %v5979_v57 = vpop.eup %5978  ;;  %v2157_v50 = vsel %vm7859_vm5, %v7789_v49, %v2153_v31  ;;  %5986 = vtanh.f32 %v2252_v19  ;;  %vm2114_vm6 = vcmp.eq.f32.partialorder %v2113_v52, 8.507059e+37 }
 0x30a   :  { %v7863_v12 = vpop.eup %5980  ;;  %v2323_v53 = vmul.f32 %v5979_v57, %v7825_v51  ;;  %v2161_v7 = vor.u32 1.1754944e-38, %v2160_v34  ;;  %v2117_v11 = vsel %vm2114_vm6, %v2116_v15, %v2112_v10  ;;  %vm2159_vm7 = vcmp.eq.f32.partialorder %v2158_v2, 8.507059e+37 }
 0x30b   :  { %v7867_v43 = vadd.f32 %v2371_v58, %v2369_v62  ;;  %v5983_v16 = vpop.eup %5982  ;;  %v2308_v44 = vmul.f32 %v7863_v12, %v7820_v54  ;;  %v2331_v55 = vand.u32 2147483647, %v7825_v51  ;;  %v2333_v46 = vand.u32 2147483648, %v7825_v51 }
 0x30c   :  { %v2324_v20 = vsub.f32 1.0, %v2323_v53  ;;  %v2338_v5 = vmul.f32 %v5983_v16, %v7831_v38  ;;  %v2162_v29 = vsel %vm2159_vm7, %v2161_v7, %v2157_v50  ;;  %vm2328_vm8 = vweird.f32 %v5979_v57 }
 0x30d   :  { %v2175_v56 = vmul.f32 %v5977_v6, %v2162_v29  ;;  %v2348_v36 = vand.u32 2147483648, %v7831_v38  ;;  %vm2327_vm9 = vweird.f32 %v7825_v51  ;;  %v2346_v34 = vand.u32 2147483647, %v7831_v38 }
 0x30e   :  { %v2339_v49 = vsub.f32 1.0, %v2338_v5  ;;  %v2325_v18 = vmul.f32 %v5979_v57, %v2324_v20  ;;  %v7880_v39 = vpop.eup %5984  ;;  %v2174_v58 = vmul.f32 %v5971_v61, %v2117_v11  ;;  %vm2343_vm10 = vweird.f32 %v5983_v16  ;;  %vm2329_vm12 = vmor %vm2327_vm9, %vm2328_vm8 }
 0x30f   :  { %v2353_v63 = vmul.f32 %v7880_v39, %v7841_v1  ;;  %v5987_v52 = vpop.eup %5986  ;;  %v2309_v24 = vsub.f32 1.0, %v2308_v44  ;;  %vm2342_vm11 = vweird.f32 %v7831_v38  ;;  %v2334_v6 = vor.u32 1.1754944e-38, %v2333_v46  ;;  %v10323_v44 = vld [vmem:[#allocation80_spill] sm:$0xff] }
 0x310   :  { %v2340_v31 = vmul.f32 %v5983_v16, %v2339_v49  ;;  %v2326_v19 = vadd.f32 %v5979_v57, %v2325_v18  ;;  %v2380_v62 = vpack.c.bf16 %v2175_v56, %v2174_v58  ;;  %vm2332_vm13 = vcmp.eq.f32.partialorder %v2331_v55, 8.507059e+37  ;;  %vm2344_vm14 = vmor %vm2342_vm11, %vm2343_vm10 }
 0x311   :  { %v2354_v2 = vsub.f32 1.0, %v2353_v63  ;;  %v2349_v21 = vor.u32 1.1754944e-38, %v2348_v36  ;;  %vm2347_vm15 = vcmp.eq.f32.partialorder %v2346_v34, 8.507059e+37  ;;  %v2310_v50 = vmul.f32 %v7863_v12, %v2309_v24  ;;  %v10302_v63 = vld [vmem:[#allocation28_spill] sm:$0xff]  ;;  %v10305_v24 = vld [vmem:[#allocation31_spill] sm:$0xff] }
 0x312   :  { %v2330_v10 = vsel %vm2329_vm12, %v5979_v57, %v2326_v19  ;;  %v2341_v51 = vadd.f32 %v5983_v16, %v2340_v31  ;;  %2389 = vmatmul.bf16.vlgmr.msra.gmra.mxu0 %v2380_v62  ;;  %2403 = vmatmul.bf16.vlgmr.msra.gmra.mxu1 %v2380_v62  ;;  %vm2313_vm0 = vweird.f32 %v7863_v12  ;;  %5988 = vtanh.f32 %v7867_v43  ;;  %v10301_v31 = vld [vmem:[#allocation27_spill] sm:$0xff]  ;;  %v10303_v19 = vld [vmem:[#allocation29_spill] sm:$0xff] }
 0x313   :  { %v2335_v61 = vsel %vm2332_vm13, %v2334_v6, %v2330_v10  ;;  %2417 = vmatmul.bf16.vlgmr.msra.gmra.mxu2 %v2380_v62  ;;  %2431 = vmatmul.bf16.vlgmr.msra.gmra.mxu3 %v2380_v62  ;;  %v2355_v38 = vmul.f32 %v7880_v39, %v2354_v2  ;;  %v2311_v20 = vadd.f32 %v7863_v12, %v2310_v50  ;;  %vm2358_vm1 = vweird.f32 %v7880_v39  ;;  %v10306_v6 = vld [vmem:[#allocation32_spill] sm:$0xff]  ;;  %v10307_v62 = vld [vmem:[#allocation33_spill] sm:$0xff]  ;;  %v10308_v2 = vld [vmem:[#allocation34_spill] sm:$0xff] }
 0x314   :  { %v2345_v15 = vsel %vm2344_vm14, %v5983_v16, %v2341_v51  ;;  %v2372_v53 = vmul.f32 %v5987_v52, %v2335_v61  ;;  %2632 = vmatpush.bf16.msra.mxu0 %v6644_v37  ;;  %2646 = vmatpush.bf16.msra.mxu1 %v6646_v41  ;;  %vm2312_vm2 = vweird.f32 %v7820_v54  ;;  %v2363_v11 = vand.u32 2147483648, %v7841_v1  ;;  %v10304_v52 = vld [vmem:[#allocation30_spill] sm:$0xff]  ;;  %v10309_v10 = vld [vmem:[#allocation61_spill] sm:$0xff] }
 0x315   :  { %v2350_v7 = vsel %vm2347_vm15, %v2349_v21, %v2345_v15  ;;  %2660 = vmatpush.bf16.msra.mxu2 %v6648_v47  ;;  %2674 = vmatpush.bf16.msra.mxu3 %v6651_v48  ;;  %v2356_v5 = vadd.f32 %v7880_v39, %v2355_v38  ;;  %vm7910_vm3 = vmor %vm2312_vm2, %vm2313_vm0  ;;  %v2316_v55 = vand.u32 2147483647, %v7820_v54  ;;  %vm2357_vm4 = vweird.f32 %v7841_v1  ;;  %v10310_v51 = vld [vmem:[#allocation62_spill] sm:$0xff]  ;;  %v10311_v21 = vld [vmem:[#allocation63_spill] sm:$0xff] }
 0x316   :  { %v2370_v57 = vmul.f32 %v2350_v7, %v7533_v33  ;;  %v2318_v33 = vand.u32 2147483648, %v7820_v54  ;;  %v2361_v46 = vand.u32 2147483647, %v7841_v1  ;;  %vm2359_vm5 = vmor %vm2357_vm4, %vm2358_vm1  ;;  %v2315_v29 = vsel %vm7910_vm3, %v7863_v12, %v2311_v20  ;;  %v10312_v61 = vld [vmem:[#allocation65_spill] sm:$0xff]  ;;  %v10313_v15 = vld [vmem:[#allocation67_spill] sm:$0xff] }
 0x317   :  { %v2360_v49 = vsel %vm2359_vm5, %v7880_v39, %v2356_v5  ;;  %v2364_v36 = vor.u32 1.1754944e-38, %v2363_v11  ;;  %vm2317_vm6 = vcmp.eq.f32.partialorder %v2316_v55, 8.507059e+37  ;;  %v10315_v50 = vld [vmem:[#allocation69_spill] sm:$0xff]  ;;  %v10316_v38 = vld [vmem:[#allocation70_spill] sm:$0xff]  ;;  %v10317_v7 = vld [vmem:[#allocation72_spill] sm:$0xff] }
 0x318   :  { %v7897_v16 = vadd.f32 %v2372_v53, %v2370_v57  ;;  %2633 = vmatpush.bf16.msra.mxu0 %v10195_v32  ;;  %2647 = vmatpush.bf16.msra.mxu1 %v10196_v25  ;;  %v5989_v18 = vpop.eup %5988  ;;  %v2319_v56 = vor.u32 1.1754944e-38, %v2318_v33  ;;  %vm2362_vm7 = vcmp.eq.f32.partialorder %v2361_v46, 8.507059e+37  ;;  %v10314_v53 = vld [vmem:[#allocation68_spill] sm:$0xff]  ;;  %v10318_v57 = vld [vmem:[#allocation73_spill] sm:$0xff]  ;;  %v10319_v20 = vld [vmem:[#allocation74_spill] sm:$0xff] }
 0x319   :  { %2661 = vmatpush.bf16.msra.mxu2 %v10197_v23  ;;  %2675 = vmatpush.bf16.msra.mxu3 %v6663_v59  ;;  %v2365_v34 = vsel %vm2362_vm7, %v2364_v36, %v2360_v49  ;;  %v10320_v5 = vld [vmem:[#allocation75_spill] sm:$0xff]  ;;  %v10321_v33 = vld [vmem:[#allocation78_spill] sm:$0xff]  ;;  %v10327_v49 = vld [vmem:[#allocation85_spill] sm:$0xff] }
 0x31a   :  { %5990 = vtanh.f32 %v7897_v16  ;;  %v2320_v1 = vsel %vm2317_vm6, %v2319_v56, %v2315_v29  ;;  %v10322_v11 = vld [vmem:[#allocation79_spill] sm:$0xff]  ;;  %v10324_v55 = vld [vmem:[#allocation82_spill] sm:$0xff]  ;;  %v10326_v29 = vld [vmem:[#allocation84_spill] sm:$0xff] }
 0x31b   :  { %v2377_v58 = vmul.f32 %v5989_v18, %v2320_v1  ;;  %v10325_v46 = vld [vmem:[#allocation83_spill] sm:$0xff]  ;;  %v10329_v56 = vld [vmem:[#allocation89_spill] sm:$0xff]  ;;  %v10330_v36 = vld [vmem:[#allocation90_spill] sm:$0xff] }
 0x31c   :  { %2634 = vmatpush.bf16.msra.mxu0 %v6665_v60  ;;  %2648 = vmatpush.bf16.msra.mxu1 %v6668_v0  ;;  %v10328_v18 = vld [vmem:[#allocation87_spill] sm:$0xff]  ;;  %v10332_v1 = vld [vmem:[#allocation92_spill] sm:$0xff] }
 0x31d   :  { %2662 = vmatpush.bf16.msra.mxu2 %v6671_v3  ;;  %2676 = vmatpush.bf16.msra.mxu3 %v6675_v4 }
 0x320   :  { %v5991_v54 = vpop.eup %5990  ;;  %2635 = vmatpush.bf16.msra.mxu0 %v6680_v9  ;;  %2649 = vmatpush.bf16.msra.mxu1 %v6682_v13 }
 0x321   :  { %v2378_v12 = vmul.f32 %v5991_v54, %v2365_v34  ;;  %2663 = vmatpush.bf16.msra.mxu2 %v6684_v14  ;;  %2677 = vmatpush.bf16.msra.mxu3 %v6687_v17  ;;  %v10331_v54 = vld [vmem:[#allocation91_spill] sm:$0xff]  ;;  %v10333_v34 = vld [vmem:[#allocation94_spill] sm:$0xff] }
 0x323   :  { %v2379_v39 = vpack.c.bf16 %v2378_v12, %v2377_v58  ;;  %v10334_v58 = vld [vmem:[#allocation95_spill] sm:$0xff]  ;;  %v10335_v12 = vld [vmem:[#allocation96_spill] sm:$0xff] }
 0x324   :  { %2636 = vmatpush.bf16.msra.mxu0 %v6692_v22  ;;  %2650 = vmatpush.bf16.msra.mxu1 %v6694_v26 }
 0x325   :  { %2445 = vmatmul.bf16.vlgmr.msrb.gmra.mxu0 %v2379_v39  ;;  %2459 = vmatmul.bf16.vlgmr.msrb.gmra.mxu1 %v2379_v39 }
 0x326   :  { %2473 = vmatmul.bf16.vlgmr.msrb.gmra.mxu2 %v2379_v39  ;;  %2487 = vmatmul.bf16.vlgmr.msrb.gmra.mxu3 %v2379_v39 }
 0x327   :  { %2664 = vmatpush.bf16.msra.mxu2 %v6696_v27  ;;  %2678 = vmatpush.bf16.msra.mxu3 %v6699_v30 }
 0x328   :  { %2637 = vmatpush.bf16.msra.mxu0 %v6704_v35  ;;  %2651 = vmatpush.bf16.msra.mxu1 %v6706_v40 }
 0x32b   :  { %2665 = vmatpush.bf16.msra.mxu2 %v6708_v42  ;;  %2679 = vmatpush.bf16.msra.mxu3 %v6711_v45 }
 0x32c   :  { %2638 = vmatpush.bf16.msra.mxu0 %v10301_v31  ;;  %2652 = vmatpush.bf16.msra.mxu1 %v10302_v63 }
 0x32f   :  { %2666 = vmatpush.bf16.msra.mxu2 %v10303_v19  ;;  %2680 = vmatpush.bf16.msra.mxu3 %v10304_v52 }
 0x330   :  { %2639 = vmatpush.bf16.msra.mxu0 %v10305_v24  ;;  %2653 = vmatpush.bf16.msra.mxu1 %v10306_v6 }
 0x333   :  { %2667 = vmatpush.bf16.msra.mxu2 %v10307_v62  ;;  %2681 = vmatpush.bf16.msra.mxu3 %v10308_v2 }
 0x334   :  { %2832 = vmatpush.bf16.msrb.mxu0 %v10309_v10  ;;  %2846 = vmatpush.bf16.msrb.mxu1 %v10310_v51  ;;  %v10379_v51 = vld [vmem:[#allocation53_spill] sm:$0xff] }
 0x335   :  { %2640 = vmatmul.bf16.vlgmr.msra.gmra.mxu0 %v2379_v39  ;;  %2654 = vmatmul.bf16.vlgmr.msra.gmra.mxu1 %v2379_v39  ;;  %v10380_v10 = vld [vmem:[#allocation37_spill] sm:$0xff] }
 0x336   :  { %2668 = vmatmul.bf16.vlgmr.msra.gmra.mxu2 %v2379_v39  ;;  %2682 = vmatmul.bf16.vlgmr.msra.gmra.mxu3 %v2379_v39  ;;  %v10336_v39 = vld [vmem:[#allocation97_spill] sm:$0xff] }
 0x337   :  { %2860 = vmatpush.bf16.msrb.mxu2 %v10311_v21  ;;  %2874 = vmatpush.bf16.msrb.mxu3 %v10312_v61  ;;  %v10375_v61 = vld [vmem:[#allocation147_spill] sm:$0xff] }
 0x338   :  { %2833 = vmatpush.bf16.msrb.mxu0 %v10313_v15  ;;  %2847 = vmatpush.bf16.msrb.mxu1 %v10314_v53 }
 0x33b   :  { %2861 = vmatpush.bf16.msrb.mxu2 %v10315_v50  ;;  %2875 = vmatpush.bf16.msrb.mxu3 %v10316_v38 }
 0x33c   :  { %2834 = vmatpush.bf16.msrb.mxu0 %v10317_v7  ;;  %2848 = vmatpush.bf16.msrb.mxu1 %v10318_v57 }
 0x33f   :  { %2862 = vmatpush.bf16.msrb.mxu2 %v10319_v20  ;;  %2876 = vmatpush.bf16.msrb.mxu3 %v10320_v5 }
 0x340   :  { %2835 = vmatpush.bf16.msrb.mxu0 %v10321_v33  ;;  %2849 = vmatpush.bf16.msrb.mxu1 %v10322_v11 }
 0x343   :  { %2863 = vmatpush.bf16.msrb.mxu2 %v10323_v44  ;;  %2877 = vmatpush.bf16.msrb.mxu3 %v10324_v55 }
 0x344   :  { %2836 = vmatpush.bf16.msrb.mxu0 %v10325_v46  ;;  %2850 = vmatpush.bf16.msrb.mxu1 %v10326_v29  ;;  %v10337_v29 = vld [vmem:[#allocation100_spill] sm:$0xff] }
 0x347   :  { %2864 = vmatpush.bf16.msrb.mxu2 %v10327_v49  ;;  %2878 = vmatpush.bf16.msrb.mxu3 %v10328_v18  ;;  %v10338_v49 = vld [vmem:[#allocation102_spill] sm:$0xff]  ;;  %v10339_v18 = vld [vmem:[#allocation105_spill] sm:$0xff] }
 0x348   :  { %2837 = vmatpush.bf16.msrb.mxu0 %v10329_v56  ;;  %2851 = vmatpush.bf16.msrb.mxu1 %v10330_v36  ;;  %v10340_v56 = vld [vmem:[#allocation106_spill] sm:$0xff]  ;;  %v10341_v36 = vld [vmem:[#allocation103_spill] sm:$0xff] }
 0x34b   :  { %2865 = vmatpush.bf16.msrb.mxu2 %v10331_v54  ;;  %2879 = vmatpush.bf16.msrb.mxu3 %v10332_v1  ;;  %v10342_v54 = vld [vmem:[#allocation104_spill] sm:$0xff]  ;;  %v10343_v1 = vld [vmem:[#allocation107_spill] sm:$0xff] }
 0x34c   :  { %2838 = vmatpush.bf16.msrb.mxu0 %v10333_v34  ;;  %2852 = vmatpush.bf16.msrb.mxu1 %v10334_v58  ;;  %v10344_v34 = vld [vmem:[#allocation109_spill] sm:$0xff]  ;;  %v10345_v58 = vld [vmem:[#allocation112_spill] sm:$0xff] }
 0x34f   :  { %2866 = vmatpush.bf16.msrb.mxu2 %v10335_v12  ;;  %2880 = vmatpush.bf16.msrb.mxu3 %v10336_v39  ;;  %v10346_v12 = vld [vmem:[#allocation113_spill] sm:$0xff]  ;;  %v10347_v39 = vld [vmem:[#allocation114_spill] sm:$0xff] }
 0x350   :  { %2839 = vmatpush.bf16.msrb.mxu0 %v10337_v29  ;;  %2853 = vmatpush.bf16.msrb.mxu1 %v10338_v49  ;;  %v10348_v29 = vld [vmem:[#allocation115_spill] sm:$0xff]  ;;  %v10349_v49 = vld [vmem:[#allocation118_spill] sm:$0xff] }
 0x353   :  { %2867 = vmatpush.bf16.msrb.mxu2 %v10341_v36  ;;  %2881 = vmatpush.bf16.msrb.mxu3 %v10342_v54  ;;  %v10352_v36 = vld [vmem:[#allocation122_spill] sm:$0xff]  ;;  %v10353_v54 = vld [vmem:[#allocation123_spill] sm:$0xff] }
 0x354   :  { %2888 = vmatpush.bf16.msra.mxu0 %v10339_v18  ;;  %2902 = vmatpush.bf16.msra.mxu1 %v10340_v56  ;;  %v10350_v18 = vld [vmem:[#allocation119_spill] sm:$0xff]  ;;  %v10351_v56 = vld [vmem:[#allocation120_spill] sm:$0xff] }
 0x357   :  { %2916 = vmatpush.bf16.msra.mxu2 %v10343_v1  ;;  %2930 = vmatpush.bf16.msra.mxu3 %v10344_v34  ;;  %v10354_v1 = vld [vmem:[#allocation124_spill] sm:$0xff]  ;;  %v10355_v34 = vld [vmem:[#allocation125_spill] sm:$0xff] }
 0x358   :  { %2889 = vmatpush.bf16.msra.mxu0 %v10345_v58  ;;  %2903 = vmatpush.bf16.msra.mxu1 %v10346_v12  ;;  %v10356_v58 = vld [vmem:[#allocation127_spill] sm:$0xff]  ;;  %v10357_v12 = vld [vmem:[#allocation128_spill] sm:$0xff] }
 0x35b   :  { %2917 = vmatpush.bf16.msra.mxu2 %v10347_v39  ;;  %2931 = vmatpush.bf16.msra.mxu3 %v10348_v29  ;;  %v10358_v39 = vld [vmem:[#allocation129_spill] sm:$0xff]  ;;  %v10359_v29 = vld [vmem:[#allocation130_spill] sm:$0xff] }
 0x35c   :  { %2890 = vmatpush.bf16.msra.mxu0 %v10349_v49  ;;  %2904 = vmatpush.bf16.msra.mxu1 %v10350_v18  ;;  %v10360_v49 = vld [vmem:[#allocation131_spill] sm:$0xff]  ;;  %v10361_v18 = vld [vmem:[#allocation133_spill] sm:$0xff] }
 0x35f   :  { %2918 = vmatpush.bf16.msra.mxu2 %v10351_v56  ;;  %2932 = vmatpush.bf16.msra.mxu3 %v10352_v36  ;;  %v10362_v56 = vld [vmem:[#allocation134_spill] sm:$0xff]  ;;  %v10363_v36 = vld [vmem:[#allocation135_spill] sm:$0xff] }
 0x360   :  { %2891 = vmatpush.bf16.msra.mxu0 %v10353_v54  ;;  %2905 = vmatpush.bf16.msra.mxu1 %v10354_v1  ;;  %v10364_v54 = vld [vmem:[#allocation136_spill] sm:$0xff]  ;;  %v10365_v1 = vld [vmem:[#allocation137_spill] sm:$0xff] }
 0x363   :  { %2919 = vmatpush.bf16.msra.mxu2 %v10355_v34  ;;  %2933 = vmatpush.bf16.msra.mxu3 %v10356_v58  ;;  %v10366_v34 = vld [vmem:[#allocation138_spill] sm:$0xff]  ;;  %v10367_v58 = vld [vmem:[#allocation139_spill] sm:$0xff] }
 0x364   :  { %2892 = vmatpush.bf16.msra.mxu0 %v10357_v12  ;;  %2906 = vmatpush.bf16.msra.mxu1 %v10358_v39  ;;  %v10368_v12 = vld [vmem:[#allocation140_spill] sm:$0xff]  ;;  %v10369_v39 = vld [vmem:[#allocation141_spill] sm:$0xff] }
 0x367   :  { %2920 = vmatpush.bf16.msra.mxu2 %v10359_v29  ;;  %2934 = vmatpush.bf16.msra.mxu3 %v10360_v49  ;;  %v10370_v29 = vld [vmem:[#allocation142_spill] sm:$0xff]  ;;  %v10371_v49 = vld [vmem:[#allocation143_spill] sm:$0xff] }
 0x368   :  { %2893 = vmatpush.bf16.msra.mxu0 %v10361_v18  ;;  %2907 = vmatpush.bf16.msra.mxu1 %v10362_v56  ;;  %v10372_v18 = vld [vmem:[#allocation144_spill] sm:$0xff] }
 0x36b   :  { %2921 = vmatpush.bf16.msra.mxu2 %v10363_v36  ;;  %2935 = vmatpush.bf16.msra.mxu3 %v10364_v54 }
 0x36c   :  { %2894 = vmatpush.bf16.msra.mxu0 %v10365_v1  ;;  %2908 = vmatpush.bf16.msra.mxu1 %v10366_v34 }
 0x36f   :  { %2922 = vmatpush.bf16.msra.mxu2 %v10367_v58  ;;  %2936 = vmatpush.bf16.msra.mxu3 %v10368_v12 }
 0x370   :  { %2895 = vmatpush.bf16.msra.mxu0 %v10369_v39  ;;  %2909 = vmatpush.bf16.msra.mxu1 %v10370_v29  ;;  %v10373_v39 = vld [vmem:[#allocation145_spill] sm:$0xff]  ;;  %v10374_v29 = vld [vmem:[#allocation146_spill] sm:$0xff] }
 0x373   :  { %2923 = vmatpush.bf16.msra.mxu2 %v10371_v49  ;;  %2937 = vmatpush.bf16.msra.mxu3 %v10372_v18 }
 0x38f   :  { %v2390_v56 = vpop.f32.mrf.mxu0  ;;  %v2404_v36 = vpop.f32.mrf.mxu1 }
 0x396   :  { %v2418_v46 = vpop.f32.mrf.mxu2  ;;  %v2432_v1 = vpop.f32.mrf.mxu3 }
 0x397   :  { %v2392_v54 = vpop.f32.mrf.mxu0  ;;  %v2406_v55 = vpop.f32.mrf.mxu1 }
 0x39e   :  { %v2420_v44 = vpop.f32.mrf.mxu2  ;;  %v8009_v12 = vpop.f32.mrf.mxu3 }
 0x3a2   :  { %v2446_v34 = vpop.f32.mrf.mxu0  ;;  %v2460_v11 = vpop.f32.mrf.mxu1 }
 0x3a3   :  { %v2447_v58 = vadd.f32 %v2446_v34, %v2390_v56  ;;  %v2461_v33 = vadd.f32 %v2460_v11, %v2404_v36 }
 0x3a5   :  { %v2493_v5 = vadd.f32 %v2447_v58, %v10373_v39  ;;  %v2494_v20 = vadd.f32 %v2461_v33, %v10374_v29  ;;  %v10376_v33 = vld [vmem:[#allocation35_spill] sm:$0xff] }
 0x3a7   :  { %v5574_v49 = vmul.f32 -1.442695, %v2493_v5  ;;  %v5575_v57 = vmul.f32 -1.442695, %v2494_v20  ;;  %v10377_v5 = vld [vmem:[#allocation52_spill] sm:$0xff] }
 0x3a8   :  { %v445_v20 = vadd.f32 %v10377_v5, %v10376_v33 }
 0x3a9   :  { %5992 = vpow2.f32 %v5574_v49  ;;  %v2474_v18 = vpop.f32.mrf.mxu2  ;;  %v2488_v34 = vpop.f32.mrf.mxu3  ;;  %v10378_v49 = vld [vmem:[#allocation36_spill] sm:$0xff] }
 0x3aa   :  { %5994 = vpow2.f32 %v5575_v57  ;;  %v2475_v7 = vadd.f32 %v2474_v18, %v2418_v46  ;;  %v2448_v38 = vpop.f32.mrf.mxu0  ;;  %v2462_v50 = vpop.f32.mrf.mxu1  ;;  %v494_v57 = vadd.f32 %v10379_v51, %v10378_v49 }
 0x3ab   :  { %v2449_v53 = vadd.f32 %v2448_v38, %v2392_v54  ;;  %v2463_v15 = vadd.f32 %v2462_v50, %v2406_v55  ;;  %v10381_v38 = vld [vmem:[#allocation55_spill] sm:$0xff] }
 0x3ac   :  { %v2495_v21 = vadd.f32 %v2475_v7, %v10375_v61  ;;  %v543_v50 = vadd.f32 %v10381_v38, %v10380_v10  ;;  %v10382_v7 = vld [vmem:[#allocation38_spill] sm:$0xff]  ;;  %v8030_v51 = vpack.c.bf16 %v494_v57, %v445_v20 }
 0x3ad   :  { %v2497_v11 = vadd.f32 %v2449_v53, %v10373_v39  ;;  %v2498_v56 = vadd.f32 %v2463_v15, %v10374_v29  ;;  %v10383_v15 = vld [vmem:[#allocation56_spill] sm:$0xff]  ;;  %v2489_v29 = vadd.f32 %v2488_v34, %v2432_v1  ;;  %v10385_v1 = vld [vmem:[#allocation51_spill] sm:$0xff]  ;;  %v10386_v10 = vld [vmem:[#allocation54_spill] sm:$0xff] }
 0x3ae   :  { %v5576_v36 = vmul.f32 -1.442695, %v2495_v21  ;;  %v592_v21 = vadd.f32 %v10383_v15, %v10382_v7  ;;  %v2688_v34 = vunpack.c.l.bf16 %v10385_v1  ;;  %v2690_v49 = vunpack.c.l.bf16 %v10386_v10 }
 0x3af   :  { %v5993_v58 = vpop.eup %5992  ;;  %v5577_v46 = vmul.f32 -1.442695, %v2497_v11  ;;  %v5578_v53 = vmul.f32 -1.442695, %v2498_v56 }
 0x3b0   :  { %v5995_v18 = vpop.eup %5994  ;;  %v8022_v55 = vadd.f32 1.0, %v5993_v58  ;;  %5996 = vpow2.f32 %v5576_v36  ;;  %v8032_v58 = vpack.c.bf16 %v592_v21, %v543_v50  ;;  %v10384_v36 = vld [vmem:[#allocation40_spill] sm:$0xff] }
 0x3b1   :  { %v8026_v54 = vadd.f32 1.0, %v5995_v18  ;;  %5998 = vpow2.f32 %v5577_v46  ;;  %v2476_v5 = vpop.f32.mrf.mxu2  ;;  %v2496_v56 = vadd.f32 %v2489_v29, %v10384_v36  ;;  %v2689_v46 = vunpack.c.h.bf16 %v10385_v1  ;;  %v2490_v39 = vpop.f32.mrf.mxu3 }
 0x3b2   :  { %6000 = vrcp.f32 %v8022_v55  ;;  %v2477_v11 = vadd.f32 %v2476_v5, %v2420_v44  ;;  %v2641_v18 = vpop.f32.mrf.mxu0  ;;  %v2655_v57 = vpop.f32.mrf.mxu1  ;;  %vm2530_vm8 = vweird.f32 %v8022_v55 }
 0x3b3   :  { %6002 = vrcp.f32 %v8026_v54  ;;  %v2696_v5 = vadd.f32 %v2688_v34, %v2641_v18  ;;  %v2697_v2 = vadd.f32 %v2689_v46, %v2655_v57  ;;  %v2551_v18 = vand.u32 2147483648, %v8026_v54 }
 0x3b4   :  { %6004 = vpow2.f32 %v5578_v53  ;;  %v2499_v15 = vadd.f32 %v2477_v11, %v10375_v61  ;;  %v2536_v61 = vand.u32 2147483648, %v8022_v55  ;;  %v2549_v62 = vand.u32 2147483647, %v8026_v54 }
 0x3b5   :  { %6006 = vtanh.f32 %v2496_v56  ;;  %v5580_v6 = vmul.f32 -1.442695, %v2696_v5  ;;  %vm2545_vm9 = vweird.f32 %v8026_v54  ;;  %v2552_v5 = vor.u32 1.1754944e-38, %v2551_v18 }
 0x3b6   :  { %v5997_v38 = vpop.eup %5996  ;;  %v5579_v44 = vmul.f32 -1.442695, %v2499_v15  ;;  %v2534_v15 = vand.u32 2147483647, %v8022_v55  ;;  %vm8078_vm13 = vcmp.eq.f32.partialorder %v2549_v62, 8.507059e+37 }
 0x3b7   :  { %v5999_v7 = vpop.eup %5998  ;;  %v8058_v34 = vadd.f32 1.0, %v5997_v38  ;;  %v2491_v38 = vadd.f32 %v2490_v39, %v8009_v12 }
 0x3b8   :  { %v8039_v33 = vpop.eup %6000  ;;  %v8041_v20 = vadd.f32 1.0, %v5999_v7  ;;  %vm8066_vm10 = vcmp.eq.f32.partialorder %v2534_v15, 8.507059e+37 }
 0x3b9   :  { %v8045_v53 = vpop.eup %6002  ;;  %v2526_v21 = vmul.f32 %v8039_v33, %v8022_v55  ;;  %vm2531_vm11 = vweird.f32 %v8039_v33  ;;  %v2500_v18 = vadd.f32 %v2491_v38, %v10384_v36 }
 0x3ba   :  { %v6005_v1 = vpop.eup %6004  ;;  %v2541_v7 = vmul.f32 %v8045_v53, %v8026_v54  ;;  %6008 = vrcp.f32 %v8041_v20  ;;  %vm2546_vm12 = vweird.f32 %v8045_v53  ;;  %vm8087_vm14 = vmor %vm2530_vm8, %vm2531_vm11  ;;  %vm2575_vm15 = vweird.f32 %v8041_v20  ;;  %v2643_v19 = vpop.f32.mrf.mxu0 }
 0x3bb   :  { %v2527_v29 = vsub.f32 1.0, %v2526_v21  ;;  %v8055_v50 = vadd.f32 1.0, %v6005_v1  ;;  %6010 = vpow2.f32 %v5579_v44  ;;  %v6007_v44 = vpop.eup %6006  ;;  %v5581_v1 = vmul.f32 -1.442695, %v2697_v2  ;;  %vm8100_vm0 = vmor %vm2545_vm9, %vm2546_vm12 }
 0x3bc   :  { %v2542_v56 = vsub.f32 1.0, %v2541_v7  ;;  %v2669_v7 = vpop.f32.mrf.mxu2  ;;  %v2579_v2 = vand.u32 2147483647, %v8041_v20  ;;  %v2581_v62 = vand.u32 2147483648, %v8041_v20 }
 0x3bd   :  { %v2528_v11 = vmul.f32 %v8039_v33, %v2527_v29  ;;  %6012 = vrcp.f32 %v8055_v50  ;;  %v2537_v29 = vor.u32 1.1754944e-38, %v2536_v61  ;;  %v2698_v38 = vadd.f32 %v2690_v49, %v2669_v7 }
 0x3be   :  { %v2543_v21 = vmul.f32 %v8045_v53, %v2542_v56  ;;  %6014 = vrcp.f32 %v8058_v34  ;;  %vm2590_vm1 = vweird.f32 %v8055_v50  ;;  %v2596_v54 = vand.u32 2147483648, %v8055_v50 }
 0x3bf   :  { %v2529_v57 = vadd.f32 %v8039_v33, %v2528_v11  ;;  %6016 = vpow2.f32 %v5580_v6  ;;  %vm8116_vm3 = vcmp.eq.f32.partialorder %v2579_v2, 8.507059e+37  ;;  %v2594_v7 = vand.u32 2147483647, %v8055_v50 }
 0x3c0   :  { %v8073_v24 = vpop.eup %6008  ;;  %v2544_v15 = vadd.f32 %v8045_v53, %v2543_v21  ;;  %6018 = vpow2.f32 %v5581_v1  ;;  %v2582_v1 = vor.u32 1.1754944e-38, %v2581_v62  ;;  %v5582_v2 = vmul.f32 -1.442695, %v2698_v38 }
 0x3c1   :  { %v6011_v56 = vpop.eup %6010  ;;  %v2571_v39 = vmul.f32 %v8073_v24, %v8041_v20  ;;  %v2533_v55 = vsel %vm8087_vm14, %v8039_v33, %v2529_v57  ;;  %vm2576_vm2 = vweird.f32 %v8073_v24  ;;  %vm2595_vm7 = vcmp.eq.f32.partialorder %v2594_v7, 8.507059e+37 }
 0x3c2   :  { %v8091_v11 = vadd.f32 1.0, %v6011_v56  ;;  %v2548_v36 = vsel %vm8100_vm0, %v8045_v53, %v2544_v15  ;;  %v2538_v53 = vsel %vm8066_vm10, %v2537_v29, %v2533_v55  ;;  %v2657_v15 = vpop.f32.mrf.mxu1  ;;  %vm8134_vm5 = vmor %vm2575_vm15, %vm2576_vm2  ;;  %vm2560_vm10 = vweird.f32 %v8058_v34 }
 0x3c3   :  { %v6013_v21 = vpop.eup %6012  ;;  %v2572_v56 = vsub.f32 1.0, %v2571_v39  ;;  %v2553_v61 = vsel %vm8078_vm13, %v2552_v5, %v2548_v36  ;;  %v2619_v29 = vmul.f32 %v6007_v44, %v2538_v53  ;;  %v10400_v5 = vunpack.c.h.bf16 %v8030_v51 }
 0x3c4   :  { %v2586_v52 = vmul.f32 %v6013_v21, %v8055_v50  ;;  %6020 = vrcp.f32 %v8091_v11  ;;  %v8120_v49 = vpop.eup %6014  ;;  %vm2591_vm4 = vweird.f32 %v6013_v21  ;;  %v2671_v20 = vpop.f32.mrf.mxu2  ;;  %v2617_v62 = vmul.f32 %v2553_v61, %v7800_v28 }
 0x3c5   :  { %v2573_v63 = vmul.f32 %v8073_v24, %v2572_v56  ;;  %v6017_v39 = vpop.eup %6016  ;;  %v10397_v56 = vunpack.c.l.bf16 %v8030_v51  ;;  %6022 = vtanh.f32 %v2500_v18  ;;  %v2701_v12 = vadd.f32 %v10400_v5, %v2657_v15  ;;  %vm2592_vm6 = vmor %vm2590_vm1, %vm2591_vm4 }
 0x3c6   :  { %v2587_v57 = vsub.f32 1.0, %v2586_v52  ;;  %v8138_v46 = vadd.f32 1.0, %v6017_v39  ;;  %v6019_v36 = vpop.eup %6018  ;;  %v2597_v44 = vor.u32 1.1754944e-38, %v2596_v54  ;;  %v10401_v28 = vunpack.c.l.bf16 %v8032_v58 }
 0x3c7   :  { %v2574_v6 = vadd.f32 %v8073_v24, %v2573_v63  ;;  %v2700_v31 = vadd.f32 %v10397_v56, %v2643_v19  ;;  %v2556_v63 = vmul.f32 %v8120_v49, %v8058_v34  ;;  %v8149_v18 = vadd.f32 1.0, %v6019_v36 }
 0x3c8   :  { %v2588_v45 = vmul.f32 %v6013_v21, %v2587_v57  ;;  %6024 = vrcp.f32 %v8138_v46  ;;  %v2702_v57 = vadd.f32 %v10401_v28, %v2671_v20  ;;  %v2691_v61 = vunpack.c.h.bf16 %v10386_v10 }
 0x3c9   :  { %v2578_v19 = vsel %vm8134_vm5, %v8073_v24, %v2574_v6  ;;  %6026 = vpow2.f32 %v5582_v2  ;;  %v5583_v24 = vmul.f32 -1.442695, %v2700_v31  ;;  %v2557_v15 = vsub.f32 1.0, %v2556_v63 }
 0x3ca   :  { %v2589_v55 = vadd.f32 %v6013_v21, %v2588_v45  ;;  %v8151_v38 = vpop.eup %6020  ;;  %v2583_v51 = vsel %vm8116_vm3, %v2582_v1, %v2578_v19  ;;  %6028 = vrcp.f32 %v8149_v18  ;;  %v2683_v45 = vpop.f32.mrf.mxu3  ;;  %v5584_v50 = vmul.f32 -1.442695, %v2701_v12 }
 0x3cb   :  { %v6023_v6 = vpop.eup %6022  ;;  %v8162_v54 = vadd.f32 %v2619_v29, %v2617_v62  ;;  %v2601_v31 = vmul.f32 %v8151_v38, %v8091_v11  ;;  %v2699_v1 = vadd.f32 %v2691_v61, %v2683_v45  ;;  %6030 = vpow2.f32 %v5583_v24 }
 0x3cc   :  { %v2593_v53 = vsel %vm2592_vm6, %v6013_v21, %v2589_v55  ;;  %v2620_v21 = vmul.f32 %v6023_v6, %v2583_v51  ;;  %v5585_v2 = vmul.f32 -1.442695, %v2702_v57  ;;  %v2695_v56 = vunpack.c.h.bf16 %v8032_v58 }
 0x3cd   :  { %v2598_v39 = vsel %vm2595_vm7, %v2597_v44, %v2593_v53  ;;  %v2558_v36 = vmul.f32 %v8120_v49, %v2557_v15  ;;  %v2566_v10 = vand.u32 2147483648, %v8058_v34  ;;  %6032 = vpow2.f32 %v5584_v50 }
 0x3ce   :  { %v2618_v33 = vmul.f32 %v2598_v39, %v7813_v8  ;;  %v6025_v7 = vpop.eup %6024  ;;  %vm2561_vm8 = vweird.f32 %v8120_v49  ;;  %6034 = vtanh.f32 %v8162_v54  ;;  %v2602_v8 = vsub.f32 1.0, %v2601_v31 }
 0x3cf   :  { %v6027_v52 = vpop.eup %6026  ;;  %v2729_v63 = vmul.f32 %v6025_v7, %v8138_v46  ;;  %v2611_v19 = vand.u32 2147483648, %v8091_v11  ;;  %vm2733_vm9 = vweird.f32 %v8138_v46  ;;  %6036 = vtanh.f32 %v2699_v1  ;;  %vm8210_vm3 = vmor %vm2560_vm10, %vm2561_vm8 }
 0x3d0   :  { %v6029_v29 = vpop.eup %6028  ;;  %v8175_v5 = vadd.f32 %v2620_v21, %v2618_v33  ;;  %v2754_v20 = vand.u32 2147483648, %v8149_v18  ;;  %v2737_v62 = vand.u32 2147483647, %v8138_v46  ;;  %v2739_v55 = vand.u32 2147483648, %v8138_v46 }
 0x3d1   :  { %v2730_v58 = vsub.f32 1.0, %v2729_v63  ;;  %v2744_v12 = vmul.f32 %v6029_v29, %v8149_v18  ;;  %6038 = vpow2.f32 %v5585_v2  ;;  %v6031_v44 = vpop.eup %6030  ;;  %v8182_v51 = vadd.f32 1.0, %v6027_v52 }
 0x3d2   :  { %vm2734_vm11 = vweird.f32 %v6025_v7  ;;  %v2603_v45 = vmul.f32 %v8151_v38, %v2602_v8  ;;  %vm2748_vm12 = vweird.f32 %v8149_v18  ;;  %v2752_v28 = vand.u32 2147483647, %v8149_v18  ;;  %v2685_v52 = vpop.f32.mrf.mxu3 }
 0x3d3   :  { %v2745_v24 = vsub.f32 1.0, %v2744_v12  ;;  %v2731_v53 = vmul.f32 %v6025_v7, %v2730_v58  ;;  %v8187_v57 = vadd.f32 1.0, %v6031_v44  ;;  %v6033_v15 = vpop.eup %6032  ;;  %6040 = vtanh.f32 %v8175_v5  ;;  %vm2735_vm14 = vmor %vm2733_vm9, %vm2734_vm11 }
 0x3d4   :  { %vm2749_vm13 = vweird.f32 %v6029_v29  ;;  %v6035_v50 = vpop.eup %6034  ;;  %vm2738_vm15 = vcmp.eq.f32.partialorder %v2737_v62, 8.507059e+37  ;;  %v2740_v6 = vor.u32 1.1754944e-38, %v2739_v55  ;;  %v8193_v31 = vadd.f32 1.0, %v6033_v15 }
 0x3d5   :  { %v2746_v39 = vmul.f32 %v6029_v29, %v2745_v24  ;;  %v2732_v61 = vadd.f32 %v6025_v7, %v2731_v53  ;;  %6042 = vrcp.f32 %v8187_v57  ;;  %v6037_v33 = vpop.eup %6036  ;;  %v2755_v21 = vor.u32 1.1754944e-38, %v2754_v20  ;;  %vm2750_vm0 = vmor %vm2748_vm12, %vm2749_vm13 }
 0x3d6   :  { %6044 = vrcp.f32 %v8182_v51  ;;  %vm2753_vm1 = vcmp.eq.f32.partialorder %v2752_v28, 8.507059e+37  ;;  %v2559_v8 = vadd.f32 %v8120_v49, %v2558_v36  ;;  %v2604_v20 = vadd.f32 %v8151_v38, %v2603_v45 }
 0x3d7   :  { %v2736_v1 = vsel %vm2735_vm14, %v6025_v7, %v2732_v61  ;;  %v2747_v2 = vadd.f32 %v6029_v29, %v2746_v39  ;;  %v6039_v63 = vpop.eup %6038  ;;  %6046 = vrcp.f32 %v8193_v31  ;;  %vm2606_vm2 = vweird.f32 %v8151_v38 }
 0x3d8   :  { %v2741_v46 = vsel %vm2738_vm15, %v2740_v6, %v2736_v1  ;;  %v8203_v62 = vadd.f32 1.0, %v6039_v63  ;;  %v2703_v55 = vadd.f32 %v2695_v56, %v2685_v52  ;;  %v2564_v44 = vand.u32 2147483647, %v8058_v34 }
 0x3d9   :  { %v2751_v58 = vsel %vm2750_vm0, %v6029_v29, %v2747_v2  ;;  %v2822_v12 = vmul.f32 %v6037_v33, %v2741_v46  ;;  %v6041_v18 = vpop.eup %6040  ;;  %vm2605_vm4 = vweird.f32 %v8091_v11  ;;  %v2609_v29 = vand.u32 2147483647, %v8091_v11 }
 0x3da   :  { %v2756_v7 = vsel %vm2753_vm1, %v2755_v21, %v2751_v58  ;;  %6048 = vrcp.f32 %v8203_v62  ;;  %v2563_v56 = vsel %vm8210_vm3, %v8120_v49, %v2559_v8  ;;  %vm8221_vm5 = vmor %vm2605_vm4, %vm2606_vm2  ;;  %v2567_v15 = vor.u32 1.1754944e-38, %v2566_v10 }
 0x3db   :  { %v2820_v36 = vmul.f32 %v2756_v7, %v7867_v43  ;;  %v6043_v53 = vpop.eup %6042  ;;  %v2608_v61 = vsel %vm8221_vm5, %v8151_v38, %v2604_v20  ;;  %6050 = vtanh.f32 %v2703_v55  ;;  %vm2565_vm6 = vcmp.eq.f32.partialorder %v2564_v44, 8.507059e+37 }
 0x3dc   :  { %v8225_v28 = vpop.eup %6044  ;;  %v2774_v43 = vmul.f32 %v6043_v53, %v8187_v57  ;;  %v2612_v49 = vor.u32 1.1754944e-38, %v2611_v19  ;;  %v2568_v1 = vsel %vm2565_vm6, %v2567_v15, %v2563_v56  ;;  %vm2610_vm7 = vcmp.eq.f32.partialorder %v2609_v29, 8.507059e+37 }
 0x3dd   :  { %v8229_v39 = vadd.f32 %v2822_v12, %v2820_v36  ;;  %v6047_v6 = vpop.eup %6046  ;;  %v2759_v34 = vmul.f32 %v8225_v28, %v8182_v51  ;;  %v2782_v10 = vand.u32 2147483647, %v8187_v57  ;;  %v2784_v2 = vand.u32 2147483648, %v8187_v57 }
 0x3de   :  { %v2775_v33 = vsub.f32 1.0, %v2774_v43  ;;  %v2789_v21 = vmul.f32 %v6047_v6, %v8193_v31  ;;  %v2613_v52 = vsel %vm2610_vm7, %v2612_v49, %v2608_v61  ;;  %vm2779_vm8 = vweird.f32 %v6043_v53 }
 0x3df   :  { %v2626_v46 = vmul.f32 %v6041_v18, %v2613_v52  ;;  %v2799_v11 = vand.u32 2147483648, %v8193_v31  ;;  %vm2778_vm9 = vweird.f32 %v8187_v57  ;;  %v2797_v19 = vand.u32 2147483647, %v8193_v31 }
 0x3e0   :  { %v2790_v38 = vsub.f32 1.0, %v2789_v21  ;;  %v2776_v63 = vmul.f32 %v6043_v53, %v2775_v33  ;;  %v8242_v8 = vpop.eup %6048  ;;  %v2625_v58 = vmul.f32 %v6035_v50, %v2568_v1  ;;  %vm2794_vm10 = vweird.f32 %v6047_v6  ;;  %vm2780_vm12 = vmor %vm2778_vm9, %vm2779_vm8  ;;  %v10431_v1 = vld [vmem:[#allocation80_spill] sm:$0xff] }
 0x3e1   :  { %v2804_v20 = vmul.f32 %v8242_v8, %v8203_v62  ;;  %v6051_v55 = vpop.eup %6050  ;;  %v2760_v44 = vsub.f32 1.0, %v2759_v34  ;;  %vm2793_vm11 = vweird.f32 %v8193_v31  ;;  %v2785_v18 = vor.u32 1.1754944e-38, %v2784_v2 }
 0x3e2   :  { %v2791_v12 = vmul.f32 %v6047_v6, %v2790_v38  ;;  %v2777_v7 = vadd.f32 %v6043_v53, %v2776_v63  ;;  %v2831_v24 = vpack.c.bf16 %v2626_v46, %v2625_v58  ;;  %vm2783_vm13 = vcmp.eq.f32.partialorder %v2782_v10, 8.507059e+37  ;;  %vm2795_vm14 = vmor %vm2793_vm11, %vm2794_vm10  ;;  %v10408_v58 = vld [vmem:[#allocation26_spill] sm:$0xff] }
 0x3e3   :  { %v2805_v36 = vsub.f32 1.0, %v2804_v20  ;;  %v2800_v56 = vor.u32 1.1754944e-38, %v2799_v11  ;;  %vm2798_vm15 = vcmp.eq.f32.partialorder %v2797_v19, 8.507059e+37  ;;  %v2761_v43 = vmul.f32 %v8225_v28, %v2760_v44  ;;  %v10410_v20 = vld [vmem:[#allocation28_spill] sm:$0xff]  ;;  %v10413_v44 = vld [vmem:[#allocation31_spill] sm:$0xff] }
 0x3e4   :  { %v2781_v29 = vsel %vm2780_vm12, %v6043_v53, %v2777_v7  ;;  %v2792_v57 = vadd.f32 %v6047_v6, %v2791_v12  ;;  %2840 = vmatmul.bf16.vlgmr.msrb.gmra.mxu0 %v2831_v24  ;;  %2854 = vmatmul.bf16.vlgmr.msrb.gmra.mxu1 %v2831_v24  ;;  %vm2764_vm0 = vweird.f32 %v8225_v28  ;;  %6052 = vtanh.f32 %v8229_v39  ;;  %v10409_v12 = vld [vmem:[#allocation27_spill] sm:$0xff]  ;;  %v10411_v7 = vld [vmem:[#allocation29_spill] sm:$0xff] }
 0x3e5   :  { %v2786_v50 = vsel %vm2783_vm13, %v2785_v18, %v2781_v29  ;;  %2868 = vmatmul.bf16.vlgmr.msrb.gmra.mxu2 %v2831_v24  ;;  %2882 = vmatmul.bf16.vlgmr.msrb.gmra.mxu3 %v2831_v24  ;;  %v2806_v31 = vmul.f32 %v8242_v8, %v2805_v36  ;;  %v2762_v49 = vadd.f32 %v8225_v28, %v2761_v43  ;;  %vm2809_vm1 = vweird.f32 %v8242_v8  ;;  %v10414_v18 = vld [vmem:[#allocation32_spill] sm:$0xff]  ;;  %v10415_v24 = vld [vmem:[#allocation33_spill] sm:$0xff]  ;;  %v10416_v36 = vld [vmem:[#allocation34_spill] sm:$0xff] }
 0x3e6   :  { %v2796_v45 = vsel %vm2795_vm14, %v6047_v6, %v2792_v57  ;;  %v2823_v15 = vmul.f32 %v6051_v55, %v2786_v50  ;;  %3083 = vmatpush.bf16.msrb.mxu0 %v6644_v37  ;;  %3097 = vmatpush.bf16.msrb.mxu1 %v6646_v41  ;;  %vm2763_vm2 = vweird.f32 %v8182_v51  ;;  %v2814_v21 = vand.u32 2147483648, %v8203_v62  ;;  %v10412_v55 = vld [vmem:[#allocation30_spill] sm:$0xff]  ;;  %v10417_v29 = vld [vmem:[#allocation61_spill] sm:$0xff] }
 0x3e7   :  { %v2801_v61 = vsel %vm2798_vm15, %v2800_v56, %v2796_v45  ;;  %3111 = vmatpush.bf16.msrb.mxu2 %v6648_v47  ;;  %3125 = vmatpush.bf16.msrb.mxu3 %v6651_v48  ;;  %v2807_v33 = vadd.f32 %v8242_v8, %v2806_v31  ;;  %vm8272_vm3 = vmor %vm2763_vm2, %vm2764_vm0  ;;  %v2767_v34 = vand.u32 2147483647, %v8182_v51  ;;  %vm2808_vm4 = vweird.f32 %v8203_v62  ;;  %v10418_v57 = vld [vmem:[#allocation62_spill] sm:$0xff]  ;;  %v10419_v56 = vld [vmem:[#allocation63_spill] sm:$0xff] }
 0x3e8   :  { %v2821_v53 = vmul.f32 %v2801_v61, %v7897_v16  ;;  %v2769_v16 = vand.u32 2147483648, %v8182_v51  ;;  %v2812_v10 = vand.u32 2147483647, %v8203_v62  ;;  %vm2810_vm5 = vmor %vm2808_vm4, %vm2809_vm1  ;;  %v2766_v2 = vsel %vm8272_vm3, %v8225_v28, %v2762_v49  ;;  %v10420_v50 = vld [vmem:[#allocation65_spill] sm:$0xff]  ;;  %v10421_v45 = vld [vmem:[#allocation67_spill] sm:$0xff] }
 0x3e9   :  { %v2811_v52 = vsel %vm2810_vm5, %v8242_v8, %v2807_v33  ;;  %v2815_v46 = vor.u32 1.1754944e-38, %v2814_v21  ;;  %vm2768_vm6 = vcmp.eq.f32.partialorder %v2767_v34, 8.507059e+37  ;;  %v10423_v43 = vld [vmem:[#allocation69_spill] sm:$0xff]  ;;  %v10424_v31 = vld [vmem:[#allocation70_spill] sm:$0xff]  ;;  %v10425_v61 = vld [vmem:[#allocation72_spill] sm:$0xff] }
 0x3ea   :  { %v8259_v6 = vadd.f32 %v2823_v15, %v2821_v53  ;;  %3084 = vmatpush.bf16.msrb.mxu0 %v10195_v32  ;;  %3098 = vmatpush.bf16.msrb.mxu1 %v10196_v25  ;;  %v6053_v38 = vpop.eup %6052  ;;  %v2770_v63 = vor.u32 1.1754944e-38, %v2769_v16  ;;  %vm2813_vm7 = vcmp.eq.f32.partialorder %v2812_v10, 8.507059e+37  ;;  %v10422_v15 = vld [vmem:[#allocation68_spill] sm:$0xff]  ;;  %v10426_v53 = vld [vmem:[#allocation73_spill] sm:$0xff]  ;;  %v10427_v49 = vld [vmem:[#allocation74_spill] sm:$0xff] }
 0x3eb   :  { %3112 = vmatpush.bf16.msrb.mxu2 %v10197_v23  ;;  %3126 = vmatpush.bf16.msrb.mxu3 %v6663_v59  ;;  %v2816_v11 = vsel %vm2813_vm7, %v2815_v46, %v2811_v52  ;;  %v10428_v33 = vld [vmem:[#allocation75_spill] sm:$0xff]  ;;  %v10429_v16 = vld [vmem:[#allocation78_spill] sm:$0xff]  ;;  %v10435_v52 = vld [vmem:[#allocation85_spill] sm:$0xff] }
 0x3ec   :  { %6054 = vtanh.f32 %v8259_v6  ;;  %v2771_v62 = vsel %vm2768_vm6, %v2770_v63, %v2766_v2  ;;  %v10430_v21 = vld [vmem:[#allocation79_spill] sm:$0xff]  ;;  %v10432_v34 = vld [vmem:[#allocation82_spill] sm:$0xff]  ;;  %v10434_v2 = vld [vmem:[#allocation84_spill] sm:$0xff] }
 0x3ed   :  { %v2828_v19 = vmul.f32 %v6053_v38, %v2771_v62  ;;  %v10433_v10 = vld [vmem:[#allocation83_spill] sm:$0xff]  ;;  %v10437_v63 = vld [vmem:[#allocation89_spill] sm:$0xff]  ;;  %v10438_v46 = vld [vmem:[#allocation90_spill] sm:$0xff] }
 0x3ee   :  { %3085 = vmatpush.bf16.msrb.mxu0 %v6665_v60  ;;  %3099 = vmatpush.bf16.msrb.mxu1 %v6668_v0  ;;  %v10436_v38 = vld [vmem:[#allocation87_spill] sm:$0xff]  ;;  %v10440_v62 = vld [vmem:[#allocation92_spill] sm:$0xff] }
 0x3ef   :  { %3113 = vmatpush.bf16.msrb.mxu2 %v6671_v3  ;;  %3127 = vmatpush.bf16.msrb.mxu3 %v6675_v4 }
 0x3f2   :  { %v6055_v51 = vpop.eup %6054  ;;  %3086 = vmatpush.bf16.msrb.mxu0 %v6680_v9  ;;  %3100 = vmatpush.bf16.msrb.mxu1 %v6682_v13 }
 0x3f3   :  { %v2829_v28 = vmul.f32 %v6055_v51, %v2816_v11  ;;  %3114 = vmatpush.bf16.msrb.mxu2 %v6684_v14  ;;  %3128 = vmatpush.bf16.msrb.mxu3 %v6687_v17  ;;  %v10439_v51 = vld [vmem:[#allocation91_spill] sm:$0xff]  ;;  %v10441_v11 = vld [vmem:[#allocation94_spill] sm:$0xff] }
 0x3f5   :  { %v2830_v8 = vpack.c.bf16 %v2829_v28, %v2828_v19  ;;  %v10442_v19 = vld [vmem:[#allocation95_spill] sm:$0xff]  ;;  %v10443_v28 = vld [vmem:[#allocation96_spill] sm:$0xff] }
 0x3f6   :  { %3087 = vmatpush.bf16.msrb.mxu0 %v6692_v22  ;;  %3101 = vmatpush.bf16.msrb.mxu1 %v6694_v26 }
 0x3f7   :  { %2896 = vmatmul.bf16.vlgmr.msra.gmra.mxu0 %v2830_v8  ;;  %2910 = vmatmul.bf16.vlgmr.msra.gmra.mxu1 %v2830_v8 }
 0x3f8   :  { %2924 = vmatmul.bf16.vlgmr.msra.gmra.mxu2 %v2830_v8  ;;  %2938 = vmatmul.bf16.vlgmr.msra.gmra.mxu3 %v2830_v8 }
 0x3f9   :  { %3115 = vmatpush.bf16.msrb.mxu2 %v6696_v27  ;;  %3129 = vmatpush.bf16.msrb.mxu3 %v6699_v30 }
 0x3fa   :  { %3088 = vmatpush.bf16.msrb.mxu0 %v6704_v35  ;;  %3102 = vmatpush.bf16.msrb.mxu1 %v6706_v40 }
 0x3fd   :  { %3116 = vmatpush.bf16.msrb.mxu2 %v6708_v42  ;;  %3130 = vmatpush.bf16.msrb.mxu3 %v10408_v58 }
 0x3fe   :  { %3089 = vmatpush.bf16.msrb.mxu0 %v10409_v12  ;;  %3103 = vmatpush.bf16.msrb.mxu1 %v10410_v20 }
 0x401   :  { %3117 = vmatpush.bf16.msrb.mxu2 %v10411_v7  ;;  %3131 = vmatpush.bf16.msrb.mxu3 %v10412_v55 }
 0x402   :  { %3090 = vmatpush.bf16.msrb.mxu0 %v10413_v44  ;;  %3104 = vmatpush.bf16.msrb.mxu1 %v10414_v18 }
 0x405   :  { %3118 = vmatpush.bf16.msrb.mxu2 %v10415_v24  ;;  %3132 = vmatpush.bf16.msrb.mxu3 %v10416_v36 }
 0x406   :  { %3283 = vmatpush.bf16.msra.mxu0 %v10417_v29  ;;  %3297 = vmatpush.bf16.msra.mxu1 %v10418_v57  ;;  %v10487_v57 = vld [vmem:[#allocation59_spill] sm:$0xff]  ;;  %v10488_v29 = vld [vmem:[#allocation37_spill] sm:$0xff] }
 0x407   :  { %3091 = vmatmul.bf16.vlgmr.msrb.gmra.mxu0 %v2830_v8  ;;  %3105 = vmatmul.bf16.vlgmr.msrb.gmra.mxu1 %v2830_v8 }
 0x408   :  { %3119 = vmatmul.bf16.vlgmr.msrb.gmra.mxu2 %v2830_v8  ;;  %3133 = vmatmul.bf16.vlgmr.msrb.gmra.mxu3 %v2830_v8  ;;  %v10444_v8 = vld [vmem:[#allocation97_spill] sm:$0xff] }
 0x409   :  { %3311 = vmatpush.bf16.msra.mxu2 %v10419_v56  ;;  %3325 = vmatpush.bf16.msra.mxu3 %v10420_v50  ;;  %v10483_v50 = vld [vmem:[#allocation147_spill] sm:$0xff] }
 0x40a   :  { %3284 = vmatpush.bf16.msra.mxu0 %v10421_v45  ;;  %3298 = vmatpush.bf16.msra.mxu1 %v10422_v15 }
 0x40d   :  { %3312 = vmatpush.bf16.msra.mxu2 %v10423_v43  ;;  %3326 = vmatpush.bf16.msra.mxu3 %v10424_v31 }
 0x40e   :  { %3285 = vmatpush.bf16.msra.mxu0 %v10425_v61  ;;  %3299 = vmatpush.bf16.msra.mxu1 %v10426_v53 }
 0x411   :  { %3313 = vmatpush.bf16.msra.mxu2 %v10427_v49  ;;  %3327 = vmatpush.bf16.msra.mxu3 %v10428_v33 }
 0x412   :  { %3286 = vmatpush.bf16.msra.mxu0 %v10429_v16  ;;  %3300 = vmatpush.bf16.msra.mxu1 %v10430_v21 }
 0x415   :  { %3314 = vmatpush.bf16.msra.mxu2 %v10431_v1  ;;  %3328 = vmatpush.bf16.msra.mxu3 %v10432_v34 }
 0x416   :  { %3287 = vmatpush.bf16.msra.mxu0 %v10433_v10  ;;  %3301 = vmatpush.bf16.msra.mxu1 %v10434_v2  ;;  %v10445_v2 = vld [vmem:[#allocation100_spill] sm:$0xff] }
 0x419   :  { %3315 = vmatpush.bf16.msra.mxu2 %v10435_v52  ;;  %3329 = vmatpush.bf16.msra.mxu3 %v10436_v38  ;;  %v10446_v52 = vld [vmem:[#allocation102_spill] sm:$0xff]  ;;  %v10447_v38 = vld [vmem:[#allocation105_spill] sm:$0xff] }
 0x41a   :  { %3288 = vmatpush.bf16.msra.mxu0 %v10437_v63  ;;  %3302 = vmatpush.bf16.msra.mxu1 %v10438_v46  ;;  %v10448_v63 = vld [vmem:[#allocation106_spill] sm:$0xff]  ;;  %v10449_v46 = vld [vmem:[#allocation103_spill] sm:$0xff] }
 0x41d   :  { %3316 = vmatpush.bf16.msra.mxu2 %v10439_v51  ;;  %3330 = vmatpush.bf16.msra.mxu3 %v10440_v62  ;;  %v10450_v51 = vld [vmem:[#allocation104_spill] sm:$0xff]  ;;  %v10451_v62 = vld [vmem:[#allocation107_spill] sm:$0xff] }
 0x41e   :  { %3289 = vmatpush.bf16.msra.mxu0 %v10441_v11  ;;  %3303 = vmatpush.bf16.msra.mxu1 %v10442_v19  ;;  %v10452_v11 = vld [vmem:[#allocation109_spill] sm:$0xff]  ;;  %v10453_v19 = vld [vmem:[#allocation112_spill] sm:$0xff] }
 0x421   :  { %3317 = vmatpush.bf16.msra.mxu2 %v10443_v28  ;;  %3331 = vmatpush.bf16.msra.mxu3 %v10444_v8  ;;  %v10454_v28 = vld [vmem:[#allocation113_spill] sm:$0xff]  ;;  %v10455_v8 = vld [vmem:[#allocation114_spill] sm:$0xff] }
 0x422   :  { %3290 = vmatpush.bf16.msra.mxu0 %v10445_v2  ;;  %3304 = vmatpush.bf16.msra.mxu1 %v10446_v52  ;;  %v10456_v2 = vld [vmem:[#allocation115_spill] sm:$0xff]  ;;  %v10457_v52 = vld [vmem:[#allocation118_spill] sm:$0xff] }
 0x425   :  { %3318 = vmatpush.bf16.msra.mxu2 %v10449_v46  ;;  %3332 = vmatpush.bf16.msra.mxu3 %v10450_v51  ;;  %v10460_v46 = vld [vmem:[#allocation122_spill] sm:$0xff]  ;;  %v10461_v51 = vld [vmem:[#allocation123_spill] sm:$0xff] }
 0x426   :  { %3339 = vmatpush.bf16.msrb.mxu0 %v10447_v38  ;;  %3353 = vmatpush.bf16.msrb.mxu1 %v10448_v63  ;;  %v10458_v38 = vld [vmem:[#allocation119_spill] sm:$0xff]  ;;  %v10459_v63 = vld [vmem:[#allocation120_spill] sm:$0xff] }
 0x429   :  { %3367 = vmatpush.bf16.msrb.mxu2 %v10451_v62  ;;  %3381 = vmatpush.bf16.msrb.mxu3 %v10452_v11  ;;  %v10462_v62 = vld [vmem:[#allocation124_spill] sm:$0xff]  ;;  %v10463_v11 = vld [vmem:[#allocation125_spill] sm:$0xff] }
 0x42a   :  { %3340 = vmatpush.bf16.msrb.mxu0 %v10453_v19  ;;  %3354 = vmatpush.bf16.msrb.mxu1 %v10454_v28  ;;  %v10464_v19 = vld [vmem:[#allocation127_spill] sm:$0xff]  ;;  %v10465_v28 = vld [vmem:[#allocation128_spill] sm:$0xff] }
 0x42d   :  { %3368 = vmatpush.bf16.msrb.mxu2 %v10455_v8  ;;  %3382 = vmatpush.bf16.msrb.mxu3 %v10456_v2  ;;  %v10466_v8 = vld [vmem:[#allocation129_spill] sm:$0xff]  ;;  %v10467_v2 = vld [vmem:[#allocation130_spill] sm:$0xff] }
 0x42e   :  { %3341 = vmatpush.bf16.msrb.mxu0 %v10457_v52  ;;  %3355 = vmatpush.bf16.msrb.mxu1 %v10458_v38  ;;  %v10468_v52 = vld [vmem:[#allocation131_spill] sm:$0xff]  ;;  %v10469_v38 = vld [vmem:[#allocation133_spill] sm:$0xff] }
 0x431   :  { %3369 = vmatpush.bf16.msrb.mxu2 %v10459_v63  ;;  %3383 = vmatpush.bf16.msrb.mxu3 %v10460_v46  ;;  %v10470_v63 = vld [vmem:[#allocation134_spill] sm:$0xff]  ;;  %v10471_v46 = vld [vmem:[#allocation135_spill] sm:$0xff] }
 0x432   :  { %3342 = vmatpush.bf16.msrb.mxu0 %v10461_v51  ;;  %3356 = vmatpush.bf16.msrb.mxu1 %v10462_v62  ;;  %v10472_v51 = vld [vmem:[#allocation136_spill] sm:$0xff]  ;;  %v10473_v62 = vld [vmem:[#allocation137_spill] sm:$0xff] }
 0x435   :  { %3370 = vmatpush.bf16.msrb.mxu2 %v10463_v11  ;;  %3384 = vmatpush.bf16.msrb.mxu3 %v10464_v19  ;;  %v10474_v11 = vld [vmem:[#allocation138_spill] sm:$0xff]  ;;  %v10475_v19 = vld [vmem:[#allocation139_spill] sm:$0xff] }
 0x436   :  { %3343 = vmatpush.bf16.msrb.mxu0 %v10465_v28  ;;  %3357 = vmatpush.bf16.msrb.mxu1 %v10466_v8  ;;  %v10476_v28 = vld [vmem:[#allocation140_spill] sm:$0xff]  ;;  %v10477_v8 = vld [vmem:[#allocation141_spill] sm:$0xff] }
 0x439   :  { %3371 = vmatpush.bf16.msrb.mxu2 %v10467_v2  ;;  %3385 = vmatpush.bf16.msrb.mxu3 %v10468_v52  ;;  %v10478_v2 = vld [vmem:[#allocation142_spill] sm:$0xff]  ;;  %v10479_v52 = vld [vmem:[#allocation143_spill] sm:$0xff] }
 0x43a   :  { %3344 = vmatpush.bf16.msrb.mxu0 %v10469_v38  ;;  %3358 = vmatpush.bf16.msrb.mxu1 %v10470_v63  ;;  %v10480_v38 = vld [vmem:[#allocation144_spill] sm:$0xff] }
 0x43d   :  { %3372 = vmatpush.bf16.msrb.mxu2 %v10471_v46  ;;  %3386 = vmatpush.bf16.msrb.mxu3 %v10472_v51 }
 0x43e   :  { %3345 = vmatpush.bf16.msrb.mxu0 %v10473_v62  ;;  %3359 = vmatpush.bf16.msrb.mxu1 %v10474_v11 }
 0x441   :  { %3373 = vmatpush.bf16.msrb.mxu2 %v10475_v19  ;;  %3387 = vmatpush.bf16.msrb.mxu3 %v10476_v28 }
 0x442   :  { %3346 = vmatpush.bf16.msrb.mxu0 %v10477_v8  ;;  %3360 = vmatpush.bf16.msrb.mxu1 %v10478_v2  ;;  %v10481_v8 = vld [vmem:[#allocation145_spill] sm:$0xff]  ;;  %v10482_v2 = vld [vmem:[#allocation146_spill] sm:$0xff] }
 0x445   :  { %3374 = vmatpush.bf16.msrb.mxu2 %v10479_v52  ;;  %3388 = vmatpush.bf16.msrb.mxu3 %v10480_v38 }
 0x461   :  { %v2841_v63 = vpop.f32.mrf.mxu0  ;;  %v2855_v46 = vpop.f32.mrf.mxu1 }
 0x468   :  { %v2869_v10 = vpop.f32.mrf.mxu2  ;;  %v2883_v62 = vpop.f32.mrf.mxu3 }
 0x469   :  { %v2843_v51 = vpop.f32.mrf.mxu0  ;;  %v2857_v34 = vpop.f32.mrf.mxu1 }
 0x470   :  { %v2871_v1 = vpop.f32.mrf.mxu2  ;;  %v8371_v28 = vpop.f32.mrf.mxu3 }
 0x474   :  { %v2897_v11 = vpop.f32.mrf.mxu0  ;;  %v2911_v21 = vpop.f32.mrf.mxu1 }
 0x475   :  { %v2898_v19 = vadd.f32 %v2897_v11, %v2841_v63  ;;  %v2912_v16 = vadd.f32 %v2911_v21, %v2855_v46 }
 0x477   :  { %v2944_v33 = vadd.f32 %v2898_v19, %v10481_v8  ;;  %v2945_v49 = vadd.f32 %v2912_v16, %v10482_v2  ;;  %v10484_v16 = vld [vmem:[#allocation35_spill] sm:$0xff] }
 0x479   :  { %v5586_v52 = vmul.f32 -1.442695, %v2944_v33  ;;  %v5587_v53 = vmul.f32 -1.442695, %v2945_v49  ;;  %v10485_v33 = vld [vmem:[#allocation58_spill] sm:$0xff] }
 0x47a   :  { %v450_v49 = vadd.f32 %v10485_v33, %v10484_v16 }
 0x47b   :  { %6056 = vpow2.f32 %v5586_v52  ;;  %v2925_v38 = vpop.f32.mrf.mxu2  ;;  %v2939_v11 = vpop.f32.mrf.mxu3  ;;  %v10486_v52 = vld [vmem:[#allocation36_spill] sm:$0xff] }
 0x47c   :  { %6058 = vpow2.f32 %v5587_v53  ;;  %v2926_v61 = vadd.f32 %v2925_v38, %v2869_v10  ;;  %v2899_v31 = vpop.f32.mrf.mxu0  ;;  %v2913_v43 = vpop.f32.mrf.mxu1  ;;  %v499_v53 = vadd.f32 %v10487_v57, %v10486_v52 }
 0x47d   :  { %v2900_v15 = vadd.f32 %v2899_v31, %v2843_v51  ;;  %v2914_v45 = vadd.f32 %v2913_v43, %v2857_v34  ;;  %v10489_v31 = vld [vmem:[#allocation64_spill] sm:$0xff] }
 0x47e   :  { %v2946_v56 = vadd.f32 %v2926_v61, %v10483_v50  ;;  %v548_v43 = vadd.f32 %v10489_v31, %v10488_v29  ;;  %v10490_v61 = vld [vmem:[#allocation38_spill] sm:$0xff]  ;;  %v8392_v57 = vpack.c.bf16 %v499_v53, %v450_v49  ;;  %v10494_v29 = vld [vmem:[#allocation60_spill] sm:$0xff] }
 0x47f   :  { %v2948_v21 = vadd.f32 %v2900_v15, %v10481_v8  ;;  %v2949_v63 = vadd.f32 %v2914_v45, %v10482_v2  ;;  %v10491_v45 = vld [vmem:[#allocation66_spill] sm:$0xff]  ;;  %v2940_v2 = vadd.f32 %v2939_v11, %v2883_v62  ;;  %v10493_v62 = vld [vmem:[#allocation57_spill] sm:$0xff]  ;;  %v3141_v52 = vunpack.c.l.bf16 %v10494_v29 }
 0x480   :  { %v5588_v46 = vmul.f32 -1.442695, %v2946_v56  ;;  %v597_v56 = vadd.f32 %v10491_v45, %v10490_v61  ;;  %v3139_v11 = vunpack.c.l.bf16 %v10493_v62 }
 0x481   :  { %v6057_v19 = vpop.eup %6056  ;;  %v5589_v10 = vmul.f32 -1.442695, %v2948_v21  ;;  %v5590_v15 = vmul.f32 -1.442695, %v2949_v63 }
 0x482   :  { %v6059_v38 = vpop.eup %6058  ;;  %v8384_v34 = vadd.f32 1.0, %v6057_v19  ;;  %6060 = vpow2.f32 %v5588_v46  ;;  %v8394_v19 = vpack.c.bf16 %v597_v56, %v548_v43  ;;  %v10492_v46 = vld [vmem:[#allocation40_spill] sm:$0xff] }
 0x483   :  { %v8388_v51 = vadd.f32 1.0, %v6059_v38  ;;  %6062 = vpow2.f32 %v5589_v10  ;;  %v2927_v33 = vpop.f32.mrf.mxu2  ;;  %v2947_v63 = vadd.f32 %v2940_v2, %v10492_v46  ;;  %v3140_v10 = vunpack.c.h.bf16 %v10493_v62  ;;  %v2941_v8 = vpop.f32.mrf.mxu3 }
 0x484   :  { %6064 = vrcp.f32 %v8384_v34  ;;  %v2928_v21 = vadd.f32 %v2927_v33, %v2871_v1  ;;  %v3092_v38 = vpop.f32.mrf.mxu0  ;;  %v3106_v53 = vpop.f32.mrf.mxu1  ;;  %vm2981_vm8 = vweird.f32 %v8384_v34 }
 0x485   :  { %6066 = vrcp.f32 %v8388_v51  ;;  %v3147_v33 = vadd.f32 %v3139_v11, %v3092_v38  ;;  %v3148_v36 = vadd.f32 %v3140_v10, %v3106_v53  ;;  %v3002_v38 = vand.u32 2147483648, %v8388_v51 }
 0x486   :  { %6068 = vpow2.f32 %v5590_v15  ;;  %v2950_v45 = vadd.f32 %v2928_v21, %v10483_v50  ;;  %v2987_v50 = vand.u32 2147483648, %v8384_v34  ;;  %v3000_v24 = vand.u32 2147483647, %v8388_v51 }
 0x487   :  { %6070 = vtanh.f32 %v2947_v63  ;;  %v5592_v18 = vmul.f32 -1.442695, %v3147_v33  ;;  %vm2996_vm9 = vweird.f32 %v8388_v51  ;;  %v3003_v33 = vor.u32 1.1754944e-38, %v3002_v38 }
 0x488   :  { %v6061_v31 = vpop.eup %6060  ;;  %v5591_v1 = vmul.f32 -1.442695, %v2950_v45  ;;  %v2985_v45 = vand.u32 2147483647, %v8384_v34  ;;  %vm8440_vm13 = vcmp.eq.f32.partialorder %v3000_v24, 8.507059e+37 }
 0x489   :  { %v6063_v61 = vpop.eup %6062  ;;  %v8420_v11 = vadd.f32 1.0, %v6061_v31  ;;  %v2942_v31 = vadd.f32 %v2941_v8, %v8371_v28 }
 0x48a   :  { %v8401_v16 = vpop.eup %6064  ;;  %v8403_v49 = vadd.f32 1.0, %v6063_v61  ;;  %vm8428_vm10 = vcmp.eq.f32.partialorder %v2985_v45, 8.507059e+37 }
 0x48b   :  { %v8407_v15 = vpop.eup %6066  ;;  %v2977_v56 = vmul.f32 %v8401_v16, %v8384_v34  ;;  %vm2982_vm11 = vweird.f32 %v8401_v16  ;;  %v2951_v38 = vadd.f32 %v2942_v31, %v10492_v46 }
 0x48c   :  { %v6069_v62 = vpop.eup %6068  ;;  %v2992_v61 = vmul.f32 %v8407_v15, %v8388_v51  ;;  %6072 = vrcp.f32 %v8403_v49  ;;  %vm2997_vm12 = vweird.f32 %v8407_v15  ;;  %vm8449_vm14 = vmor %vm2981_vm8, %vm2982_vm11  ;;  %vm3026_vm15 = vweird.f32 %v8403_v49  ;;  %v3094_v7 = vpop.f32.mrf.mxu0 }
 0x48d   :  { %v2978_v2 = vsub.f32 1.0, %v2977_v56  ;;  %v8417_v43 = vadd.f32 1.0, %v6069_v62  ;;  %6074 = vpow2.f32 %v5591_v1  ;;  %v6071_v1 = vpop.eup %6070  ;;  %v5593_v62 = vmul.f32 -1.442695, %v3148_v36  ;;  %vm8462_vm0 = vmor %vm2996_vm9, %vm2997_vm12 }
 0x48e   :  { %v2993_v63 = vsub.f32 1.0, %v2992_v61  ;;  %v3120_v61 = vpop.f32.mrf.mxu2  ;;  %v3030_v36 = vand.u32 2147483647, %v8403_v49  ;;  %v3032_v24 = vand.u32 2147483648, %v8403_v49 }
 0x48f   :  { %v2979_v21 = vmul.f32 %v8401_v16, %v2978_v2  ;;  %6076 = vrcp.f32 %v8417_v43  ;;  %v2988_v2 = vor.u32 1.1754944e-38, %v2987_v50  ;;  %v3149_v31 = vadd.f32 %v3141_v52, %v3120_v61 }
 0x490   :  { %v2994_v56 = vmul.f32 %v8407_v15, %v2993_v63  ;;  %6078 = vrcp.f32 %v8420_v11  ;;  %vm3041_vm1 = vweird.f32 %v8417_v43  ;;  %v3047_v51 = vand.u32 2147483648, %v8417_v43 }
 0x491   :  { %v2980_v53 = vadd.f32 %v8401_v16, %v2979_v21  ;;  %6080 = vpow2.f32 %v5592_v18  ;;  %vm8478_vm3 = vcmp.eq.f32.partialorder %v3030_v36, 8.507059e+37  ;;  %v3045_v61 = vand.u32 2147483647, %v8417_v43 }
 0x492   :  { %v8435_v44 = vpop.eup %6072  ;;  %v2995_v45 = vadd.f32 %v8407_v15, %v2994_v56  ;;  %6082 = vpow2.f32 %v5593_v62  ;;  %v3033_v62 = vor.u32 1.1754944e-38, %v3032_v24  ;;  %v5594_v36 = vmul.f32 -1.442695, %v3149_v31 }
 0x493   :  { %v6075_v63 = vpop.eup %6074  ;;  %v3022_v8 = vmul.f32 %v8435_v44, %v8403_v49  ;;  %v2984_v34 = vsel %vm8449_vm14, %v8401_v16, %v2980_v53  ;;  %vm3027_vm2 = vweird.f32 %v8435_v44  ;;  %vm3046_vm7 = vcmp.eq.f32.partialorder %v3045_v61, 8.507059e+37 }
 0x494   :  { %v8453_v21 = vadd.f32 1.0, %v6075_v63  ;;  %v2999_v46 = vsel %vm8462_vm0, %v8407_v15, %v2995_v45  ;;  %v2989_v15 = vsel %vm8428_vm10, %v2988_v2, %v2984_v34  ;;  %v3108_v45 = vpop.f32.mrf.mxu1  ;;  %vm8496_vm5 = vmor %vm3026_vm15, %vm3027_vm2  ;;  %vm3011_vm10 = vweird.f32 %v8420_v11 }
 0x495   :  { %v6077_v56 = vpop.eup %6076  ;;  %v3023_v63 = vsub.f32 1.0, %v3022_v8  ;;  %v3004_v50 = vsel %vm8440_vm13, %v3003_v33, %v2999_v46  ;;  %v3070_v2 = vmul.f32 %v6071_v1, %v2989_v15  ;;  %v10508_v33 = vunpack.c.h.bf16 %v8392_v57 }
 0x496   :  { %v3037_v55 = vmul.f32 %v6077_v56, %v8417_v43  ;;  %6084 = vrcp.f32 %v8453_v21  ;;  %v8482_v52 = vpop.eup %6078  ;;  %vm3042_vm4 = vweird.f32 %v6077_v56  ;;  %v3122_v49 = vpop.f32.mrf.mxu2  ;;  %v3068_v24 = vmul.f32 %v3004_v50, %v8162_v54 }
 0x497   :  { %v3024_v20 = vmul.f32 %v8435_v44, %v3023_v63  ;;  %v6081_v8 = vpop.eup %6080  ;;  %v10505_v63 = vunpack.c.l.bf16 %v8392_v57  ;;  %6086 = vtanh.f32 %v2951_v38  ;;  %v3152_v28 = vadd.f32 %v10508_v33, %v3108_v45  ;;  %vm3043_vm6 = vmor %vm3041_vm1, %vm3042_vm4  ;;  %v3134_v54 = vpop.f32.mrf.mxu3 }
 0x498   :  { %v3038_v53 = vsub.f32 1.0, %v3037_v55  ;;  %v8500_v10 = vadd.f32 1.0, %v6081_v8  ;;  %v6083_v46 = vpop.eup %6082  ;;  %v3048_v1 = vor.u32 1.1754944e-38, %v3047_v51  ;;  %v3142_v50 = vunpack.c.h.bf16 %v10494_v29 }
 0x499   :  { %v3025_v18 = vadd.f32 %v8435_v44, %v3024_v20  ;;  %v3151_v12 = vadd.f32 %v10505_v63, %v3094_v7  ;;  %v3007_v20 = vmul.f32 %v8482_v52, %v8420_v11  ;;  %v8511_v38 = vadd.f32 1.0, %v6083_v46 }
 0x49a   :  { %v3039_v58 = vmul.f32 %v6077_v56, %v3038_v53  ;;  %6088 = vrcp.f32 %v8500_v10  ;;  %v5596_v43 = vmul.f32 -1.442695, %v3152_v28  ;;  %v8524_v51 = vadd.f32 %v3070_v2, %v3068_v24 }
 0x49b   :  { %v3029_v7 = vsel %vm8496_vm5, %v8435_v44, %v3025_v18  ;;  %6090 = vpow2.f32 %v5594_v36  ;;  %v5595_v44 = vmul.f32 -1.442695, %v3151_v12  ;;  %v3008_v45 = vsub.f32 1.0, %v3007_v20 }
 0x49c   :  { %v3040_v34 = vadd.f32 %v6077_v56, %v3039_v58  ;;  %v8513_v31 = vpop.eup %6084  ;;  %v3034_v57 = vsel %vm8478_vm3, %v3033_v62, %v3029_v7  ;;  %6092 = vrcp.f32 %v8511_v38  ;;  %v10509_v58 = vunpack.c.l.bf16 %v8394_v19 }
 0x49d   :  { %v6087_v18 = vpop.eup %6086  ;;  %v3052_v12 = vmul.f32 %v8513_v31, %v8453_v21  ;;  %v3150_v62 = vadd.f32 %v3142_v50, %v3134_v54  ;;  %6094 = vpow2.f32 %v5595_v44  ;;  %v3146_v63 = vunpack.c.h.bf16 %v8394_v19 }
 0x49e   :  { %v3044_v15 = vsel %vm3043_vm6, %v6077_v56, %v3040_v34  ;;  %v3153_v53 = vadd.f32 %v10509_v58, %v3122_v49  ;;  %v3071_v56 = vmul.f32 %v6087_v18, %v3034_v57  ;;  %v3009_v46 = vmul.f32 %v8482_v52, %v3008_v45 }
 0x49f   :  { %v3049_v8 = vsel %vm3046_vm7, %v3048_v1, %v3044_v15  ;;  %v3017_v29 = vand.u32 2147483648, %v8420_v11  ;;  %6096 = vpow2.f32 %v5596_v43  ;;  %vm3012_vm8 = vweird.f32 %v8482_v52 }
 0x4a0   :  { %v3069_v16 = vmul.f32 %v3049_v8, %v8175_v5  ;;  %v6089_v61 = vpop.eup %6088  ;;  %v5597_v36 = vmul.f32 -1.442695, %v3153_v53  ;;  %6098 = vtanh.f32 %v8524_v51  ;;  %v3053_v5 = vsub.f32 1.0, %v3052_v12  ;;  %vm8572_vm3 = vmor %vm3011_vm10, %vm3012_vm8 }
 0x4a1   :  { %v6091_v55 = vpop.eup %6090  ;;  %v3180_v20 = vmul.f32 %v6089_v61, %v8500_v10  ;;  %v3062_v7 = vand.u32 2147483648, %v8453_v21  ;;  %vm3184_vm9 = vweird.f32 %v8500_v10  ;;  %6100 = vtanh.f32 %v3150_v62 }
 0x4a2   :  { %v6093_v2 = vpop.eup %6092  ;;  %v8537_v33 = vadd.f32 %v3071_v56, %v3069_v16  ;;  %v3205_v49 = vand.u32 2147483648, %v8511_v38  ;;  %v3188_v24 = vand.u32 2147483647, %v8500_v10  ;;  %v3190_v34 = vand.u32 2147483648, %v8500_v10 }
 0x4a3   :  { %v3181_v19 = vsub.f32 1.0, %v3180_v20  ;;  %v3195_v28 = vmul.f32 %v6093_v2, %v8511_v38  ;;  %6102 = vpow2.f32 %v5597_v36  ;;  %v6095_v1 = vpop.eup %6094  ;;  %v8544_v57 = vadd.f32 1.0, %v6091_v55  ;;  %v3136_v55 = vpop.f32.mrf.mxu3 }
 0x4a4   :  { %vm3185_vm11 = vweird.f32 %v6089_v61  ;;  %v3054_v54 = vmul.f32 %v8513_v31, %v3053_v5  ;;  %vm3199_vm12 = vweird.f32 %v8511_v38  ;;  %v3203_v58 = vand.u32 2147483647, %v8511_v38 }
 0x4a5   :  { %v3196_v44 = vsub.f32 1.0, %v3195_v28  ;;  %v3182_v15 = vmul.f32 %v6089_v61, %v3181_v19  ;;  %v8549_v53 = vadd.f32 1.0, %v6095_v1  ;;  %v6097_v45 = vpop.eup %6096  ;;  %6104 = vtanh.f32 %v8537_v33  ;;  %vm3186_vm14 = vmor %vm3184_vm9, %vm3185_vm11 }
 0x4a6   :  { %vm3200_vm13 = vweird.f32 %v6093_v2  ;;  %v6099_v43 = vpop.eup %6098  ;;  %vm3189_vm15 = vcmp.eq.f32.partialorder %v3188_v24, 8.507059e+37  ;;  %v3191_v18 = vor.u32 1.1754944e-38, %v3190_v34  ;;  %v8555_v12 = vadd.f32 1.0, %v6097_v45 }
 0x4a7   :  { %v3197_v8 = vmul.f32 %v6093_v2, %v3196_v44  ;;  %v3183_v50 = vadd.f32 %v6089_v61, %v3182_v15  ;;  %6106 = vrcp.f32 %v8549_v53  ;;  %v6101_v16 = vpop.eup %6100  ;;  %v3206_v56 = vor.u32 1.1754944e-38, %v3205_v49  ;;  %vm3201_vm0 = vmor %vm3199_vm12, %vm3200_vm13 }
 0x4a8   :  { %6108 = vrcp.f32 %v8544_v57  ;;  %vm3204_vm1 = vcmp.eq.f32.partialorder %v3203_v58, 8.507059e+37  ;;  %v3010_v5 = vadd.f32 %v8482_v52, %v3009_v46  ;;  %v3055_v49 = vadd.f32 %v8513_v31, %v3054_v54 }
 0x4a9   :  { %v3187_v62 = vsel %vm3186_vm14, %v6089_v61, %v3183_v50  ;;  %v3198_v36 = vadd.f32 %v6093_v2, %v3197_v8  ;;  %v6103_v20 = vpop.eup %6102  ;;  %6110 = vrcp.f32 %v8555_v12  ;;  %vm3057_vm2 = vweird.f32 %v8513_v31 }
 0x4aa   :  { %v3192_v10 = vsel %vm3189_vm15, %v3191_v18, %v3187_v62  ;;  %v8565_v24 = vadd.f32 1.0, %v6103_v20  ;;  %v3154_v34 = vadd.f32 %v3146_v63, %v3136_v55  ;;  %v3015_v1 = vand.u32 2147483647, %v8420_v11 }
 0x4ab   :  { %v3202_v19 = vsel %vm3201_vm0, %v6093_v2, %v3198_v36  ;;  %v3273_v28 = vmul.f32 %v6101_v16, %v3192_v10  ;;  %v6105_v38 = vpop.eup %6104  ;;  %vm3056_vm4 = vweird.f32 %v8453_v21  ;;  %v3060_v2 = vand.u32 2147483647, %v8453_v21 }
 0x4ac   :  { %v3207_v61 = vsel %vm3204_vm1, %v3206_v56, %v3202_v19  ;;  %6112 = vrcp.f32 %v8565_v24  ;;  %v3014_v63 = vsel %vm8572_vm3, %v8482_v52, %v3010_v5  ;;  %vm8583_vm5 = vmor %vm3056_vm4, %vm3057_vm2  ;;  %v3018_v45 = vor.u32 1.1754944e-38, %v3017_v29 }
 0x4ad   :  { %v3271_v46 = vmul.f32 %v3207_v61, %v8229_v39  ;;  %v6107_v15 = vpop.eup %6106  ;;  %v3059_v50 = vsel %vm8583_vm5, %v8513_v31, %v3055_v49  ;;  %6114 = vtanh.f32 %v3154_v34  ;;  %vm3016_vm6 = vcmp.eq.f32.partialorder %v3015_v1, 8.507059e+37 }
 0x4ae   :  { %v8587_v58 = vpop.eup %6108  ;;  %v3225_v39 = vmul.f32 %v6107_v15, %v8549_v53  ;;  %v3063_v52 = vor.u32 1.1754944e-38, %v3062_v7  ;;  %v3019_v62 = vsel %vm3016_vm6, %v3018_v45, %v3014_v63  ;;  %vm3061_vm7 = vcmp.eq.f32.partialorder %v3060_v2, 8.507059e+37 }
 0x4af   :  { %v8591_v8 = vadd.f32 %v3273_v28, %v3271_v46  ;;  %v6111_v18 = vpop.eup %6110  ;;  %v3210_v11 = vmul.f32 %v8587_v58, %v8544_v57  ;;  %v3233_v29 = vand.u32 2147483647, %v8549_v53  ;;  %v3235_v36 = vand.u32 2147483648, %v8549_v53 }
 0x4b0   :  { %v3226_v16 = vsub.f32 1.0, %v3225_v39  ;;  %v3240_v56 = vmul.f32 %v6111_v18, %v8555_v12  ;;  %v3064_v55 = vsel %vm3061_vm7, %v3063_v52, %v3059_v50  ;;  %vm3230_vm8 = vweird.f32 %v6107_v15 }
 0x4b1   :  { %v3077_v10 = vmul.f32 %v6105_v38, %v3064_v55  ;;  %v3250_v21 = vand.u32 2147483648, %v8555_v12  ;;  %vm3229_vm9 = vweird.f32 %v8549_v53  ;;  %v3248_v7 = vand.u32 2147483647, %v8555_v12 }
 0x4b2   :  { %v3241_v31 = vsub.f32 1.0, %v3240_v56  ;;  %v3227_v20 = vmul.f32 %v6107_v15, %v3226_v16  ;;  %v8604_v5 = vpop.eup %6112  ;;  %v3076_v19 = vmul.f32 %v6099_v43, %v3019_v62  ;;  %vm3245_vm10 = vweird.f32 %v6111_v18  ;;  %vm3231_vm12 = vmor %vm3229_vm9, %vm3230_vm8  ;;  %v10539_v62 = vld [vmem:[#allocation80_spill] sm:$0xff] }
 0x4b3   :  { %v3255_v49 = vmul.f32 %v8604_v5, %v8565_v24  ;;  %v6115_v34 = vpop.eup %6114  ;;  %v3211_v1 = vsub.f32 1.0, %v3210_v11  ;;  %vm3244_vm11 = vweird.f32 %v8555_v12  ;;  %v3236_v38 = vor.u32 1.1754944e-38, %v3235_v36 }
 0x4b4   :  { %v3242_v28 = vmul.f32 %v6111_v18, %v3241_v31  ;;  %v3228_v61 = vadd.f32 %v6107_v15, %v3227_v20  ;;  %v3282_v44 = vpack.c.bf16 %v3077_v10, %v3076_v19  ;;  %vm3234_vm13 = vcmp.eq.f32.partialorder %v3233_v29, 8.507059e+37  ;;  %vm3246_vm14 = vmor %vm3244_vm11, %vm3245_vm10  ;;  %v10516_v19 = vld [vmem:[#allocation26_spill] sm:$0xff] }
 0x4b5   :  { %v3256_v46 = vsub.f32 1.0, %v3255_v49  ;;  %v3251_v63 = vor.u32 1.1754944e-38, %v3250_v21  ;;  %vm3249_vm15 = vcmp.eq.f32.partialorder %v3248_v7, 8.507059e+37  ;;  %v3212_v39 = vmul.f32 %v8587_v58, %v3211_v1  ;;  %v10518_v49 = vld [vmem:[#allocation28_spill] sm:$0xff]  ;;  %v10521_v1 = vld [vmem:[#allocation31_spill] sm:$0xff] }
 0x4b6   :  { %v3232_v2 = vsel %vm3231_vm12, %v6107_v15, %v3228_v61  ;;  %v3243_v53 = vadd.f32 %v6111_v18, %v3242_v28  ;;  %3291 = vmatmul.bf16.vlgmr.msra.gmra.mxu0 %v3282_v44  ;;  %3305 = vmatmul.bf16.vlgmr.msra.gmra.mxu1 %v3282_v44  ;;  %vm3215_vm0 = vweird.f32 %v8587_v58  ;;  %6116 = vtanh.f32 %v8591_v8  ;;  %v10517_v28 = vld [vmem:[#allocation27_spill] sm:$0xff]  ;;  %v10519_v61 = vld [vmem:[#allocation29_spill] sm:$0xff] }
 0x4b7   :  { %v3237_v43 = vsel %vm3234_vm13, %v3236_v38, %v3232_v2  ;;  %3319 = vmatmul.bf16.vlgmr.msra.gmra.mxu2 %v3282_v44  ;;  %3333 = vmatmul.bf16.vlgmr.msra.gmra.mxu3 %v3282_v44  ;;  %v3257_v12 = vmul.f32 %v8604_v5, %v3256_v46  ;;  %v3213_v52 = vadd.f32 %v8587_v58, %v3212_v39  ;;  %vm3260_vm1 = vweird.f32 %v8604_v5  ;;  %v10522_v38 = vld [vmem:[#allocation32_spill] sm:$0xff]  ;;  %v10523_v44 = vld [vmem:[#allocation33_spill] sm:$0xff]  ;;  %v10524_v46 = vld [vmem:[#allocation34_spill] sm:$0xff] }
 0x4b8   :  { %v3247_v54 = vsel %vm3246_vm14, %v6111_v18, %v3243_v53  ;;  %v3274_v45 = vmul.f32 %v6115_v34, %v3237_v43  ;;  %3534 = vmatpush.bf16.msra.mxu0 %v6644_v37  ;;  %3548 = vmatpush.bf16.msra.mxu1 %v6646_v41  ;;  %vm3214_vm2 = vweird.f32 %v8544_v57  ;;  %v3265_v56 = vand.u32 2147483648, %v8565_v24  ;;  %v10520_v34 = vld [vmem:[#allocation30_spill] sm:$0xff]  ;;  %v10525_v2 = vld [vmem:[#allocation61_spill] sm:$0xff] }
 0x4b9   :  { %v3252_v50 = vsel %vm3249_vm15, %v3251_v63, %v3247_v54  ;;  %3562 = vmatpush.bf16.msra.mxu2 %v6648_v47  ;;  %3576 = vmatpush.bf16.msra.mxu3 %v6651_v48  ;;  %v3258_v16 = vadd.f32 %v8604_v5, %v3257_v12  ;;  %vm8634_vm3 = vmor %vm3214_vm2, %vm3215_vm0  ;;  %v3218_v11 = vand.u32 2147483647, %v8544_v57  ;;  %vm3259_vm4 = vweird.f32 %v8565_v24  ;;  %v10526_v53 = vld [vmem:[#allocation62_spill] sm:$0xff]  ;;  %v10527_v63 = vld [vmem:[#allocation63_spill] sm:$0xff] }
 0x4ba   :  { %v3272_v15 = vmul.f32 %v3252_v50, %v8259_v6  ;;  %v3220_v6 = vand.u32 2147483648, %v8544_v57  ;;  %v3263_v29 = vand.u32 2147483647, %v8565_v24  ;;  %vm3261_vm5 = vmor %vm3259_vm4, %vm3260_vm1  ;;  %v3217_v36 = vsel %vm8634_vm3, %v8587_v58, %v3213_v52  ;;  %v10528_v43 = vld [vmem:[#allocation65_spill] sm:$0xff]  ;;  %v10529_v54 = vld [vmem:[#allocation67_spill] sm:$0xff] }
 0x4bb   :  { %v3262_v55 = vsel %vm3261_vm5, %v8604_v5, %v3258_v16  ;;  %v3266_v10 = vor.u32 1.1754944e-38, %v3265_v56  ;;  %vm3219_vm6 = vcmp.eq.f32.partialorder %v3218_v11, 8.507059e+37  ;;  %v10531_v39 = vld [vmem:[#allocation69_spill] sm:$0xff]  ;;  %v10532_v12 = vld [vmem:[#allocation70_spill] sm:$0xff]  ;;  %v10533_v50 = vld [vmem:[#allocation72_spill] sm:$0xff] }
 0x4bc   :  { %v8621_v18 = vadd.f32 %v3274_v45, %v3272_v15  ;;  %3535 = vmatpush.bf16.msra.mxu0 %v10195_v32  ;;  %3549 = vmatpush.bf16.msra.mxu1 %v10196_v25  ;;  %v6117_v31 = vpop.eup %6116  ;;  %v3221_v20 = vor.u32 1.1754944e-38, %v3220_v6  ;;  %vm3264_vm7 = vcmp.eq.f32.partialorder %v3263_v29, 8.507059e+37  ;;  %v10530_v45 = vld [vmem:[#allocation68_spill] sm:$0xff]  ;;  %v10534_v15 = vld [vmem:[#allocation73_spill] sm:$0xff]  ;;  %v10535_v52 = vld [vmem:[#allocation74_spill] sm:$0xff] }
 0x4bd   :  { %3563 = vmatpush.bf16.msra.mxu2 %v10197_v23  ;;  %3577 = vmatpush.bf16.msra.mxu3 %v6663_v59  ;;  %v3267_v21 = vsel %vm3264_vm7, %v3266_v10, %v3262_v55  ;;  %v10536_v16 = vld [vmem:[#allocation75_spill] sm:$0xff]  ;;  %v10537_v6 = vld [vmem:[#allocation78_spill] sm:$0xff]  ;;  %v10543_v55 = vld [vmem:[#allocation85_spill] sm:$0xff] }
 0x4be   :  { %6118 = vtanh.f32 %v8621_v18  ;;  %v3222_v24 = vsel %vm3219_vm6, %v3221_v20, %v3217_v36  ;;  %v10538_v56 = vld [vmem:[#allocation79_spill] sm:$0xff]  ;;  %v10540_v11 = vld [vmem:[#allocation82_spill] sm:$0xff]  ;;  %v10542_v36 = vld [vmem:[#allocation84_spill] sm:$0xff] }
 0x4bf   :  { %v3279_v7 = vmul.f32 %v6117_v31, %v3222_v24  ;;  %v10541_v29 = vld [vmem:[#allocation83_spill] sm:$0xff]  ;;  %v10545_v20 = vld [vmem:[#allocation89_spill] sm:$0xff]  ;;  %v10546_v10 = vld [vmem:[#allocation90_spill] sm:$0xff] }
 0x4c0   :  { %3536 = vmatpush.bf16.msra.mxu0 %v6665_v60  ;;  %3550 = vmatpush.bf16.msra.mxu1 %v6668_v0  ;;  %v10544_v31 = vld [vmem:[#allocation87_spill] sm:$0xff]  ;;  %v10548_v24 = vld [vmem:[#allocation92_spill] sm:$0xff] }
 0x4c1   :  { %3564 = vmatpush.bf16.msra.mxu2 %v6671_v3  ;;  %3578 = vmatpush.bf16.msra.mxu3 %v6675_v4 }
 0x4c4   :  { %v6119_v57 = vpop.eup %6118  ;;  %3537 = vmatpush.bf16.msra.mxu0 %v6680_v9  ;;  %3551 = vmatpush.bf16.msra.mxu1 %v6682_v13 }
 0x4c5   :  { %v3280_v58 = vmul.f32 %v6119_v57, %v3267_v21  ;;  %3565 = vmatpush.bf16.msra.mxu2 %v6684_v14  ;;  %3579 = vmatpush.bf16.msra.mxu3 %v6687_v17  ;;  %v10547_v57 = vld [vmem:[#allocation91_spill] sm:$0xff]  ;;  %v10549_v21 = vld [vmem:[#allocation94_spill] sm:$0xff] }
 0x4c7   :  { %v3281_v5 = vpack.c.bf16 %v3280_v58, %v3279_v7  ;;  %v10550_v7 = vld [vmem:[#allocation95_spill] sm:$0xff]  ;;  %v10551_v58 = vld [vmem:[#allocation96_spill] sm:$0xff] }
 0x4c8   :  { %3538 = vmatpush.bf16.msra.mxu0 %v6692_v22  ;;  %3552 = vmatpush.bf16.msra.mxu1 %v6694_v26 }
 0x4c9   :  { %3347 = vmatmul.bf16.vlgmr.msrb.gmra.mxu0 %v3281_v5  ;;  %3361 = vmatmul.bf16.vlgmr.msrb.gmra.mxu1 %v3281_v5 }
 0x4ca   :  { %3375 = vmatmul.bf16.vlgmr.msrb.gmra.mxu2 %v3281_v5  ;;  %3389 = vmatmul.bf16.vlgmr.msrb.gmra.mxu3 %v3281_v5 }
 0x4cb   :  { %3566 = vmatpush.bf16.msra.mxu2 %v6696_v27  ;;  %3580 = vmatpush.bf16.msra.mxu3 %v6699_v30 }
 0x4cc   :  { %3539 = vmatpush.bf16.msra.mxu0 %v6704_v35  ;;  %3553 = vmatpush.bf16.msra.mxu1 %v6706_v40 }
 0x4cf   :  { %3567 = vmatpush.bf16.msra.mxu2 %v6708_v42  ;;  %3581 = vmatpush.bf16.msra.mxu3 %v10516_v19 }
 0x4d0   :  { %3540 = vmatpush.bf16.msra.mxu0 %v10517_v28  ;;  %3554 = vmatpush.bf16.msra.mxu1 %v10518_v49 }
 0x4d3   :  { %3568 = vmatpush.bf16.msra.mxu2 %v10519_v61  ;;  %3582 = vmatpush.bf16.msra.mxu3 %v10520_v34 }
 0x4d4   :  { %3541 = vmatpush.bf16.msra.mxu0 %v10521_v1  ;;  %3555 = vmatpush.bf16.msra.mxu1 %v10522_v38 }
 0x4d7   :  { %3569 = vmatpush.bf16.msra.mxu2 %v10523_v44  ;;  %3583 = vmatpush.bf16.msra.mxu3 %v10524_v46 }
 0x4d8   :  { %3734 = vmatpush.bf16.msrb.mxu0 %v10525_v2  ;;  %3748 = vmatpush.bf16.msrb.mxu1 %v10526_v53 }
 0x4d9   :  { %3542 = vmatmul.bf16.vlgmr.msra.gmra.mxu0 %v3281_v5  ;;  %3556 = vmatmul.bf16.vlgmr.msra.gmra.mxu1 %v3281_v5 }
 0x4da   :  { %3570 = vmatmul.bf16.vlgmr.msra.gmra.mxu2 %v3281_v5  ;;  %3584 = vmatmul.bf16.vlgmr.msra.gmra.mxu3 %v3281_v5  ;;  %v10552_v5 = vld [vmem:[#allocation97_spill] sm:$0xff] }
 0x4db   :  { %3762 = vmatpush.bf16.msrb.mxu2 %v10527_v63  ;;  %3776 = vmatpush.bf16.msrb.mxu3 %v10528_v43  ;;  %v10591_v43 = vld [vmem:[#allocation147_spill] sm:$0xff] }
 0x4dc   :  { %3735 = vmatpush.bf16.msrb.mxu0 %v10529_v54  ;;  %3749 = vmatpush.bf16.msrb.mxu1 %v10530_v45 }
 0x4df   :  { %3763 = vmatpush.bf16.msrb.mxu2 %v10531_v39  ;;  %3777 = vmatpush.bf16.msrb.mxu3 %v10532_v12 }
 0x4e0   :  { %3736 = vmatpush.bf16.msrb.mxu0 %v10533_v50  ;;  %3750 = vmatpush.bf16.msrb.mxu1 %v10534_v15 }
 0x4e3   :  { %3764 = vmatpush.bf16.msrb.mxu2 %v10535_v52  ;;  %3778 = vmatpush.bf16.msrb.mxu3 %v10536_v16 }
 0x4e4   :  { %3737 = vmatpush.bf16.msrb.mxu0 %v10537_v6  ;;  %3751 = vmatpush.bf16.msrb.mxu1 %v10538_v56 }
 0x4e7   :  { %3765 = vmatpush.bf16.msrb.mxu2 %v10539_v62  ;;  %3779 = vmatpush.bf16.msrb.mxu3 %v10540_v11 }
 0x4e8   :  { %3738 = vmatpush.bf16.msrb.mxu0 %v10541_v29  ;;  %3752 = vmatpush.bf16.msrb.mxu1 %v10542_v36  ;;  %v10553_v36 = vld [vmem:[#allocation100_spill] sm:$0xff] }
 0x4eb   :  { %3766 = vmatpush.bf16.msrb.mxu2 %v10543_v55  ;;  %3780 = vmatpush.bf16.msrb.mxu3 %v10544_v31  ;;  %v10554_v55 = vld [vmem:[#allocation102_spill] sm:$0xff]  ;;  %v10555_v31 = vld [vmem:[#allocation105_spill] sm:$0xff] }
 0x4ec   :  { %3739 = vmatpush.bf16.msrb.mxu0 %v10545_v20  ;;  %3753 = vmatpush.bf16.msrb.mxu1 %v10546_v10  ;;  %v10556_v20 = vld [vmem:[#allocation106_spill] sm:$0xff]  ;;  %v10557_v10 = vld [vmem:[#allocation103_spill] sm:$0xff] }
 0x4ef   :  { %3767 = vmatpush.bf16.msrb.mxu2 %v10547_v57  ;;  %3781 = vmatpush.bf16.msrb.mxu3 %v10548_v24  ;;  %v10558_v57 = vld [vmem:[#allocation104_spill] sm:$0xff]  ;;  %v10559_v24 = vld [vmem:[#allocation107_spill] sm:$0xff] }
 0x4f0   :  { %3740 = vmatpush.bf16.msrb.mxu0 %v10549_v21  ;;  %3754 = vmatpush.bf16.msrb.mxu1 %v10550_v7  ;;  %v10560_v21 = vld [vmem:[#allocation109_spill] sm:$0xff]  ;;  %v10561_v7 = vld [vmem:[#allocation112_spill] sm:$0xff] }
 0x4f3   :  { %3768 = vmatpush.bf16.msrb.mxu2 %v10551_v58  ;;  %3782 = vmatpush.bf16.msrb.mxu3 %v10552_v5  ;;  %v10562_v58 = vld [vmem:[#allocation113_spill] sm:$0xff]  ;;  %v10563_v5 = vld [vmem:[#allocation114_spill] sm:$0xff] }
 0x4f4   :  { %3741 = vmatpush.bf16.msrb.mxu0 %v10553_v36  ;;  %3755 = vmatpush.bf16.msrb.mxu1 %v10554_v55  ;;  %v10564_v36 = vld [vmem:[#allocation115_spill] sm:$0xff]  ;;  %v10565_v55 = vld [vmem:[#allocation118_spill] sm:$0xff] }
 0x4f7   :  { %3769 = vmatpush.bf16.msrb.mxu2 %v10557_v10  ;;  %3783 = vmatpush.bf16.msrb.mxu3 %v10558_v57  ;;  %v10568_v10 = vld [vmem:[#allocation122_spill] sm:$0xff]  ;;  %v10569_v57 = vld [vmem:[#allocation123_spill] sm:$0xff] }
 0x4f8   :  { %3790 = vmatpush.bf16.msra.mxu0 %v10555_v31  ;;  %3804 = vmatpush.bf16.msra.mxu1 %v10556_v20  ;;  %v10566_v31 = vld [vmem:[#allocation119_spill] sm:$0xff]  ;;  %v10567_v20 = vld [vmem:[#allocation120_spill] sm:$0xff] }
 0x4fb   :  { %3818 = vmatpush.bf16.msra.mxu2 %v10559_v24  ;;  %3832 = vmatpush.bf16.msra.mxu3 %v10560_v21  ;;  %v10570_v24 = vld [vmem:[#allocation124_spill] sm:$0xff]  ;;  %v10571_v21 = vld [vmem:[#allocation125_spill] sm:$0xff] }
 0x4fc   :  { %3791 = vmatpush.bf16.msra.mxu0 %v10561_v7  ;;  %3805 = vmatpush.bf16.msra.mxu1 %v10562_v58  ;;  %v10572_v7 = vld [vmem:[#allocation127_spill] sm:$0xff]  ;;  %v10573_v58 = vld [vmem:[#allocation128_spill] sm:$0xff] }
 0x4ff   :  { %3819 = vmatpush.bf16.msra.mxu2 %v10563_v5  ;;  %3833 = vmatpush.bf16.msra.mxu3 %v10564_v36  ;;  %v10574_v5 = vld [vmem:[#allocation129_spill] sm:$0xff]  ;;  %v10575_v36 = vld [vmem:[#allocation130_spill] sm:$0xff] }
 0x500   :  { %3792 = vmatpush.bf16.msra.mxu0 %v10565_v55  ;;  %3806 = vmatpush.bf16.msra.mxu1 %v10566_v31  ;;  %v10576_v55 = vld [vmem:[#allocation131_spill] sm:$0xff]  ;;  %v10577_v31 = vld [vmem:[#allocation133_spill] sm:$0xff] }
 0x503   :  { %3820 = vmatpush.bf16.msra.mxu2 %v10567_v20  ;;  %3834 = vmatpush.bf16.msra.mxu3 %v10568_v10  ;;  %v10578_v20 = vld [vmem:[#allocation134_spill] sm:$0xff]  ;;  %v10579_v10 = vld [vmem:[#allocation135_spill] sm:$0xff] }
 0x504   :  { %3793 = vmatpush.bf16.msra.mxu0 %v10569_v57  ;;  %3807 = vmatpush.bf16.msra.mxu1 %v10570_v24  ;;  %v10580_v57 = vld [vmem:[#allocation136_spill] sm:$0xff]  ;;  %v10581_v24 = vld [vmem:[#allocation137_spill] sm:$0xff] }
 0x507   :  { %3821 = vmatpush.bf16.msra.mxu2 %v10571_v21  ;;  %3835 = vmatpush.bf16.msra.mxu3 %v10572_v7  ;;  %v10582_v21 = vld [vmem:[#allocation138_spill] sm:$0xff]  ;;  %v10583_v7 = vld [vmem:[#allocation139_spill] sm:$0xff] }
 0x508   :  { %3794 = vmatpush.bf16.msra.mxu0 %v10573_v58  ;;  %3808 = vmatpush.bf16.msra.mxu1 %v10574_v5  ;;  %v10584_v58 = vld [vmem:[#allocation140_spill] sm:$0xff]  ;;  %v10585_v5 = vld [vmem:[#allocation141_spill] sm:$0xff] }
 0x50b   :  { %3822 = vmatpush.bf16.msra.mxu2 %v10575_v36  ;;  %3836 = vmatpush.bf16.msra.mxu3 %v10576_v55  ;;  %v10586_v36 = vld [vmem:[#allocation142_spill] sm:$0xff]  ;;  %v10587_v55 = vld [vmem:[#allocation143_spill] sm:$0xff] }
 0x50c   :  { %3795 = vmatpush.bf16.msra.mxu0 %v10577_v31  ;;  %3809 = vmatpush.bf16.msra.mxu1 %v10578_v20  ;;  %v10588_v31 = vld [vmem:[#allocation144_spill] sm:$0xff] }
 0x50f   :  { %3823 = vmatpush.bf16.msra.mxu2 %v10579_v10  ;;  %3837 = vmatpush.bf16.msra.mxu3 %v10580_v57 }
 0x510   :  { %3796 = vmatpush.bf16.msra.mxu0 %v10581_v24  ;;  %3810 = vmatpush.bf16.msra.mxu1 %v10582_v21 }
 0x513   :  { %3824 = vmatpush.bf16.msra.mxu2 %v10583_v7  ;;  %3838 = vmatpush.bf16.msra.mxu3 %v10584_v58  ;;  %v10589_v58 = vld [vmem:[#allocation145_spill] sm:$0xff] }
 0x514   :  { %3797 = vmatpush.bf16.msra.mxu0 %v10585_v5  ;;  %3811 = vmatpush.bf16.msra.mxu1 %v10586_v36  ;;  %v10590_v5 = vld [vmem:[#allocation146_spill] sm:$0xff] }
 0x517   :  { %3825 = vmatpush.bf16.msra.mxu2 %v10587_v55  ;;  %3839 = vmatpush.bf16.msra.mxu3 %v10588_v31 }
 0x533   :  { %v3292_v20 = vpop.f32.mrf.mxu0  ;;  %v3306_v10 = vpop.f32.mrf.mxu1 }
 0x53a   :  { %v3320_v29 = vpop.f32.mrf.mxu2  ;;  %v3334_v24 = vpop.f32.mrf.mxu3 }
 0x53b   :  { %v3294_v57 = vpop.f32.mrf.mxu0  ;;  %v3308_v11 = vpop.f32.mrf.mxu1 }
 0x542   :  { %v3322_v62 = vpop.f32.mrf.mxu2  ;;  %v8735_v36 = vpop.f32.mrf.mxu3 }
 0x546   :  { %v3348_v21 = vpop.f32.mrf.mxu0  ;;  %v3362_v56 = vpop.f32.mrf.mxu1 }
 0x547   :  { %v3349_v7 = vadd.f32 %v3348_v21, %v3292_v20  ;;  %v3363_v6 = vadd.f32 %v3362_v56, %v3306_v10 }
 0x549   :  { %v3395_v16 = vadd.f32 %v3349_v7, %v10589_v58  ;;  %v3396_v52 = vadd.f32 %v3363_v6, %v10590_v5 }
 0x54b   :  { %v5598_v55 = vmul.f32 -1.442695, %v3395_v16  ;;  %v5599_v15 = vmul.f32 -1.442695, %v3396_v52 }
 0x54d   :  { %6120 = vpow2.f32 %v5598_v55  ;;  %v3376_v31 = vpop.f32.mrf.mxu2 }
 0x54e   :  { %6122 = vpow2.f32 %v5599_v15  ;;  %v3377_v50 = vadd.f32 %v3376_v31, %v3320_v29  ;;  %v3350_v12 = vpop.f32.mrf.mxu0  ;;  %v3364_v39 = vpop.f32.mrf.mxu1  ;;  %v10592_v15 = vld [vmem:[#allocation35_spill] sm:$0xff]  ;;  %v10593_v29 = vld [vmem:[#allocation76_spill] sm:$0xff] }
 0x54f   :  { %v3351_v45 = vadd.f32 %v3350_v12, %v3294_v57  ;;  %v3365_v54 = vadd.f32 %v3364_v39, %v3308_v11  ;;  %v455_v55 = vadd.f32 %v10593_v29, %v10592_v15  ;;  %v10594_v31 = vld [vmem:[#allocation36_spill] sm:$0xff]  ;;  %v10595_v12 = vld [vmem:[#allocation77_spill] sm:$0xff]  ;;  %v10600_v15 = vld [vmem:[#allocation71_spill] sm:$0xff] }
 0x550   :  { %v3397_v63 = vadd.f32 %v3377_v50, %v10591_v43  ;;  %v504_v39 = vadd.f32 %v10595_v12, %v10594_v31  ;;  %v3390_v50 = vpop.f32.mrf.mxu3 }
 0x551   :  { %v3399_v56 = vadd.f32 %v3351_v45, %v10589_v58  ;;  %v3400_v20 = vadd.f32 %v3365_v54, %v10590_v5  ;;  %v10596_v54 = vld [vmem:[#allocation37_spill] sm:$0xff]  ;;  %v10599_v5 = vld [vmem:[#allocation88_spill] sm:$0xff] }
 0x552   :  { %v5600_v10 = vmul.f32 -1.442695, %v3397_v63  ;;  %v10597_v63 = vld [vmem:[#allocation86_spill] sm:$0xff] }
 0x553   :  { %v6121_v6 = vpop.eup %6120  ;;  %v5601_v21 = vmul.f32 -1.442695, %v3399_v56  ;;  %v5602_v52 = vmul.f32 -1.442695, %v3400_v20  ;;  %v553_v57 = vadd.f32 %v10597_v63, %v10596_v54  ;;  %v10598_v56 = vld [vmem:[#allocation38_spill] sm:$0xff]  ;;  %v3590_v63 = vunpack.c.l.bf16 %v10600_v15 }
 0x554   :  { %v6123_v7 = vpop.eup %6122  ;;  %v8740_v16 = vadd.f32 1.0, %v6121_v6  ;;  %6124 = vpow2.f32 %v5600_v10  ;;  %v602_v6 = vadd.f32 %v10599_v5, %v10598_v56  ;;  %v8754_v10 = vpack.c.bf16 %v504_v39, %v455_v55  ;;  %v10601_v56 = vld [vmem:[#allocation81_spill] sm:$0xff] }
 0x555   :  { %v8746_v11 = vadd.f32 1.0, %v6123_v7  ;;  %6126 = vpow2.f32 %v5601_v21  ;;  %v3378_v45 = vpop.f32.mrf.mxu2  ;;  %v3591_v5 = vunpack.c.h.bf16 %v10600_v15 }
 0x556   :  { %6128 = vrcp.f32 %v8740_v16  ;;  %v3379_v20 = vadd.f32 %v3378_v45, %v3322_v62  ;;  %v8756_v7 = vpack.c.bf16 %v602_v6, %v553_v57  ;;  %v3543_v12 = vpop.f32.mrf.mxu0  ;;  %v3557_v54 = vpop.f32.mrf.mxu1  ;;  %v3436_v15 = vand.u32 2147483647, %v8740_v16 }
 0x557   :  { %6130 = vrcp.f32 %v8746_v11  ;;  %v3598_v6 = vadd.f32 %v3590_v63, %v3543_v12  ;;  %v3438_v53 = vand.u32 2147483648, %v8740_v16  ;;  %v3453_v2 = vand.u32 2147483648, %v8746_v11 }
 0x558   :  { %6132 = vpow2.f32 %v5602_v52  ;;  %v3401_v21 = vadd.f32 %v3379_v20, %v10591_v43  ;;  %v3391_v52 = vadd.f32 %v3390_v50, %v3334_v24  ;;  %v3599_v24 = vadd.f32 %v3591_v5, %v3557_v54  ;;  %v3392_v12 = vpop.f32.mrf.mxu3  ;;  %v10602_v20 = vld [vmem:[#allocation40_spill] sm:$0xff] }
 0x559   :  { %v5604_v5 = vmul.f32 -1.442695, %v3598_v6  ;;  %vm3447_vm10 = vweird.f32 %v8746_v11  ;;  %vm3432_vm11 = vweird.f32 %v8740_v16  ;;  %vm8803_vm13 = vcmp.eq.f32.partialorder %v3436_v15, 8.507059e+37 }
 0x55a   :  { %v6125_v29 = vpop.eup %6124  ;;  %v5603_v55 = vmul.f32 -1.442695, %v3401_v21  ;;  %v3398_v44 = vadd.f32 %v3391_v52, %v10602_v20  ;;  %v10616_v49 = vunpack.c.l.bf16 %v8756_v7 }
 0x55b   :  { %v6127_v31 = vpop.eup %6126  ;;  %v8777_v21 = vadd.f32 1.0, %v6125_v29 }
 0x55c   :  { %v8762_v46 = vpop.eup %6128  ;;  %v8764_v62 = vadd.f32 1.0, %v6127_v31 }
 0x55d   :  { %v8767_v45 = vpop.eup %6130  ;;  %v3428_v57 = vmul.f32 %v8762_v46, %v8740_v16  ;;  %vm3433_vm9 = vweird.f32 %v8762_v46 }
 0x55e   :  { %v6133_v43 = vpop.eup %6132  ;;  %v3443_v58 = vmul.f32 %v8767_v45, %v8746_v11  ;;  %6134 = vrcp.f32 %v8764_v62  ;;  %vm3448_vm8 = vweird.f32 %v8767_v45  ;;  %vm8811_vm14 = vmor %vm3432_vm11, %vm3433_vm9  ;;  %vm3477_vm0 = vweird.f32 %v8764_v62 }
 0x55f   :  { %v3429_v50 = vsub.f32 1.0, %v3428_v57  ;;  %v8779_v39 = vadd.f32 1.0, %v6133_v43  ;;  %6136 = vpow2.f32 %v5603_v55  ;;  %v3451_v43 = vand.u32 2147483647, %v8746_v11  ;;  %vm8799_vm12 = vmor %vm3447_vm10, %vm3448_vm8 }
 0x560   :  { %v3444_v63 = vsub.f32 1.0, %v3443_v58  ;;  %v3393_v58 = vadd.f32 %v3392_v12, %v8735_v36  ;;  %v5605_v55 = vmul.f32 -1.442695, %v3599_v24  ;;  %v3439_v24 = vor.u32 1.1754944e-38, %v3438_v53 }
 0x561   :  { %v3430_v54 = vmul.f32 %v8762_v46, %v3429_v50  ;;  %6138 = vrcp.f32 %v8779_v39  ;;  %v3571_v50 = vpop.f32.mrf.mxu2  ;;  %v3454_v11 = vor.u32 1.1754944e-38, %v3453_v2  ;;  %vm8815_vm15 = vcmp.eq.f32.partialorder %v3451_v43, 8.507059e+37 }
 0x562   :  { %v3445_v29 = vmul.f32 %v8767_v45, %v3444_v63  ;;  %6140 = vrcp.f32 %v8777_v21  ;;  %v3483_v38 = vand.u32 2147483648, %v8764_v62  ;;  %vm3492_vm1 = vweird.f32 %v8779_v39 }
 0x563   :  { %v3431_v52 = vadd.f32 %v8762_v46, %v3430_v54  ;;  %6142 = vtanh.f32 %v3398_v44  ;;  %v3545_v44 = vpop.f32.mrf.mxu0  ;;  %v3498_v1 = vand.u32 2147483648, %v8779_v39  ;;  %vm3462_vm9 = vweird.f32 %v8777_v21 }
 0x564   :  { %v8794_v57 = vpop.eup %6134  ;;  %v3446_v6 = vadd.f32 %v8767_v45, %v3445_v29  ;;  %6144 = vpow2.f32 %v5604_v5  ;;  %v3402_v29 = vadd.f32 %v3393_v58, %v10602_v20 }
 0x565   :  { %v6137_v63 = vpop.eup %6136  ;;  %v3473_v54 = vmul.f32 %v8794_v57, %v8764_v62  ;;  %v3435_v5 = vsel %vm8811_vm14, %v8762_v46, %v3431_v52  ;;  %6146 = vpow2.f32 %v5605_v55  ;;  %vm3478_vm2 = vweird.f32 %v8794_v57 }
 0x566   :  { %v8819_v15 = vadd.f32 1.0, %v6137_v63  ;;  %v3450_v2 = vsel %vm8799_vm12, %v8767_v45, %v3446_v6  ;;  %v3481_v63 = vand.u32 2147483647, %v8764_v62  ;;  %v10611_v45 = vunpack.c.l.bf16 %v10601_v56  ;;  %vm8854_vm4 = vmor %vm3477_vm0, %vm3478_vm2 }
 0x567   :  { %v6139_v53 = vpop.eup %6138  ;;  %v3474_v31 = vsub.f32 1.0, %v3473_v54  ;;  %v3440_v6 = vsel %vm8803_vm13, %v3439_v24, %v3435_v5  ;;  %v3455_v36 = vsel %vm8815_vm15, %v3454_v11, %v3450_v2 }
 0x568   :  { %v3488_v43 = vmul.f32 %v6139_v53, %v8779_v39  ;;  %v8832_v58 = vpop.eup %6140  ;;  %6148 = vrcp.f32 %v8819_v15  ;;  %v3600_v52 = vadd.f32 %v10611_v45, %v3571_v50  ;;  %vm3493_vm3 = vweird.f32 %v6139_v53  ;;  %v3559_v45 = vpop.f32.mrf.mxu1 }
 0x569   :  { %v3475_v46 = vmul.f32 %v8794_v57, %v3474_v31  ;;  %v6143_v55 = vpop.eup %6142  ;;  %v3496_v31 = vand.u32 2147483647, %v8779_v39  ;;  %6150 = vtanh.f32 %v3402_v29  ;;  %v3458_v50 = vmul.f32 %v8832_v58, %v8777_v21  ;;  %vm3494_vm5 = vmor %vm3492_vm1, %vm3493_vm3 }
 0x56a   :  { %v3489_v54 = vsub.f32 1.0, %v3488_v43  ;;  %v6145_v20 = vpop.eup %6144  ;;  %v3519_v16 = vmul.f32 %v3455_v36, %v8524_v51  ;;  %v3521_v5 = vmul.f32 %v6143_v55, %v3440_v6  ;;  %v5606_v43 = vmul.f32 -1.442695, %v3600_v52  ;;  %v3573_v55 = vpop.f32.mrf.mxu2 }
 0x56b   :  { %v3476_v34 = vadd.f32 %v8794_v57, %v3475_v46  ;;  %v8849_v24 = vadd.f32 1.0, %v6145_v20  ;;  %v6147_v11 = vpop.eup %6146  ;;  %v10614_v29 = vunpack.c.l.bf16 %v8754_v10  ;;  %v3499_v52 = vor.u32 1.1754944e-38, %v3498_v1 }
 0x56c   :  { %v3490_v12 = vmul.f32 %v6139_v53, %v3489_v54  ;;  %v8864_v51 = vadd.f32 1.0, %v6147_v11  ;;  %vm3482_vm6 = vcmp.eq.f32.partialorder %v3481_v63, 8.507059e+37  ;;  %v3484_v6 = vor.u32 1.1754944e-38, %v3483_v38 }
 0x56d   :  { %v3602_v46 = vadd.f32 %v10614_v29, %v3545_v44  ;;  %v3480_v20 = vsel %vm8854_vm4, %v8794_v57, %v3476_v34  ;;  %6152 = vrcp.f32 %v8849_v24  ;;  %vm3497_vm7 = vcmp.eq.f32.partialorder %v3496_v31, 8.507059e+37  ;;  %v3585_v34 = vpop.f32.mrf.mxu3 }
 0x56e   :  { %v3491_v54 = vadd.f32 %v6139_v53, %v3490_v12  ;;  %v8866_v62 = vpop.eup %6148  ;;  %v3459_v36 = vsub.f32 1.0, %v3458_v50  ;;  %6154 = vrcp.f32 %v8864_v51  ;;  %v10615_v57 = vunpack.c.h.bf16 %v8754_v10 }
 0x56f   :  { %v6151_v11 = vpop.eup %6150  ;;  %v3485_v2 = vsel %vm3482_vm6, %v3484_v6, %v3480_v20  ;;  %v5607_v61 = vmul.f32 -1.442695, %v3602_v46  ;;  %v3604_v39 = vadd.f32 %v10616_v49, %v3573_v55  ;;  %v8876_v28 = vadd.f32 %v3521_v5, %v3519_v16 }
 0x570   :  { %v3495_v44 = vsel %vm3494_vm5, %v6139_v53, %v3491_v54  ;;  %v3603_v12 = vadd.f32 %v10615_v57, %v3559_v45  ;;  %v3503_v1 = vmul.f32 %v8866_v62, %v8819_v15  ;;  %6156 = vpow2.f32 %v5606_v43 }
 0x571   :  { %v3500_v29 = vsel %vm3497_vm7, %v3499_v52, %v3495_v44  ;;  %v10617_v38 = vunpack.c.h.bf16 %v10601_v56  ;;  %v3468_v10 = vand.u32 2147483648, %v8777_v21  ;;  %v3522_v50 = vmul.f32 %v6151_v11, %v3485_v2 }
 0x572   :  { %v3520_v31 = vmul.f32 %v3500_v29, %v8537_v33  ;;  %v5608_v45 = vmul.f32 -1.442695, %v3603_v12  ;;  %v3460_v46 = vmul.f32 %v8832_v58, %v3459_v36  ;;  %vm3463_vm8 = vweird.f32 %v8832_v58 }
 0x573   :  { %v3601_v53 = vadd.f32 %v10617_v38, %v3585_v34  ;;  %v6153_v63 = vpop.eup %6152  ;;  %6158 = vpow2.f32 %v5607_v61  ;;  %v5609_v16 = vmul.f32 -1.442695, %v3604_v39  ;;  %v3504_v56 = vsub.f32 1.0, %v3503_v1  ;;  %vm8920_vm4 = vmor %vm3462_vm9, %vm3463_vm8 }
 0x574   :  { %v3631_v49 = vmul.f32 %v6153_v63, %v8849_v24  ;;  %v6155_v5 = vpop.eup %6154  ;;  %6160 = vtanh.f32 %v8876_v28  ;;  %v3513_v43 = vand.u32 2147483648, %v8819_v15  ;;  %v3639_v20 = vand.u32 2147483647, %v8849_v24 }
 0x575   :  { %v3646_v54 = vmul.f32 %v6155_v5, %v8864_v51  ;;  %v3641_v55 = vand.u32 2147483648, %v8849_v24  ;;  %6162 = vtanh.f32 %v3601_v53  ;;  %vm3507_vm10 = vweird.f32 %v8819_v15 }
 0x576   :  { %v3632_v33 = vsub.f32 1.0, %v3631_v49  ;;  %v6157_v52 = vpop.eup %6156  ;;  %v8894_v61 = vadd.f32 %v3522_v50, %v3520_v31  ;;  %v3656_v6 = vand.u32 2147483648, %v8864_v51  ;;  %v3654_v36 = vand.u32 2147483647, %v8864_v51 }
 0x577   :  { %6164 = vpow2.f32 %v5608_v45  ;;  %v3647_v44 = vsub.f32 1.0, %v3646_v54  ;;  %vm3636_vm11 = vweird.f32 %v6153_v63  ;;  %v3505_v57 = vmul.f32 %v8866_v62, %v3504_v56 }
 0x578   :  { %v3633_v34 = vmul.f32 %v6153_v63, %v3632_v33  ;;  %6166 = vpow2.f32 %v5609_v16  ;;  %vm3508_vm12 = vweird.f32 %v8866_v62  ;;  %vm3650_vm13 = vweird.f32 %v8864_v51 }
 0x579   :  { %vm3635_vm14 = vweird.f32 %v8849_v24  ;;  %v6159_v12 = vpop.eup %6158  ;;  %v3648_v11 = vmul.f32 %v6155_v5, %v3647_v44  ;;  %vm3651_vm15 = vweird.f32 %v6155_v5  ;;  %v8902_v2 = vadd.f32 1.0, %v6157_v52  ;;  %vm8932_vm5 = vmor %vm3507_vm10, %vm3508_vm12 }
 0x57a   :  { %v3634_v29 = vadd.f32 %v6153_v63, %v3633_v34  ;;  %v6161_v39 = vpop.eup %6160  ;;  %v3657_v1 = vor.u32 1.1754944e-38, %v3656_v6  ;;  %vm3637_vm0 = vmor %vm3635_vm14, %vm3636_vm11  ;;  %vm3640_vm1 = vcmp.eq.f32.partialorder %v3639_v20, 8.507059e+37  ;;  %v3642_v38 = vor.u32 1.1754944e-38, %v3641_v55 }
 0x57b   :  { %v8904_v53 = vadd.f32 1.0, %v6159_v12  ;;  %v6163_v31 = vpop.eup %6162  ;;  %6168 = vtanh.f32 %v8894_v61  ;;  %v3649_v45 = vadd.f32 %v6155_v5, %v3648_v11  ;;  %vm3655_vm2 = vcmp.eq.f32.partialorder %v3654_v36, 8.507059e+37  ;;  %vm3652_vm3 = vmor %vm3650_vm13, %vm3651_vm15 }
 0x57c   :  { %v3638_v50 = vsel %vm3637_vm0, %v6153_v63, %v3634_v29  ;;  %v3461_v16 = vadd.f32 %v8832_v58, %v3460_v46  ;;  %v3506_v56 = vadd.f32 %v8866_v62, %v3505_v57  ;;  %v3587_v46 = vpop.f32.mrf.mxu3  ;;  %v3466_v6 = vand.u32 2147483647, %v8777_v21 }
 0x57d   :  { %v6165_v24 = vpop.eup %6164  ;;  %v3643_v49 = vsel %vm3640_vm1, %v3642_v38, %v3638_v50  ;;  %6170 = vrcp.f32 %v8904_v53  ;;  %v3653_v33 = vsel %vm3652_vm3, %v6155_v5, %v3649_v45  ;;  %v3511_v36 = vand.u32 2147483647, %v8819_v15 }
 0x57e   :  { %v6167_v20 = vpop.eup %6166  ;;  %6172 = vrcp.f32 %v8902_v2  ;;  %v3724_v54 = vmul.f32 %v6163_v31, %v3643_v49  ;;  %v8914_v63 = vadd.f32 1.0, %v6165_v24  ;;  %v3658_v55 = vsel %vm3655_vm2, %v3657_v1, %v3653_v33 }
 0x57f   :  { %v8924_v52 = vadd.f32 1.0, %v6167_v20  ;;  %v3722_v44 = vmul.f32 %v3658_v55, %v8591_v8  ;;  %v3597_v34 = vunpack.c.h.bf16 %v8756_v7  ;;  %v3465_v57 = vsel %vm8920_vm4, %v8832_v58, %v3461_v16 }
 0x580   :  { %6174 = vrcp.f32 %v8914_v63  ;;  %v3510_v15 = vsel %vm8932_vm5, %v8866_v62, %v3506_v56  ;;  %v3469_v11 = vor.u32 1.1754944e-38, %v3468_v10  ;;  %v3514_v29 = vor.u32 1.1754944e-38, %v3513_v43 }
 0x581   :  { %6176 = vrcp.f32 %v8924_v52  ;;  %v6169_v12 = vpop.eup %6168  ;;  %v8948_v8 = vadd.f32 %v3724_v54, %v3722_v44  ;;  %v3605_v1 = vadd.f32 %v3597_v34, %v3587_v46  ;;  %vm3467_vm6 = vcmp.eq.f32.partialorder %v3466_v6, 8.507059e+37 }
 0x582   :  { %vm3512_vm7 = vcmp.eq.f32.partialorder %v3511_v36, 8.507059e+37  ;;  %v3470_v58 = vsel %vm3467_vm6, %v3469_v11, %v3465_v57  ;;  %v3686_v16 = vand.u32 2147483648, %v8904_v53  ;;  %v3701_v51 = vand.u32 2147483648, %v8914_v63 }
 0x583   :  { %v6171_v38 = vpop.eup %6170  ;;  %v3515_v50 = vsel %vm3512_vm7, %v3514_v29, %v3510_v15  ;;  %v3527_v45 = vmul.f32 %v6161_v39, %v3470_v58  ;;  %6178 = vtanh.f32 %v3605_v1  ;;  %v3684_v39 = vand.u32 2147483647, %v8904_v53 }
 0x584   :  { %v8950_v7 = vpop.eup %6172  ;;  %v3676_v31 = vmul.f32 %v6171_v38, %v8904_v53  ;;  %v3528_v24 = vmul.f32 %v6169_v12, %v3515_v50  ;;  %vm3681_vm8 = vweird.f32 %v6171_v38  ;;  %vm3680_vm9 = vweird.f32 %v8904_v53 }
 0x585   :  { %v3661_v10 = vmul.f32 %v8950_v7, %v8902_v2  ;;  %vm3682_vm11 = vmor %vm3680_vm9, %vm3681_vm8  ;;  %v3687_v6 = vor.u32 1.1754944e-38, %v3686_v16  ;;  %v3699_v36 = vand.u32 2147483647, %v8914_v63  ;;  %vm3685_vm12 = vcmp.eq.f32.partialorder %v3684_v39, 8.507059e+37 }
 0x586   :  { %v6175_v62 = vpop.eup %6174  ;;  %v3677_v49 = vsub.f32 1.0, %v3676_v31  ;;  %v3733_v56 = vpack.c.bf16 %v3528_v24, %v3527_v45  ;;  %vm3695_vm13 = vweird.f32 %v8914_v63  ;;  %v3702_v12 = vor.u32 1.1754944e-38, %v3701_v51  ;;  %v10624_v51 = vld [vmem:[#allocation27_spill] sm:$0xff] }
 0x587   :  { %v8953_v21 = vpop.eup %6176  ;;  %v3691_v43 = vmul.f32 %v6175_v62, %v8914_v63  ;;  %vm3696_vm10 = vweird.f32 %v6175_v62  ;;  %v3662_v44 = vsub.f32 1.0, %v3661_v10  ;;  %vm3700_vm15 = vcmp.eq.f32.partialorder %v3699_v36, 8.507059e+37  ;;  %v10628_v36 = vld [vmem:[#allocation31_spill] sm:$0xff] }
 0x588   :  { %v3706_v20 = vmul.f32 %v8953_v21, %v8924_v52  ;;  %v3678_v33 = vmul.f32 %v6171_v38, %v3677_v49  ;;  %3742 = vmatmul.bf16.vlgmr.msrb.gmra.mxu0 %v3733_v56  ;;  %3756 = vmatmul.bf16.vlgmr.msrb.gmra.mxu1 %v3733_v56  ;;  %vm3697_vm14 = vmor %vm3695_vm13, %vm3696_vm10  ;;  %vm3666_vm0 = vweird.f32 %v8950_v7  ;;  %6180 = vtanh.f32 %v8948_v8 }
 0x589   :  { %v3692_v54 = vsub.f32 1.0, %v3691_v43  ;;  %3770 = vmatmul.bf16.vlgmr.msrb.gmra.mxu2 %v3733_v56  ;;  %3784 = vmatmul.bf16.vlgmr.msrb.gmra.mxu3 %v3733_v56  ;;  %v6179_v5 = vpop.eup %6178  ;;  %v3663_v1 = vmul.f32 %v8950_v7, %v3662_v44  ;;  %vm3711_vm1 = vweird.f32 %v8953_v21  ;;  %vm3665_vm2 = vweird.f32 %v8902_v2  ;;  %v10630_v44 = vld [vmem:[#allocation61_spill] sm:$0xff] }
 0x58a   :  { %v3679_v55 = vadd.f32 %v6171_v38, %v3678_v33  ;;  %3985 = vmatpush.bf16.msrb.mxu0 %v6644_v37  ;;  %3999 = vmatpush.bf16.msrb.mxu1 %v6646_v41  ;;  %v3707_v34 = vsub.f32 1.0, %v3706_v20  ;;  %v3716_v24 = vand.u32 2147483648, %v8924_v52  ;;  %vm8993_vm3 = vmor %vm3665_vm2, %vm3666_vm0  ;;  %v3669_v49 = vand.u32 2147483647, %v8902_v2 }
 0x58b   :  { %v3693_v46 = vmul.f32 %v6175_v62, %v3692_v54  ;;  %4013 = vmatpush.bf16.msrb.mxu2 %v6648_v47  ;;  %4027 = vmatpush.bf16.msrb.mxu3 %v6651_v48  ;;  %v3664_v50 = vadd.f32 %v8950_v7, %v3663_v1  ;;  %vm3710_vm4 = vweird.f32 %v8924_v52  ;;  %v3714_v10 = vand.u32 2147483647, %v8924_v52  ;;  %v10638_v1 = vld [vmem:[#allocation69_spill] sm:$0xff] }
 0x58c   :  { %v3683_v57 = vsel %vm3682_vm11, %v6171_v38, %v3679_v55  ;;  %v3708_v38 = vmul.f32 %v8953_v21, %v3707_v34  ;;  %vm3712_vm5 = vmor %vm3710_vm4, %vm3711_vm1  ;;  %v3717_v20 = vor.u32 1.1754944e-38, %v3716_v24  ;;  %vm3670_vm6 = vcmp.eq.f32.partialorder %v3669_v49, 8.507059e+37  ;;  %v10625_v55 = vld [vmem:[#allocation28_spill] sm:$0xff]  ;;  %v10631_v34 = vld [vmem:[#allocation62_spill] sm:$0xff] }
 0x58d   :  { %v3688_v53 = vsel %vm3685_vm12, %v3687_v6, %v3683_v57  ;;  %v3694_v15 = vadd.f32 %v6175_v62, %v3693_v46  ;;  %v3668_v43 = vsel %vm8993_vm3, %v8950_v7, %v3664_v50  ;;  %vm3715_vm7 = vcmp.eq.f32.partialorder %v3714_v10, 8.507059e+37  ;;  %v10626_v46 = vld [vmem:[#allocation29_spill] sm:$0xff]  ;;  %v10627_v6 = vld [vmem:[#allocation30_spill] sm:$0xff]  ;;  %v10645_v24 = vld [vmem:[#allocation79_spill] sm:$0xff] }
 0x58e   :  { %v3725_v29 = vmul.f32 %v6179_v5, %v3688_v53  ;;  %3986 = vmatpush.bf16.msrb.mxu0 %v10195_v32  ;;  %4000 = vmatpush.bf16.msrb.mxu1 %v10196_v25  ;;  %v3709_v45 = vadd.f32 %v8953_v21, %v3708_v38  ;;  %v10629_v5 = vld [vmem:[#allocation32_spill] sm:$0xff]  ;;  %v10632_v57 = vld [vmem:[#allocation33_spill] sm:$0xff]  ;;  %v10633_v53 = vld [vmem:[#allocation34_spill] sm:$0xff] }
 0x58f   :  { %v3698_v11 = vsel %vm3697_vm14, %v6175_v62, %v3694_v15  ;;  %4014 = vmatpush.bf16.msrb.mxu2 %v10197_v23  ;;  %4028 = vmatpush.bf16.msrb.mxu3 %v6663_v59  ;;  %v10634_v15 = vld [vmem:[#allocation63_spill] sm:$0xff]  ;;  %v10639_v38 = vld [vmem:[#allocation70_spill] sm:$0xff]  ;;  %v10646_v62 = vld [vmem:[#allocation80_spill] sm:$0xff] }
 0x590   :  { %v3703_v31 = vsel %vm3700_vm15, %v3702_v12, %v3698_v11  ;;  %v3713_v16 = vsel %vm3712_vm5, %v8953_v21, %v3709_v45  ;;  %v10635_v12 = vld [vmem:[#allocation65_spill] sm:$0xff]  ;;  %v10636_v11 = vld [vmem:[#allocation67_spill] sm:$0xff]  ;;  %v10642_v50 = vld [vmem:[#allocation74_spill] sm:$0xff] }
 0x591   :  { %v3723_v63 = vmul.f32 %v3703_v31, %v8621_v18  ;;  %v3671_v18 = vand.u32 2147483648, %v8902_v2  ;;  %v6181_v2 = vpop.eup %6180  ;;  %v3718_v39 = vsel %vm3715_vm7, %v3717_v20, %v3713_v16  ;;  %v10640_v31 = vld [vmem:[#allocation72_spill] sm:$0xff]  ;;  %v10643_v45 = vld [vmem:[#allocation75_spill] sm:$0xff]  ;;  %v10647_v49 = vld [vmem:[#allocation82_spill] sm:$0xff] }
 0x592   :  { %3987 = vmatpush.bf16.msrb.mxu0 %v6665_v60  ;;  %4001 = vmatpush.bf16.msrb.mxu1 %v6668_v0  ;;  %v10648_v10 = vld [vmem:[#allocation83_spill] sm:$0xff]  ;;  %v10650_v16 = vld [vmem:[#allocation85_spill] sm:$0xff]  ;;  %v10653_v20 = vld [vmem:[#allocation90_spill] sm:$0xff] }
 0x593   :  { %v8980_v58 = vadd.f32 %v3725_v29, %v3723_v63  ;;  %4015 = vmatpush.bf16.msrb.mxu2 %v6671_v3  ;;  %4029 = vmatpush.bf16.msrb.mxu3 %v6675_v4  ;;  %v3672_v56 = vor.u32 1.1754944e-38, %v3671_v18  ;;  %v10637_v29 = vld [vmem:[#allocation68_spill] sm:$0xff]  ;;  %v10641_v63 = vld [vmem:[#allocation73_spill] sm:$0xff]  ;;  %v10644_v18 = vld [vmem:[#allocation78_spill] sm:$0xff] }
 0x595   :  { %6182 = vtanh.f32 %v8980_v58  ;;  %v3673_v33 = vsel %vm3670_vm6, %v3672_v56, %v3668_v43  ;;  %v10649_v43 = vld [vmem:[#allocation84_spill] sm:$0xff]  ;;  %v10652_v56 = vld [vmem:[#allocation89_spill] sm:$0xff] }
 0x596   :  { %3988 = vmatpush.bf16.msrb.mxu0 %v6680_v9  ;;  %4002 = vmatpush.bf16.msrb.mxu1 %v6682_v13  ;;  %v3730_v54 = vmul.f32 %v6181_v2, %v3673_v33  ;;  %v10651_v2 = vld [vmem:[#allocation87_spill] sm:$0xff]  ;;  %v10655_v33 = vld [vmem:[#allocation92_spill] sm:$0xff] }
 0x597   :  { %4016 = vmatpush.bf16.msrb.mxu2 %v6684_v14  ;;  %4030 = vmatpush.bf16.msrb.mxu3 %v6687_v17 }
 0x59a   :  { %3989 = vmatpush.bf16.msrb.mxu0 %v6692_v22  ;;  %4003 = vmatpush.bf16.msrb.mxu1 %v6694_v26 }
 0x59b   :  { %v6183_v52 = vpop.eup %6182  ;;  %4017 = vmatpush.bf16.msrb.mxu2 %v6696_v27  ;;  %4031 = vmatpush.bf16.msrb.mxu3 %v6699_v30 }
 0x59c   :  { %v3731_v7 = vmul.f32 %v6183_v52, %v3718_v39  ;;  %v10654_v52 = vld [vmem:[#allocation91_spill] sm:$0xff]  ;;  %v10656_v39 = vld [vmem:[#allocation94_spill] sm:$0xff] }
 0x59e   :  { %v3732_v21 = vpack.c.bf16 %v3731_v7, %v3730_v54  ;;  %3990 = vmatpush.bf16.msrb.mxu0 %v6704_v35  ;;  %4004 = vmatpush.bf16.msrb.mxu1 %v6706_v40  ;;  %v10657_v54 = vld [vmem:[#allocation95_spill] sm:$0xff]  ;;  %v10658_v7 = vld [vmem:[#allocation96_spill] sm:$0xff] }
 0x59f   :  { %4018 = vmatpush.bf16.msrb.mxu2 %v6708_v42  ;;  %4032 = vmatpush.bf16.msrb.mxu3 %v10516_v19 }
 0x5a0   :  { %3798 = vmatmul.bf16.vlgmr.msra.gmra.mxu0 %v3732_v21  ;;  %3812 = vmatmul.bf16.vlgmr.msra.gmra.mxu1 %v3732_v21 }
 0x5a1   :  { %3826 = vmatmul.bf16.vlgmr.msra.gmra.mxu2 %v3732_v21  ;;  %3840 = vmatmul.bf16.vlgmr.msra.gmra.mxu3 %v3732_v21 }
 0x5a2   :  { %3991 = vmatpush.bf16.msrb.mxu0 %v10624_v51  ;;  %4005 = vmatpush.bf16.msrb.mxu1 %v10625_v55 }
 0x5a3   :  { %4019 = vmatpush.bf16.msrb.mxu2 %v10626_v46  ;;  %4033 = vmatpush.bf16.msrb.mxu3 %v10627_v6 }
 0x5a6   :  { %3992 = vmatpush.bf16.msrb.mxu0 %v10628_v36  ;;  %4006 = vmatpush.bf16.msrb.mxu1 %v10629_v5 }
 0x5a7   :  { %4020 = vmatpush.bf16.msrb.mxu2 %v10632_v57  ;;  %4034 = vmatpush.bf16.msrb.mxu3 %v10633_v53 }
 0x5aa   :  { %4185 = vmatpush.bf16.msra.mxu0 %v10630_v44  ;;  %4199 = vmatpush.bf16.msra.mxu1 %v10631_v34 }
 0x5ab   :  { %4213 = vmatpush.bf16.msra.mxu2 %v10634_v15  ;;  %4227 = vmatpush.bf16.msra.mxu3 %v10635_v12  ;;  %v10698_v12 = vld [vmem:[#allocation147_spill] sm:$0xff] }
 0x5ae   :  { %4186 = vmatpush.bf16.msra.mxu0 %v10636_v11  ;;  %4200 = vmatpush.bf16.msra.mxu1 %v10637_v29 }
 0x5af   :  { %4214 = vmatpush.bf16.msra.mxu2 %v10638_v1  ;;  %4228 = vmatpush.bf16.msra.mxu3 %v10639_v38 }
 0x5b0   :  { %3993 = vmatmul.bf16.vlgmr.msrb.gmra.mxu0 %v3732_v21  ;;  %4007 = vmatmul.bf16.vlgmr.msrb.gmra.mxu1 %v3732_v21 }
 0x5b1   :  { %4021 = vmatmul.bf16.vlgmr.msrb.gmra.mxu2 %v3732_v21  ;;  %4035 = vmatmul.bf16.vlgmr.msrb.gmra.mxu3 %v3732_v21  ;;  %v10659_v21 = vld [vmem:[#allocation97_spill] sm:$0xff] }
 0x5b2   :  { %4187 = vmatpush.bf16.msra.mxu0 %v10640_v31  ;;  %4201 = vmatpush.bf16.msra.mxu1 %v10641_v63 }
 0x5b3   :  { %4215 = vmatpush.bf16.msra.mxu2 %v10642_v50  ;;  %4229 = vmatpush.bf16.msra.mxu3 %v10643_v45 }
 0x5b6   :  { %4188 = vmatpush.bf16.msra.mxu0 %v10644_v18  ;;  %4202 = vmatpush.bf16.msra.mxu1 %v10645_v24 }
 0x5b7   :  { %4216 = vmatpush.bf16.msra.mxu2 %v10646_v62  ;;  %4230 = vmatpush.bf16.msra.mxu3 %v10647_v49 }
 0x5ba   :  { %4189 = vmatpush.bf16.msra.mxu0 %v10648_v10  ;;  %4203 = vmatpush.bf16.msra.mxu1 %v10649_v43  ;;  %v10660_v43 = vld [vmem:[#allocation100_spill] sm:$0xff] }
 0x5bb   :  { %4217 = vmatpush.bf16.msra.mxu2 %v10650_v16  ;;  %4231 = vmatpush.bf16.msra.mxu3 %v10651_v2  ;;  %v10661_v16 = vld [vmem:[#allocation102_spill] sm:$0xff]  ;;  %v10662_v2 = vld [vmem:[#allocation103_spill] sm:$0xff] }
 0x5be   :  { %4190 = vmatpush.bf16.msra.mxu0 %v10652_v56  ;;  %4204 = vmatpush.bf16.msra.mxu1 %v10653_v20  ;;  %v10663_v56 = vld [vmem:[#allocation104_spill] sm:$0xff]  ;;  %v10664_v20 = vld [vmem:[#allocation105_spill] sm:$0xff] }
 0x5bf   :  { %4218 = vmatpush.bf16.msra.mxu2 %v10654_v52  ;;  %4232 = vmatpush.bf16.msra.mxu3 %v10655_v33  ;;  %v10665_v52 = vld [vmem:[#allocation106_spill] sm:$0xff]  ;;  %v10666_v33 = vld [vmem:[#allocation107_spill] sm:$0xff] }
 0x5c2   :  { %4191 = vmatpush.bf16.msra.mxu0 %v10656_v39  ;;  %4205 = vmatpush.bf16.msra.mxu1 %v10657_v54  ;;  %v10667_v39 = vld [vmem:[#allocation109_spill] sm:$0xff]  ;;  %v10668_v54 = vld [vmem:[#allocation112_spill] sm:$0xff] }
 0x5c3   :  { %4219 = vmatpush.bf16.msra.mxu2 %v10658_v7  ;;  %4233 = vmatpush.bf16.msra.mxu3 %v10659_v21  ;;  %v10669_v7 = vld [vmem:[#allocation113_spill] sm:$0xff]  ;;  %v10670_v21 = vld [vmem:[#allocation114_spill] sm:$0xff] }
 0x5c6   :  { %4192 = vmatpush.bf16.msra.mxu0 %v10660_v43  ;;  %4206 = vmatpush.bf16.msra.mxu1 %v10661_v16  ;;  %v10671_v43 = vld [vmem:[#allocation115_spill] sm:$0xff]  ;;  %v10672_v16 = vld [vmem:[#allocation118_spill] sm:$0xff] }
 0x5c7   :  { %4220 = vmatpush.bf16.msra.mxu2 %v10662_v2  ;;  %4234 = vmatpush.bf16.msra.mxu3 %v10663_v56  ;;  %v10673_v2 = vld [vmem:[#allocation119_spill] sm:$0xff]  ;;  %v10674_v56 = vld [vmem:[#allocation120_spill] sm:$0xff] }
 0x5ca   :  { %4241 = vmatpush.bf16.msrb.mxu0 %v10664_v20  ;;  %4255 = vmatpush.bf16.msrb.mxu1 %v10665_v52  ;;  %v10675_v20 = vld [vmem:[#allocation122_spill] sm:$0xff]  ;;  %v10676_v52 = vld [vmem:[#allocation123_spill] sm:$0xff] }
 0x5cb   :  { %4269 = vmatpush.bf16.msrb.mxu2 %v10666_v33  ;;  %4283 = vmatpush.bf16.msrb.mxu3 %v10667_v39  ;;  %v10677_v33 = vld [vmem:[#allocation124_spill] sm:$0xff]  ;;  %v10678_v39 = vld [vmem:[#allocation125_spill] sm:$0xff] }
 0x5ce   :  { %4242 = vmatpush.bf16.msrb.mxu0 %v10668_v54  ;;  %4256 = vmatpush.bf16.msrb.mxu1 %v10669_v7  ;;  %v10679_v54 = vld [vmem:[#allocation127_spill] sm:$0xff]  ;;  %v10680_v7 = vld [vmem:[#allocation128_spill] sm:$0xff] }
 0x5cf   :  { %4270 = vmatpush.bf16.msrb.mxu2 %v10670_v21  ;;  %4284 = vmatpush.bf16.msrb.mxu3 %v10671_v43  ;;  %v10681_v21 = vld [vmem:[#allocation129_spill] sm:$0xff]  ;;  %v10682_v43 = vld [vmem:[#allocation130_spill] sm:$0xff] }
 0x5d2   :  { %4243 = vmatpush.bf16.msrb.mxu0 %v10672_v16  ;;  %4257 = vmatpush.bf16.msrb.mxu1 %v10673_v2  ;;  %v10683_v16 = vld [vmem:[#allocation131_spill] sm:$0xff]  ;;  %v10684_v2 = vld [vmem:[#allocation133_spill] sm:$0xff] }
 0x5d3   :  { %4271 = vmatpush.bf16.msrb.mxu2 %v10674_v56  ;;  %4285 = vmatpush.bf16.msrb.mxu3 %v10675_v20  ;;  %v10685_v56 = vld [vmem:[#allocation134_spill] sm:$0xff]  ;;  %v10686_v20 = vld [vmem:[#allocation135_spill] sm:$0xff] }
 0x5d6   :  { %4244 = vmatpush.bf16.msrb.mxu0 %v10676_v52  ;;  %4258 = vmatpush.bf16.msrb.mxu1 %v10677_v33  ;;  %v10687_v52 = vld [vmem:[#allocation136_spill] sm:$0xff]  ;;  %v10688_v33 = vld [vmem:[#allocation137_spill] sm:$0xff] }
 0x5d7   :  { %4272 = vmatpush.bf16.msrb.mxu2 %v10678_v39  ;;  %4286 = vmatpush.bf16.msrb.mxu3 %v10679_v54  ;;  %v10689_v39 = vld [vmem:[#allocation138_spill] sm:$0xff]  ;;  %v10690_v54 = vld [vmem:[#allocation139_spill] sm:$0xff] }
 0x5da   :  { %4245 = vmatpush.bf16.msrb.mxu0 %v10680_v7  ;;  %4259 = vmatpush.bf16.msrb.mxu1 %v10681_v21  ;;  %v10691_v7 = vld [vmem:[#allocation140_spill] sm:$0xff]  ;;  %v10692_v21 = vld [vmem:[#allocation141_spill] sm:$0xff] }
 0x5db   :  { %4273 = vmatpush.bf16.msrb.mxu2 %v10682_v43  ;;  %4287 = vmatpush.bf16.msrb.mxu3 %v10683_v16  ;;  %v10693_v43 = vld [vmem:[#allocation142_spill] sm:$0xff]  ;;  %v10694_v16 = vld [vmem:[#allocation143_spill] sm:$0xff] }
 0x5de   :  { %4246 = vmatpush.bf16.msrb.mxu0 %v10684_v2  ;;  %4260 = vmatpush.bf16.msrb.mxu1 %v10685_v56  ;;  %v10695_v2 = vld [vmem:[#allocation144_spill] sm:$0xff] }
 0x5df   :  { %4274 = vmatpush.bf16.msrb.mxu2 %v10686_v20  ;;  %4288 = vmatpush.bf16.msrb.mxu3 %v10687_v52 }
 0x5e2   :  { %4247 = vmatpush.bf16.msrb.mxu0 %v10688_v33  ;;  %4261 = vmatpush.bf16.msrb.mxu1 %v10689_v39 }
 0x5e3   :  { %4275 = vmatpush.bf16.msrb.mxu2 %v10690_v54  ;;  %4289 = vmatpush.bf16.msrb.mxu3 %v10691_v7  ;;  %v10696_v7 = vld [vmem:[#allocation145_spill] sm:$0xff] }
 0x5e6   :  { %4248 = vmatpush.bf16.msrb.mxu0 %v10692_v21  ;;  %4262 = vmatpush.bf16.msrb.mxu1 %v10693_v43  ;;  %v10697_v21 = vld [vmem:[#allocation146_spill] sm:$0xff] }
 0x5e7   :  { %4276 = vmatpush.bf16.msrb.mxu2 %v10694_v16  ;;  %4290 = vmatpush.bf16.msrb.mxu3 %v10695_v2 }
 0x605   :  { %v3743_v56 = vpop.f32.mrf.mxu0  ;;  %v3757_v20 = vpop.f32.mrf.mxu1 }
 0x60c   :  { %v3771_v10 = vpop.f32.mrf.mxu2  ;;  %v3785_v33 = vpop.f32.mrf.mxu3 }
 0x60d   :  { %v3745_v52 = vpop.f32.mrf.mxu0  ;;  %v3759_v49 = vpop.f32.mrf.mxu1 }
 0x614   :  { %v3773_v62 = vpop.f32.mrf.mxu2  ;;  %v9090_v43 = vpop.f32.mrf.mxu3 }
 0x61d   :  { %v3799_v39 = vpop.f32.mrf.mxu0  ;;  %v3813_v24 = vpop.f32.mrf.mxu1 }
 0x61e   :  { %v3800_v54 = vadd.f32 %v3799_v39, %v3743_v56  ;;  %v3814_v18 = vadd.f32 %v3813_v24, %v3757_v20 }
 0x620   :  { %v3846_v45 = vadd.f32 %v3800_v54, %v10696_v7  ;;  %v3847_v50 = vadd.f32 %v3814_v18, %v10697_v21 }
 0x622   :  { %v5610_v16 = vmul.f32 -1.442695, %v3846_v45  ;;  %v5611_v63 = vmul.f32 -1.442695, %v3847_v50 }
 0x624   :  { %6184 = vpow2.f32 %v5610_v16  ;;  %v3827_v2 = vpop.f32.mrf.mxu2 }
 0x625   :  { %6186 = vpow2.f32 %v5611_v63  ;;  %v3828_v31 = vadd.f32 %v3827_v2, %v3771_v10  ;;  %v3801_v38 = vpop.f32.mrf.mxu0  ;;  %v3815_v1 = vpop.f32.mrf.mxu1  ;;  %v10699_v63 = vld [vmem:[#allocation35_spill] sm:$0xff]  ;;  %v10700_v10 = vld [vmem:[#allocation98_spill] sm:$0xff]  ;;  %v10701_v2 = vld [vmem:[#allocation36_spill] sm:$0xff] }
 0x626   :  { %v3802_v29 = vadd.f32 %v3801_v38, %v3745_v52  ;;  %v3816_v11 = vadd.f32 %v3815_v1, %v3759_v49  ;;  %v460_v16 = vadd.f32 %v10700_v10, %v10699_v63  ;;  %v10702_v38 = vld [vmem:[#allocation99_spill] sm:$0xff]  ;;  %v10707_v63 = vld [vmem:[#allocation93_spill] sm:$0xff] }
 0x627   :  { %v3848_v15 = vadd.f32 %v3828_v31, %v10698_v12  ;;  %v509_v1 = vadd.f32 %v10702_v38, %v10701_v2  ;;  %v3841_v31 = vpop.f32.mrf.mxu3 }
 0x628   :  { %v3850_v24 = vadd.f32 %v3802_v29, %v10696_v7  ;;  %v3851_v56 = vadd.f32 %v3816_v11, %v10697_v21  ;;  %v10703_v11 = vld [vmem:[#allocation37_spill] sm:$0xff]  ;;  %v10706_v21 = vld [vmem:[#allocation110_spill] sm:$0xff] }
 0x629   :  { %v5612_v20 = vmul.f32 -1.442695, %v3848_v15  ;;  %v10704_v15 = vld [vmem:[#allocation108_spill] sm:$0xff] }
 0x62a   :  { %v6185_v18 = vpop.eup %6184  ;;  %v5613_v39 = vmul.f32 -1.442695, %v3850_v24  ;;  %v5614_v50 = vmul.f32 -1.442695, %v3851_v56  ;;  %v558_v52 = vadd.f32 %v10704_v15, %v10703_v11  ;;  %v10705_v24 = vld [vmem:[#allocation38_spill] sm:$0xff]  ;;  %v4041_v15 = vunpack.c.l.bf16 %v10707_v63 }
 0x62b   :  { %v6187_v54 = vpop.eup %6186  ;;  %v9095_v45 = vadd.f32 1.0, %v6185_v18  ;;  %6188 = vpow2.f32 %v5612_v20  ;;  %v607_v18 = vadd.f32 %v10706_v21, %v10705_v24  ;;  %v9109_v20 = vpack.c.bf16 %v509_v1, %v460_v16  ;;  %v10708_v24 = vld [vmem:[#allocation101_spill] sm:$0xff] }
 0x62c   :  { %v9101_v49 = vadd.f32 1.0, %v6187_v54  ;;  %6190 = vpow2.f32 %v5613_v39  ;;  %v3829_v29 = vpop.f32.mrf.mxu2  ;;  %v4042_v21 = vunpack.c.h.bf16 %v10707_v63 }
 0x62d   :  { %6192 = vrcp.f32 %v9095_v45  ;;  %v3830_v56 = vadd.f32 %v3829_v29, %v3773_v62  ;;  %v9111_v54 = vpack.c.bf16 %v607_v18, %v558_v52  ;;  %v3994_v38 = vpop.f32.mrf.mxu0  ;;  %v4008_v11 = vpop.f32.mrf.mxu1  ;;  %v3887_v63 = vand.u32 2147483647, %v9095_v45 }
 0x62e   :  { %6194 = vrcp.f32 %v9101_v49  ;;  %v4049_v18 = vadd.f32 %v4041_v15, %v3994_v38  ;;  %v3889_v34 = vand.u32 2147483648, %v9095_v45  ;;  %v3904_v44 = vand.u32 2147483648, %v9101_v49 }
 0x62f   :  { %6196 = vpow2.f32 %v5614_v50  ;;  %v3852_v39 = vadd.f32 %v3830_v56, %v10698_v12  ;;  %v3842_v50 = vadd.f32 %v3841_v31, %v3785_v33  ;;  %v4050_v33 = vadd.f32 %v4042_v21, %v4008_v11  ;;  %v3843_v38 = vpop.f32.mrf.mxu3  ;;  %v10709_v56 = vld [vmem:[#allocation40_spill] sm:$0xff] }
 0x630   :  { %v5616_v21 = vmul.f32 -1.442695, %v4049_v18  ;;  %vm3898_vm10 = vweird.f32 %v9101_v49  ;;  %vm3883_vm11 = vweird.f32 %v9095_v45  ;;  %vm9158_vm13 = vcmp.eq.f32.partialorder %v3887_v63, 8.507059e+37 }
 0x631   :  { %v6189_v10 = vpop.eup %6188  ;;  %v5615_v16 = vmul.f32 -1.442695, %v3852_v39  ;;  %v3849_v57 = vadd.f32 %v3842_v50, %v10709_v56  ;;  %v10723_v55 = vunpack.c.l.bf16 %v9111_v54 }
 0x632   :  { %v6191_v2 = vpop.eup %6190  ;;  %v9132_v39 = vadd.f32 1.0, %v6189_v10 }
 0x633   :  { %v9117_v53 = vpop.eup %6192  ;;  %v9119_v62 = vadd.f32 1.0, %v6191_v2 }
 0x634   :  { %v9122_v29 = vpop.eup %6194  ;;  %v3879_v52 = vmul.f32 %v9117_v53, %v9095_v45  ;;  %vm3884_vm9 = vweird.f32 %v9117_v53 }
 0x635   :  { %v6197_v12 = vpop.eup %6196  ;;  %v3894_v7 = vmul.f32 %v9122_v29, %v9101_v49  ;;  %6198 = vrcp.f32 %v9119_v62  ;;  %vm3899_vm8 = vweird.f32 %v9122_v29  ;;  %vm9166_vm14 = vmor %vm3883_vm11, %vm3884_vm9  ;;  %vm3928_vm0 = vweird.f32 %v9119_v62 }
 0x636   :  { %v3880_v31 = vsub.f32 1.0, %v3879_v52  ;;  %v9134_v1 = vadd.f32 1.0, %v6197_v12  ;;  %6200 = vpow2.f32 %v5615_v16  ;;  %v3902_v12 = vand.u32 2147483647, %v9101_v49  ;;  %vm9154_vm12 = vmor %vm3898_vm10, %vm3899_vm8 }
 0x637   :  { %v3895_v15 = vsub.f32 1.0, %v3894_v7  ;;  %v3844_v7 = vadd.f32 %v3843_v38, %v9090_v43  ;;  %v5617_v16 = vmul.f32 -1.442695, %v4050_v33  ;;  %v3890_v33 = vor.u32 1.1754944e-38, %v3889_v34 }
 0x638   :  { %v3881_v11 = vmul.f32 %v9117_v53, %v3880_v31  ;;  %6202 = vrcp.f32 %v9134_v1  ;;  %v4022_v31 = vpop.f32.mrf.mxu2  ;;  %v3905_v49 = vor.u32 1.1754944e-38, %v3904_v44  ;;  %vm9170_vm15 = vcmp.eq.f32.partialorder %v3902_v12, 8.507059e+37 }
 0x639   :  { %v3896_v10 = vmul.f32 %v9122_v29, %v3895_v15  ;;  %6204 = vrcp.f32 %v9132_v39  ;;  %v3934_v5 = vand.u32 2147483648, %v9119_v62  ;;  %vm3943_vm1 = vweird.f32 %v9134_v1 }
 0x63a   :  { %v3882_v50 = vadd.f32 %v9117_v53, %v3881_v11  ;;  %6206 = vtanh.f32 %v3849_v57  ;;  %v3996_v57 = vpop.f32.mrf.mxu0  ;;  %v3949_v36 = vand.u32 2147483648, %v9134_v1  ;;  %vm3913_vm9 = vweird.f32 %v9132_v39 }
 0x63b   :  { %v9149_v52 = vpop.eup %6198  ;;  %v3897_v18 = vadd.f32 %v9122_v29, %v3896_v10  ;;  %6208 = vpow2.f32 %v5616_v21  ;;  %v3853_v10 = vadd.f32 %v3844_v7, %v10709_v56 }
 0x63c   :  { %v6201_v15 = vpop.eup %6200  ;;  %v3924_v11 = vmul.f32 %v9149_v52, %v9119_v62  ;;  %v3886_v21 = vsel %vm9166_vm14, %v9117_v53, %v3882_v50  ;;  %6210 = vpow2.f32 %v5617_v16  ;;  %vm3929_vm2 = vweird.f32 %v9149_v52 }
 0x63d   :  { %v9174_v63 = vadd.f32 1.0, %v6201_v15  ;;  %v3901_v44 = vsel %vm9154_vm12, %v9122_v29, %v3897_v18  ;;  %v3932_v15 = vand.u32 2147483647, %v9119_v62  ;;  %v10718_v29 = vunpack.c.l.bf16 %v10708_v24  ;;  %vm9209_vm4 = vmor %vm3928_vm0, %vm3929_vm2 }
 0x63e   :  { %v6203_v34 = vpop.eup %6202  ;;  %v3925_v2 = vsub.f32 1.0, %v3924_v11  ;;  %v3891_v18 = vsel %vm9158_vm13, %v3890_v33, %v3886_v21  ;;  %v3906_v43 = vsel %vm9170_vm15, %v3905_v49, %v3901_v44 }
 0x63f   :  { %v3939_v12 = vmul.f32 %v6203_v34, %v9134_v1  ;;  %v9187_v7 = vpop.eup %6204  ;;  %6212 = vrcp.f32 %v9174_v63  ;;  %v4051_v50 = vadd.f32 %v10718_v29, %v4022_v31  ;;  %vm3944_vm3 = vweird.f32 %v6203_v34  ;;  %v4010_v29 = vpop.f32.mrf.mxu1 }
 0x640   :  { %v3926_v53 = vmul.f32 %v9149_v52, %v3925_v2  ;;  %v6207_v16 = vpop.eup %6206  ;;  %v3947_v2 = vand.u32 2147483647, %v9134_v1  ;;  %6214 = vtanh.f32 %v3853_v10  ;;  %v3909_v31 = vmul.f32 %v9187_v7, %v9132_v39  ;;  %vm3945_vm5 = vmor %vm3943_vm1, %vm3944_vm3 }
 0x641   :  { %v3940_v11 = vsub.f32 1.0, %v3939_v12  ;;  %v6209_v56 = vpop.eup %6208  ;;  %v3970_v45 = vmul.f32 %v3906_v43, %v8876_v28  ;;  %v3972_v21 = vmul.f32 %v6207_v16, %v3891_v18  ;;  %v5618_v12 = vmul.f32 -1.442695, %v4051_v50  ;;  %v4024_v16 = vpop.f32.mrf.mxu2 }
 0x642   :  { %v3927_v6 = vadd.f32 %v9149_v52, %v3926_v53  ;;  %v9204_v33 = vadd.f32 1.0, %v6209_v56  ;;  %v6211_v49 = vpop.eup %6210  ;;  %v10721_v10 = vunpack.c.l.bf16 %v9109_v20  ;;  %v3950_v50 = vor.u32 1.1754944e-38, %v3949_v36 }
 0x643   :  { %v3941_v38 = vmul.f32 %v6203_v34, %v3940_v11  ;;  %v9219_v28 = vadd.f32 1.0, %v6211_v49  ;;  %vm3933_vm6 = vcmp.eq.f32.partialorder %v3932_v15, 8.507059e+37  ;;  %v3935_v18 = vor.u32 1.1754944e-38, %v3934_v5 }
 0x644   :  { %v4053_v53 = vadd.f32 %v10721_v10, %v3996_v57  ;;  %v3931_v56 = vsel %vm9209_vm4, %v9149_v52, %v3927_v6  ;;  %6216 = vrcp.f32 %v9204_v33  ;;  %vm3948_vm7 = vcmp.eq.f32.partialorder %v3947_v2, 8.507059e+37  ;;  %v4036_v6 = vpop.f32.mrf.mxu3 }
 0x645   :  { %v3942_v11 = vadd.f32 %v6203_v34, %v3941_v38  ;;  %v9221_v62 = vpop.eup %6212  ;;  %v3910_v43 = vsub.f32 1.0, %v3909_v31  ;;  %6218 = vrcp.f32 %v9219_v28  ;;  %v10722_v52 = vunpack.c.h.bf16 %v9109_v20 }
 0x646   :  { %v6215_v49 = vpop.eup %6214  ;;  %v3936_v44 = vsel %vm3933_vm6, %v3935_v18, %v3931_v56  ;;  %v5619_v46 = vmul.f32 -1.442695, %v4053_v53  ;;  %v4055_v1 = vadd.f32 %v10723_v55, %v4024_v16  ;;  %v9231_v51 = vadd.f32 %v3972_v21, %v3970_v45 }
 0x647   :  { %v3946_v57 = vsel %vm3945_vm5, %v6203_v34, %v3942_v11  ;;  %v4054_v38 = vadd.f32 %v10722_v52, %v4010_v29  ;;  %v3954_v36 = vmul.f32 %v9221_v62, %v9174_v63  ;;  %6220 = vpow2.f32 %v5618_v12 }
 0x648   :  { %v3951_v10 = vsel %vm3948_vm7, %v3950_v50, %v3946_v57  ;;  %v10724_v5 = vunpack.c.h.bf16 %v10708_v24  ;;  %v3919_v20 = vand.u32 2147483648, %v9132_v39  ;;  %v3973_v31 = vmul.f32 %v6215_v49, %v3936_v44 }
 0x649   :  { %v3971_v2 = vmul.f32 %v3951_v10, %v8894_v61  ;;  %v5620_v29 = vmul.f32 -1.442695, %v4054_v38  ;;  %v3911_v53 = vmul.f32 %v9187_v7, %v3910_v43  ;;  %vm3914_vm8 = vweird.f32 %v9187_v7 }
 0x64a   :  { %v4052_v34 = vadd.f32 %v10724_v5, %v4036_v6  ;;  %v6217_v15 = vpop.eup %6216  ;;  %6222 = vpow2.f32 %v5619_v46  ;;  %v5621_v45 = vmul.f32 -1.442695, %v4055_v1  ;;  %v3955_v24 = vsub.f32 1.0, %v3954_v36  ;;  %vm9275_vm4 = vmor %vm3913_vm9, %vm3914_vm8 }
 0x64b   :  { %v4082_v55 = vmul.f32 %v6217_v15, %v9204_v33  ;;  %v6219_v21 = vpop.eup %6218  ;;  %6224 = vtanh.f32 %v9231_v51  ;;  %v3964_v12 = vand.u32 2147483648, %v9174_v63  ;;  %v4090_v56 = vand.u32 2147483647, %v9204_v33 }
 0x64c   :  { %v4097_v11 = vmul.f32 %v6219_v21, %v9219_v28  ;;  %v4092_v16 = vand.u32 2147483648, %v9204_v33  ;;  %6226 = vtanh.f32 %v4052_v34  ;;  %vm3958_vm10 = vweird.f32 %v9174_v63 }
 0x64d   :  { %v4083_v61 = vsub.f32 1.0, %v4082_v55  ;;  %v6221_v50 = vpop.eup %6220  ;;  %v9249_v46 = vadd.f32 %v3973_v31, %v3971_v2  ;;  %v4107_v18 = vand.u32 2147483648, %v9219_v28  ;;  %v4105_v43 = vand.u32 2147483647, %v9219_v28 }
 0x64e   :  { %6228 = vpow2.f32 %v5620_v29  ;;  %v4098_v57 = vsub.f32 1.0, %v4097_v11  ;;  %vm4087_vm11 = vweird.f32 %v6217_v15  ;;  %v3956_v52 = vmul.f32 %v9221_v62, %v3955_v24 }
 0x64f   :  { %v4084_v6 = vmul.f32 %v6217_v15, %v4083_v61  ;;  %6230 = vpow2.f32 %v5621_v45  ;;  %vm3959_vm12 = vweird.f32 %v9221_v62  ;;  %vm4101_vm13 = vweird.f32 %v9219_v28 }
 0x650   :  { %vm4086_vm14 = vweird.f32 %v9204_v33  ;;  %v6223_v38 = vpop.eup %6222  ;;  %v4099_v49 = vmul.f32 %v6219_v21, %v4098_v57  ;;  %vm4102_vm15 = vweird.f32 %v6219_v21  ;;  %v9257_v44 = vadd.f32 1.0, %v6221_v50  ;;  %vm9287_vm5 = vmor %vm3958_vm10, %vm3959_vm12 }
 0x651   :  { %v4085_v10 = vadd.f32 %v6217_v15, %v4084_v6  ;;  %v6225_v1 = vpop.eup %6224  ;;  %v4108_v36 = vor.u32 1.1754944e-38, %v4107_v18  ;;  %vm4088_vm0 = vmor %vm4086_vm14, %vm4087_vm11  ;;  %vm4091_vm1 = vcmp.eq.f32.partialorder %v4090_v56, 8.507059e+37  ;;  %v4093_v5 = vor.u32 1.1754944e-38, %v4092_v16 }
 0x652   :  { %v9259_v34 = vadd.f32 1.0, %v6223_v38  ;;  %v6227_v2 = vpop.eup %6226  ;;  %6232 = vtanh.f32 %v9249_v46  ;;  %v4100_v29 = vadd.f32 %v6219_v21, %v4099_v49  ;;  %vm4106_vm2 = vcmp.eq.f32.partialorder %v4105_v43, 8.507059e+37  ;;  %vm4103_vm3 = vmor %vm4101_vm13, %vm4102_vm15 }
 0x653   :  { %v4089_v31 = vsel %vm4088_vm0, %v6217_v15, %v4085_v10  ;;  %v3912_v45 = vadd.f32 %v9187_v7, %v3911_v53  ;;  %v3957_v24 = vadd.f32 %v9221_v62, %v3956_v52  ;;  %v4038_v53 = vpop.f32.mrf.mxu3  ;;  %v3917_v18 = vand.u32 2147483647, %v9132_v39 }
 0x654   :  { %v6229_v33 = vpop.eup %6228  ;;  %v4094_v55 = vsel %vm4091_vm1, %v4093_v5, %v4089_v31  ;;  %6234 = vrcp.f32 %v9259_v34  ;;  %v4104_v61 = vsel %vm4103_vm3, %v6219_v21, %v4100_v29  ;;  %v3962_v43 = vand.u32 2147483647, %v9174_v63 }
 0x655   :  { %v6231_v56 = vpop.eup %6230  ;;  %6236 = vrcp.f32 %v9257_v44  ;;  %v4175_v11 = vmul.f32 %v6227_v2, %v4094_v55  ;;  %v9269_v15 = vadd.f32 1.0, %v6229_v33  ;;  %v4109_v16 = vsel %vm4106_vm2, %v4108_v36, %v4104_v61 }
 0x656   :  { %v9279_v50 = vadd.f32 1.0, %v6231_v56  ;;  %v4173_v57 = vmul.f32 %v4109_v16, %v8948_v8  ;;  %v4048_v6 = vunpack.c.h.bf16 %v9111_v54  ;;  %v3916_v52 = vsel %vm9275_vm4, %v9187_v7, %v3912_v45 }
 0x657   :  { %6238 = vrcp.f32 %v9269_v15  ;;  %v3961_v63 = vsel %vm9287_vm5, %v9221_v62, %v3957_v24  ;;  %v3920_v49 = vor.u32 1.1754944e-38, %v3919_v20  ;;  %v3965_v10 = vor.u32 1.1754944e-38, %v3964_v12 }
 0x658   :  { %6240 = vrcp.f32 %v9279_v50  ;;  %v6233_v38 = vpop.eup %6232  ;;  %v9303_v8 = vadd.f32 %v4175_v11, %v4173_v57  ;;  %v4056_v36 = vadd.f32 %v4048_v6, %v4038_v53  ;;  %vm3918_vm6 = vcmp.eq.f32.partialorder %v3917_v18, 8.507059e+37 }
 0x659   :  { %vm3963_vm7 = vcmp.eq.f32.partialorder %v3962_v43, 8.507059e+37  ;;  %v3921_v7 = vsel %vm3918_vm6, %v3920_v49, %v3916_v52  ;;  %v4137_v45 = vand.u32 2147483648, %v9259_v34  ;;  %v4152_v28 = vand.u32 2147483648, %v9269_v15 }
 0x65a   :  { %v6235_v5 = vpop.eup %6234  ;;  %v3966_v31 = vsel %vm3963_vm7, %v3965_v10, %v3961_v63  ;;  %v3978_v29 = vmul.f32 %v6225_v1, %v3921_v7  ;;  %6242 = vtanh.f32 %v4056_v36  ;;  %v4135_v1 = vand.u32 2147483647, %v9259_v34  ;;  %v10738_v7 = vld [vmem:[#allocation62_spill] sm:$0xff] }
 0x65b   :  { %v9305_v54 = vpop.eup %6236  ;;  %v4127_v2 = vmul.f32 %v6235_v5, %v9259_v34  ;;  %v3979_v33 = vmul.f32 %v6233_v38, %v3966_v31  ;;  %vm4132_vm8 = vweird.f32 %v6235_v5  ;;  %vm4131_vm9 = vweird.f32 %v9259_v34  ;;  %v10739_v31 = vld [vmem:[#allocation33_spill] sm:$0xff] }
 0x65c   :  { %v4112_v20 = vmul.f32 %v9305_v54, %v9257_v44  ;;  %vm4133_vm11 = vmor %vm4131_vm9, %vm4132_vm8  ;;  %v4138_v18 = vor.u32 1.1754944e-38, %v4137_v45  ;;  %v4150_v43 = vand.u32 2147483647, %v9269_v15  ;;  %vm4136_vm12 = vcmp.eq.f32.partialorder %v4135_v1, 8.507059e+37  ;;  %v10749_v45 = vld [vmem:[#allocation74_spill] sm:$0xff]  ;;  %v10753_v1 = vld [vmem:[#allocation80_spill] sm:$0xff] }
 0x65d   :  { %v6239_v62 = vpop.eup %6238  ;;  %v4128_v55 = vsub.f32 1.0, %v4127_v2  ;;  %v4184_v24 = vpack.c.bf16 %v3979_v33, %v3978_v29  ;;  %vm4146_vm13 = vweird.f32 %v9269_v15  ;;  %v4153_v38 = vor.u32 1.1754944e-38, %v4152_v28  ;;  %v10742_v29 = vld [vmem:[#allocation65_spill] sm:$0xff]  ;;  %v10743_v33 = vld [vmem:[#allocation67_spill] sm:$0xff] }
 0x65e   :  { %v9308_v39 = vpop.eup %6240  ;;  %v4142_v12 = vmul.f32 %v6239_v62, %v9269_v15  ;;  %vm4147_vm10 = vweird.f32 %v6239_v62  ;;  %v4113_v57 = vsub.f32 1.0, %v4112_v20  ;;  %vm4151_vm15 = vcmp.eq.f32.partialorder %v4150_v43, 8.507059e+37  ;;  %v10747_v20 = vld [vmem:[#allocation72_spill] sm:$0xff]  ;;  %v10755_v28 = vld [vmem:[#allocation83_spill] sm:$0xff]  ;;  %v10759_v43 = vld [vmem:[#allocation89_spill] sm:$0xff] }
 0x65f   :  { %v4157_v56 = vmul.f32 %v9308_v39, %v9279_v50  ;;  %v4129_v61 = vmul.f32 %v6235_v5, %v4128_v55  ;;  %4193 = vmatmul.bf16.vlgmr.msra.gmra.mxu0 %v4184_v24  ;;  %4207 = vmatmul.bf16.vlgmr.msra.gmra.mxu1 %v4184_v24  ;;  %vm4148_vm14 = vmor %vm4146_vm13, %vm4147_vm10  ;;  %vm4117_vm0 = vweird.f32 %v9305_v54  ;;  %6244 = vtanh.f32 %v9303_v8  ;;  %v10745_v55 = vld [vmem:[#allocation69_spill] sm:$0xff] }
 0x660   :  { %v4143_v11 = vsub.f32 1.0, %v4142_v12  ;;  %4221 = vmatmul.bf16.vlgmr.msra.gmra.mxu2 %v4184_v24  ;;  %4235 = vmatmul.bf16.vlgmr.msra.gmra.mxu3 %v4184_v24  ;;  %v6243_v21 = vpop.eup %6242  ;;  %vm4162_vm1 = vweird.f32 %v9308_v39  ;;  %vm4116_vm2 = vweird.f32 %v9257_v44  ;;  %vm4161_vm4 = vweird.f32 %v9279_v50  ;;  %v10748_v12 = vld [vmem:[#allocation73_spill] sm:$0xff]  ;;  %v10750_v24 = vld [vmem:[#allocation75_spill] sm:$0xff] }
 0x661   :  { %v4130_v16 = vadd.f32 %v6235_v5, %v4129_v61  ;;  %4436 = vmatpush.bf16.msra.mxu0 %v6644_v37  ;;  %4450 = vmatpush.bf16.msra.mxu1 %v6646_v41  ;;  %v4158_v6 = vsub.f32 1.0, %v4157_v56  ;;  %v4114_v41 = vmul.f32 %v9305_v54, %v4113_v57  ;;  %vm9348_vm3 = vmor %vm4116_vm2, %vm4117_vm0  ;;  %v10751_v56 = vld [vmem:[#allocation78_spill] sm:$0xff]  ;;  %v10752_v61 = vld [vmem:[#allocation79_spill] sm:$0xff] }
 0x662   :  { %v4144_v53 = vmul.f32 %v6239_v62, %v4143_v11  ;;  %4464 = vmatpush.bf16.msra.mxu2 %v6648_v47  ;;  %4478 = vmatpush.bf16.msra.mxu3 %v6651_v48  ;;  %vm4163_vm5 = vmor %vm4161_vm4, %vm4162_vm1  ;;  %v10754_v11 = vld [vmem:[#allocation82_spill] sm:$0xff]  ;;  %v10761_v57 = vld [vmem:[#allocation91_spill] sm:$0xff] }
 0x663   :  { %v4134_v52 = vsel %vm4133_vm11, %v6235_v5, %v4130_v16  ;;  %v4159_v47 = vmul.f32 %v9308_v39, %v4158_v6  ;;  %v10756_v16 = vld [vmem:[#allocation84_spill] sm:$0xff] }
 0x664   :  { %v4139_v34 = vsel %vm4136_vm12, %v4138_v18, %v4134_v52  ;;  %v4145_v63 = vadd.f32 %v6239_v62, %v4144_v53  ;;  %v10757_v53 = vld [vmem:[#allocation85_spill] sm:$0xff]  ;;  %v10758_v18 = vld [vmem:[#allocation87_spill] sm:$0xff]  ;;  %v10762_v6 = vld [vmem:[#allocation92_spill] sm:$0xff] }
 0x665   :  { %v4176_v37 = vmul.f32 %v6243_v21, %v4139_v34  ;;  %4437 = vmatpush.bf16.msra.mxu0 %v10195_v32  ;;  %4451 = vmatpush.bf16.msra.mxu1 %v10196_v25  ;;  %v4115_v32 = vadd.f32 %v9305_v54, %v4114_v41  ;;  %v4160_v25 = vadd.f32 %v9308_v39, %v4159_v47  ;;  %v10760_v21 = vld [vmem:[#allocation90_spill] sm:$0xff]  ;;  %v10764_v34 = vld [vmem:[#allocation95_spill] sm:$0xff]  ;;  %v10770_v47 = vld [vmem:[#allocation104_spill] sm:$0xff] }
 0x666   :  { %v4149_v49 = vsel %vm4148_vm14, %v6239_v62, %v4145_v63  ;;  %4465 = vmatpush.bf16.msra.mxu2 %v10197_v23  ;;  %4479 = vmatpush.bf16.msra.mxu3 %v6663_v59  ;;  %v4122_v59 = vand.u32 2147483648, %v9257_v44  ;;  %v4167_v23 = vand.u32 2147483648, %v9279_v50  ;;  %v10744_v62 = vld [vmem:[#allocation68_spill] sm:$0xff]  ;;  %v10763_v52 = vld [vmem:[#allocation94_spill] sm:$0xff]  ;;  %v10769_v41 = vld [vmem:[#allocation103_spill] sm:$0xff] }
 0x667   :  { %v4154_v10 = vsel %vm4151_vm15, %v4153_v38, %v4149_v49  ;;  %v10765_v63 = vld [vmem:[#allocation96_spill] sm:$0xff]  ;;  %v10766_v38 = vld [vmem:[#allocation97_spill] sm:$0xff] }
 0x668   :  { %v4174_v48 = vmul.f32 %v4154_v10, %v8980_v58  ;;  %v4164_v58 = vsel %vm4163_vm5, %v9308_v39, %v4160_v25  ;;  %v4123_v36 = vor.u32 1.1754944e-38, %v4122_v59  ;;  %v4168_v5 = vor.u32 1.1754944e-38, %v4167_v23  ;;  %v10746_v39 = vld [vmem:[#allocation70_spill] sm:$0xff]  ;;  %v10767_v49 = vld [vmem:[#allocation100_spill] sm:$0xff]  ;;  %v10771_v10 = vld [vmem:[#allocation105_spill] sm:$0xff] }
 0x669   :  { %4438 = vmatpush.bf16.msra.mxu0 %v6665_v60  ;;  %4452 = vmatpush.bf16.msra.mxu1 %v6668_v0  ;;  %v4120_v0 = vand.u32 2147483647, %v9257_v44  ;;  %v6245_v44 = vpop.eup %6244  ;;  %v10774_v25 = vld [vmem:[#allocation109_spill] sm:$0xff]  ;;  %v10775_v59 = vld [vmem:[#allocation112_spill] sm:$0xff]  ;;  %v10777_v60 = vld [vmem:[#allocation114_spill] sm:$0xff] }
 0x66a   :  { %v9335_v15 = vadd.f32 %v4176_v37, %v4174_v48  ;;  %4466 = vmatpush.bf16.msra.mxu2 %v6671_v3  ;;  %4480 = vmatpush.bf16.msra.mxu3 %v6675_v4  ;;  %v4165_v3 = vand.u32 2147483647, %v9279_v50  ;;  %v4119_v4 = vsel %vm9348_vm3, %v9305_v54, %v4115_v32  ;;  %v10768_v37 = vld [vmem:[#allocation102_spill] sm:$0xff]  ;;  %v10773_v32 = vld [vmem:[#allocation107_spill] sm:$0xff]  ;;  %v10776_v23 = vld [vmem:[#allocation113_spill] sm:$0xff] }
 0x66b   :  { %vm4121_vm6 = vcmp.eq.f32.partialorder %v4120_v0, 8.507059e+37  ;;  %v10772_v48 = vld [vmem:[#allocation106_spill] sm:$0xff]  ;;  %v10778_v0 = vld [vmem:[#allocation115_spill] sm:$0xff] }
 0x66c   :  { %6246 = vtanh.f32 %v9335_v15  ;;  %vm4166_vm7 = vcmp.eq.f32.partialorder %v4165_v3, 8.507059e+37  ;;  %v4124_v2 = vsel %vm4121_vm6, %v4123_v36, %v4119_v4  ;;  %v10779_v3 = vld [vmem:[#allocation118_spill] sm:$0xff]  ;;  %v10780_v4 = vld [vmem:[#allocation119_spill] sm:$0xff] }
 0x66d   :  { %4439 = vmatpush.bf16.msra.mxu0 %v6680_v9  ;;  %4453 = vmatpush.bf16.msra.mxu1 %v6682_v13  ;;  %v4169_v9 = vsel %vm4166_vm7, %v4168_v5, %v4164_v58  ;;  %v4181_v13 = vmul.f32 %v6245_v44, %v4124_v2  ;;  %v10781_v58 = vld [vmem:[#allocation120_spill] sm:$0xff]  ;;  %v10782_v44 = vld [vmem:[#allocation122_spill] sm:$0xff]  ;;  %v10783_v36 = vld [vmem:[#allocation123_spill] sm:$0xff] }
 0x66e   :  { %4467 = vmatpush.bf16.msra.mxu2 %v6684_v14  ;;  %4481 = vmatpush.bf16.msra.mxu3 %v6687_v17  ;;  %v10731_v17 = vld [vmem:[#allocation27_spill] sm:$0xff]  ;;  %v10784_v5 = vld [vmem:[#allocation124_spill] sm:$0xff] }
 0x66f   :  { %v10786_v2 = vld [vmem:[#allocation127_spill] sm:$0xff] }
 0x671   :  { %4440 = vmatpush.bf16.msra.mxu0 %v6692_v22  ;;  %4454 = vmatpush.bf16.msra.mxu1 %v6694_v26  ;;  %v10732_v22 = vld [vmem:[#allocation28_spill] sm:$0xff]  ;;  %v10733_v26 = vld [vmem:[#allocation29_spill] sm:$0xff] }
 0x672   :  { %v6247_v50 = vpop.eup %6246  ;;  %4468 = vmatpush.bf16.msra.mxu2 %v6696_v27  ;;  %4482 = vmatpush.bf16.msra.mxu3 %v6699_v30  ;;  %v10734_v27 = vld [vmem:[#allocation30_spill] sm:$0xff]  ;;  %v10735_v30 = vld [vmem:[#allocation31_spill] sm:$0xff] }
 0x673   :  { %v4182_v54 = vmul.f32 %v6247_v50, %v4169_v9  ;;  %v10785_v50 = vld [vmem:[#allocation125_spill] sm:$0xff]  ;;  %v10787_v9 = vld [vmem:[#allocation128_spill] sm:$0xff] }
 0x675   :  { %v4183_v14 = vpack.c.bf16 %v4182_v54, %v4181_v13  ;;  %4441 = vmatpush.bf16.msra.mxu0 %v6704_v35  ;;  %4455 = vmatpush.bf16.msra.mxu1 %v6706_v40  ;;  %v10736_v35 = vld [vmem:[#allocation32_spill] sm:$0xff]  ;;  %v10737_v40 = vld [vmem:[#allocation61_spill] sm:$0xff]  ;;  %v10789_v54 = vld [vmem:[#allocation130_spill] sm:$0xff] }
 0x676   :  { %4469 = vmatpush.bf16.msra.mxu2 %v6708_v42  ;;  %4483 = vmatpush.bf16.msra.mxu3 %v10516_v19  ;;  %v10740_v42 = vld [vmem:[#allocation34_spill] sm:$0xff]  ;;  %v10741_v19 = vld [vmem:[#allocation63_spill] sm:$0xff]  ;;  %v10788_v13 = vld [vmem:[#allocation129_spill] sm:$0xff] }
 0x677   :  { %4249 = vmatmul.bf16.vlgmr.msrb.gmra.mxu0 %v4183_v14  ;;  %4263 = vmatmul.bf16.vlgmr.msrb.gmra.mxu1 %v4183_v14 }
 0x678   :  { %4277 = vmatmul.bf16.vlgmr.msrb.gmra.mxu2 %v4183_v14  ;;  %4291 = vmatmul.bf16.vlgmr.msrb.gmra.mxu3 %v4183_v14 }
 0x679   :  { %4442 = vmatpush.bf16.msra.mxu0 %v10731_v17  ;;  %4456 = vmatpush.bf16.msra.mxu1 %v10732_v22  ;;  %v10791_v17 = vld [vmem:[#allocation133_spill] sm:$0xff]  ;;  %v10792_v22 = vld [vmem:[#allocation134_spill] sm:$0xff] }
 0x67a   :  { %4470 = vmatpush.bf16.msra.mxu2 %v10733_v26  ;;  %4484 = vmatpush.bf16.msra.mxu3 %v10734_v27  ;;  %v10793_v26 = vld [vmem:[#allocation135_spill] sm:$0xff]  ;;  %v10794_v27 = vld [vmem:[#allocation136_spill] sm:$0xff] }
 0x67d   :  { %4443 = vmatpush.bf16.msra.mxu0 %v10735_v30  ;;  %4457 = vmatpush.bf16.msra.mxu1 %v10736_v35  ;;  %v10795_v30 = vld [vmem:[#allocation137_spill] sm:$0xff]  ;;  %v10796_v35 = vld [vmem:[#allocation138_spill] sm:$0xff] }
 0x67e   :  { %4471 = vmatpush.bf16.msra.mxu2 %v10739_v31  ;;  %4485 = vmatpush.bf16.msra.mxu3 %v10740_v42  ;;  %v10799_v31 = vld [vmem:[#allocation141_spill] sm:$0xff]  ;;  %v10800_v42 = vld [vmem:[#allocation142_spill] sm:$0xff] }
 0x681   :  { %4636 = vmatpush.bf16.msrb.mxu0 %v10737_v40  ;;  %4650 = vmatpush.bf16.msrb.mxu1 %v10738_v7  ;;  %v10797_v40 = vld [vmem:[#allocation139_spill] sm:$0xff]  ;;  %v10798_v7 = vld [vmem:[#allocation140_spill] sm:$0xff] }
 0x682   :  { %4664 = vmatpush.bf16.msrb.mxu2 %v10741_v19  ;;  %4678 = vmatpush.bf16.msrb.mxu3 %v10742_v29  ;;  %v10801_v19 = vld [vmem:[#allocation143_spill] sm:$0xff]  ;;  %v10802_v29 = vld [vmem:[#allocation144_spill] sm:$0xff] }
 0x685   :  { %4637 = vmatpush.bf16.msrb.mxu0 %v10743_v33  ;;  %4651 = vmatpush.bf16.msrb.mxu1 %v10744_v62 }
 0x686   :  { %4665 = vmatpush.bf16.msrb.mxu2 %v10745_v55  ;;  %4679 = vmatpush.bf16.msrb.mxu3 %v10746_v39 }
 0x687   :  { %4444 = vmatmul.bf16.vlgmr.msra.gmra.mxu0 %v4183_v14  ;;  %4458 = vmatmul.bf16.vlgmr.msra.gmra.mxu1 %v4183_v14 }
 0x688   :  { %4472 = vmatmul.bf16.vlgmr.msra.gmra.mxu2 %v4183_v14  ;;  %4486 = vmatmul.bf16.vlgmr.msra.gmra.mxu3 %v4183_v14  ;;  %v10790_v14 = vld [vmem:[#allocation131_spill] sm:$0xff] }
 0x689   :  { %4638 = vmatpush.bf16.msrb.mxu0 %v10747_v20  ;;  %4652 = vmatpush.bf16.msrb.mxu1 %v10748_v12 }
 0x68a   :  { %4666 = vmatpush.bf16.msrb.mxu2 %v10749_v45  ;;  %4680 = vmatpush.bf16.msrb.mxu3 %v10750_v24 }
 0x68d   :  { %4639 = vmatpush.bf16.msrb.mxu0 %v10751_v56  ;;  %4653 = vmatpush.bf16.msrb.mxu1 %v10752_v61 }
 0x68e   :  { %4667 = vmatpush.bf16.msrb.mxu2 %v10753_v1  ;;  %4681 = vmatpush.bf16.msrb.mxu3 %v10754_v11 }
 0x691   :  { %4640 = vmatpush.bf16.msrb.mxu0 %v10755_v28  ;;  %4654 = vmatpush.bf16.msrb.mxu1 %v10756_v16  ;;  %v10803_v28 = vld [vmem:[#allocation145_spill] sm:$0xff] }
 0x692   :  { %4668 = vmatpush.bf16.msrb.mxu2 %v10757_v53  ;;  %4682 = vmatpush.bf16.msrb.mxu3 %v10758_v18  ;;  %v10804_v53 = vld [vmem:[#allocation146_spill] sm:$0xff] }
 0x695   :  { %4641 = vmatpush.bf16.msrb.mxu0 %v10759_v43  ;;  %4655 = vmatpush.bf16.msrb.mxu1 %v10760_v21 }
 0x696   :  { %4669 = vmatpush.bf16.msrb.mxu2 %v10761_v57  ;;  %4683 = vmatpush.bf16.msrb.mxu3 %v10762_v6 }
 0x699   :  { %4642 = vmatpush.bf16.msrb.mxu0 %v10763_v52  ;;  %4656 = vmatpush.bf16.msrb.mxu1 %v10764_v34 }
 0x69a   :  { %4670 = vmatpush.bf16.msrb.mxu2 %v10765_v63  ;;  %4684 = vmatpush.bf16.msrb.mxu3 %v10766_v38 }
 0x69d   :  { %4643 = vmatpush.bf16.msrb.mxu0 %v10767_v49  ;;  %4657 = vmatpush.bf16.msrb.mxu1 %v10768_v37  ;;  %v10805_v49 = vld [vmem:[#allocation147_spill] sm:$0xff] }
 0x69e   :  { %4671 = vmatpush.bf16.msrb.mxu2 %v10769_v41  ;;  %4685 = vmatpush.bf16.msrb.mxu3 %v10770_v47 }
 0x6a1   :  { %4692 = vmatpush.bf16.msra.mxu0 %v10771_v10  ;;  %4706 = vmatpush.bf16.msra.mxu1 %v10772_v48 }
 0x6a2   :  { %4720 = vmatpush.bf16.msra.mxu2 %v10773_v32  ;;  %4734 = vmatpush.bf16.msra.mxu3 %v10774_v25  ;;  %v10806_v25 = vld [vmem:[#allocation35_spill] sm:$0xff] }
 0x6a5   :  { %4693 = vmatpush.bf16.msra.mxu0 %v10775_v59  ;;  %4707 = vmatpush.bf16.msra.mxu1 %v10776_v23  ;;  %v10807_v59 = vld [vmem:[#allocation116_spill] sm:$0xff] }
 0x6a6   :  { %4721 = vmatpush.bf16.msra.mxu2 %v10777_v60  ;;  %4735 = vmatpush.bf16.msra.mxu3 %v10778_v0  ;;  %v465_v23 = vadd.f32 %v10807_v59, %v10806_v25 }
 0x6a9   :  { %4694 = vmatpush.bf16.msra.mxu0 %v10779_v3  ;;  %4708 = vmatpush.bf16.msra.mxu1 %v10780_v4  ;;  %v10808_v3 = vld [vmem:[#allocation36_spill] sm:$0xff]  ;;  %v10809_v4 = vld [vmem:[#allocation117_spill] sm:$0xff] }
 0x6aa   :  { %4722 = vmatpush.bf16.msra.mxu2 %v10781_v58  ;;  %4736 = vmatpush.bf16.msra.mxu3 %v10782_v44  ;;  %v514_v58 = vadd.f32 %v10809_v4, %v10808_v3 }
 0x6ad   :  { %4695 = vmatpush.bf16.msra.mxu0 %v10783_v36  ;;  %4709 = vmatpush.bf16.msra.mxu1 %v10784_v5 }
 0x6ae   :  { %4723 = vmatpush.bf16.msra.mxu2 %v10785_v50  ;;  %4737 = vmatpush.bf16.msra.mxu3 %v10786_v2 }
 0x6b1   :  { %4696 = vmatpush.bf16.msra.mxu0 %v10787_v9  ;;  %4710 = vmatpush.bf16.msra.mxu1 %v10788_v13  ;;  %v10810_v9 = vld [vmem:[#allocation37_spill] sm:$0xff]  ;;  %v10811_v13 = vld [vmem:[#allocation126_spill] sm:$0xff] }
 0x6b2   :  { %4724 = vmatpush.bf16.msra.mxu2 %v10789_v54  ;;  %4738 = vmatpush.bf16.msra.mxu3 %v10790_v14  ;;  %v563_v54 = vadd.f32 %v10811_v13, %v10810_v9  ;;  %v10812_v14 = vld [vmem:[#allocation38_spill] sm:$0xff] }
 0x6b5   :  { %4697 = vmatpush.bf16.msra.mxu0 %v10791_v17  ;;  %4711 = vmatpush.bf16.msra.mxu1 %v10792_v22  ;;  %v10813_v17 = vld [vmem:[#allocation132_spill] sm:$0xff] }
 0x6b6   :  { %4725 = vmatpush.bf16.msra.mxu2 %v10793_v26  ;;  %4739 = vmatpush.bf16.msra.mxu3 %v10794_v27  ;;  %v612_v22 = vadd.f32 %v10813_v17, %v10812_v14  ;;  %v9464_v26 = vpack.c.bf16 %v514_v58, %v465_v23 }
 0x6b9   :  { %4698 = vmatpush.bf16.msra.mxu0 %v10795_v30  ;;  %4712 = vmatpush.bf16.msra.mxu1 %v10796_v35  ;;  %v10814_v30 = vld [vmem:[#allocation40_spill] sm:$0xff] }
 0x6ba   :  { %4726 = vmatpush.bf16.msra.mxu2 %v10797_v40  ;;  %4740 = vmatpush.bf16.msra.mxu3 %v10798_v7  ;;  %v9467_v7 = vpack.c.bf16 %v612_v22, %v563_v54 }
 0x6bd   :  { %4699 = vmatpush.bf16.msra.mxu0 %v10799_v31  ;;  %4713 = vmatpush.bf16.msra.mxu1 %v10800_v42 }
 0x6be   :  { %4727 = vmatpush.bf16.msra.mxu2 %v10801_v19  ;;  %4741 = vmatpush.bf16.msra.mxu3 %v10802_v29  ;;  %v10815_v29 = vld [vmem:[#allocation111_spill] sm:$0xff] }
 0x6dc   :  { %v4194_v33 = vpop.f32.mrf.mxu0  ;;  %v4208_v62 = vpop.f32.mrf.mxu1 }
 0x6e3   :  { %v4222_v55 = vpop.f32.mrf.mxu2  ;;  %v4236_v12 = vpop.f32.mrf.mxu3 }
 0x6e4   :  { %v4196_v39 = vpop.f32.mrf.mxu0  ;;  %v4210_v20 = vpop.f32.mrf.mxu1 }
 0x6eb   :  { %v4224_v45 = vpop.f32.mrf.mxu2  ;;  %v9443_v11 = vpop.f32.mrf.mxu3 }
 0x6f4   :  { %v4250_v24 = vpop.f32.mrf.mxu0  ;;  %v4264_v56 = vpop.f32.mrf.mxu1 }
 0x6f5   :  { %v4251_v61 = vadd.f32 %v4250_v24, %v4194_v33  ;;  %v4265_v1 = vadd.f32 %v4264_v56, %v4208_v62  ;;  %v4492_v33 = vunpack.c.l.bf16 %v10815_v29 }
 0x6f7   :  { %v4297_v16 = vadd.f32 %v4251_v61, %v10803_v28  ;;  %v4298_v18 = vadd.f32 %v4265_v1, %v10804_v53  ;;  %v4496_v61 = vunpack.c.l.bf16 %v9464_v26 }
 0x6f9   :  { %v5622_v43 = vmul.f32 -1.442695, %v4297_v16  ;;  %v5623_v21 = vmul.f32 -1.442695, %v4298_v18 }
 0x6fb   :  { %6248 = vpow2.f32 %v5622_v43  ;;  %v4278_v57 = vpop.f32.mrf.mxu2  ;;  %v4292_v48 = vpop.f32.mrf.mxu3  ;;  %v4497_v43 = vunpack.c.h.bf16 %v9464_v26 }
 0x6fc   :  { %6250 = vpow2.f32 %v5623_v21  ;;  %v4279_v6 = vadd.f32 %v4278_v57, %v4222_v55  ;;  %v4252_v52 = vpop.f32.mrf.mxu0  ;;  %v4266_v34 = vpop.f32.mrf.mxu1  ;;  %v4293_v50 = vadd.f32 %v4292_v48, %v4236_v12  ;;  %v4493_v55 = vunpack.c.h.bf16 %v10815_v29 }
 0x6fd   :  { %v4253_v63 = vadd.f32 %v4252_v52, %v4196_v39  ;;  %v4267_v38 = vadd.f32 %v4266_v34, %v4210_v20  ;;  %v10816_v39 = vld [vmem:[#allocation121_spill] sm:$0xff]  ;;  %v4498_v52 = vunpack.c.l.bf16 %v9467_v7 }
 0x6fe   :  { %v4299_v37 = vadd.f32 %v4279_v6, %v10805_v49  ;;  %v4300_v35 = vadd.f32 %v4293_v50, %v10814_v30  ;;  %v4494_v20 = vunpack.c.l.bf16 %v10816_v39  ;;  %v4495_v56 = vunpack.c.h.bf16 %v10816_v39 }
 0x6ff   :  { %v4301_v41 = vadd.f32 %v4253_v63, %v10803_v28  ;;  %v4302_v47 = vadd.f32 %v4267_v38, %v10804_v53 }
 0x700   :  { %v5624_v10 = vmul.f32 -1.442695, %v4299_v37 }
 0x701   :  { %v6249_v32 = vpop.eup %6248  ;;  %v5625_v60 = vmul.f32 -1.442695, %v4301_v41  ;;  %v5626_v36 = vmul.f32 -1.442695, %v4302_v47 }
 0x702   :  { %v6251_v0 = vpop.eup %6250  ;;  %v9454_v44 = vadd.f32 1.0, %v6249_v32  ;;  %6252 = vpow2.f32 %v5624_v10 }
 0x703   :  { %v9456_v5 = vadd.f32 1.0, %v6251_v0  ;;  %6254 = vpow2.f32 %v5625_v60  ;;  %v4280_v2 = vpop.f32.mrf.mxu2  ;;  %v4294_v48 = vpop.f32.mrf.mxu3 }
 0x704   :  { %6256 = vrcp.f32 %v9454_v44  ;;  %v4281_v27 = vadd.f32 %v4280_v2, %v4224_v45  ;;  %v4445_v42 = vpop.f32.mrf.mxu0  ;;  %v4459_v62 = vpop.f32.mrf.mxu1  ;;  %v4338_v47 = vand.u32 2147483647, %v9454_v44  ;;  %v4340_v10 = vand.u32 2147483648, %v9454_v44 }
 0x705   :  { %6258 = vrcp.f32 %v9456_v5  ;;  %v4500_v18 = vadd.f32 %v4492_v33, %v4445_v42  ;;  %v4501_v6 = vadd.f32 %v4493_v55, %v4459_v62  ;;  %v4355_v41 = vand.u32 2147483648, %v9456_v5 }
 0x706   :  { %6260 = vpow2.f32 %v5626_v36  ;;  %v4303_v31 = vadd.f32 %v4281_v27, %v10805_v49  ;;  %vm4334_vm10 = vweird.f32 %v9454_v44  ;;  %v4353_v23 = vand.u32 2147483647, %v9456_v5 }
 0x707   :  { %6262 = vtanh.f32 %v4300_v35  ;;  %v5628_v25 = vmul.f32 -1.442695, %v4500_v18  ;;  %v4295_v3 = vadd.f32 %v4294_v48, %v9443_v11  ;;  %v5629_v4 = vmul.f32 -1.442695, %v4501_v6 }
 0x708   :  { %v6253_v40 = vpop.eup %6252  ;;  %v5627_v45 = vmul.f32 -1.442695, %v4303_v31  ;;  %vm4349_vm11 = vweird.f32 %v9456_v5  ;;  %vm9502_vm13 = vcmp.eq.f32.partialorder %v4338_v47, 8.507059e+37  ;;  %v4341_v2 = vor.u32 1.1754944e-38, %v4340_v10 }
 0x709   :  { %v6255_v19 = vpop.eup %6254  ;;  %v9482_v63 = vadd.f32 1.0, %v6253_v40  ;;  %v4356_v54 = vor.u32 1.1754944e-38, %v4355_v41  ;;  %vm4354_vm15 = vcmp.eq.f32.partialorder %v4353_v23, 8.507059e+37  ;;  %v4304_v31 = vadd.f32 %v4295_v3, %v10814_v30 }
 0x70a   :  { %v6257_v12 = vpop.eup %6256  ;;  %v9473_v24 = vadd.f32 1.0, %v6255_v19 }
 0x70b   :  { %v6259_v1 = vpop.eup %6258  ;;  %v4330_v16 = vmul.f32 %v6257_v12, %v9454_v44  ;;  %vm4335_vm8 = vweird.f32 %v6257_v12  ;;  %v4473_v58 = vpop.f32.mrf.mxu2 }
 0x70c   :  { %v6261_v21 = vpop.eup %6260  ;;  %v4345_v57 = vmul.f32 %v6259_v1, %v9456_v5  ;;  %6264 = vrcp.f32 %v9473_v24  ;;  %vm4350_vm9 = vweird.f32 %v6259_v1  ;;  %vm9498_vm12 = vmor %vm4334_vm10, %vm4335_vm8  ;;  %v4502_v27 = vadd.f32 %v4494_v20, %v4473_v58  ;;  %v4447_v18 = vpop.f32.mrf.mxu0 }
 0x70d   :  { %v4331_v34 = vsub.f32 1.0, %v4330_v16  ;;  %v9484_v38 = vadd.f32 1.0, %v6261_v21  ;;  %6266 = vpow2.f32 %v5627_v45  ;;  %v6263_v60 = vpop.eup %6262  ;;  %vm9507_vm14 = vmor %vm4349_vm11, %vm4350_vm9  ;;  %vm4379_vm0 = vweird.f32 %v9473_v24 }
 0x70e   :  { %v4346_v37 = vsub.f32 1.0, %v4345_v57  ;;  %v4383_v33 = vand.u32 2147483647, %v9473_v24  ;;  %v5630_v16 = vmul.f32 -1.442695, %v4502_v27  ;;  %vm4364_vm9 = vweird.f32 %v9482_v63 }
 0x70f   :  { %v4332_v32 = vmul.f32 %v6257_v12, %v4331_v34  ;;  %6268 = vrcp.f32 %v9484_v38  ;;  %v4400_v55 = vand.u32 2147483648, %v9484_v38  ;;  %vm4394_vm3 = vweird.f32 %v9484_v38 }
 0x710   :  { %v4347_v59 = vmul.f32 %v6259_v1, %v4346_v37  ;;  %6270 = vrcp.f32 %v9482_v63  ;;  %vm9548_vm5 = vcmp.eq.f32.partialorder %v4383_v33, 8.507059e+37 }
 0x711   :  { %v4333_v0 = vadd.f32 %v6257_v12, %v4332_v32  ;;  %6272 = vpow2.f32 %v5628_v25  ;;  %v4504_v32 = vadd.f32 %v4496_v61, %v4447_v18  ;;  %v4461_v25 = vpop.f32.mrf.mxu1  ;;  %v4401_v3 = vor.u32 1.1754944e-38, %v4400_v55  ;;  %v4487_v61 = vpop.f32.mrf.mxu3 }
 0x712   :  { %v9494_v36 = vpop.eup %6264  ;;  %v4348_v9 = vadd.f32 %v6259_v1, %v4347_v59  ;;  %6274 = vpow2.f32 %v5629_v4 }
 0x713   :  { %v6267_v13 = vpop.eup %6266  ;;  %v4337_v5 = vsel %vm9498_vm12, %v6257_v12, %v4333_v0  ;;  %v4375_v14 = vmul.f32 %v9494_v36, %v9473_v24  ;;  %v4385_v12 = vand.u32 2147483648, %v9473_v24  ;;  %vm4380_vm1 = vweird.f32 %v9494_v36  ;;  %v4475_v23 = vpop.f32.mrf.mxu2 }
 0x714   :  { %v4352_v17 = vsel %vm9507_vm14, %v6259_v1, %v4348_v9  ;;  %v9517_v22 = vadd.f32 1.0, %v6267_v13  ;;  %v4342_v42 = vsel %vm9502_vm13, %v4341_v2, %v4337_v5  ;;  %v4398_v1 = vand.u32 2147483647, %v9484_v38  ;;  %vm9544_vm4 = vmor %vm4379_vm0, %vm4380_vm1 }
 0x715   :  { %v6269_v35 = vpop.eup %6268  ;;  %v4376_v40 = vsub.f32 1.0, %v4375_v14  ;;  %v4357_v19 = vsel %vm4354_vm15, %v4356_v54, %v4352_v17  ;;  %v4423_v6 = vmul.f32 %v6263_v60, %v4342_v42  ;;  %v4386_v4 = vor.u32 1.1754944e-38, %v4385_v12 }
 0x716   :  { %v4390_v29 = vmul.f32 %v6269_v35, %v9484_v38  ;;  %v9525_v62 = vpop.eup %6270  ;;  %6276 = vrcp.f32 %v9517_v22  ;;  %v4421_v57 = vmul.f32 %v4357_v19, %v9231_v51  ;;  %vm4395_vm2 = vweird.f32 %v6269_v35 }
 0x717   :  { %v4377_v20 = vmul.f32 %v9494_v36, %v4376_v40  ;;  %v6273_v21 = vpop.eup %6272  ;;  %6278 = vtanh.f32 %v4304_v31  ;;  %v4360_v37 = vmul.f32 %v9525_v62, %v9482_v63  ;;  %vm4396_vm6 = vmor %vm4394_vm3, %vm4395_vm2  ;;  %vm4399_vm7 = vcmp.eq.f32.partialorder %v4398_v1, 8.507059e+37 }
 0x718   :  { %v4391_v45 = vsub.f32 1.0, %v4390_v29  ;;  %v9537_v47 = vadd.f32 1.0, %v6273_v21  ;;  %v6275_v10 = vpop.eup %6274  ;;  %6280 = vpow2.f32 %v5630_v16  ;;  %v9562_v0 = vadd.f32 %v4423_v6, %v4421_v57 }
 0x719   :  { %v4378_v34 = vadd.f32 %v9494_v36, %v4377_v20  ;;  %v9558_v24 = vadd.f32 1.0, %v6275_v10  ;;  %v4361_v58 = vsub.f32 1.0, %v4360_v37  ;;  %v5631_v13 = vmul.f32 -1.442695, %v4504_v32 }
 0x71a   :  { %v4392_v41 = vmul.f32 %v6269_v35, %v4391_v45  ;;  %6282 = vrcp.f32 %v9537_v47  ;;  %v4506_v11 = vadd.f32 %v4498_v52, %v4475_v23  ;;  %v4503_v5 = vadd.f32 %v4495_v56, %v4487_v61 }
 0x71b   :  { %v4382_v38 = vsel %vm9544_vm4, %v9494_v36, %v4378_v34  ;;  %6284 = vrcp.f32 %v9558_v24  ;;  %v4505_v36 = vadd.f32 %v4497_v43, %v4461_v25  ;;  %v4370_v17 = vand.u32 2147483648, %v9482_v63 }
 0x71c   :  { %v4393_v59 = vadd.f32 %v6269_v35, %v4392_v41  ;;  %v9560_v60 = vpop.eup %6276  ;;  %v4387_v2 = vsel %vm9548_vm5, %v4386_v4, %v4382_v38  ;;  %6286 = vtanh.f32 %v9562_v0  ;;  %v4362_v52 = vmul.f32 %v9525_v62, %v4361_v58 }
 0x71d   :  { %v6279_v44 = vpop.eup %6278  ;;  %v4405_v54 = vmul.f32 %v9560_v60, %v9517_v22  ;;  %v5632_v40 = vmul.f32 -1.442695, %v4505_v36  ;;  %vm4365_vm8 = vweird.f32 %v9525_v62  ;;  %6288 = vpow2.f32 %v5631_v13 }
 0x71e   :  { %v4397_v50 = vsel %vm4396_vm6, %v6269_v35, %v4393_v59  ;;  %v6281_v14 = vpop.eup %6280  ;;  %v4424_v27 = vmul.f32 %v6279_v44, %v4387_v2  ;;  %v5633_v39 = vmul.f32 -1.442695, %v4506_v11  ;;  %v4415_v19 = vand.u32 2147483648, %v9517_v22  ;;  %vm9625_vm4 = vmor %vm4364_vm9, %vm4365_vm8  ;;  %v4489_v11 = vpop.f32.mrf.mxu3 }
 0x71f   :  { %v4402_v9 = vsel %vm4399_vm7, %v4401_v3, %v4397_v50  ;;  %v9579_v35 = vadd.f32 1.0, %v6281_v14  ;;  %v4406_v42 = vsub.f32 1.0, %v4405_v54  ;;  %v4541_v29 = vand.u32 2147483647, %v9537_v47 }
 0x720   :  { %v6283_v26 = vpop.eup %6282  ;;  %v4422_v43 = vmul.f32 %v4402_v9, %v9249_v46  ;;  %6290 = vtanh.f32 %v4503_v5  ;;  %v4543_v55 = vand.u32 2147483648, %v9537_v47  ;;  %vm4409_vm10 = vweird.f32 %v9517_v22 }
 0x721   :  { %v4533_v31 = vmul.f32 %v6283_v26, %v9537_v47  ;;  %v6285_v56 = vpop.eup %6284  ;;  %6292 = vrcp.f32 %v9579_v35  ;;  %v4558_v12 = vand.u32 2147483648, %v9558_v24  ;;  %v4556_v45 = vand.u32 2147483647, %v9558_v24 }
 0x722   :  { %v4548_v33 = vmul.f32 %v6285_v56, %v9558_v24  ;;  %v9591_v20 = vadd.f32 %v4424_v27, %v4422_v43  ;;  %6294 = vpow2.f32 %v5632_v40  ;;  %v9595_v1 = vpop.eup %6286  ;;  %vm4538_vm11 = vweird.f32 %v6283_v26 }
 0x723   :  { %v4534_v46 = vsub.f32 1.0, %v4533_v31  ;;  %6296 = vpow2.f32 %v5633_v39  ;;  %v4407_v21 = vmul.f32 %v9560_v60, %v4406_v42  ;;  %vm4410_vm12 = vweird.f32 %v9560_v60  ;;  %v6289_v57 = vpop.eup %6288 }
 0x724   :  { %v4549_v16 = vsub.f32 1.0, %v4548_v33  ;;  %vm4552_vm13 = vweird.f32 %v9558_v24  ;;  %vm4537_vm14 = vweird.f32 %v9537_v47  ;;  %vm4553_vm15 = vweird.f32 %v6285_v56  ;;  %vm9640_vm5 = vmor %vm4409_vm10, %vm4410_vm12  ;;  %v5814_v33 = vld [vmem:[#allocation16 + $0x30] sm:$0xff] }
 0x725   :  { %v4535_v18 = vmul.f32 %v6283_v26, %v4534_v46  ;;  %vm4542_vm0 = vcmp.eq.f32.partialorder %v4541_v29, 8.507059e+37  ;;  %v4559_v41 = vor.u32 1.1754944e-38, %v4558_v12  ;;  %vm4539_vm1 = vmor %vm4537_vm14, %vm4538_vm11  ;;  %v4544_v10 = vor.u32 1.1754944e-38, %v4543_v55 }
 0x726   :  { %v4550_v6 = vmul.f32 %v6285_v56, %v4549_v16  ;;  %v6291_v37 = vpop.eup %6290  ;;  %vm9601_vm2 = vcmp.eq.f32.partialorder %v4556_v45, 8.507059e+37  ;;  %v9605_v48 = vadd.f32 1.0, %v6289_v57  ;;  %6298 = vtanh.f32 %v9591_v20  ;;  %vm4554_vm3 = vmor %vm4552_vm13, %vm4553_vm15 }
 0x727   :  { %v4536_v34 = vadd.f32 %v6283_v26, %v4535_v18  ;;  %v9607_v32 = vpop.eup %6292  ;;  %v4363_v38 = vadd.f32 %v9525_v62, %v4362_v52  ;;  %v4408_v4 = vadd.f32 %v9560_v60, %v4407_v21  ;;  %v4368_v44 = vand.u32 2147483647, %v9482_v63 }
 0x728   :  { %v4551_v25 = vadd.f32 %v6285_v56, %v4550_v6  ;;  %v6295_v59 = vpop.eup %6294  ;;  %v4563_v23 = vmul.f32 %v9607_v32, %v9579_v35  ;;  %6300 = vrcp.f32 %v9605_v48  ;;  %v4413_v54 = vand.u32 2147483647, %v9517_v22 }
 0x729   :  { %v4540_v47 = vsel %vm4539_vm1, %v6283_v26, %v4536_v34  ;;  %v6297_v61 = vpop.eup %6296  ;;  %v9618_v36 = vadd.f32 1.0, %v6295_v59  ;;  %v4371_v5 = vor.u32 1.1754944e-38, %v4370_v17  ;;  %v4499_v43 = vunpack.c.h.bf16 %v9467_v7 }
 0x72a   :  { %v4545_v3 = vsel %vm4542_vm0, %v4544_v10, %v4540_v47  ;;  %v4555_v58 = vsel %vm4554_vm3, %v6285_v56, %v4551_v25  ;;  %v4564_v2 = vsub.f32 1.0, %v4563_v23  ;;  %v9631_v13 = vadd.f32 1.0, %v6297_v61 }
 0x72b   :  { %v4626_v50 = vmul.f32 %v6291_v37, %v4545_v3  ;;  %v4560_v9 = vsel %vm9601_vm2, %v4559_v41, %v4555_v58  ;;  %6302 = vrcp.f32 %v9618_v36  ;;  %v4367_v63 = vsel %vm9625_vm4, %v9525_v62, %v4363_v38 }
 0x72c   :  { %v4624_v26 = vmul.f32 %v4560_v9, %v9303_v8  ;;  %v4565_v27 = vmul.f32 %v9607_v32, %v4564_v2  ;;  %6304 = vrcp.f32 %v9631_v13  ;;  %v4412_v17 = vsel %vm9640_vm5, %v9560_v60, %v4408_v4  ;;  %v6299_v40 = vpop.eup %6298 }
 0x72d   :  { %v4416_v8 = vor.u32 1.1754944e-38, %v4415_v19  ;;  %v4573_v52 = vand.u32 2147483648, %v9579_v35  ;;  %v4507_v7 = vadd.f32 %v4499_v43, %v4489_v11  ;;  %vm4568_vm6 = vweird.f32 %v9607_v32 }
 0x72e   :  { %v4628_v31 = vadd.f32 %v4626_v50, %v4624_v26  ;;  %v6301_v39 = vpop.eup %6300  ;;  %v4566_v56 = vadd.f32 %v9607_v32, %v4565_v27  ;;  %vm4369_vm7 = vcmp.eq.f32.partialorder %v4368_v44, 8.507059e+37  ;;  %vm4414_vm8 = vcmp.eq.f32.partialorder %v4413_v54, 8.507059e+37 }
 0x72f   :  { %v4578_v62 = vmul.f32 %v6301_v39, %v9605_v48  ;;  %v4372_v42 = vsel %vm4369_vm7, %v4371_v5, %v4367_v63  ;;  %v4417_v60 = vsel %vm4414_vm8, %v4416_v8, %v4412_v17  ;;  %vm4567_vm9 = vweird.f32 %v9579_v35 }
 0x730   :  { %6306 = vtanh.f32 %v4628_v31  ;;  %v4571_v22 = vand.u32 2147483647, %v9579_v35  ;;  %v4429_v19 = vmul.f32 %v9595_v1, %v4372_v42  ;;  %v4430_v29 = vmul.f32 %v6299_v40, %v4417_v60  ;;  %vm9664_vm10 = vmor %vm4567_vm9, %vm4568_vm6  ;;  %v5815_v42 = vld [vmem:[#allocation16 + $0x38] sm:$0xff] }
 0x731   :  { %v6303_v46 = vpop.eup %6302  ;;  %v4574_v55 = vor.u32 1.1754944e-38, %v4573_v52  ;;  %v4579_v12 = vsub.f32 1.0, %v4578_v62  ;;  %6308 = vtanh.f32 %v4507_v7  ;;  %v4588_v18 = vand.u32 2147483648, %v9605_v48 }
 0x732   :  { %v6305_v45 = vpop.eup %6304  ;;  %v4593_v16 = vmul.f32 %v6303_v46, %v9618_v36  ;;  %v4635_v21 = vpack.c.bf16 %v4430_v29, %v4429_v19  ;;  %v4570_v35 = vsel %vm9664_vm10, %v9607_v32, %v4566_v56  ;;  %vm4583_vm11 = vweird.f32 %v6301_v39 }
 0x733   :  { %v4608_v1 = vmul.f32 %v6305_v45, %v9631_v13  ;;  %v4580_v57 = vmul.f32 %v6301_v39, %v4579_v12  ;;  %v4586_v6 = vand.u32 2147483647, %v9605_v48  ;;  %vm4572_vm12 = vcmp.eq.f32.partialorder %v4571_v22, 8.507059e+37 }
 0x734   :  { %v4594_v34 = vsub.f32 1.0, %v4593_v16  ;;  %vm4582_vm13 = vweird.f32 %v9605_v48  ;;  %4644 = vmatmul.bf16.vlgmr.msrb.gmra.mxu0 %v4635_v21  ;;  %4658 = vmatmul.bf16.vlgmr.msrb.gmra.mxu1 %v4635_v21  ;;  %v4603_v41 = vand.u32 2147483648, %v9618_v36  ;;  %v4601_v51 = vand.u32 2147483647, %v9618_v36 }
 0x735   :  { %v4581_v10 = vadd.f32 %v6301_v39, %v4580_v57  ;;  %4672 = vmatmul.bf16.vlgmr.msrb.gmra.mxu2 %v4635_v21  ;;  %4686 = vmatmul.bf16.vlgmr.msrb.gmra.mxu3 %v4635_v21  ;;  %v4575_v32 = vsel %vm4572_vm12, %v4574_v55, %v4570_v35  ;;  %vm4598_vm14 = vweird.f32 %v6303_v46  ;;  %vm4584_vm15 = vmor %vm4582_vm13, %vm4583_vm11  ;;  %v4589_v25 = vor.u32 1.1754944e-38, %v4588_v18  ;;  %v5813_v35 = vld [vmem:[#allocation16 + $0x28] sm:$0xff] }
 0x736   :  { %v6307_v37 = vpop.eup %6306  ;;  %v4595_v47 = vmul.f32 %v6303_v46, %v4594_v34  ;;  %v4609_v23 = vsub.f32 1.0, %v4608_v1  ;;  %vm4587_vm0 = vcmp.eq.f32.partialorder %v4586_v6, 8.507059e+37  ;;  %vm4597_vm1 = vweird.f32 %v9618_v36  ;;  %4962 = vmatpush.bf16.msrb.mxu0 %v5815_v42 }
 0x737   :  { %v4632_v38 = vmul.f32 %v6307_v37, %v4575_v32  ;;  %v6309_v59 = vpop.eup %6308  ;;  %v4585_v48 = vsel %vm4584_vm15, %v6301_v39, %v4581_v10  ;;  %vm4599_vm2 = vmor %vm4597_vm1, %vm4598_vm14  ;;  %v4604_v61 = vor.u32 1.1754944e-38, %v4603_v41  ;;  %vm4602_vm3 = vcmp.eq.f32.partialorder %v4601_v51, 8.507059e+37  ;;  %v5812_v51 = vld [vmem:[#allocation16 + $0x20] sm:$0xff] }
 0x738   :  { %v4590_v3 = vsel %vm4587_vm0, %v4589_v25, %v4585_v48  ;;  %v4596_v4 = vadd.f32 %v6303_v46, %v4595_v47  ;;  %v4610_v44 = vmul.f32 %v6305_v45, %v4609_v23  ;;  %vm4613_vm4 = vweird.f32 %v6305_v45  ;;  %v5811_v23 = vld [vmem:[#allocation16 + $0x18] sm:$0xff] }
 0x739   :  { %v4627_v50 = vmul.f32 %v6309_v59, %v4590_v3  ;;  %v4618_v54 = vand.u32 2147483648, %v9631_v13  ;;  %vm4612_vm5 = vweird.f32 %v9631_v13  ;;  %v4616_v36 = vand.u32 2147483647, %v9631_v13 }
 0x73a   :  { %v4600_v58 = vsel %vm4599_vm2, %v6303_v46, %v4596_v4  ;;  %v4611_v11 = vadd.f32 %v6305_v45, %v4610_v44  ;;  %vm4614_vm6 = vmor %vm4612_vm5, %vm4613_vm4  ;;  %4963 = vmatpush.bf16.msrb.mxu0 %v5814_v33 }
 0x73b   :  { %v4605_v24 = vsel %vm4602_vm3, %v4604_v61, %v4600_v58  ;;  %v4619_v14 = vor.u32 1.1754944e-38, %v4618_v54  ;;  %vm4617_vm7 = vcmp.eq.f32.partialorder %v4616_v36, 8.507059e+37  ;;  %v5809_v54 = vld [vmem:[#allocation16 + $0x8] sm:$0xff] }
 0x73c   :  { %v4625_v2 = vmul.f32 %v4605_v24, %v9335_v15  ;;  %v4615_v5 = vsel %vm4614_vm6, %v6305_v45, %v4611_v11 }
 0x73d   :  { %v4620_v43 = vsel %vm4617_vm7, %v4619_v14, %v4615_v5 }
 0x73e   :  { %v4629_v9 = vadd.f32 %v4627_v50, %v4625_v2  ;;  %4964 = vmatpush.bf16.msrb.mxu0 %v5813_v35 }
 0x740   :  { %6310 = vtanh.f32 %v4629_v9 }
 0x742   :  { %4965 = vmatpush.bf16.msrb.mxu0 %v5812_v51 }
 0x746   :  { %v6311_v26 = vpop.eup %6310  ;;  %4966 = vmatpush.bf16.msrb.mxu0 %v5811_v23 }
 0x747   :  { %v4633_v27 = vmul.f32 %v6311_v26, %v4620_v43 }
 0x749   :  { %v4634_v63 = vpack.c.bf16 %v4633_v27, %v4632_v38 }
 0x74b   :  { %4700 = vmatmul.bf16.vlgmr.msra.gmra.mxu0 %v4634_v63  ;;  %4714 = vmatmul.bf16.vlgmr.msra.gmra.mxu1 %v4634_v63 }
 0x74c   :  { %4728 = vmatmul.bf16.vlgmr.msra.gmra.mxu2 %v4634_v63  ;;  %4742 = vmatmul.bf16.vlgmr.msra.gmra.mxu3 %v4634_v63 }
 0x7b1   :  { %v4645_v15 = vpop.f32.mrf.mxu0  ;;  %v4659_v17 = vpop.f32.mrf.mxu1 }
 0x7b8   :  { %v4673_v40 = vpop.f32.mrf.mxu2  ;;  %v4687_v31 = vpop.f32.mrf.mxu3 }
 0x7b9   :  { %v4647_v8 = vpop.f32.mrf.mxu0  ;;  %v4661_v52 = vpop.f32.mrf.mxu1 }
 0x7c0   :  { %v4675_v7 = vpop.f32.mrf.mxu2  ;;  %v9684_v60 = vpop.f32.mrf.mxu3 }
 0x7c8   :  { %v4701_v13 = vpop.f32.mrf.mxu0  ;;  %v4715_v39 = vpop.f32.mrf.mxu1 }
 0x7c9   :  { %v4702_v56 = vadd.f32 %v4701_v13, %v4645_v15  ;;  %v4716_v62 = vadd.f32 %v4715_v39, %v4659_v17 }
 0x7cb   :  { %v4748_v22 = vadd.f32 %v4702_v56, %v10803_v28  ;;  %v4749_v19 = vadd.f32 %v4716_v62, %v10804_v53 }
 0x7cd   :  { %v5634_v29 = vmul.f32 -1.442695, %v4748_v22  ;;  %v5635_v46 = vmul.f32 -1.442695, %v4749_v19 }
 0x7cf   :  { %6312 = vpow2.f32 %v5634_v29  ;;  %v4729_v55 = vpop.f32.mrf.mxu2  ;;  %v4743_v41 = vpop.f32.mrf.mxu3 }
 0x7d0   :  { %6314 = vpow2.f32 %v5635_v46  ;;  %v4730_v12 = vadd.f32 %v4729_v55, %v4673_v40  ;;  %v4703_v45 = vpop.f32.mrf.mxu0  ;;  %v4717_v16 = vpop.f32.mrf.mxu1  ;;  %v4744_v50 = vadd.f32 %v4743_v41, %v4687_v31  ;;  %v5808_v40 = vld [vmem:[#allocation16] sm:$0xff] }
 0x7d1   :  { %v4704_v18 = vadd.f32 %v4703_v45, %v4647_v8  ;;  %v4718_v21 = vadd.f32 %v4717_v16, %v4661_v52 }
 0x7d2   :  { %v4750_v1 = vadd.f32 %v4730_v12, %v10805_v49  ;;  %v4751_v43 = vadd.f32 %v4744_v50, %v10814_v30 }
 0x7d3   :  { %v4752_v57 = vadd.f32 %v4704_v18, %v10803_v28  ;;  %v4753_v6 = vadd.f32 %v4718_v21, %v10804_v53  ;;  %v5810_v53 = vld [vmem:[#allocation16 + $0x10] sm:$0xff] }
 0x7d4   :  { %v5636_v34 = vmul.f32 -1.442695, %v4750_v1  ;;  %4967 = vmatpush.bf16.msrb.mxu0 %v5810_v53 }
 0x7d5   :  { %v6313_v37 = vpop.eup %6312  ;;  %v5637_v10 = vmul.f32 -1.442695, %v4752_v57  ;;  %v5638_v25 = vmul.f32 -1.442695, %v4753_v6 }
 0x7d6   :  { %v6315_v32 = vpop.eup %6314  ;;  %v4774_v47 = vadd.f32 1.0, %v6313_v37  ;;  %6316 = vpow2.f32 %v5636_v34 }
 0x7d7   :  { %v9691_v38 = vadd.f32 1.0, %v6315_v32  ;;  %6318 = vpow2.f32 %v5637_v10  ;;  %v4731_v59 = vpop.f32.mrf.mxu2  ;;  %v4745_v11 = vpop.f32.mrf.mxu3 }
 0x7d8   :  { %6320 = vrcp.f32 %v4774_v47  ;;  %v4732_v28 = vadd.f32 %v4731_v59, %v4675_v7  ;;  %v4789_v27 = vand.u32 2147483647, %v4774_v47  ;;  %v4746_v63 = vadd.f32 %v4745_v11, %v9684_v60  ;;  %4968 = vmatpush.bf16.msrb.mxu0 %v5809_v54 }
 0x7d9   :  { %6322 = vrcp.f32 %v9691_v38  ;;  %v4791_v17 = vand.u32 2147483648, %v4774_v47  ;;  %v4806_v52 = vand.u32 2147483648, %v9691_v38  ;;  %vm4800_vm10 = vweird.f32 %v9691_v38 }
 0x7da   :  { %6324 = vpow2.f32 %v5638_v25  ;;  %v4754_v3 = vadd.f32 %v4732_v28, %v10805_v49  ;;  %v4804_v13 = vand.u32 2147483647, %v9691_v38  ;;  %vm4785_vm12 = vweird.f32 %v4774_v47 }
 0x7db   :  { %v4755_v42 = vadd.f32 %v4746_v63, %v10814_v30  ;;  %vm9721_vm14 = vcmp.eq.f32.partialorder %v4789_v27, 8.507059e+37  ;;  %v4792_v29 = vor.u32 1.1754944e-38, %v4791_v17  ;;  %v4807_v33 = vor.u32 1.1754944e-38, %v4806_v52 }
 0x7dc   :  { %v6317_v48 = vpop.eup %6316  ;;  %v5639_v24 = vmul.f32 -1.442695, %v4754_v3  ;;  %4969 = vmatpush.bf16.msrb.mxu0 %v5808_v40  ;;  %vm4805_vm15 = vcmp.eq.f32.partialorder %v4804_v13, 8.507059e+37 }
 0x7dd   :  { %v6319_v4 = vpop.eup %6318  ;;  %v9695_v61 = vadd.f32 1.0, %v6317_v48 }
 0x7de   :  { %v6321_v58 = vpop.eup %6320  ;;  %v9697_v44 = vadd.f32 1.0, %v6319_v4 }
 0x7df   :  { %v6323_v2 = vpop.eup %6322  ;;  %v4781_v9 = vmul.f32 %v6321_v58, %v4774_v47  ;;  %6326 = vrcp.f32 %v9695_v61  ;;  %vm4786_vm9 = vweird.f32 %v6321_v58 }
 0x7e0   :  { %v6325_v36 = vpop.eup %6324  ;;  %v4796_v5 = vmul.f32 %v6323_v2, %v9691_v38  ;;  %6328 = vrcp.f32 %v9697_v44  ;;  %vm4801_vm8 = vweird.f32 %v6323_v2  ;;  %vm9717_vm13 = vmor %vm4785_vm12, %vm4786_vm9  ;;  %v4834_v18 = vand.u32 2147483647, %v9697_v44 }
 0x7e1   :  { %v4782_v49 = vsub.f32 1.0, %v4781_v9  ;;  %v9702_v14 = vadd.f32 1.0, %v6325_v36  ;;  %6330 = vpow2.f32 %v5639_v24  ;;  %vm9712_vm11 = vmor %vm4800_vm10, %vm4801_vm8  ;;  %v4836_v21 = vand.u32 2147483648, %v9697_v44 }
 0x7e2   :  { %v4797_v26 = vsub.f32 1.0, %v4796_v5  ;;  %vm4830_vm1 = vweird.f32 %v9697_v44  ;;  %vm4835_vm4 = vcmp.eq.f32.partialorder %v4834_v18, 8.507059e+37  ;;  %vm4815_vm9 = vweird.f32 %v9695_v61 }
 0x7e3   :  { %v4783_v15 = vmul.f32 %v6321_v58, %v4782_v49  ;;  %6332 = vrcp.f32 %v9702_v14  ;;  %v4851_v10 = vand.u32 2147483648, %v9702_v14  ;;  %v4837_v32 = vor.u32 1.1754944e-38, %v4836_v21 }
 0x7e4   :  { %v4798_v8 = vmul.f32 %v6323_v2, %v4797_v26  ;;  %6334 = vtanh.f32 %v4751_v43  ;;  %v4849_v47 = vand.u32 2147483647, %v9702_v14  ;;  %vm4845_vm5 = vweird.f32 %v9702_v14 }
 0x7e5   :  { %v9708_v31 = vpop.eup %6326  ;;  %v4784_v7 = vadd.f32 %v6321_v58, %v4783_v15  ;;  %6336 = vtanh.f32 %v4755_v42 }
 0x7e6   :  { %v6329_v39 = vpop.eup %6328  ;;  %v4799_v62 = vadd.f32 %v6323_v2, %v4798_v8  ;;  %v4811_v35 = vmul.f32 %v9708_v31, %v9695_v61  ;;  %vm4850_vm7 = vcmp.eq.f32.partialorder %v4849_v47, 8.507059e+37  ;;  %vm4816_vm8 = vweird.f32 %v9708_v31 }
 0x7e7   :  { %v6331_v60 = vpop.eup %6330  ;;  %v4826_v46 = vmul.f32 %v6329_v39, %v9697_v44  ;;  %v4788_v55 = vsel %vm9717_vm13, %v6321_v58, %v4784_v7  ;;  %vm4831_vm0 = vweird.f32 %v6329_v39  ;;  %v4852_v58 = vor.u32 1.1754944e-38, %v4851_v10 }
 0x7e8   :  { %v4803_v30 = vsel %vm9712_vm11, %v6323_v2, %v4799_v62  ;;  %v9730_v12 = vadd.f32 1.0, %v6331_v60  ;;  %v4793_v57 = vsel %vm9721_vm14, %v4792_v29, %v4788_v55  ;;  %vm4832_vm3 = vmor %vm4830_vm1, %vm4831_vm0  ;;  %v4812_v23 = vsub.f32 1.0, %v4811_v35 }
 0x7e9   :  { %v6333_v45 = vpop.eup %6332  ;;  %v4827_v16 = vsub.f32 1.0, %v4826_v46  ;;  %v4808_v6 = vsel %vm4805_vm15, %v4807_v33, %v4803_v30  ;;  %vm4817_vm11 = vmor %vm4815_vm9, %vm4816_vm8 }
 0x7ea   :  { %v4841_v1 = vmul.f32 %v6333_v45, %v9702_v14  ;;  %6338 = vrcp.f32 %v9730_v12  ;;  %v6335_v41 = vpop.eup %6334  ;;  %v4872_v25 = vmul.f32 %v4808_v6, %v9562_v0  ;;  %vm4846_vm2 = vweird.f32 %v6333_v45 }
 0x7eb   :  { %v4828_v34 = vmul.f32 %v6329_v39, %v4827_v16  ;;  %v4874_v38 = vmul.f32 %v6335_v41, %v4793_v57  ;;  %v6337_v53 = vpop.eup %6336  ;;  %vm4847_vm6 = vmor %vm4845_vm5, %vm4846_vm2  ;;  %v4813_v2 = vmul.f32 %v9708_v31, %v4812_v23  ;;  %v4821_v14 = vand.u32 2147483648, %v9695_v61 }
 0x7ec   :  { %v4842_v37 = vsub.f32 1.0, %v4841_v1  ;;  %v4866_v26 = vand.u32 2147483648, %v9730_v12  ;;  %vm4860_vm12 = vweird.f32 %v9730_v12  ;;  %v4864_v27 = vand.u32 2147483647, %v9730_v12 }
 0x7ed   :  { %v4829_v51 = vadd.f32 %v6329_v39, %v4828_v34  ;;  %v4876_v50 = vadd.f32 %v4874_v38, %v4872_v25  ;;  %v4814_v49 = vadd.f32 %v9708_v31, %v4813_v2  ;;  %v4822_v40 = vor.u32 1.1754944e-38, %v4821_v14 }
 0x7ee   :  { %v4843_v59 = vmul.f32 %v6333_v45, %v4842_v37  ;;  %v4867_v8 = vor.u32 1.1754944e-38, %v4866_v26  ;;  %vm4865_vm15 = vcmp.eq.f32.partialorder %v4864_v27, 8.507059e+37 }
 0x7ef   :  { %v4833_v28 = vsel %vm4832_vm3, %v6329_v39, %v4829_v51  ;;  %6340 = vtanh.f32 %v4876_v50  ;;  %v4818_v63 = vsel %vm4817_vm11, %v9708_v31, %v4814_v49 }
 0x7f0   :  { %v4838_v48 = vsel %vm4835_vm4, %v4837_v32, %v4833_v28  ;;  %v4844_v3 = vadd.f32 %v6333_v45, %v4843_v59  ;;  %v6339_v4 = vpop.eup %6338 }
 0x7f1   :  { %v4856_v0 = vmul.f32 %v6339_v4, %v9730_v12  ;;  %v4875_v24 = vmul.f32 %v6337_v53, %v4838_v48  ;;  %vm4861_vm10 = vweird.f32 %v6339_v4 }
 0x7f2   :  { %v4848_v44 = vsel %vm4847_vm6, %v6333_v45, %v4844_v3  ;;  %vm4862_vm13 = vmor %vm4860_vm12, %vm4861_vm10 }
 0x7f3   :  { %v4853_v9 = vsel %vm4850_vm7, %v4852_v58, %v4848_v44  ;;  %v4857_v11 = vsub.f32 1.0, %v4856_v0 }
 0x7f4   :  { %v4873_v54 = vmul.f32 %v4853_v9, %v9591_v20  ;;  %v4819_v20 = vand.u32 2147483647, %v9695_v61  ;;  %v5831_v61 = vld [vmem:[%s9772_s8] ss:$0 sm:$0xff] }
 0x7f5   :  { %v4858_v36 = vmul.f32 %v6339_v4, %v4857_v11  ;;  %v6341_v17 = vpop.eup %6340 }
 0x7f6   :  { %v4877_v5 = vadd.f32 %v4875_v24, %v4873_v54  ;;  %vm4820_vm14 = vcmp.eq.f32.partialorder %v4819_v20, 8.507059e+37 }
 0x7f7   :  { %v4859_v43 = vadd.f32 %v6339_v4, %v4858_v36  ;;  %v4823_v7 = vsel %vm4820_vm14, %v4822_v40, %v4818_v63 }
 0x7f8   :  { %6342 = vtanh.f32 %v4877_v5  ;;  %v4880_v39 = vmul.f32 %v6341_v17, %v4823_v7 }
 0x7f9   :  { %v4863_v15 = vsel %vm4862_vm13, %v6339_v4, %v4859_v43 }
 0x7fa   :  { %v4868_v13 = vsel %vm4865_vm15, %v4867_v8, %v4863_v15 }
 0x7fe   :  { %v6343_v52 = vpop.eup %6342 }
 0x7ff   :  { %v4881_v56 = vmul.f32 %v6343_v52, %v4868_v13 }
 0x801   :  { %v4893_v62 = vpack.c.bf16 %v4881_v56, %v4880_v39 }
 0x803   :  { %4970 = vmatmul.bf16.vlgmr.msrb.gmra.mxu0 %v4893_v62 }
 0x880   :  { %v4971_v42 = vpop.f32.mrf.mxu0 }
 0x881   :  { %v4972_v60 = vadd.f32 %v5831_v61, %v4971_v42 }
 0x883   :  { %4976 = vst [vmem:[#allocation17] sm:$0xff] %v4972_v60 }
 0x888   :  { %v4973_v31 = vpop.f32.mrf.mxu0 }
 0x889   :  { %v4974_v22 = vadd.f32 %v5831_v61, %v4973_v31 }
 0x88b   :  { %4977 = vst [vmem:[#allocation17 + $0x8] sm:$0xff] %v4974_v22 }
 0x88c   :  { %4990 = dma.vmem_to_hbm [thread:$0]  %s4983_s23, 256, %s4985_s25, [#allocation7], %s6559_s26, %s6559_s26, %s6560_s27  }
 0x88d   :  { %6544 = dma.done.wait [#allocation7], 256  }
 0x88e   :  { %6545 = vsyncadd [#allocation7], 4294967040 }
 0x88f   :  { %4995 = vsyncpa [#allocation6], 1 }
 0x890   :  { %4996 = vsyncpa [#allocation9], 1 }
 0x891   :  { %4997 = vsyncpa [#allocation12], 1 }
 0x892   :  { %4998 = vsyncpa [#allocation15], 1 }
 0x893   :  { %4999 = vsyncpa [#allocation7], 1 }

</bundles_post_ra>
